<compile_context>
chip_gen: v7x
topology: tpu7x:2x2x1
jax: 0.10.0
libtpu: 0.0.40
codegen_flags: <defaults>
</compile_context>

<pallas_src>
import functools

import jax
import jax.numpy as jnp
import numpy as np
from jax import lax
from jax.experimental import pallas as pl
from jax.experimental.pallas import tpu as pltpu


def _rotate_sample_kernel(t_ref, coords_ref, vol_ref, out_ref, *, C, D, H, W, gmax):
    """One (batch, point-tile) step of the rotate+trilinear-sample."""
    b = pl.program_id(0)
    n_tile = out_ref.shape[2]

    # (1, n_tile) lane-major world coordinates of this tile of output voxel centers.
    cx = coords_ref[0:1, :]
    cy = coords_ref[1:2, :]
    cz = coords_ref[2:3, :]

    # cam_i = world_hom @ T[i,:]^T, then fold the align_corners=False unnormalization
    # ((cam/gmax + 1) * size - 1) * 0.5 into one scale + offset.
    def sample_index(i, size):
        cam = (cx * t_ref[b, 4 * i + 0]
               + cy * t_ref[b, 4 * i + 1]
               + cz * t_ref[b, 4 * i + 2]
               + t_ref[b, 4 * i + 3])
        return cam * (0.5 * size / gmax) + 0.5 * (size - 1.0)

    ix = sample_index(0, W)          # (1, n_tile) voxel-index-space x
    iy = sample_index(1, H)
    iz = sample_index(2, D)

    # Tent-function trilinear weights, transposed so n_tile is the lane dim.
    # Exact equivalent of the one-hot corner weights with zero padding.
    g = lax.broadcasted_iota(jnp.int32, (D, 1), 0).astype(jnp.float32)   # D == H == W
    wx_t = jnp.maximum(0.0, 1.0 - jnp.abs(g - ix))    # (W, n_tile)
    wy_t = jnp.maximum(0.0, 1.0 - jnp.abs(g - iy))    # (H, n_tile)
    wz_t = jnp.maximum(0.0, 1.0 - jnp.abs(g - iz))    # (D, n_tile)

    # Separable trilinear gather.
    # 1) contract over w on the MXU: (C*D*H, W) @ (W, n_tile) -> (C*D*H, n_tile)
    acc = jnp.dot(vol_ref[0], wx_t, preferred_element_type=jnp.float32)
    # 2) contract over h: per-point weights -> broadcast multiply + reduce over axis 1
    acc = jnp.sum(acc.reshape(C * D, H, n_tile) * wy_t[None, :, :], axis=1)   # (C*D, n_tile)
    # 3) contract over d
    acc = jnp.sum(acc.reshape(C, D, n_tile) * wz_t[None, :, :], axis=1)       # (C, n_tile)

    out_ref[0, :, :] = acc.astype(out_ref.dtype)


def rotate_world_forward(voxels, cam_poses_cv2, vol_size, n_tile=512):
    """JAX/Pallas equivalent of Rotate_world.forward(voxels, camPoses_cv2, grid_size=D)."""
    B, t, C, D, H, W = voxels.shape
    assert D == H == W, "forward() assumes cubic feature volumes"
    G = D
    BT = B * (t - 1)
    N = D * H * W
    n_tile = min(n_tile, N)
    assert N % n_tile == 0 and n_tile % 128 == 0

    # --- glue: relative pose T = pose_0 @ inv(pose_1) (tiny 4x4 algebra) ---
    pose_0 = jnp.broadcast_to(cam_poses_cv2[:, 0:1], (B, t - 1, 4, 4)).reshape(BT, 4, 4)
    pose_1 = cam_poses_cv2[:, 1:].reshape(BT, 4, 4)
    T = pose_0 @ jnp.linalg.inv(pose_1)
    t_flat = T.reshape(BT, 16).astype(jnp.float32)

    # --- glue: world voxel-center grid (pytorch3d Volumes, translation 0), lane-major (3, N) ---
    vs = vol_size / G
    gmax = float((G - 1) / 2.0 * vs)      # grid_coord.max()
    axis = (jnp.arange(G, dtype=jnp.float32) - (G - 1) / 2.0) * vs
    zg, yg, xg = jnp.meshgrid(axis, axis, axis, indexing="ij")
    coords = jnp.stack([xg, yg, zg], axis=0).reshape(3, N).astype(jnp.float32)

    # Pure reshape (no transpose): rows are (c*D*H + d*H + h), columns are w.
    vol = voxels[:, 1:].reshape(BT, C * D * H, W).astype(jnp.float32)

    kernel = functools.partial(_rotate_sample_kernel, C=C, D=D, H=H, W=W, gmax=gmax)
    out = pl.pallas_call(
        kernel,
        out_shape=jax.ShapeDtypeStruct((BT, C, N), jnp.float32),
        grid_spec=pltpu.PrefetchScalarGridSpec(
            num_scalar_prefetch=0,
            grid=(BT, N // n_tile),
            in_specs=[
                pl.BlockSpec(memory_space=pltpu.MemorySpace.SMEM),          # T (BT, 16)
                pl.BlockSpec((3, n_tile), lambda b, n: (0, n)),             # world coords tile
                pl.BlockSpec((1, C * D * H, W), lambda b, n: (b, 0, 0)),    # full volume of item b
            ],
            out_specs=pl.BlockSpec((1, C, n_tile), lambda b, n: (b, 0, n)),  # lane-dense output
        ),
        compiler_params=pltpu.CompilerParams(
            # No carried state across either axis -> both parallel (helps v7x 2-TC megacore).
            dimension_semantics=("parallel", "parallel"),
            # Kernel needs only a few MiB; 32 MiB is safe on every generation (v7x has 64 MiB).
            vmem_limit_bytes=32 * 1024 * 1024,
        ),
    )(t_flat, coords, vol)

    transformed = out.reshape(B, t - 1, C, D, H, W)   # pure reshape, no transpose
    return jnp.concatenate([voxels[:, 0:1], transformed.astype(voxels.dtype)], axis=1)


def reference_forward(voxels, cam_poses_cv2, vol_size):
    """Pure-JAX reference (gather-based trilinear grid_sample, zero padding)."""
    B, t, C, D, H, W = voxels.shape
    BT = B * (t - 1)
    N = D * H * W

    pose_0 = jnp.broadcast_to(cam_poses_cv2[:, 0:1], (B, t - 1, 4, 4)).reshape(BT, 4, 4)
    pose_1 = cam_poses_cv2[:, 1:].reshape(BT, 4, 4)
    T = pose_0 @ jnp.linalg.inv(pose_1)

    vs = vol_size / D
    gmax = (D - 1) / 2.0 * vs
    axis = (jnp.arange(D, dtype=jnp.float32) - (D - 1) / 2.0) * vs
    zg, yg, xg = jnp.meshgrid(axis, axis, axis, indexing="ij")
    coords = jnp.stack([xg, yg, zg], axis=-1).reshape(N, 3)
    hom = jnp.concatenate([coords, jnp.ones((N, 1), jnp.float32)], axis=-1)
    cam = jnp.einsum("nk,bik->bni", hom, T)[:, :, :3]        # (BT, N, 3)

    g = cam / gmax
    ix = ((g[..., 0] + 1.0) * W - 1.0) * 0.5
    iy = ((g[..., 1] + 1.0) * H - 1.0) * 0.5
    iz = ((g[..., 2] + 1.0) * D - 1.0) * 0.5

    def split(v):
        f = jnp.floor(v)
        return f.astype(jnp.int32), v - f

    ix0, fx = split(ix)
    iy0, fy = split(iy)
    iz0, fz = split(iz)

    vol = voxels[:, 1:].reshape(BT, C, N)
    out = jnp.zeros((BT, C, N), jnp.float32)
    for dz in (0, 1):
        for dy in (0, 1):
            for dx in (0, 1):
                zi, yi, xi = iz0 + dz, iy0 + dy, ix0 + dx
                wzc = fz if dz else (1.0 - fz)
                wyc = fy if dy else (1.0 - fy)
                wxc = fx if dx else (1.0 - fx)
                valid = ((zi >= 0) & (zi < D) & (yi >= 0) & (yi < H)
                         & (xi >= 0) & (xi < W)).astype(jnp.float32)
                flat = (jnp.clip(zi, 0, D - 1) * H * W
                        + jnp.clip(yi, 0, H - 1) * W
                        + jnp.clip(xi, 0, W - 1))
                vals = jnp.take_along_axis(vol, flat[:, None, :], axis=2)   # (BT,C,N)
                out = out + vals * (wzc * wyc * wxc * valid)[:, None, :]

    out = out.reshape(B, t - 1, C, D, H, W)
    return jnp.concatenate([voxels[:, 0:1], out], axis=1)


if __name__ == "__main__":
    key = jax.random.PRNGKey(0)
    B, t, C = 2, 3, 4
    grid_size = 16           # forward(..., grid_size=16) path; D=H=W=grid_size
    vol_size = 4.0           # config.render.volume_size

    k_vox, k_rot, k_tr = jax.random.split(key, 3)
    voxels = jax.random.normal(k_vox, (B, t, C, grid_size, grid_size, grid_size),
                               jnp.float32)

    # deterministic valid camera poses: random rotation (QR) + small translation
    A = jax.random.normal(k_rot, (B, t, 3, 3), jnp.float32)
    Q, _ = jnp.linalg.qr(A)
    trans = jax.random.uniform(k_tr, (B, t, 3, 1), jnp.float32, -0.5, 0.5)
    top = jnp.concatenate([Q, trans], axis=-1)                                 # (B,t,3,4)
    bottom = jnp.broadcast_to(jnp.array([0.0, 0.0, 0.0, 1.0], jnp.float32),
                              (B, t, 1, 4))
    cam_poses = jnp.concatenate([top, bottom], axis=-2)                        # (B,t,4,4)

    out = rotate_world_forward(voxels, cam_poses, vol_size)
    out = jax.block_until_ready(out)

    ref = reference_forward(voxels, cam_poses, vol_size)
    np.testing.assert_allclose(np.asarray(out), np.asarray(ref), atol=2e-4, rtol=2e-4)

    print("KERNEL_OK")
</pallas_src>

<mosaic_0001>
module attributes {stable_mosaic.version = 11 : i64} {
  func.func @_rotate_sample_kernel(%arg0: i32, %arg1: i32, %arg2: memref<4x16xf32, #tpu.memory_space<smem>>, %arg3: memref<3x512xf32, #tpu.memory_space<vmem>>, %arg4: memref<1x1024x16xf32, #tpu.memory_space<vmem>>, %arg5: memref<1x4x512xf32, #tpu.memory_space<vmem>>) attributes {dimension_semantics = [#tpu.dimension_semantics<parallel>, #tpu.dimension_semantics<parallel>], iteration_bounds = array<i64: 4, 8>, scalar_prefetch = 0 : i64, scratch_operands = 0 : i64, tpu.core_type = #tpu.core_type<tc>, window_params = [{transform_indices = @transform_0, window_bounds = array<i64: 4, 16>}, {transform_indices = @transform_1, window_bounds = array<i64: 3, 512>}, {transform_indices = @transform_2, window_bounds = array<i64: 1, 1024, 16>}, {transform_indices = @transform_3, window_bounds = array<i64: 1, 4, 512>}]} {
    %c0 = arith.constant 0 : index
    %c0_0 = arith.constant 0 : index
    %0 = vector.load %arg3[%c0, %c0_0] : memref<3x512xf32, #tpu.memory_space<vmem>>, vector<1x512xf32>
    %c1 = arith.constant 1 : index
    %c0_1 = arith.constant 0 : index
    %1 = vector.load %arg3[%c1, %c0_1] : memref<3x512xf32, #tpu.memory_space<vmem>>, vector<1x512xf32>
    %c2 = arith.constant 2 : index
    %c0_2 = arith.constant 0 : index
    %2 = vector.load %arg3[%c2, %c0_2] : memref<3x512xf32, #tpu.memory_space<vmem>>, vector<1x512xf32>
    %3 = arith.index_cast %arg0 : i32 to index
    %c0_3 = arith.constant 0 : index
    %4 = memref.load %arg2[%3, %c0_3] : memref<4x16xf32, #tpu.memory_space<smem>>
    %5 = vector.broadcast %4 : f32 to vector<1x512xf32>
    %6 = arith.mulf %0, %5 : vector<1x512xf32>
    %7 = arith.index_cast %arg0 : i32 to index
    %c1_4 = arith.constant 1 : index
    %8 = memref.load %arg2[%7, %c1_4] : memref<4x16xf32, #tpu.memory_space<smem>>
    %9 = vector.broadcast %8 : f32 to vector<1x512xf32>
    %10 = arith.mulf %1, %9 : vector<1x512xf32>
    %11 = arith.addf %6, %10 : vector<1x512xf32>
    %12 = arith.index_cast %arg0 : i32 to index
    %c2_5 = arith.constant 2 : index
    %13 = memref.load %arg2[%12, %c2_5] : memref<4x16xf32, #tpu.memory_space<smem>>
    %14 = vector.broadcast %13 : f32 to vector<1x512xf32>
    %15 = arith.mulf %2, %14 : vector<1x512xf32>
    %16 = arith.addf %11, %15 : vector<1x512xf32>
    %17 = arith.index_cast %arg0 : i32 to index
    %c3 = arith.constant 3 : index
    %18 = memref.load %arg2[%17, %c3] : memref<4x16xf32, #tpu.memory_space<smem>>
    %19 = vector.broadcast %18 : f32 to vector<1x512xf32>
    %20 = arith.addf %16, %19 : vector<1x512xf32>
    %cst = arith.constant 4.26666689 : f32
    %21 = vector.broadcast %cst : f32 to vector<1x512xf32>
    %22 = arith.mulf %20, %21 : vector<1x512xf32>
    %cst_6 = arith.constant 7.500000e+00 : f32
    %23 = vector.broadcast %cst_6 : f32 to vector<1x512xf32>
    %24 = arith.addf %22, %23 : vector<1x512xf32>
    %25 = arith.index_cast %arg0 : i32 to index
    %c4 = arith.constant 4 : index
    %26 = memref.load %arg2[%25, %c4] : memref<4x16xf32, #tpu.memory_space<smem>>
    %27 = vector.broadcast %26 : f32 to vector<1x512xf32>
    %28 = arith.mulf %0, %27 : vector<1x512xf32>
    %29 = arith.index_cast %arg0 : i32 to index
    %c5 = arith.constant 5 : index
    %30 = memref.load %arg2[%29, %c5] : memref<4x16xf32, #tpu.memory_space<smem>>
    %31 = vector.broadcast %30 : f32 to vector<1x512xf32>
    %32 = arith.mulf %1, %31 : vector<1x512xf32>
    %33 = arith.addf %28, %32 : vector<1x512xf32>
    %34 = arith.index_cast %arg0 : i32 to index
    %c6 = arith.constant 6 : index
    %35 = memref.load %arg2[%34, %c6] : memref<4x16xf32, #tpu.memory_space<smem>>
    %36 = vector.broadcast %35 : f32 to vector<1x512xf32>
    %37 = arith.mulf %2, %36 : vector<1x512xf32>
    %38 = arith.addf %33, %37 : vector<1x512xf32>
    %39 = arith.index_cast %arg0 : i32 to index
    %c7 = arith.constant 7 : index
    %40 = memref.load %arg2[%39, %c7] : memref<4x16xf32, #tpu.memory_space<smem>>
    %41 = vector.broadcast %40 : f32 to vector<1x512xf32>
    %42 = arith.addf %38, %41 : vector<1x512xf32>
    %cst_7 = arith.constant 4.26666689 : f32
    %43 = vector.broadcast %cst_7 : f32 to vector<1x512xf32>
    %44 = arith.mulf %42, %43 : vector<1x512xf32>
    %cst_8 = arith.constant 7.500000e+00 : f32
    %45 = vector.broadcast %cst_8 : f32 to vector<1x512xf32>
    %46 = arith.addf %44, %45 : vector<1x512xf32>
    %47 = arith.index_cast %arg0 : i32 to index
    %c8 = arith.constant 8 : index
    %48 = memref.load %arg2[%47, %c8] : memref<4x16xf32, #tpu.memory_space<smem>>
    %49 = vector.broadcast %48 : f32 to vector<1x512xf32>
    %50 = arith.mulf %0, %49 : vector<1x512xf32>
    %51 = arith.index_cast %arg0 : i32 to index
    %c9 = arith.constant 9 : index
    %52 = memref.load %arg2[%51, %c9] : memref<4x16xf32, #tpu.memory_space<smem>>
    %53 = vector.broadcast %52 : f32 to vector<1x512xf32>
    %54 = arith.mulf %1, %53 : vector<1x512xf32>
    %55 = arith.addf %50, %54 : vector<1x512xf32>
    %56 = arith.index_cast %arg0 : i32 to index
    %c10 = arith.constant 10 : index
    %57 = memref.load %arg2[%56, %c10] : memref<4x16xf32, #tpu.memory_space<smem>>
    %58 = vector.broadcast %57 : f32 to vector<1x512xf32>
    %59 = arith.mulf %2, %58 : vector<1x512xf32>
    %60 = arith.addf %55, %59 : vector<1x512xf32>
    %61 = arith.index_cast %arg0 : i32 to index
    %c11 = arith.constant 11 : index
    %62 = memref.load %arg2[%61, %c11] : memref<4x16xf32, #tpu.memory_space<smem>>
    %63 = vector.broadcast %62 : f32 to vector<1x512xf32>
    %64 = arith.addf %60, %63 : vector<1x512xf32>
    %cst_9 = arith.constant 4.26666689 : f32
    %65 = vector.broadcast %cst_9 : f32 to vector<1x512xf32>
    %66 = arith.mulf %64, %65 : vector<1x512xf32>
    %cst_10 = arith.constant 7.500000e+00 : f32
    %67 = vector.broadcast %cst_10 : f32 to vector<1x512xf32>
    %68 = arith.addf %66, %67 : vector<1x512xf32>
    %69 = tpu.iota {dimensions = array<i32: 0>} : vector<16x1xi32>
    %70 = arith.sitofp %69 : vector<16x1xi32> to vector<16x1xf32>
    %71 = vector.broadcast %70 : vector<16x1xf32> to vector<16x512xf32>
    %72 = vector.broadcast %24 : vector<1x512xf32> to vector<16x512xf32>
    %73 = arith.subf %71, %72 : vector<16x512xf32>
    %74 = math.absf %73 : vector<16x512xf32>
    %cst_11 = arith.constant 1.000000e+00 : f32
    %75 = vector.broadcast %cst_11 : f32 to vector<16x512xf32>
    %76 = arith.subf %75, %74 : vector<16x512xf32>
    %cst_12 = arith.constant 0.000000e+00 : f32
    %77 = vector.broadcast %cst_12 : f32 to vector<16x512xf32>
    %78 = arith.maximumf %77, %76 : vector<16x512xf32>
    %79 = vector.broadcast %70 : vector<16x1xf32> to vector<16x512xf32>
    %80 = vector.broadcast %46 : vector<1x512xf32> to vector<16x512xf32>
    %81 = arith.subf %79, %80 : vector<16x512xf32>
    %82 = math.absf %81 : vector<16x512xf32>
    %cst_13 = arith.constant 1.000000e+00 : f32
    %83 = vector.broadcast %cst_13 : f32 to vector<16x512xf32>
    %84 = arith.subf %83, %82 : vector<16x512xf32>
    %cst_14 = arith.constant 0.000000e+00 : f32
    %85 = vector.broadcast %cst_14 : f32 to vector<16x512xf32>
    %86 = arith.maximumf %85, %84 : vector<16x512xf32>
    %87 = vector.broadcast %70 : vector<16x1xf32> to vector<16x512xf32>
    %88 = vector.broadcast %68 : vector<1x512xf32> to vector<16x512xf32>
    %89 = arith.subf %87, %88 : vector<16x512xf32>
    %90 = math.absf %89 : vector<16x512xf32>
    %cst_15 = arith.constant 1.000000e+00 : f32
    %91 = vector.broadcast %cst_15 : f32 to vector<16x512xf32>
    %92 = arith.subf %91, %90 : vector<16x512xf32>
    %cst_16 = arith.constant 0.000000e+00 : f32
    %93 = vector.broadcast %cst_16 : f32 to vector<16x512xf32>
    %94 = arith.maximumf %93, %92 : vector<16x512xf32>
    %c0_17 = arith.constant 0 : index
    %c0_18 = arith.constant 0 : index
    %c0_19 = arith.constant 0 : index
    %95 = vector.load %arg4[%c0_17, %c0_18, %c0_19] : memref<1x1024x16xf32, #tpu.memory_space<vmem>>, vector<1x1024x16xf32>
    %96 = vector.shape_cast %95 : vector<1x1024x16xf32> to vector<1024x16xf32>
    %cst_20 = arith.constant dense<0.000000e+00> : vector<1024x512xf32>
    %97 = tpu.matmul %96, %78, %cst_20 {dimension_numbers = #tpu.dot_dimension_numbers<[1], [0], [0], [1], [0, 0, 1, 1], [], []>} : vector<1024x16xf32>, vector<16x512xf32>, vector<1024x512xf32> -> vector<1024x512xf32>
    %98 = vector.shape_cast %97 : vector<1024x512xf32> to vector<64x16x512xf32>
    %99 = vector.shape_cast %86 : vector<16x512xf32> to vector<1x16x512xf32>
    %100 = vector.broadcast %99 : vector<1x16x512xf32> to vector<64x16x512xf32>
    %101 = arith.mulf %98, %100 : vector<64x16x512xf32>
    %cst_21 = arith.constant dense<0.000000e+00> : vector<64x512xf32>
    %102 = vector.multi_reduction <add>, %101, %cst_21 [1] : vector<64x16x512xf32> to vector<64x512xf32>
    %103 = vector.shape_cast %102 : vector<64x512xf32> to vector<4x16x512xf32>
    %104 = vector.shape_cast %94 : vector<16x512xf32> to vector<1x16x512xf32>
    %105 = vector.broadcast %104 : vector<1x16x512xf32> to vector<4x16x512xf32>
    %106 = arith.mulf %103, %105 : vector<4x16x512xf32>
    %cst_22 = arith.constant dense<0.000000e+00> : vector<4x512xf32>
    %107 = vector.multi_reduction <add>, %106, %cst_22 [1] : vector<4x16x512xf32> to vector<4x512xf32>
    %c0_23 = arith.constant 0 : index
    %c0_24 = arith.constant 0 : index
    %c0_25 = arith.constant 0 : index
    %108 = vector.load %arg5[%c0_23, %c0_24, %c0_25] : memref<1x4x512xf32, #tpu.memory_space<vmem>>, vector<1x4x512xf32>
    %109 = vector.shape_cast %108 : vector<1x4x512xf32> to vector<4x512xf32>
    %110 = vector.shape_cast %107 : vector<4x512xf32> to vector<1x4x512xf32>
    tpu.vector_store %arg5[%c0_23, %c0_24, %c0_25], %110 {strides = array<i32>} : memref<1x4x512xf32, #tpu.memory_space<vmem>>, vector<1x4x512xf32>,
    return
  }
  func.func @transform_0(%arg0: i32, %arg1: i32) -> (i32, i32) {
    %c0_i32 = arith.constant 0 : i32
    %c0_i32_0 = arith.constant 0 : i32
    %c0_i32_1 = arith.constant 0 : i32
    return %c0_i32, %c0_i32_0 : i32, i32
  }
  func.func @transform_1(%arg0: i32, %arg1: i32) -> (i32, i32) {
    %c0_i32 = arith.constant 0 : i32
    %c0_i32_0 = arith.constant 0 : i32
    return %c0_i32, %arg1 : i32, i32
  }
  func.func @transform_2(%arg0: i32, %arg1: i32) -> (i32, i32, i32) {
    %c0_i32 = arith.constant 0 : i32
    %c0_i32_0 = arith.constant 0 : i32
    %c0_i32_1 = arith.constant 0 : i32
    return %arg0, %c0_i32, %c0_i32_0 : i32, i32, i32
  }
  func.func @transform_3(%arg0: i32, %arg1: i32) -> (i32, i32, i32) {
    %c0_i32 = arith.constant 0 : i32
    %c0_i32_0 = arith.constant 0 : i32
    return %arg0, %c0_i32, %arg1 : i32, i32, i32
  }
}

</mosaic_0001>

<bundles_post_ra>
// kernel: tpu_custom_call.1
= control target key start
LH: loop header
LB: loop body
LE: loop exit
PB: predicated region body
PF: predicated region fallthrough
CT: control target
= control target key end

     0   :  { %s10882_s0 = inlined_call_operand.vmem [shape: f32[4,16], index: 0, kind: input, shape index: {}]   ;;  %s10883_s1 = inlined_call_operand.vmem [shape: f32[3,4096], index: 1, kind: input, shape index: {}]   ;;  %s10884_s2 = inlined_call_operand.vmem [shape: f32[4,1024,16], index: 2, kind: input, shape index: {}]   ;;  %s10885_s3 = inlined_call_operand.hbm [shape: f32[4,4,4096], index: 3, kind: output, shape index: {}]  }
   0x1   :  { %11008 = sst [smem:[#allocation157_spill]] %s10882_s0 }
   0x2   :  { %11009 = sst [smem:[#allocation158_spill]] %s10883_s1 }
   0x3   :  { %8 = vsyncpa [#allocation4], 0 }
   0x4   :  { %9 = vsyncpa [#allocation3], 0 }
   0x5   :  { %11 = vsyncpa [#allocation3 + $0x1], 0  ;;  %s6838_s12 = smov 0   ;;  %s6840_s13 = smov 0  }
   0x6   :  { %s6842_s14 = smov 0   ;;  %s6844_s15 = smov 0  }
   0x7   :  { %s6846_s16 = smov 0   ;;  %s6848_s17 = smov 0  }
   0x8   :  { %s6850_s18 = smov 0   ;;  %s6852_s19 = smov 0  }
   0x9 LB: > { %s6331_s20 = sadd.s32 4294967295, %s6813_s19   ;;  %s6332_s21 = sadd.s32 4294967294, %s6813_s19   ;;  %s6813_s19 = sphi %s6852_s19, %s17_s19   ;;  %s6809_s18 = sphi %s6850_s18, %s11996_s18   ;;  %s6805_s17 = sphi %s6848_s17, %s11995_s17   ;;  %s6801_s16 = sphi %s6846_s16, %s11994_s16   ;;  %s6797_s15 = sphi %s6844_s15, %s11993_s15   ;;  %s6793_s14 = sphi %s6842_s14, %s11992_s14   ;;  %s6789_s13 = sphi %s6840_s13, %s11991_s13   ;;  %s6785_s12 = sphi %s6838_s12, %s11990_s12  }
   0xa   : > { %s26_s22 = sadd.s32 1, %s6805_s17  ;;  %s29_s23 = sadd.s32 1, %s6809_s18 }
   0xb   : > { %p27_p0 = scmp.ge.s32.totalorder %s26_s22, 8  ;;  %s111_s24 = sadd.s32 1, %s6793_s14 }
   0xc   : > { %p121_p1 = scmp.ne.s32.totalorder %s6793_s14, %s6789_s13  ;;  %p122_p2 = scmp.eq.s32.totalorder %s6331_s20, 31 }
   0xd   : > { %s11998_s22 = smov (%p27_p0, %s26_s22), 0  ;;  %s12000_s23 = smov (!%p27_p0, %s29_s23), %s6809_s18 }
   0xe   : > { %s107_s25 = ssub.s32 %s6805_s17, %s11998_s22  ;;  %p6890_p3 = por %p122_p2, %p121_p1 }
   0xf   : > { %p31_p4 = scmp.ge.s32.totalorder %s12000_s23, 4  ;;  %p127_p5 = scmp.ne.s32.totalorder %s6789_s13, %s6785_s12 }
  0x10   : > { %p128_p6 = scmp.eq.s32.totalorder %s6332_s21, 31  ;;  %p6333_p7 = scmp.ge.s32.totalorder %s6813_s19, 1 }
  0x11   : > { %s12002_s23 = smov (%p31_p4, %s12000_s23), 0  ;;  %p135_p9 = scmp.lt.s32.totalorder %s6813_s19, 33 }
  0x12   : > { %p6899_p8 = por %p128_p6, %p127_p5  ;;  %s106_s28 = ssub.s32 %s6809_s18, %s12002_s23 }
  0x13   : > { %s108_s29 = sor.u32 %s107_s25, %s106_s28  ;;  %p6906_p10 = pnand %p6333_p7, %p135_p9 }
  0x14   : > { %s11011_s27 = scalar_select %p6899_p8, 1, 0 }
  0x15   : > { %p109_p11 = scmp.eq.s32.totalorder %s108_s29, 0  ;;  %p6910_p12 = scmp.eq.s32.totalorder %s6331_s20, 0 }
  0x16   : > { %p6623_p13 = pneg %p6906_p10  ;;  %s11014_s0 = sld [smem:[#allocation157_spill]] }
  0x17   : > { %s6920_s8 = scalar_select %p109_p11, %s6793_s14, %s111_s24  }
  0x18   : > { %p6624_p0 = pnand %p6910_p12, %p6623_p13 }
  0x1a   : > { %p6702_p2 = pneg %p6624_p0 }
  0x1c   : > { %s148_s7 = sshll.u32 %s11014_s0, 4  ;;  %s149_s7 = int_to_ptr.vmem [resolvable:$true] %s148_s7 }
  0x1d   : > { %s6700_s9 = scalar_lea.vmem %s149_s7, 64  ;;  %p6708_p6 = scmp.lt.s32.totalorder %s149_s7, %s149_s7 }
  0x1e   : > { %p6701_p1 = scmp.ne.s32.totalorder %s149_s7, %s6700_s9  ;;  %p6709_p7 = scmp.lt.s32.totalorder %s6700_s9, %s6700_s9 }
  0x20   : > { %p6703_p4 = pnand %p6702_p2, %p6701_p1  ;;  %p6710_p9 = por %p6709_p7, %p6708_p6 }
  0x22   : > { %p6704_p5 = pneg %p6703_p4 }
  0x24   : > { %p6711_p8 = pnand %p6710_p9, %p6704_p5 }
  0x26   : > { %6714 = shalt.err (!%p6711_p8)
}
  0x27   : > { %s6815_s10 = smov [#allocation2]   ;;  %178 = sbr.rel (%p6906_p10) target bundleno = 1136 (0x470), region = 32 }
  0x28   : > { %6626 = dma.vmem_to_smem (!%p6624_p0), %s149_s7, 64, %s6815_s10, [#allocation4]  }
  0x2e   : > { %6776 = dma.done.wait (%p6910_p12), [#allocation4], 64  }
  0x2f   : > { %6778 = vsyncadd (%p6910_p12), [#allocation4], 4294967232 }
  0x30   : > { %184 = sfence }
  0x31   : > { %s6931_s11 = sshll.u32 %s6797_s15, 2  ;;  %s6934_s20 = sshll.u32 %s6801_s16, 7  ;;  %v10890_v0 = vmov 0.0   ;;  %v285_v6 = vlaneseq  ;;  %vm577_vm0 = vcmask 130048   ;;  %vm5573_vm1 = vcmask 1041409  }
  0x32   : > { %p209_p8 = scmp.lt.s32.totalorder %s6931_s11, 31  ;;  %s226_s21 = sld [smem:[#allocation2 + %s6934_s20]]  ;;  %1026 = vmatprep.mubr.f32.mxu0 %v10890_v0  ;;  %1859 = vmatprep.mubr.f32.mxu1 %v10890_v0  ;;  %vm5576_vm2 = vcmask 1042434   ;;  %vm5579_vm3 = vcmask 1043459   ;;  %vm5582_vm4 = vcmask 1044484   ;;  %vm5585_vm5 = vcmask 1045509  }
  0x33   : > { %s229_s24 = sadd.s32 1, %s6934_s20  ;;  %s234_s15 = sadd.s32 2, %s6934_s20  ;;  %v286_v12 = vshrl.u32 %v285_v6, 7  ;;  %vm5588_vm6 = vcmask 1046534   ;;  %vm5591_vm7 = vcmask 1047559  }
  0x34   : > { %s210_s25 = scalar_select %p209_p8, %s6931_s11, 31 }
  0x35   : > { %s230_s28 = sld [smem:[#allocation2 + %s229_s24]]  ;;  %s239_s4 = sadd.s32 3, %s6934_s20  ;;  %v287_v21 = vadd.s32 8, %v286_v12  ;;  %v297_v24 = vsub.s32 1, %v286_v12  ;;  %v305_v25 = vsub.s32 3, %v286_v12  ;;  %v6963_v35 = vcvt.s32.f32 %v286_v12 }
  0x36   : > { %s235_s29 = sld [smem:[#allocation2 + %s234_s15]]  ;;  %s6340_s30 = sshll.u32 %s210_s25, 2  ;;  %v6973_v50 = vsub.s32 0, %v286_v12  ;;  %v6982_v63 = vsub.s32 2, %v286_v12 }
  0x37   : > { %s11015_s1 = sld [smem:[#allocation158_spill]]  ;;  %s245_s10 = sadd.s32 4, %s6934_s20  ;;  %v6965_v36 = vcvt.s32.f32 %v287_v21 }
  0x38   : > { %s6947_s9 = sld [smem:[#allocation2 + %s239_s4]]  ;;  %v227_v3 = vstv %s226_s21  ;;  %s249_s0 = sadd.s32 5, %s6934_s20 }
  0x39   : > { %s246_s24 = sld [smem:[#allocation2 + %s245_s10]]  ;;  %s254_s25 = sadd.s32 6, %s6934_s20 }
  0x3a   : > { %s250_s15 = sld [smem:[#allocation2 + %s249_s0]]  ;;  %s265_s5 = sadd.s32 8, %s6934_s20 }
  0x3b   : > { %v231_v7 = vstv %s230_s28  ;;  %s255_s4 = sld [smem:[#allocation2 + %s254_s25]]  ;;  %s269_s6 = sadd.s32 9, %s6934_s20 }
  0x3c   : > { %v236_v8 = vstv %s235_s29  ;;  %s274_s0 = sadd.s32 10, %s6934_s20  ;;  %s279_s10 = sadd.s32 11, %s6934_s20 }
  0x3d   : > { %s212_s7 = scalar_lea.vmem %s11015_s1, %s6340_s30  ;;  %s259_s30 = sadd.s32 7, %s6934_s20 }
  0x3e   : > { %v220_v1 = vld [vmem:[%s212_s7] ss:$4 sm:$0xf]  ;;  %v6343_v2 = vld [vmem:[%s212_s7 + $0x1] ss:$4 sm:$0xf]  ;;  %v241_v13 = vstv %s6947_s9 }
  0x3f   : > { %v6344_v4 = vld [vmem:[%s212_s7 + $0x2] ss:$4 sm:$0xf]  ;;  %v228_v5 = vmul.f32 %v227_v3, %v220_v1  ;;  %v232_v9 = vmul.f32 %v6343_v2, %v231_v7  ;;  %s6953_s21 = sld [smem:[#allocation2 + %s259_s30]]  ;;  %v247_v15 = vstv %s246_s24  ;;  %p214_p10 = scmp.lt.s32.totalorder %s6801_s16, 3 }
  0x40   : > { %v237_v10 = vmul.f32 %v6344_v4, %v236_v8  ;;  %s266_s7 = sld [smem:[#allocation2 + %s265_s5]]  ;;  %v251_v16 = vstv %s250_s15  ;;  %v248_v17 = vmul.f32 %v247_v15, %v220_v1  ;;  %s205_s25 = sand.u32 1, %s6789_s13  }
  0x41   : > { %v233_v11 = vadd.f32 %v232_v9, %v228_v5  ;;  %s270_s1 = sld [smem:[#allocation2 + %s269_s6]]  ;;  %v252_v18 = vmul.f32 %v6343_v2, %v251_v16  ;;  %v256_v20 = vstv %s255_s4  ;;  %s6338_s30 = sshll.u32 %s205_s25, 4 }
  0x42   : > { %s275_s28 = sld [smem:[#allocation2 + %s274_s0]]  ;;  %v257_v23 = vmul.f32 %v6344_v4, %v256_v20  ;;  %s6604_s4 = sshll.u32 %s6801_s16, 5 }
  0x43   : > { %v238_v14 = vadd.f32 %v237_v10, %v233_v11  ;;  %s6960_s29 = sld [smem:[#allocation2 + %s279_s10]]  ;;  %v253_v22 = vadd.f32 %v252_v18, %v248_v17  ;;  %s207_s6 = scalar_lea.vmem [#allocation5], %s6338_s30 }
  0x45   : > { %v242_v19 = vadd.f32 %v241_v13, %v238_v14  ;;  %v261_v27 = vstv %s6953_s21  ;;  %v258_v30 = vadd.f32 %v257_v23, %v253_v22  ;;  %s6230_s21 = sadd.s32 %s6604_s4, %s6931_s11  ;;  %s6218_s11 = scalar_lea.sflag [#allocation3], %s205_s25 }
  0x46   : > { %v267_v28 = vstv %s266_s7  ;;  %s6605_s5 = sshll.u32 %s6230_s21, 6  ;;  %s6234_s7 = sshll.u32 %s207_s6, 4  ;;  %s10827_s7 = int_to_ptr.vmem [resolvable:$true] %s6234_s7 }
  0x47   : > { %v243_v26 = vmul.f32 4.266667, %v242_v19  ;;  %v271_v29 = vstv %s270_s1  ;;  %v268_v31 = vmul.f32 %v267_v28, %v220_v1  ;;  %v262_v37 = vadd.f32 %v261_v27, %v258_v30  ;;  %s215_s1 = scalar_select %p214_p10, %s6801_s16, 3 }
  0x48   : > { %v272_v32 = vmul.f32 %v6343_v2, %v271_v29  ;;  %v276_v34 = vstv %s275_s28  ;;  %s10825_s10 = scalar_lea.hbm %s10885_s3, %s6605_s5  ;;  %s6715_s28 = scalar_lea.vmem %s10827_s7, 256 }
  0x49   : > { %v244_v33 = vadd.f32 7.5, %v243_v26  ;;  %v277_v39 = vmul.f32 %v6344_v4, %v276_v34  ;;  %v281_v40 = vstv %s6960_s29  ;;  %v263_v43 = vmul.f32 4.266667, %v262_v37  ;;  %s6608_s20 = sshll.u32 %s215_s1, 10  ;;  %p6716_p11 = scmp.ne.s32.totalorder %s10827_s7, %s6715_s28 }
  0x4a   : > { %v273_v38 = vadd.f32 %v272_v32, %v268_v31  ;;  %s7003_s15 = scalar_lea.vmem %s10884_s2, %s6608_s20  ;;  %s6817_s29 = smov [#allocation5]  }
  0x4b   : > { %v298_v41 = vrot.slane %v244_v33, %v297_v24  ;;  %v306_v42 = vrot.slane %v244_v33, %v305_v25  ;;  %v6970_v47 = vadd.f32 7.5, %v263_v43  ;;  %v294_v62 = vrot.slane %v244_v33, %v6973_v50  ;;  %v449_v29 = vld [vmem:[%s7003_s15] sm:$0xff]  ;;  %v450_v31 = vld [vmem:[%s7003_s15 + $0x8] sm:$0xff]  ;;  %v451_v32 = vld [vmem:[%s7003_s15 + $0x10] sm:$0xff]  ;;  %p6717_p12 = pnand %p6716_p11, %p6890_p3  ;;  %s6719_s1 = sshll.u32 %s6817_s29, 4  ;;  %s6720_s1 = int_to_ptr.vmem [resolvable:$false] %s6719_s1 }
  0x4c   : > { %v278_v44 = vadd.f32 %v277_v39, %v273_v38  ;;  %v302_v7 = vrot.slane %v244_v33, %v6982_v63  ;;  %v452_v33 = vld [vmem:[%s7003_s15 + $0x18] sm:$0xff]  ;;  %v453_v34 = vld [vmem:[%s7003_s15 + $0x20] sm:$0xff]  ;;  %v454_v37 = vld [vmem:[%s7003_s15 + $0x28] sm:$0xff]  ;;  %s6721_s20 = scalar_lea.vmem %s6720_s1, 512  ;;  %p6722_p0 = scmp.lt.s32.totalorder %s10827_s7, %s6720_s1 }
  0x4d   : > { %v312_v45 = vsub.f32 %v6963_v35, %v298_v41  ;;  %v316_v46 = vsub.f32 %v6965_v36, %v298_v41  ;;  %v314_v49 = vsub.f32 %v6963_v35, %v306_v42  ;;  %v6976_v54 = vrot.slane %v6970_v47, %v297_v24  ;;  %v455_v38 = vld [vmem:[%s7003_s15 + $0x30] sm:$0xff]  ;;  %v456_v39 = vld [vmem:[%s7003_s15 + $0x38] sm:$0xff]  ;;  %v458_v41 = vld [vmem:[%s7003_s15 + $0x48] sm:$0xff]  ;;  %p6718_p13 = pneg %p6717_p12  ;;  %p6723_p1 = scmp.lt.s32.totalorder %s6721_s20, %s6715_s28 }
  0x4e   : > { %v282_v48 = vadd.f32 %v281_v40, %v278_v44  ;;  %v318_v58 = vsub.f32 %v6965_v36, %v306_v42  ;;  %v311_v5 = vsub.f32 %v6963_v35, %v294_v62  ;;  %v315_v6 = vsub.f32 %v6965_v36, %v294_v62  ;;  %v457_v40 = vld [vmem:[%s7003_s15 + $0x40] sm:$0xff]  ;;  %v459_v42 = vld [vmem:[%s7003_s15 + $0x50] sm:$0xff]  ;;  %v460_v43 = vld [vmem:[%s7003_s15 + $0x58] sm:$0xff] }
  0x4f   : > { %v320_v51 = vand.u32 2147483647, %v312_v45  ;;  %v324_v52 = vand.u32 2147483647, %v316_v46  ;;  %v322_v59 = vand.u32 2147483647, %v314_v49  ;;  %v6992_v10 = vrot.slane %v6970_v47, %v305_v25  ;;  %p6724_p2 = por %p6723_p1, %p6722_p0 }
  0x50   : > { %v283_v53 = vmul.f32 4.266667, %v282_v48  ;;  %v326_v3 = vand.u32 2147483647, %v318_v58  ;;  %v319_v12 = vand.u32 2147483647, %v311_v5  ;;  %v313_v15 = vsub.f32 %v6963_v35, %v302_v7 }
  0x51   : > { %v328_v55 = vsub.f32 1.0, %v320_v51  ;;  %v332_v56 = vsub.f32 1.0, %v324_v52  ;;  %v330_v4 = vsub.f32 1.0, %v322_v59  ;;  %v323_v14 = vand.u32 2147483647, %v315_v6  ;;  %v461_v44 = vld [vmem:[%s7003_s15 + $0x60] sm:$0xff]  ;;  %p6725_p4 = pnand %p6724_p2, %p6718_p13 }
  0x52   : > { %v6978_v57 = vadd.f32 7.5, %v283_v53  ;;  %v334_v8 = vsub.f32 1.0, %v326_v3  ;;  %v327_v17 = vsub.f32 1.0, %v319_v12  ;;  %v317_v19 = vsub.f32 %v6965_v36, %v302_v7  ;;  %v462_v45 = vld [vmem:[%s7003_s15 + $0x68] sm:$0xff]  ;;  %v463_v46 = vld [vmem:[%s7003_s15 + $0x70] sm:$0xff]  ;;  %v464_v48 = vld [vmem:[%s7003_s15 + $0x78] sm:$0xff] }
  0x53   : > { %v336_v60 = vmax.f32 %v328_v55, 0.0  ;;  %v340_v61 = vmax.f32 %v332_v56, 0.0  ;;  %v338_v9 = vmax.f32 %v330_v4, 0.0  ;;  %v331_v18 = vsub.f32 1.0, %v323_v14  ;;  %v465_v49 = vld [vmem:[%s7003_s15 + $0x80] sm:$0xff]  ;;  %v466_v51 = vld [vmem:[%s7003_s15 + $0x88] sm:$0xff] }
  0x54   : > { %v6985_v1 = vrot.slane %v6978_v57, %v297_v24  ;;  %v6995_v11 = vrot.slane %v6978_v57, %v305_v25  ;;  %v342_v13 = vmax.f32 %v334_v8, 0.0  ;;  %v335_v20 = vmax.f32 %v327_v17, 0.0  ;;  %v467_v52 = vld [vmem:[%s7003_s15 + $0x90] sm:$0xff]  ;;  %v468_v53 = vld [vmem:[%s7003_s15 + $0x98] sm:$0xff]  ;;  %v469_v55 = vld [vmem:[%s7003_s15 + $0xa0] sm:$0xff] }
  0x55   : > { %v6609_v2 = vpack.c.bf16 %v340_v61, %v336_v60  ;;  %v321_v21 = vand.u32 2147483647, %v313_v15  ;;  %v339_v22 = vmax.f32 %v331_v18, 0.0  ;;  %v325_v23 = vand.u32 2147483647, %v317_v19  ;;  %v470_v56 = vld [vmem:[%s7003_s15 + $0xa8] sm:$0xff] }
  0x56   : > { %v6613_v16 = vpack.c.bf16 %v342_v13, %v338_v9  ;;  %v471_v58 = vld [vmem:[%s7003_s15 + $0xb0] sm:$0xff]  ;;  %v472_v59 = vld [vmem:[%s7003_s15 + $0xb8] sm:$0xff]  ;;  %v473_v60 = vld [vmem:[%s7003_s15 + $0xc0] sm:$0xff] }
  0x57   : > { %6610 = vmatprep.subr.bf16.mxu0 %v6609_v2  ;;  %v329_v24 = vsub.f32 1.0, %v321_v21  ;;  %v6611_v25 = vpack.c.bf16 %v339_v22, %v335_v20  ;;  %v333_v26 = vsub.f32 1.0, %v325_v23  ;;  %v474_v61 = vld [vmem:[%s7003_s15 + $0xc8] sm:$0xff]  ;;  %v475_v62 = vld [vmem:[%s7003_s15 + $0xd0] sm:$0xff]  ;;  %v476_v2 = vld [vmem:[%s7003_s15 + $0xd8] sm:$0xff] }
  0x58   : > { %6614 = vmatprep.subr.bf16.mxu1 %v6613_v16  ;;  %v477_v3 = vld [vmem:[%s7003_s15 + $0xe0] sm:$0xff]  ;;  %v478_v4 = vld [vmem:[%s7003_s15 + $0xe8] sm:$0xff]  ;;  %v479_v5 = vld [vmem:[%s7003_s15 + $0xf0] sm:$0xff] }
  0x59   : > { %v337_v27 = vmax.f32 %v329_v24, 0.0  ;;  %6612 = vmatpush1.bf16.msra.mxu0 %v6611_v25  ;;  %v341_v28 = vmax.f32 %v333_v26, 0.0  ;;  %v480_v6 = vld [vmem:[%s7003_s15 + $0xf8] sm:$0xff]  ;;  %v481_v7 = vld [vmem:[%s7003_s15 + $0x100] sm:$0xff]  ;;  %v482_v8 = vld [vmem:[%s7003_s15 + $0x108] sm:$0xff]  ;;  %v347_v25 = vrot.slane %v6970_v47, %v6973_v50  ;;  %v355_v26 = vrot.slane %v6970_v47, %v6982_v63 }
  0x5a   : > { %v483_v9 = vld [vmem:[%s7003_s15 + $0x110] sm:$0xff]  ;;  %v484_v12 = vld [vmem:[%s7003_s15 + $0x118] sm:$0xff]  ;;  %v485_v13 = vld [vmem:[%s7003_s15 + $0x120] sm:$0xff] }
  0x5b   : > { %v6615_v30 = vpack.c.bf16 %v341_v28, %v337_v27  ;;  %v486_v14 = vld [vmem:[%s7003_s15 + $0x128] sm:$0xff]  ;;  %v487_v15 = vld [vmem:[%s7003_s15 + $0x130] sm:$0xff]  ;;  %v488_v16 = vld [vmem:[%s7003_s15 + $0x138] sm:$0xff]  ;;  %v364_v28 = vsub.f32 %v6963_v35, %v347_v25  ;;  %v366_v47 = vsub.f32 %v6963_v35, %v355_v26 }
  0x5c   : > { %6346 = vmatmul.mubr.msk.f32.vlgmr.msra.gmra.mrb[0].mxu0 %vm577_vm0, %v449_v29  ;;  %v489_v17 = vld [vmem:[%s7003_s15 + $0x140] sm:$0xff]  ;;  %v490_v18 = vld [vmem:[%s7003_s15 + $0x148] sm:$0xff]  ;;  %v491_v19 = vld [vmem:[%s7003_s15 + $0x150] sm:$0xff] }
  0x5d   : > { %6616 = vmatpush1.bf16.msra.mxu1 %v6615_v30  ;;  %1032 = vmatprep.mubr.f32.mxu0 %v10890_v0  ;;  %v492_v20 = vld [vmem:[%s7003_s15 + $0x158] sm:$0xff]  ;;  %v493_v21 = vld [vmem:[%s7003_s15 + $0x160] sm:$0xff]  ;;  %v494_v22 = vld [vmem:[%s7003_s15 + $0x168] sm:$0xff]  ;;  %v7255_v30 = vrot.slane %v6978_v57, %v6982_v63  ;;  %v370_v63 = vsub.f32 %v6965_v36, %v355_v26 }
  0x5e   : > { %v495_v23 = vld [vmem:[%s7003_s15 + $0x170] sm:$0xff]  ;;  %v496_v24 = vld [vmem:[%s7003_s15 + $0x178] sm:$0xff]  ;;  %v497_v27 = vld [vmem:[%s7003_s15 + $0x180] sm:$0xff] }
  0x60   : > { %6474 = vmatmul.mubr.msk.f32.vlgmr.msra.gmra.mrb[0].mxu1 %vm577_vm0, %v449_v29  ;;  %6347 = vmatmul.mubr.msk.f32.gmra.mrb[2].mxu0 %vm577_vm0, %v450_v31  ;;  %v7251_v29 = vrot.slane %v6978_v57, %v6973_v50  ;;  %v498_v50 = vld [vmem:[%s7003_s15 + $0x188] sm:$0xff]  ;;  %v369_v57 = vsub.f32 %v6965_v36, %v6976_v54 }
  0x61   : > { %1865 = vmatprep.mubr.f32.mxu1 %v10890_v0  ;;  %1038 = vmatprep.mubr.f32.mxu0 %v10890_v0 }
  0x64   : > { %6475 = vmatmul.mubr.msk.f32.gmra.mrb[2].mxu1 %vm577_vm0, %v450_v31  ;;  %6348 = vmatmul.mubr.msk.f32.gmra.mrb[4].mxu0 %vm577_vm0, %v451_v32  ;;  %v365_v31 = vsub.f32 %v6963_v35, %v6976_v54  ;;  %v367_v54 = vsub.f32 %v6963_v35, %v6992_v10 }
  0x65   : > { %1871 = vmatprep.mubr.f32.mxu1 %v10890_v0  ;;  %1044 = vmatprep.mubr.f32.mxu0 %v10890_v0 }
  0x68   : > { %6476 = vmatmul.mubr.msk.f32.gmra.mrb[4].mxu1 %vm577_vm0, %v451_v32  ;;  %6349 = vmatmul.mubr.msk.f32.gmra.mrb[6].mxu0 %vm577_vm0, %v452_v33  ;;  %v368_v32 = vsub.f32 %v6965_v36, %v347_v25 }
  0x69   : > { %1877 = vmatprep.mubr.f32.mxu1 %v10890_v0  ;;  %1050 = vmatprep.mubr.f32.mxu0 %v10890_v0 }
  0x6c   : > { %6477 = vmatmul.mubr.msk.f32.gmra.mrb[6].mxu1 %vm577_vm0, %v452_v33  ;;  %6350 = vmatmul.mubr.msk.f32.gmra.mrb[8].mxu0 %vm577_vm0, %v453_v34  ;;  %v372_v33 = vand.u32 2147483647, %v364_v28 }
  0x6d   : > { %1883 = vmatprep.mubr.f32.mxu1 %v10890_v0  ;;  %1056 = vmatprep.mubr.f32.mxu0 %v10890_v0 }
  0x70   : > { %6478 = vmatmul.mubr.msk.f32.gmra.mrb[8].mxu1 %vm577_vm0, %v453_v34  ;;  %6351 = vmatmul.mubr.msk.f32.gmra.mrb[10].mxu0 %vm577_vm0, %v454_v37  ;;  %v418_v34 = vsub.f32 %v6963_v35, %v6985_v1 }
  0x71   : > { %1889 = vmatprep.mubr.f32.mxu1 %v10890_v0  ;;  %1062 = vmatprep.mubr.f32.mxu0 %v10890_v0 }
  0x74   : > { %6479 = vmatmul.mubr.msk.f32.gmra.mrb[10].mxu1 %vm577_vm0, %v454_v37  ;;  %6352 = vmatmul.mubr.msk.f32.gmra.mrb[12].mxu0 %vm577_vm0, %v455_v38  ;;  %v417_v37 = vsub.f32 %v6963_v35, %v7251_v29 }
  0x75   : > { %1895 = vmatprep.mubr.f32.mxu1 %v10890_v0  ;;  %1068 = vmatprep.mubr.f32.mxu0 %v10890_v0 }
  0x78   : > { %6480 = vmatmul.mubr.msk.f32.gmra.mrb[12].mxu1 %vm577_vm0, %v455_v38  ;;  %6353 = vmatmul.mubr.msk.f32.gmra.mrb[14].mxu0 %vm577_vm0, %v456_v39  ;;  %v419_v38 = vsub.f32 %v6963_v35, %v7255_v30 }
  0x79   : > { %1901 = vmatprep.mubr.f32.mxu1 %v10890_v0  ;;  %1074 = vmatprep.mubr.f32.mxu0 %v10890_v0 }
  0x7c   : > { %6481 = vmatmul.mubr.msk.f32.gmra.mrb[14].mxu1 %vm577_vm0, %v456_v39  ;;  %6354 = vmatmul.mubr.msk.f32.gmra.mrb[16].mxu0 %vm577_vm0, %v457_v40  ;;  %v373_v39 = vand.u32 2147483647, %v365_v31 }
  0x7d   : > { %1907 = vmatprep.mubr.f32.mxu1 %v10890_v0  ;;  %1080 = vmatprep.mubr.f32.mxu0 %v10890_v0 }
  0x80   : > { %6482 = vmatmul.mubr.msk.f32.gmra.mrb[16].mxu1 %vm577_vm0, %v457_v40  ;;  %6355 = vmatmul.mubr.msk.f32.gmra.mrb[18].mxu0 %vm577_vm0, %v458_v41  ;;  %v422_v40 = vsub.f32 %v6965_v36, %v6985_v1  ;;  %v499_v1 = vld [vmem:[%s7003_s15 + $0x190] sm:$0xff] }
  0x81   : > { %1913 = vmatprep.mubr.f32.mxu1 %v10890_v0  ;;  %1086 = vmatprep.mubr.f32.mxu0 %v10890_v0 }
  0x84   : > { %6483 = vmatmul.mubr.msk.f32.gmra.mrb[18].mxu1 %vm577_vm0, %v458_v41  ;;  %6356 = vmatmul.mubr.msk.f32.gmra.mrb[20].mxu0 %vm577_vm0, %v459_v42  ;;  %v420_v41 = vsub.f32 %v6963_v35, %v6995_v11  ;;  %v378_v35 = vand.u32 2147483647, %v370_v63 }
  0x85   : > { %1919 = vmatprep.mubr.f32.mxu1 %v10890_v0  ;;  %1092 = vmatprep.mubr.f32.mxu0 %v10890_v0 }
  0x88   : > { %6484 = vmatmul.mubr.msk.f32.gmra.mrb[20].mxu1 %vm577_vm0, %v459_v42  ;;  %6357 = vmatmul.mubr.msk.f32.gmra.mrb[22].mxu0 %vm577_vm0, %v460_v43  ;;  %v374_v42 = vand.u32 2147483647, %v366_v47 }
  0x89   : > { %1925 = vmatprep.mubr.f32.mxu1 %v10890_v0  ;;  %1098 = vmatprep.mubr.f32.mxu0 %v10890_v0 }
  0x8c   : > { %6485 = vmatmul.mubr.msk.f32.gmra.mrb[22].mxu1 %vm577_vm0, %v460_v43  ;;  %6358 = vmatmul.mubr.msk.f32.gmra.mrb[24].mxu0 %vm577_vm0, %v461_v44  ;;  %v376_v43 = vand.u32 2147483647, %v368_v32 }
  0x8d   : > { %1931 = vmatprep.mubr.f32.mxu1 %v10890_v0  ;;  %1104 = vmatprep.mubr.f32.mxu0 %v10890_v0 }
  0x90   : > { %6486 = vmatmul.mubr.msk.f32.gmra.mrb[24].mxu1 %vm577_vm0, %v461_v44  ;;  %6359 = vmatmul.mubr.msk.f32.gmra.mrb[26].mxu0 %vm577_vm0, %v462_v45  ;;  %v371_v44 = vsub.f32 %v6965_v36, %v6992_v10  ;;  %v381_v10 = vsub.f32 1.0, %v373_v39 }
  0x91   : > { %1937 = vmatprep.mubr.f32.mxu1 %v10890_v0  ;;  %1110 = vmatprep.mubr.f32.mxu0 %v10890_v0 }
  0x94   : > { %6487 = vmatmul.mubr.msk.f32.gmra.mrb[26].mxu1 %vm577_vm0, %v462_v45  ;;  %6360 = vmatmul.mubr.msk.f32.gmra.mrb[28].mxu0 %vm577_vm0, %v463_v46  ;;  %v424_v45 = vsub.f32 %v6965_v36, %v6995_v11  ;;  %v379_v11 = vand.u32 2147483647, %v371_v44  ;;  %v503_v44 = vld [vmem:[%s7003_s15 + $0x1b0] sm:$0xff] }
  0x95   : > { %1943 = vmatprep.mubr.f32.mxu1 %v10890_v0  ;;  %1116 = vmatprep.mubr.f32.mxu0 %v10890_v0 }
  0x98   : > { %6488 = vmatmul.mubr.msk.f32.gmra.mrb[28].mxu1 %vm577_vm0, %v463_v46  ;;  %6361 = vmatmul.mubr.msk.f32.gmra.mrb[30].mxu0 %vm577_vm0, %v464_v48  ;;  %v377_v46 = vand.u32 2147483647, %v369_v57 }
  0x99   : > { %1949 = vmatprep.mubr.f32.mxu1 %v10890_v0  ;;  %1122 = vmatprep.mubr.f32.mxu0 %v10890_v0 }
  0x9c   : > { %6489 = vmatmul.mubr.msk.f32.gmra.mrb[30].mxu1 %vm577_vm0, %v464_v48  ;;  %6362 = vmatmul.mubr.msk.f32.gmra.mrb[32].mxu0 %vm577_vm0, %v465_v49  ;;  %v380_v48 = vsub.f32 1.0, %v372_v33 }
  0x9d   : > { %1955 = vmatprep.mubr.f32.mxu1 %v10890_v0  ;;  %1128 = vmatprep.mubr.f32.mxu0 %v10890_v0 }
  0xa0   : > { %6490 = vmatmul.mubr.msk.f32.gmra.mrb[32].mxu1 %vm577_vm0, %v465_v49  ;;  %6363 = vmatmul.mubr.msk.f32.gmra.mrb[34].mxu0 %vm577_vm0, %v466_v51  ;;  %v426_v49 = vand.u32 2147483647, %v418_v34 }
  0xa1   : > { %1961 = vmatprep.mubr.f32.mxu1 %v10890_v0  ;;  %1134 = vmatprep.mubr.f32.mxu0 %v10890_v0 }
  0xa4   : > { %6491 = vmatmul.mubr.msk.f32.gmra.mrb[34].mxu1 %vm577_vm0, %v466_v51  ;;  %6364 = vmatmul.mubr.msk.f32.gmra.mrb[36].mxu0 %vm577_vm0, %v467_v52  ;;  %v425_v51 = vand.u32 2147483647, %v417_v37 }
  0xa5   : > { %1967 = vmatprep.mubr.f32.mxu1 %v10890_v0  ;;  %1140 = vmatprep.mubr.f32.mxu0 %v10890_v0 }
  0xa8   : > { %6492 = vmatmul.mubr.msk.f32.gmra.mrb[36].mxu1 %vm577_vm0, %v467_v52  ;;  %6365 = vmatmul.mubr.msk.f32.gmra.mrb[38].mxu0 %vm577_vm0, %v468_v53  ;;  %v427_v52 = vand.u32 2147483647, %v419_v38 }
  0xa9   : > { %1973 = vmatprep.mubr.f32.mxu1 %v10890_v0  ;;  %1146 = vmatprep.mubr.f32.mxu0 %v10890_v0 }
  0xac   : > { %6493 = vmatmul.mubr.msk.f32.gmra.mrb[38].mxu1 %vm577_vm0, %v468_v53  ;;  %6366 = vmatmul.mubr.msk.f32.gmra.mrb[40].mxu0 %vm577_vm0, %v469_v55  ;;  %v430_v53 = vand.u32 2147483647, %v422_v40 }
  0xad   : > { %1979 = vmatprep.mubr.f32.mxu1 %v10890_v0  ;;  %1152 = vmatprep.mubr.f32.mxu0 %v10890_v0 }
  0xb0   : > { %6494 = vmatmul.mubr.msk.f32.gmra.mrb[40].mxu1 %vm577_vm0, %v469_v55  ;;  %6367 = vmatmul.mubr.msk.f32.gmra.mrb[42].mxu0 %vm577_vm0, %v470_v56  ;;  %v375_v55 = vand.u32 2147483647, %v367_v54 }
  0xb1   : > { %1985 = vmatprep.mubr.f32.mxu1 %v10890_v0  ;;  %1158 = vmatprep.mubr.f32.mxu0 %v10890_v0 }
  0xb4   : > { %6495 = vmatmul.mubr.msk.f32.gmra.mrb[42].mxu1 %vm577_vm0, %v470_v56  ;;  %6368 = vmatmul.mubr.msk.f32.gmra.mrb[44].mxu0 %vm577_vm0, %v471_v58  ;;  %v428_v56 = vand.u32 2147483647, %v420_v41 }
  0xb5   : > { %1991 = vmatprep.mubr.f32.mxu1 %v10890_v0  ;;  %1164 = vmatprep.mubr.f32.mxu0 %v10890_v0 }
  0xb8   : > { %6496 = vmatmul.mubr.msk.f32.gmra.mrb[44].mxu1 %vm577_vm0, %v471_v58  ;;  %6369 = vmatmul.mubr.msk.f32.gmra.mrb[46].mxu0 %vm577_vm0, %v472_v59  ;;  %v432_v58 = vand.u32 2147483647, %v424_v45 }
  0xb9   : > { %1997 = vmatprep.mubr.f32.mxu1 %v10890_v0  ;;  %1170 = vmatprep.mubr.f32.mxu0 %v10890_v0 }
  0xbc   : > { %6497 = vmatmul.mubr.msk.f32.gmra.mrb[46].mxu1 %vm577_vm0, %v472_v59  ;;  %6370 = vmatmul.mubr.msk.f32.gmra.mrb[48].mxu0 %vm577_vm0, %v473_v60  ;;  %v500_v59 = vld [vmem:[%s7003_s15 + $0x198] sm:$0xff] }
  0xbd   : > { %2003 = vmatprep.mubr.f32.mxu1 %v10890_v0  ;;  %1176 = vmatprep.mubr.f32.mxu0 %v10890_v0 }
  0xc0   : > { %6498 = vmatmul.mubr.msk.f32.gmra.mrb[48].mxu1 %vm577_vm0, %v473_v60  ;;  %6371 = vmatmul.mubr.msk.f32.gmra.mrb[50].mxu0 %vm577_vm0, %v474_v61  ;;  %v382_v60 = vsub.f32 1.0, %v374_v42 }
  0xc1   : > { %2009 = vmatprep.mubr.f32.mxu1 %v10890_v0  ;;  %1182 = vmatprep.mubr.f32.mxu0 %v10890_v0 }
  0xc4   : > { %6499 = vmatmul.mubr.msk.f32.gmra.mrb[50].mxu1 %vm577_vm0, %v474_v61  ;;  %6372 = vmatmul.mubr.msk.f32.gmra.mrb[52].mxu0 %vm577_vm0, %v475_v62  ;;  %v384_v61 = vsub.f32 1.0, %v376_v43 }
  0xc5   : > { %2015 = vmatprep.mubr.f32.mxu1 %v10890_v0  ;;  %1188 = vmatprep.mubr.f32.mxu0 %v10890_v0 }
  0xc8   : > { %6500 = vmatmul.mubr.msk.f32.gmra.mrb[52].mxu1 %vm577_vm0, %v475_v62  ;;  %6373 = vmatmul.mubr.msk.f32.gmra.mrb[54].mxu0 %vm577_vm0, %v476_v2  ;;  %v385_v62 = vsub.f32 1.0, %v377_v46 }
  0xc9   : > { %2021 = vmatprep.mubr.f32.mxu1 %v10890_v0  ;;  %1194 = vmatprep.mubr.f32.mxu0 %v10890_v0 }
  0xcc   : > { %6501 = vmatmul.mubr.msk.f32.gmra.mrb[54].mxu1 %vm577_vm0, %v476_v2  ;;  %6374 = vmatmul.mubr.msk.f32.gmra.mrb[56].mxu0 %vm577_vm0, %v477_v3  ;;  %v386_v2 = vsub.f32 1.0, %v378_v35 }
  0xcd   : > { %2027 = vmatprep.mubr.f32.mxu1 %v10890_v0  ;;  %1200 = vmatprep.mubr.f32.mxu0 %v10890_v0 }
  0xd0   : > { %6502 = vmatmul.mubr.msk.f32.gmra.mrb[56].mxu1 %vm577_vm0, %v477_v3  ;;  %6375 = vmatmul.mubr.msk.f32.gmra.mrb[58].mxu0 %vm577_vm0, %v478_v4  ;;  %v433_v3 = vsub.f32 1.0, %v425_v51 }
  0xd1   : > { %2033 = vmatprep.mubr.f32.mxu1 %v10890_v0  ;;  %1206 = vmatprep.mubr.f32.mxu0 %v10890_v0 }
  0xd4   : > { %6503 = vmatmul.mubr.msk.f32.gmra.mrb[58].mxu1 %vm577_vm0, %v478_v4  ;;  %6376 = vmatmul.mubr.msk.f32.gmra.mrb[60].mxu0 %vm577_vm0, %v479_v5  ;;  %v435_v4 = vsub.f32 1.0, %v427_v52 }
  0xd5   : > { %2039 = vmatprep.mubr.f32.mxu1 %v10890_v0  ;;  %1212 = vmatprep.mubr.f32.mxu0 %v10890_v0 }
  0xd8   : > { %6504 = vmatmul.mubr.msk.f32.gmra.mrb[60].mxu1 %vm577_vm0, %v479_v5  ;;  %6377 = vmatmul.mubr.msk.f32.gmra.mrb[62].mxu0 %vm577_vm0, %v480_v6  ;;  %v434_v5 = vsub.f32 1.0, %v426_v49 }
  0xd9   : > { %2045 = vmatprep.mubr.f32.mxu1 %v10890_v0  ;;  %1218 = vmatprep.mubr.f32.mxu0 %v10890_v0 }
  0xdc   : > { %6505 = vmatmul.mubr.msk.f32.gmra.mrb[62].mxu1 %vm577_vm0, %v480_v6  ;;  %6378 = vmatmul.mubr.msk.f32.gmra.mrb[64].mxu0 %vm577_vm0, %v481_v7  ;;  %v438_v6 = vsub.f32 1.0, %v430_v53 }
  0xdd   : > { %2051 = vmatprep.mubr.f32.mxu1 %v10890_v0  ;;  %1224 = vmatprep.mubr.f32.mxu0 %v10890_v0 }
  0xde   : > { %v7322_v25 = vmax.f32 %v438_v6, 0.0 }
  0xe0   : > { %6506 = vmatmul.mubr.msk.f32.gmra.mrb[64].mxu1 %vm577_vm0, %v481_v7  ;;  %6379 = vmatmul.mubr.msk.f32.gmra.mrb[66].mxu0 %vm577_vm0, %v482_v8  ;;  %v383_v7 = vsub.f32 1.0, %v375_v55  ;;  %11019 = vst [vmem:[#allocation11_spill] sm:$0xff] %v7322_v25 }
  0xe1   : > { %2057 = vmatprep.mubr.f32.mxu1 %v10890_v0  ;;  %1230 = vmatprep.mubr.f32.mxu0 %v10890_v0 }
  0xe2   : > { %v7324_v26 = vmax.f32 %v383_v7, 0.0 }
  0xe4   : > { %6507 = vmatmul.mubr.msk.f32.gmra.mrb[66].mxu1 %vm577_vm0, %v482_v8  ;;  %6380 = vmatmul.mubr.msk.f32.gmra.mrb[68].mxu0 %vm577_vm0, %v483_v9  ;;  %v436_v8 = vsub.f32 1.0, %v428_v56 }
  0xe5   : > { %2063 = vmatprep.mubr.f32.mxu1 %v10890_v0  ;;  %1236 = vmatprep.mubr.f32.mxu0 %v10890_v0 }
  0xe8   : > { %6508 = vmatmul.mubr.msk.f32.gmra.mrb[68].mxu1 %vm577_vm0, %v483_v9  ;;  %6381 = vmatmul.mubr.msk.f32.gmra.mrb[70].mxu0 %vm577_vm0, %v484_v12  ;;  %v7297_v9 = vmax.f32 %v380_v48, 0.0 }
  0xe9   : > { %2069 = vmatprep.mubr.f32.mxu1 %v10890_v0  ;;  %1242 = vmatprep.mubr.f32.mxu0 %v10890_v0 }
  0xec   : > { %6509 = vmatmul.mubr.msk.f32.gmra.mrb[70].mxu1 %vm577_vm0, %v484_v12  ;;  %6382 = vmatmul.mubr.msk.f32.gmra.mrb[72].mxu0 %vm577_vm0, %v485_v13  ;;  %v7299_v12 = vmax.f32 %v381_v10, 0.0 }
  0xed   : > { %2075 = vmatprep.mubr.f32.mxu1 %v10890_v0  ;;  %1248 = vmatprep.mubr.f32.mxu0 %v10890_v0 }
  0xf0   : > { %6510 = vmatmul.mubr.msk.f32.gmra.mrb[72].mxu1 %vm577_vm0, %v485_v13  ;;  %6383 = vmatmul.mubr.msk.f32.gmra.mrb[74].mxu0 %vm577_vm0, %v486_v14  ;;  %v387_v13 = vsub.f32 1.0, %v379_v11 }
  0xf1   : > { %2081 = vmatprep.mubr.f32.mxu1 %v10890_v0  ;;  %1254 = vmatprep.mubr.f32.mxu0 %v10890_v0 }
  0xf2   : > { %v7330_v28 = vmax.f32 %v387_v13, 0.0 }
  0xf4   : > { %6511 = vmatmul.mubr.msk.f32.gmra.mrb[74].mxu1 %vm577_vm0, %v486_v14  ;;  %6384 = vmatmul.mubr.msk.f32.gmra.mrb[76].mxu0 %vm577_vm0, %v487_v15  ;;  %v440_v14 = vsub.f32 1.0, %v432_v58 }
  0xf5   : > { %2087 = vmatprep.mubr.f32.mxu1 %v10890_v0  ;;  %1260 = vmatprep.mubr.f32.mxu0 %v10890_v0 }
  0xf8   : > { %6512 = vmatmul.mubr.msk.f32.gmra.mrb[76].mxu1 %vm577_vm0, %v487_v15  ;;  %6385 = vmatmul.mubr.msk.f32.gmra.mrb[78].mxu0 %vm577_vm0, %v488_v16  ;;  %v501_v15 = vld [vmem:[%s7003_s15 + $0x1a0] sm:$0xff] }
  0xf9   : > { %2093 = vmatprep.mubr.f32.mxu1 %v10890_v0  ;;  %1266 = vmatprep.mubr.f32.mxu0 %v10890_v0 }
  0xfc   : > { %6513 = vmatmul.mubr.msk.f32.gmra.mrb[78].mxu1 %vm577_vm0, %v488_v16  ;;  %6386 = vmatmul.mubr.msk.f32.gmra.mrb[80].mxu0 %vm577_vm0, %v489_v17  ;;  %v7304_v16 = vmax.f32 %v382_v60, 0.0 }
  0xfd   : > { %2099 = vmatprep.mubr.f32.mxu1 %v10890_v0  ;;  %1272 = vmatprep.mubr.f32.mxu0 %v10890_v0 }
 0x100   : > { %6514 = vmatmul.mubr.msk.f32.gmra.mrb[80].mxu1 %vm577_vm0, %v489_v17  ;;  %6387 = vmatmul.mubr.msk.f32.gmra.mrb[82].mxu0 %vm577_vm0, %v490_v18  ;;  %v7306_v17 = vmax.f32 %v384_v61, 0.0 }
 0x101   : > { %2105 = vmatprep.mubr.f32.mxu1 %v10890_v0  ;;  %1278 = vmatprep.mubr.f32.mxu0 %v10890_v0 }
 0x104   : > { %6515 = vmatmul.mubr.msk.f32.gmra.mrb[82].mxu1 %vm577_vm0, %v490_v18  ;;  %6388 = vmatmul.mubr.msk.f32.gmra.mrb[84].mxu0 %vm577_vm0, %v491_v19  ;;  %v7308_v18 = vmax.f32 %v385_v62, 0.0 }
 0x105   : > { %2111 = vmatprep.mubr.f32.mxu1 %v10890_v0  ;;  %1284 = vmatprep.mubr.f32.mxu0 %v10890_v0 }
 0x108   : > { %6516 = vmatmul.mubr.msk.f32.gmra.mrb[84].mxu1 %vm577_vm0, %v491_v19  ;;  %6389 = vmatmul.mubr.msk.f32.gmra.mrb[86].mxu0 %vm577_vm0, %v492_v20  ;;  %v421_v19 = vsub.f32 %v6965_v36, %v7251_v29  ;;  %v7332_v29 = vmax.f32 %v440_v14, 0.0 }
 0x109   : > { %2117 = vmatprep.mubr.f32.mxu1 %v10890_v0  ;;  %1290 = vmatprep.mubr.f32.mxu0 %v10890_v0 }
 0x10a   : > { %11021 = vst [vmem:[#allocation13_spill] sm:$0xff] %v7332_v29  ;;  %v429_v57 = vand.u32 2147483647, %v421_v19 }
 0x10c   : > { %6517 = vmatmul.mubr.msk.f32.gmra.mrb[86].mxu1 %vm577_vm0, %v492_v20  ;;  %6390 = vmatmul.mubr.msk.f32.gmra.mrb[88].mxu0 %vm577_vm0, %v493_v21  ;;  %v7312_v20 = vmax.f32 %v386_v2, 0.0  ;;  %v437_v51 = vsub.f32 1.0, %v429_v57 }
 0x10d   : > { %2123 = vmatprep.mubr.f32.mxu1 %v10890_v0  ;;  %1296 = vmatprep.mubr.f32.mxu0 %v10890_v0 }
 0x110   : > { %6518 = vmatmul.mubr.msk.f32.gmra.mrb[88].mxu1 %vm577_vm0, %v493_v21  ;;  %6391 = vmatmul.mubr.msk.f32.gmra.mrb[90].mxu0 %vm577_vm0, %v494_v22  ;;  %v7314_v21 = vmax.f32 %v433_v3, 0.0 }
 0x111   : > { %2129 = vmatprep.mubr.f32.mxu1 %v10890_v0  ;;  %1302 = vmatprep.mubr.f32.mxu0 %v10890_v0 }
 0x112   : > { %11016 = vst [vmem:[#allocation8_spill] sm:$0xff] %v7314_v21  ;;  %v7365_v54 = vrot.slane %v7314_v21, 3  ;;  %v7393_v49 = vrot.slane %v7314_v21, 5  ;;  %v7409_v62 = vrot.slane %v7314_v21, 6  ;;  %v7426_v13 = vrot.slane %v7314_v21, 7 }
 0x114   : > { %6519 = vmatmul.mubr.msk.f32.gmra.mrb[90].mxu1 %vm577_vm0, %v494_v22  ;;  %6392 = vmatmul.mubr.msk.f32.gmra.mrb[92].mxu0 %vm577_vm0, %v495_v23  ;;  %v7316_v22 = vmax.f32 %v435_v4, 0.0  ;;  %11030 = vst [vmem:[#allocation22_spill] sm:$0xff] %v7365_v54  ;;  %11038 = vst [vmem:[#allocation30_spill] sm:$0xff] %v7393_v49 }
 0x115   : > { %2135 = vmatprep.mubr.f32.mxu1 %v10890_v0  ;;  %1308 = vmatprep.mubr.f32.mxu0 %v10890_v0  ;;  %11042 = vst [vmem:[#allocation34_spill] sm:$0xff] %v7409_v62  ;;  %11046 = vst [vmem:[#allocation38_spill] sm:$0xff] %v7426_v13 }
 0x116   : > { %11017 = vst [vmem:[#allocation9_spill] sm:$0xff] %v7316_v22  ;;  %v7341_v31 = vrot.slane %v7316_v22, 1  ;;  %v7353_v33 = vrot.slane %v7316_v22, 2  ;;  %v7368_v41 = vrot.slane %v7316_v22, 3  ;;  %v7384_v46 = vrot.slane %v7316_v22, 4 }
 0x117   : > { %v7396_v55 = vrot.slane %v7316_v22, 5  ;;  %v7412_v2 = vrot.slane %v7316_v22, 6  ;;  %v7429_v14 = vrot.slane %v7316_v22, 7 }
 0x118   : > { %6520 = vmatmul.mubr.msk.f32.gmra.mrb[92].mxu1 %vm577_vm0, %v495_v23  ;;  %6393 = vmatmul.mubr.msk.f32.gmra.mrb[94].mxu0 %vm577_vm0, %v496_v24  ;;  %v423_v23 = vsub.f32 %v6965_v36, %v7255_v30  ;;  %v502_v36 = vld [vmem:[%s7003_s15 + $0x1a8] sm:$0xff]  ;;  %v7338_v30 = vrot.slane %v7314_v21, 1  ;;  %11023 = vst [vmem:[#allocation15_spill] sm:$0xff] %v7341_v31  ;;  %11027 = vst [vmem:[#allocation19_spill] sm:$0xff] %v7353_v33 }
 0x119   : > { %2141 = vmatprep.mubr.f32.mxu1 %v10890_v0  ;;  %1314 = vmatprep.mubr.f32.mxu0 %v10890_v0  ;;  %11031 = vst [vmem:[#allocation23_spill] sm:$0xff] %v7368_v41  ;;  %11035 = vst [vmem:[#allocation27_spill] sm:$0xff] %v7384_v46 }
 0x11a   : > { %11022 = vst [vmem:[#allocation14_spill] sm:$0xff] %v7338_v30  ;;  %v431_v38 = vand.u32 2147483647, %v423_v23  ;;  %11039 = vst [vmem:[#allocation31_spill] sm:$0xff] %v7396_v55 }
 0x11b   : > { %11043 = vst [vmem:[#allocation35_spill] sm:$0xff] %v7412_v2  ;;  %11047 = vst [vmem:[#allocation39_spill] sm:$0xff] %v7429_v14 }
 0x11c   : > { %6521 = vmatmul.mubr.msk.f32.gmra.mrb[94].mxu1 %vm577_vm0, %v496_v24  ;;  %6394 = vmatmul.mubr.msk.f32.gmra.mrb[96].mxu0 %vm577_vm0, %v497_v27  ;;  %v7320_v24 = vmax.f32 %v434_v5, 0.0  ;;  %v439_v11 = vsub.f32 1.0, %v431_v38  ;;  %v504_v5 = vld [vmem:[%s7003_s15 + $0x1b8] sm:$0xff] }
 0x11d   : > { %2147 = vmatprep.mubr.f32.mxu1 %v10890_v0  ;;  %1320 = vmatprep.mubr.f32.mxu0 %v10890_v0 }
 0x11e   : > { %11018 = vst [vmem:[#allocation10_spill] sm:$0xff] %v7320_v24  ;;  %v7344_v47 = vrot.slane %v7320_v24, 1  ;;  %v7356_v34 = vrot.slane %v7320_v24, 2  ;;  %v7371_v42 = vrot.slane %v7320_v24, 3  ;;  %v7387_v35 = vrot.slane %v7320_v24, 4 }
 0x11f   : > { %v7399_v56 = vrot.slane %v7320_v24, 5  ;;  %v7420_v6 = vrot.slane %v7320_v24, 6  ;;  %v7434_v57 = vrot.slane %v7320_v24, 7  ;;  %v7439_v38 = vmax.f32 %v439_v11, 0.0 }
 0x120   : > { %6522 = vmatmul.mubr.msk.f32.gmra.mrb[96].mxu1 %vm577_vm0, %v497_v27  ;;  %6395 = vmatmul.mubr.msk.f32.gmra.mrb[98].mxu0 %vm577_vm0, %v498_v50  ;;  %v7326_v27 = vmax.f32 %v436_v8, 0.0  ;;  %11024 = vst [vmem:[#allocation16_spill] sm:$0xff] %v7344_v47  ;;  %11028 = vst [vmem:[#allocation20_spill] sm:$0xff] %v7356_v34 }
 0x121   : > { %2153 = vmatprep.mubr.f32.mxu1 %v10890_v0  ;;  %1326 = vmatprep.mubr.f32.mxu0 %v10890_v0  ;;  %11032 = vst [vmem:[#allocation24_spill] sm:$0xff] %v7371_v42  ;;  %11036 = vst [vmem:[#allocation28_spill] sm:$0xff] %v7387_v35 }
 0x122   : > { %11020 = vst [vmem:[#allocation12_spill] sm:$0xff] %v7326_v27  ;;  %v7347_v32 = vrot.slane %v7326_v27, 1  ;;  %v7359_v37 = vrot.slane %v7326_v27, 2  ;;  %v7378_v45 = vrot.slane %v7326_v27, 3  ;;  %v7390_v48 = vrot.slane %v7326_v27, 4  ;;  %11040 = vst [vmem:[#allocation32_spill] sm:$0xff] %v7399_v56 }
 0x123   : > { %v7402_v10 = vrot.slane %v7326_v27, 5  ;;  %11044 = vst [vmem:[#allocation36_spill] sm:$0xff] %v7420_v6  ;;  %v7423_v7 = vrot.slane %v7326_v27, 6  ;;  %11049 = vst [vmem:[#allocation41_spill] sm:$0xff] %v7434_v57 }
 0x124   : > { %6523 = vmatmul.mubr.msk.f32.gmra.mrb[98].mxu1 %vm577_vm0, %v498_v50  ;;  %6396 = vmatmul.mubr.msk.f32.gmra.mrb[100].mxu0 %vm577_vm0, %v499_v1  ;;  %11025 = vst [vmem:[#allocation17_spill] sm:$0xff] %v7347_v32  ;;  %v7350_v50 = vrot.slane %v7314_v21, 2  ;;  %11029 = vst [vmem:[#allocation21_spill] sm:$0xff] %v7359_v37 }
 0x125   : > { %2159 = vmatprep.mubr.f32.mxu1 %v10890_v0  ;;  %1332 = vmatprep.mubr.f32.mxu0 %v10890_v0  ;;  %11033 = vst [vmem:[#allocation25_spill] sm:$0xff] %v7378_v45  ;;  %11037 = vst [vmem:[#allocation29_spill] sm:$0xff] %v7390_v48 }
 0x126   : > { %11026 = vst [vmem:[#allocation18_spill] sm:$0xff] %v7350_v50  ;;  %11041 = vst [vmem:[#allocation33_spill] sm:$0xff] %v7402_v10 }
 0x127   : > { %11045 = vst [vmem:[#allocation37_spill] sm:$0xff] %v7423_v7  ;;  %11051 = vst [vmem:[#allocation43_spill] sm:$0xff] %v7439_v38 }
 0x128   : > { %6524 = vmatmul.mubr.msk.f32.gmra.mrb[100].mxu1 %vm577_vm0, %v499_v1  ;;  %6397 = vmatmul.mubr.msk.f32.gmra.mrb[102].mxu0 %vm577_vm0, %v500_v59  ;;  %v7381_v1 = vrot.slane %v7314_v21, 4 }
 0x129   : > { %2165 = vmatprep.mubr.f32.mxu1 %v10890_v0  ;;  %1338 = vmatprep.mubr.f32.mxu0 %v10890_v0 }
 0x12a   : > { %11034 = vst [vmem:[#allocation26_spill] sm:$0xff] %v7381_v1 }
 0x12c   : > { %6525 = vmatmul.mubr.msk.f32.gmra.mrb[102].mxu1 %vm577_vm0, %v500_v59  ;;  %6398 = vmatmul.mubr.msk.f32.gmra.mrb[104].mxu0 %vm577_vm0, %v501_v15 }
 0x12d   : > { %2171 = vmatprep.mubr.f32.mxu1 %v10890_v0  ;;  %1344 = vmatprep.mubr.f32.mxu0 %v10890_v0 }
 0x12f   : > { %v1028_v63 = vpop.f32.mrb[0].mxu0 }
 0x130   : > { %6526 = vmatmul.mubr.msk.f32.gmra.mrb[104].mxu1 %vm577_vm0, %v501_v15  ;;  %v2628_v39 = vmul.f32 %v1028_v63, %v7297_v9  ;;  %v1030_v40 = vpop.f32.mrb[1].mxu0  ;;  %6399 = vmatmul.mubr.msk.f32.gmra.mrb[106].mxu0 %vm577_vm0, %v502_v36  ;;  %v7431_v15 = vmax.f32 %v437_v51, 0.0  ;;  %v7437_v63 = vrot.slane %v7326_v27, 7 }
 0x131   : > { %2177 = vmatprep.mubr.f32.mxu1 %v10890_v0  ;;  %v2629_v43 = vmul.f32 %v1030_v40, %v7299_v12  ;;  %1350 = vmatprep.mubr.f32.mxu0 %v10890_v0 }
 0x132   : > { %11048 = vst [vmem:[#allocation40_spill] sm:$0xff] %v7431_v15  ;;  %11050 = vst [vmem:[#allocation42_spill] sm:$0xff] %v7437_v63 }
 0x133   : > { %v1861_v52 = vpop.f32.mrb[0].mxu1  ;;  %v1034_v53 = vpop.f32.mrb[2].mxu0 }
 0x134   : > { %v2630_v58 = vmul.f32 %v1861_v52, %v7304_v16  ;;  %v1863_v59 = vpop.f32.mrb[1].mxu1  ;;  %6527 = vmatmul.mubr.msk.f32.gmra.mrb[106].mxu1 %vm577_vm0, %v502_v36  ;;  %v2632_v60 = vmul.f32 %v1034_v53, %v7306_v17  ;;  %v1036_v61 = vpop.f32.mrb[3].mxu0  ;;  %6400 = vmatmul.mubr.msk.f32.gmra.mrb[108].mxu0 %vm577_vm0, %v503_v44 }
 0x135   : > { %v2631_v3 = vmul.f32 %v1863_v59, %v7324_v26  ;;  %2183 = vmatprep.mubr.f32.mxu1 %v10890_v0  ;;  %v2633_v4 = vmul.f32 %v1036_v61, %v7308_v18  ;;  %1356 = vmatprep.mubr.f32.mxu0 %v10890_v0  ;;  %v505_v61 = vld [vmem:[%s7003_s15 + $0x1c0] sm:$0xff] }
 0x136   : > { %v3140_v8 = vadd.f32 %v2632_v60, %v2628_v39 }
 0x137   : > { %v1867_v19 = vpop.f32.mrb[2].mxu1  ;;  %v3147_v23 = vadd.f32 %v2633_v4, %v2629_v43  ;;  %v1040_v36 = vpop.f32.mrb[4].mxu0  ;;  %v7446_v43 = vrot.slane %v7431_v15, 1 }
 0x138   : > { %v3141_v39 = vrot.slane %v3140_v8, 4  ;;  %v2634_v40 = vmul.f32 %v1867_v19, %v7312_v20  ;;  %v1869_v52 = vpop.f32.mrb[3].mxu1  ;;  %6528 = vmatmul.mubr.msk.f32.gmra.mrb[108].mxu1 %vm577_vm0, %v503_v44  ;;  %v2636_v51 = vmul.f32 %v1040_v36, %v7297_v9  ;;  %v1042_v53 = vpop.f32.mrb[5].mxu0  ;;  %6401 = vmatmul.mubr.msk.f32.gmra.mrb[110].mxu0 %vm577_vm0, %v504_v5  ;;  %v7454_v44 = vrot.slane %v7439_v38, 1 }
 0x139   : > { %11052 = vst [vmem:[#allocation44_spill] sm:$0xff] %v7446_v43  ;;  %v3148_v59 = vrot.slane %v3147_v23, 4  ;;  %v2635_v60 = vmul.f32 %v1869_v52, %v7330_v28  ;;  %2189 = vmatprep.mubr.f32.mxu1 %v10890_v0  ;;  %v2637_v11 = vmul.f32 %v1042_v53, %v7299_v12  ;;  %1362 = vmatprep.mubr.f32.mxu0 %v10890_v0  ;;  %v7457_v36 = vrot.slane %v7322_v25, 1 }
 0x13a   : > { %11053 = vst [vmem:[#allocation45_spill] sm:$0xff] %v7454_v44  ;;  %v3142_v4 = vadd.f32 %v3141_v39, %v3140_v8  ;;  %v3154_v19 = vadd.f32 %v2634_v40, %v2630_v58  ;;  %v7460_v43 = vrot.slane %v7332_v29, 1  ;;  %v7463_v53 = vrot.slane %v7431_v15, 2 }
 0x13b   : > { %11054 = vst [vmem:[#allocation46_spill] sm:$0xff] %v7457_v36  ;;  %v3149_v63 = vadd.f32 %v3148_v59, %v3147_v23  ;;  %v3161_v52 = vadd.f32 %v2635_v60, %v2631_v3  ;;  %v1873_v57 = vpop.f32.mrb[4].mxu1  ;;  %v1046_v14 = vpop.f32.mrb[6].mxu0  ;;  %v7466_v0 = vrot.slane %v7439_v38, 2 }
 0x13c   : > { %11055 = vst [vmem:[#allocation47_spill] sm:$0xff] %v7460_v43  ;;  %11056 = vst [vmem:[#allocation48_spill] sm:$0xff] %v7463_v53  ;;  %v3143_v44 = vrot.slane %v3142_v4, 2  ;;  %v3155_v8 = vrot.slane %v3154_v19, 4  ;;  %v2638_v58 = vmul.f32 %v1873_v57, %v7304_v16  ;;  %v1875_v39 = vpop.f32.mrb[5].mxu1  ;;  %6529 = vmatmul.mubr.msk.f32.gmra.mrb[110].mxu1 %vm577_vm0, %v504_v5  ;;  %v2640_v40 = vmul.f32 %v1046_v14, %v7306_v17  ;;  %v1048_v23 = vpop.f32.mrb[7].mxu0 }
 0x13d   : > { %11057 = vst [vmem:[#allocation49_spill] sm:$0xff] %v7466_v0  ;;  %6402 = vmatmul.mubr.msk.f32.gmra.mrb[112].mxu0 %vm577_vm0, %v505_v61  ;;  %v3150_v3 = vrot.slane %v3149_v63, 2  ;;  %v3162_v59 = vrot.slane %v3161_v52, 4  ;;  %v2639_v60 = vmul.f32 %v1875_v39, %v7324_v26  ;;  %v11058_v53 = vmov 0.0   ;;  %v506_v43 = vld [vmem:[%s7003_s15 + $0x1c8] sm:$0xff] }
 0x13e   : > { %2195 = vmatprep.mubr.f32.mxu1 %v11058_v53  ;;  %v2641_v0 = vmul.f32 %v1048_v23, %v7308_v18  ;;  %1368 = vmatprep.mubr.f32.mxu0 %v11058_v53  ;;  %v3144_v57 = vadd.f32 %v3143_v44, %v3142_v4  ;;  %v3156_v36 = vadd.f32 %v3155_v8, %v3154_v19  ;;  %v7478_v5 = vrot.slane %v7322_v25, 2 }
 0x13f   : > { %v3168_v38 = vadd.f32 %v2640_v40, %v2636_v51  ;;  %v3151_v14 = vadd.f32 %v3150_v3, %v3149_v63  ;;  %v3163_v15 = vadd.f32 %v3162_v59, %v3161_v52  ;;  %v1879_v13 = vpop.f32.mrb[6].mxu1  ;;  %v1052_v6 = vpop.f32.mrb[8].mxu0  ;;  %v7481_v39 = vrot.slane %v7332_v29, 2 }
 0x140   : > { %11059 = vst [vmem:[#allocation50_spill] sm:$0xff] %v7478_v5  ;;  %v3175_v7 = vadd.f32 %v2641_v0, %v2637_v11  ;;  %v3145_v2 = vrot.slane %v3144_v57, 1  ;;  %v3157_v23 = vrot.slane %v3156_v36, 2  ;;  %v2642_v10 = vmul.f32 %v1879_v13, %v7312_v20  ;;  %v1881_v44 = vpop.f32.mrb[7].mxu1  ;;  %6530 = vmatmul.mubr.msk.f32.gmra.mrb[112].mxu1 %vm577_vm0, %v505_v61  ;;  %v1054_v51 = vpop.f32.mrb[9].mxu0  ;;  %v507_v11 = vld [vmem:[%s7003_s15 + $0x1d0] sm:$0xff] }
 0x141   : > { %11060 = vst [vmem:[#allocation51_spill] sm:$0xff] %v7481_v39  ;;  %v3169_v62 = vrot.slane %v3168_v38, 4  ;;  %6403 = vmatmul.mubr.msk.f32.gmra.mrb[114].mxu0 %vm577_vm0, %v506_v43  ;;  %v3152_v63 = vrot.slane %v3151_v14, 1  ;;  %v3164_v4 = vrot.slane %v3163_v15, 2  ;;  %v2643_v0 = vmul.f32 %v1881_v44, %v7330_v28  ;;  %2201 = vmatprep.mubr.f32.mxu1 %v11058_v53 }
 0x142   : > { %v3176_v19 = vrot.slane %v3175_v7, 4  ;;  %1374 = vmatprep.mubr.f32.mxu0 %v11058_v53  ;;  %v3146_v52 = vadd.f32 %v3145_v2, %v3144_v57  ;;  %v3158_v8 = vadd.f32 %v3157_v23, %v3156_v36  ;;  %v3182_v13 = vadd.f32 %v2642_v10, %v2638_v58 }
 0x143   : > { %v3170_v40 = vadd.f32 %v3169_v62, %v3168_v38  ;;  %v3153_v3 = vadd.f32 %v3152_v63, %v3151_v14  ;;  %v3165_v59 = vadd.f32 %v3164_v4, %v3163_v15  ;;  %v3189_v39 = vadd.f32 %v2643_v0, %v2639_v60  ;;  %v1885_v5 = vpop.f32.mrb[8].mxu1  ;;  %v1058_v29 = vpop.f32.mrb[10].mxu0  ;;  %v508_v38 = vld [vmem:[%s7003_s15 + $0x1d8] sm:$0xff] }
 0x144   : > { %v3177_v61 = vadd.f32 %v3176_v19, %v3175_v7  ;;  %v7491_v25 = vmul.f32 %v3146_v52, %v7314_v21  ;;  %v3159_v44 = vrot.slane %v3158_v8, 1  ;;  %v3183_v55 = vrot.slane %v3182_v13, 4  ;;  %v1887_v49 = vpop.f32.mrb[9].mxu1  ;;  %6531 = vmatmul.mubr.msk.f32.gmra.mrb[114].mxu1 %vm577_vm0, %v506_v43  ;;  %v1060_v2 = vpop.f32.mrb[11].mxu0  ;;  %v11062_v21 = vld [vmem:[#allocation31_spill] sm:$0xff] }
 0x145   : > { %v3171_v56 = vrot.slane %v3170_v40, 2  ;;  %6404 = vmatmul.mubr.msk.f32.gmra.mrb[116].mxu0 %vm577_vm0, %v507_v11  ;;  %v7496_v10 = vmul.f32 %v3153_v3, %v7320_v24  ;;  %v3166_v62 = vrot.slane %v3165_v59, 1  ;;  %v3190_v15 = vrot.slane %v3189_v39, 4  ;;  %2207 = vmatprep.mubr.f32.mxu1 %v11058_v53 }
 0x146   : > { %v3178_v7 = vrot.slane %v3177_v61, 2  ;;  %1380 = vmatprep.mubr.f32.mxu0 %v11058_v53  ;;  %v3160_v36 = vadd.f32 %v3159_v44, %v3158_v8  ;;  %v3184_v60 = vadd.f32 %v3183_v55, %v3182_v13  ;;  %v2644_v43 = vmul.f32 %v1052_v6, %v7297_v9  ;;  %v509_v13 = vld [vmem:[%s7003_s15 + $0x1e0] sm:$0xff] }
 0x147   : > { %v3172_v58 = vadd.f32 %v3171_v56, %v3170_v40  ;;  %v3167_v57 = vadd.f32 %v3166_v62, %v3165_v59  ;;  %v3191_v23 = vadd.f32 %v3190_v15, %v3189_v39  ;;  %v2646_v63 = vmul.f32 %v1885_v5, %v7304_v16  ;;  %v1891_v4 = vpop.f32.mrb[10].mxu1  ;;  %v7503_v19 = vpop.f32.mrb[12].mxu0 }
 0x148   : > { %v3179_v14 = vadd.f32 %v3178_v7, %v3177_v61  ;;  %v7506_v0 = vmul.f32 %v3160_v36, %v7316_v22  ;;  %v3185_v3 = vrot.slane %v3184_v60, 2  ;;  %v2645_v8 = vmul.f32 %v1054_v51, %v7299_v12  ;;  %v1893_v56 = vpop.f32.mrb[11].mxu1  ;;  %6532 = vmatmul.mubr.msk.f32.gmra.mrb[116].mxu1 %vm577_vm0, %v507_v11  ;;  %v7510_v55 = vpop.f32.mrb[13].mxu0 }
 0x149   : > { %v3173_v52 = vrot.slane %v3172_v58, 1  ;;  %6405 = vmatmul.mubr.msk.f32.gmra.mrb[118].mxu0 %vm577_vm0, %v508_v38  ;;  %v7514_v6 = vmul.f32 %v3167_v57, %v7326_v27  ;;  %v3192_v39 = vrot.slane %v3191_v23, 2  ;;  %v2647_v40 = vmul.f32 %v1887_v49, %v7324_v26  ;;  %2213 = vmatprep.mubr.f32.mxu1 %v11058_v53 }
 0x14a   : > { %v3180_v5 = vrot.slane %v3179_v14, 1  ;;  %1386 = vmatprep.mubr.f32.mxu0 %v11058_v53  ;;  %v3186_v59 = vadd.f32 %v3185_v3, %v3184_v60  ;;  %v2648_v11 = vmul.f32 %v1058_v29, %v7306_v17  ;;  %v2650_v61 = vmul.f32 %v1891_v4, %v7312_v20 }
 0x14b   : > { %v3174_v51 = vadd.f32 %v3173_v52, %v3172_v58  ;;  %v3193_v62 = vadd.f32 %v3192_v39, %v3191_v23  ;;  %v2649_v7 = vmul.f32 %v1060_v2, %v7308_v18  ;;  %v2651_v15 = vmul.f32 %v1893_v56, %v7330_v28  ;;  %v1897_v36 = vpop.f32.mrb[12].mxu1  ;;  %v7524_v57 = vpop.f32.mrb[14].mxu0 }
 0x14c   : > { %v3181_v44 = vadd.f32 %v3180_v5, %v3179_v14  ;;  %v3187_v27 = vrot.slane %v3186_v59, 1  ;;  %v3196_v24 = vadd.f32 %v2648_v11, %v2644_v43  ;;  %v3210_v22 = vadd.f32 %v2650_v61, %v2646_v63  ;;  %v1899_v58 = vpop.f32.mrb[13].mxu1  ;;  %6533 = vmatmul.mubr.msk.f32.gmra.mrb[118].mxu1 %vm577_vm0, %v508_v38  ;;  %v7528_v29 = vpop.f32.mrb[15].mxu0  ;;  %v510_v11 = vld [vmem:[%s7003_s15 + $0x1e8] sm:$0xff] }
 0x14d   : > { %v5064_v49 = vmul.f32 %v7338_v30, %v3174_v51  ;;  %6406 = vmatmul.mubr.msk.f32.gmra.mrb[120].mxu0 %vm577_vm0, %v509_v13  ;;  %v3194_v2 = vrot.slane %v3193_v62, 1  ;;  %v3203_v14 = vadd.f32 %v2649_v7, %v2645_v8  ;;  %v3217_v23 = vadd.f32 %v2651_v15, %v2647_v40  ;;  %2219 = vmatprep.mubr.f32.mxu1 %v11058_v53 }
 0x14e   : > { %v5065_v60 = vmul.f32 %v7344_v47, %v3181_v44  ;;  %1392 = vmatprep.mubr.f32.mxu0 %v11058_v53  ;;  %v3188_v43 = vadd.f32 %v3187_v27, %v3186_v59  ;;  %v3197_v63 = vrot.slane %v3196_v24, 4  ;;  %v3211_v52 = vrot.slane %v3210_v22, 4 }
 0x14f   : > { %v5572_v4 = vrot.slane %v5064_v49, 7  ;;  %v3195_v38 = vadd.f32 %v3194_v2, %v3193_v62  ;;  %v3204_v56 = vrot.slane %v3203_v14, 4  ;;  %v3218_v5 = vrot.slane %v3217_v23, 4  ;;  %v1903_v39 = vpop.f32.mrb[14].mxu1  ;;  %v7534_v51 = vpop.f32.mrb[16].mxu0 }
 0x150   : > { %v5593_v3 = vrot.slane %v5065_v60, 7  ;;  %v5066_v40 = vmul.f32 %v7341_v31, %v3188_v43  ;;  %v3198_v61 = vadd.f32 %v3197_v63, %v3196_v24  ;;  %v3212_v44 = vadd.f32 %v3211_v52, %v3210_v22  ;;  %v1905_v7 = vpop.f32.mrb[15].mxu1  ;;  %6534 = vmatmul.mubr.msk.f32.gmra.mrb[120].mxu1 %vm577_vm0, %v509_v13  ;;  %v7543_v27 = vpop.f32.mrb[17].mxu0 }
 0x151   : > { %v7539_v8 = vsel %vm5573_vm1, %v5572_v4, %v7491_v25  ;;  %v5067_v62 = vmul.f32 %v7347_v32, %v3195_v38  ;;  %v3205_v15 = vadd.f32 %v3204_v56, %v3203_v14  ;;  %v3219_v49 = vadd.f32 %v3218_v5, %v3217_v23  ;;  %2225 = vmatprep.mubr.f32.mxu1 %v11058_v53  ;;  %v511_v23 = vld [vmem:[%s7003_s15 + $0x1f0] sm:$0xff] }
 0x152   : > { %v7547_v59 = vsel %vm5573_vm1, %v5593_v3, %v7496_v10  ;;  %v5607_v25 = vrot.slane %v5066_v40, 7  ;;  %v3199_v60 = vrot.slane %v3198_v61, 2  ;;  %v3213_v24 = vrot.slane %v3212_v44, 2  ;;  %6407 = vmatmul.mubr.msk.f32.gmra.mrb[122].mxu0 %vm577_vm0, %v510_v11 }
 0x153   : > { %v2652_v22 = vmul.f32 %v7503_v19, %v7297_v9  ;;  %v5621_v13 = vrot.slane %v5067_v62, 7  ;;  %v3206_v2 = vrot.slane %v3205_v15, 2  ;;  %v3220_v10 = vrot.slane %v3219_v49, 2  ;;  %v7555_v43 = vpop.f32.mrb[16].mxu1  ;;  %v7557_v14 = vpop.f32.mrb[18].mxu0  ;;  %1398 = vmatprep.mubr.f32.mxu0 %v11058_v53 }
 0x154   : > { %v2654_v4 = vmul.f32 %v1897_v36, %v7304_v16  ;;  %v7563_v63 = vsel %vm5573_vm1, %v5607_v25, %v7506_v0  ;;  %v3200_v19 = vadd.f32 %v3199_v60, %v3198_v61  ;;  %v3214_v52 = vadd.f32 %v3213_v24, %v3212_v44  ;;  %v7567_v38 = vpop.f32.mrb[17].mxu1  ;;  %6535 = vmatmul.mubr.msk.f32.gmra.mrb[122].mxu1 %vm577_vm0, %v510_v11  ;;  %v7570_v36 = vpop.f32.mrb[19].mxu0  ;;  %v512_v60 = vld [vmem:[%s7003_s15 + $0x1f8] sm:$0xff] }
 0x155   : > { %v2653_v3 = vmul.f32 %v7510_v55, %v7299_v12  ;;  %v5622_v56 = vsel %vm5573_vm1, %v5621_v13, %v7514_v6  ;;  %v3207_v5 = vadd.f32 %v3206_v2, %v3205_v15  ;;  %v3221_v40 = vadd.f32 %v3220_v10, %v3219_v49  ;;  %2231 = vmatprep.mubr.f32.mxu1 %v11058_v53 }
 0x156   : > { %v2655_v0 = vmul.f32 %v1899_v58, %v7324_v26  ;;  %v3201_v61 = vrot.slane %v3200_v19, 1  ;;  %v3215_v44 = vrot.slane %v3214_v52, 1  ;;  %v2656_v55 = vmul.f32 %v7524_v57, %v7306_v17  ;;  %6408 = vmatmul.mubr.msk.f32.gmra.mrb[124].mxu0 %vm577_vm0, %v511_v23 }
 0x157   : > { %v2658_v62 = vmul.f32 %v1903_v39, %v7312_v20  ;;  %v3208_v11 = vrot.slane %v3207_v5, 1  ;;  %v3222_v25 = vrot.slane %v3221_v40, 1  ;;  %v2657_v6 = vmul.f32 %v7528_v29, %v7308_v18  ;;  %v7583_v49 = vpop.f32.mrb[18].mxu1  ;;  %v7585_v58 = vpop.f32.mrb[20].mxu0  ;;  %1404 = vmatprep.mubr.f32.mxu0 %v11058_v53 }
 0x158   : > { %v2659_v15 = vmul.f32 %v1905_v7, %v7330_v28  ;;  %v3202_v24 = vadd.f32 %v3201_v61, %v3200_v19  ;;  %v3216_v57 = vadd.f32 %v3215_v44, %v3214_v52  ;;  %v3224_v13 = vadd.f32 %v2656_v55, %v2652_v22  ;;  %v7589_v2 = vpop.f32.mrb[19].mxu1  ;;  %6536 = vmatmul.mubr.msk.f32.gmra.mrb[124].mxu1 %vm577_vm0, %v511_v23  ;;  %v7592_v10 = vpop.f32.mrb[21].mxu0 }
 0x159   : > { %v3238_v39 = vadd.f32 %v2658_v62, %v2654_v4  ;;  %v3209_v29 = vadd.f32 %v3208_v11, %v3207_v5  ;;  %v3223_v32 = vadd.f32 %v3222_v25, %v3221_v40  ;;  %v3231_v7 = vadd.f32 %v2657_v6, %v2653_v3  ;;  %2237 = vmatprep.mubr.f32.mxu1 %v11058_v53 }
 0x15a   : > { %v3245_v47 = vadd.f32 %v2659_v15, %v2655_v0  ;;  %v5068_v31 = vmul.f32 %v7350_v50, %v3202_v24  ;;  %v5070_v19 = vmul.f32 %v7353_v33, %v3216_v57  ;;  %v3225_v52 = vrot.slane %v3224_v13, 4  ;;  %6409 = vmatmul.mubr.msk.f32.gmra.mrb[126].mxu0 %vm577_vm0, %v512_v60  ;;  %v513_v0 = vld [vmem:[%s7003_s15 + $0x200] sm:$0xff] }
 0x15b   : > { %v3239_v22 = vrot.slane %v3238_v39, 4  ;;  %v5069_v4 = vmul.f32 %v7356_v34, %v3209_v29  ;;  %v5071_v23 = vmul.f32 %v7359_v37, %v3223_v32  ;;  %v3232_v61 = vrot.slane %v3231_v7, 4  ;;  %v7600_v40 = vpop.f32.mrb[20].mxu1  ;;  %v7602_v3 = vpop.f32.mrb[22].mxu0  ;;  %1410 = vmatprep.mubr.f32.mxu0 %v11058_v53 }
 0x15c   : > { %v3246_v5 = vrot.slane %v3245_v47, 4  ;;  %v5575_v44 = vrot.slane %v5068_v31, 6  ;;  %v5609_v55 = vrot.slane %v5070_v19, 6  ;;  %v3226_v62 = vadd.f32 %v3225_v52, %v3224_v13  ;;  %v7606_v25 = vpop.f32.mrb[21].mxu1  ;;  %6537 = vmatmul.mubr.msk.f32.gmra.mrb[126].mxu1 %vm577_vm0, %v512_v60  ;;  %v7609_v6 = vpop.f32.mrb[23].mxu0 }
 0x15d   : > { %v3240_v11 = vadd.f32 %v3239_v22, %v3238_v39  ;;  %v5595_v32 = vrot.slane %v5069_v4, 6  ;;  %v5623_v15 = vrot.slane %v5071_v23, 6  ;;  %v3233_v24 = vadd.f32 %v3232_v61, %v3231_v7  ;;  %2243 = vmatprep.mubr.f32.mxu1 %v11058_v53 }
 0x15e   : > { %v3247_v57 = vadd.f32 %v3246_v5, %v3245_v47  ;;  %v7614_v29 = vsel %vm5576_vm2, %v5575_v44, %v7539_v8  ;;  %v7618_v31 = vsel %vm5576_vm2, %v5609_v55, %v7563_v63  ;;  %v3227_v13 = vrot.slane %v3226_v62, 2  ;;  %6410 = vmatmul.mubr.msk.f32.gmra.mrb[128].mxu0 %vm577_vm0, %v513_v0  ;;  %v514_v63 = vld [vmem:[%s7003_s15 + $0x208] sm:$0xff] }
 0x15f   : > { %v3241_v39 = vrot.slane %v3240_v11, 2  ;;  %v7623_v60 = vsel %vm5576_vm2, %v5595_v32, %v7547_v59  ;;  %v7626_v47 = vsel %vm5576_vm2, %v5623_v15, %v5622_v56  ;;  %v3234_v7 = vrot.slane %v3233_v24, 2  ;;  %v7628_v8 = vpop.f32.mrb[22].mxu1  ;;  %v7630_v52 = vpop.f32.mrb[24].mxu0  ;;  %1416 = vmatprep.mubr.f32.mxu0 %v11058_v53 }
 0x160   : > { %v3248_v19 = vrot.slane %v3247_v57, 2  ;;  %v3228_v22 = vadd.f32 %v3227_v13, %v3226_v62  ;;  %v2660_v23 = vmul.f32 %v7534_v51, %v7297_v9  ;;  %v2662_v59 = vmul.f32 %v7555_v43, %v7304_v16  ;;  %v7638_v56 = vpop.f32.mrb[23].mxu1  ;;  %6538 = vmatmul.mubr.msk.f32.gmra.mrb[128].mxu1 %vm577_vm0, %v513_v0  ;;  %v7641_v61 = vpop.f32.mrb[25].mxu0 }
 0x161   : > { %v3242_v4 = vadd.f32 %v3241_v39, %v3240_v11  ;;  %v3235_v5 = vadd.f32 %v3234_v7, %v3233_v24  ;;  %v2661_v55 = vmul.f32 %v7543_v27, %v7299_v12  ;;  %v2663_v62 = vmul.f32 %v7567_v38, %v7324_v26  ;;  %2249 = vmatprep.mubr.f32.mxu1 %v11058_v53 }
 0x162   : > { %v3249_v44 = vadd.f32 %v3248_v19, %v3247_v57  ;;  %v3229_v51 = vrot.slane %v3228_v22, 1  ;;  %v2664_v43 = vmul.f32 %v7557_v14, %v7306_v17  ;;  %v2666_v0 = vmul.f32 %v7583_v49, %v7312_v20  ;;  %6411 = vmatmul.mubr.msk.f32.gmra.mrb[130].mxu0 %vm577_vm0, %v514_v63  ;;  %v515_v14 = vld [vmem:[%s7003_s15 + $0x210] sm:$0xff] }
 0x163   : > { %v3243_v11 = vrot.slane %v3242_v4, 1  ;;  %v3236_v32 = vrot.slane %v3235_v5, 1  ;;  %v2665_v27 = vmul.f32 %v7570_v36, %v7308_v18  ;;  %v2667_v38 = vmul.f32 %v7589_v2, %v7330_v28  ;;  %v7657_v24 = vpop.f32.mrb[24].mxu1  ;;  %v7659_v57 = vpop.f32.mrb[26].mxu0  ;;  %1422 = vmatprep.mubr.f32.mxu0 %v11058_v53 }
 0x164   : > { %v3250_v15 = vrot.slane %v3249_v44, 1  ;;  %v3230_v13 = vadd.f32 %v3229_v51, %v3228_v22  ;;  %v3252_v49 = vadd.f32 %v2664_v43, %v2660_v23  ;;  %v3266_v7 = vadd.f32 %v2666_v0, %v2662_v59  ;;  %v7663_v19 = vpop.f32.mrb[25].mxu1  ;;  %6539 = vmatmul.mubr.msk.f32.gmra.mrb[130].mxu1 %vm577_vm0, %v514_v63  ;;  %v7666_v37 = vpop.f32.mrb[27].mxu0 }
 0x165   : > { %v3244_v39 = vadd.f32 %v3243_v11, %v3242_v4  ;;  %v3237_v36 = vadd.f32 %v3236_v32, %v3235_v5  ;;  %v3259_v2 = vadd.f32 %v2665_v27, %v2661_v55  ;;  %v3273_v33 = vadd.f32 %v2667_v38, %v2663_v62  ;;  %2255 = vmatprep.mubr.f32.mxu1 %v11058_v53  ;;  %v516_v62 = vld [vmem:[%s7003_s15 + $0x218] sm:$0xff] }
 0x166   : > { %v3251_v34 = vadd.f32 %v3250_v15, %v3249_v44  ;;  %v5072_v50 = vmul.f32 %v7365_v54, %v3230_v13  ;;  %v3253_v4 = vrot.slane %v3252_v49, 4  ;;  %v3267_v23 = vrot.slane %v3266_v7, 4  ;;  %6412 = vmatmul.mubr.msk.f32.gmra.mrb[132].mxu0 %vm577_vm0, %v515_v14 }
 0x167   : > { %v5074_v22 = vmul.f32 %v7368_v41, %v3244_v39  ;;  %v5073_v59 = vmul.f32 %v7371_v42, %v3237_v36  ;;  %v3260_v51 = vrot.slane %v3259_v2, 4  ;;  %v3274_v5 = vrot.slane %v3273_v33, 4  ;;  %v7674_v44 = vpop.f32.mrb[26].mxu1  ;;  %v7676_v55 = vpop.f32.mrb[28].mxu0  ;;  %1428 = vmatprep.mubr.f32.mxu0 %v11058_v53 }
 0x168   : > { %v5075_v63 = vmul.f32 %v7378_v45, %v3251_v34  ;;  %v5578_v11 = vrot.slane %v5072_v50, 5  ;;  %v3254_v0 = vadd.f32 %v3253_v4, %v3252_v49  ;;  %v3268_v32 = vadd.f32 %v3267_v23, %v3266_v7  ;;  %v7680_v15 = vpop.f32.mrb[27].mxu1  ;;  %6540 = vmatmul.mubr.msk.f32.gmra.mrb[132].mxu1 %vm577_vm0, %v515_v14  ;;  %v7683_v27 = vpop.f32.mrb[29].mxu0 }
 0x169   : > { %v5611_v43 = vrot.slane %v5074_v22, 5  ;;  %v5597_v34 = vrot.slane %v5073_v59, 5  ;;  %v3261_v13 = vadd.f32 %v3260_v51, %v3259_v2  ;;  %v3275_v39 = vadd.f32 %v3274_v5, %v3273_v33  ;;  %2261 = vmatprep.mubr.f32.mxu1 %v11058_v53 }
 0x16a   : > { %v5625_v38 = vrot.slane %v5075_v63, 5  ;;  %v7688_v36 = vsel %vm5579_vm3, %v5578_v11, %v7614_v29  ;;  %v3255_v49 = vrot.slane %v3254_v0, 2  ;;  %v3269_v7 = vrot.slane %v3268_v32, 2  ;;  %6413 = vmatmul.mubr.msk.f32.gmra.mrb[134].mxu0 %vm577_vm0, %v516_v62 }
 0x16b   : > { %v7692_v50 = vsel %vm5579_vm3, %v5611_v43, %v7618_v31  ;;  %v7697_v14 = vsel %vm5579_vm3, %v5597_v34, %v7623_v60  ;;  %v3262_v2 = vrot.slane %v3261_v13, 2  ;;  %v3276_v29 = vrot.slane %v3275_v39, 2  ;;  %v7703_v22 = vpop.f32.mrb[28].mxu1  ;;  %v7705_v4 = vpop.f32.mrb[30].mxu0  ;;  %1434 = vmatprep.mubr.f32.mxu0 %v11058_v53  ;;  %v517_v31 = vld [vmem:[%s7003_s15 + $0x220] sm:$0xff] }
 0x16c   : > { %v7701_v33 = vsel %vm5579_vm3, %v5625_v38, %v7626_v47  ;;  %v3256_v23 = vadd.f32 %v3255_v49, %v3254_v0  ;;  %v3270_v59 = vadd.f32 %v3269_v7, %v3268_v32  ;;  %v2668_v60 = vmul.f32 %v7585_v58, %v7297_v9  ;;  %v7713_v47 = vpop.f32.mrb[29].mxu1  ;;  %6541 = vmatmul.mubr.msk.f32.gmra.mrb[134].mxu1 %vm577_vm0, %v516_v62  ;;  %v7716_v51 = vpop.f32.mrb[31].mxu0 }
 0x16d   : > { %v2670_v63 = vmul.f32 %v7600_v40, %v7304_v16  ;;  %v3263_v5 = vadd.f32 %v3262_v2, %v3261_v13  ;;  %v3277_v11 = vadd.f32 %v3276_v29, %v3275_v39  ;;  %v2669_v43 = vmul.f32 %v7592_v10, %v7299_v12  ;;  %2267 = vmatprep.mubr.f32.mxu1 %v11058_v53 }
 0x16e   : > { %v2671_v0 = vmul.f32 %v7606_v25, %v7324_v26  ;;  %v3257_v58 = vrot.slane %v3256_v23, 1  ;;  %v3271_v32 = vrot.slane %v3270_v59, 1  ;;  %v2672_v40 = vmul.f32 %v7602_v3, %v7306_v17  ;;  %6414 = vmatmul.mubr.msk.f32.gmra.mrb[136].mxu0 %vm577_vm0, %v517_v31  ;;  %v518_v3 = vld [vmem:[%s7003_s15 + $0x228] sm:$0xff] }
 0x16f   : > { %v2674_v62 = vmul.f32 %v7628_v8, %v7312_v20  ;;  %v3264_v34 = vrot.slane %v3263_v5, 1  ;;  %v3278_v38 = vrot.slane %v3277_v11, 1  ;;  %v2673_v10 = vmul.f32 %v7609_v6, %v7308_v18  ;;  %v7732_v13 = vpop.f32.mrb[30].mxu1  ;;  %v7734_v39 = vpop.f32.mrb[32].mxu0  ;;  %1440 = vmatprep.mubr.f32.mxu0 %v11058_v53 }
 0x170   : > { %v2675_v25 = vmul.f32 %v7638_v56, %v7330_v28  ;;  %v3258_v49 = vadd.f32 %v3257_v58, %v3256_v23  ;;  %v3272_v7 = vadd.f32 %v3271_v32, %v3270_v59  ;;  %v3280_v8 = vadd.f32 %v2672_v40, %v2668_v60  ;;  %v7738_v29 = vpop.f32.mrb[31].mxu1  ;;  %6542 = vmatmul.mubr.msk.f32.gmra.mrb[136].mxu1 %vm577_vm0, %v517_v31  ;;  %v7741_v45 = vpop.f32.mrb[33].mxu0 }
 0x171   : > { %v3294_v2 = vadd.f32 %v2674_v62, %v2670_v63  ;;  %v3265_v6 = vadd.f32 %v3264_v34, %v3263_v5  ;;  %v3279_v42 = vadd.f32 %v3278_v38, %v3277_v11  ;;  %v3287_v56 = vadd.f32 %v2673_v10, %v2669_v43  ;;  %2273 = vmatprep.mubr.f32.mxu1 %v11058_v53 }
 0x172   : > { %v3301_v41 = vadd.f32 %v2675_v25, %v2671_v0  ;;  %v5076_v54 = vmul.f32 %v7381_v1, %v3258_v49  ;;  %v5078_v23 = vmul.f32 %v7384_v46, %v3272_v7  ;;  %v3281_v59 = vrot.slane %v3280_v8, 4  ;;  %6415 = vmatmul.mubr.msk.f32.gmra.mrb[138].mxu0 %vm577_vm0, %v518_v3  ;;  %v519_v0 = vld [vmem:[%s7003_s15 + $0x230] sm:$0xff] }
 0x173   : > { %v3295_v60 = vrot.slane %v3294_v2, 4  ;;  %v5077_v63 = vmul.f32 %v7387_v35, %v3265_v6  ;;  %v5079_v31 = vmul.f32 %v7390_v48, %v3279_v42  ;;  %v3288_v58 = vrot.slane %v3287_v56, 4  ;;  %v7749_v11 = vpop.f32.mrb[32].mxu1  ;;  %v7751_v43 = vpop.f32.mrb[34].mxu0  ;;  %1446 = vmatprep.mubr.f32.mxu0 %v11058_v53  ;;  %v11061_v1 = vld [vmem:[#allocation30_spill] sm:$0xff] }
 0x174   : > { %v3302_v5 = vrot.slane %v3301_v41, 4  ;;  %v5581_v32 = vrot.slane %v5076_v54, 4  ;;  %v5613_v40 = vrot.slane %v5078_v23, 4  ;;  %v3282_v62 = vadd.f32 %v3281_v59, %v3280_v8  ;;  %v7755_v38 = vpop.f32.mrb[33].mxu1  ;;  %6543 = vmatmul.mubr.msk.f32.gmra.mrb[138].mxu1 %vm577_vm0, %v518_v3  ;;  %v7758_v10 = vpop.f32.mrb[35].mxu0 }
 0x175   : > { %v3296_v34 = vadd.f32 %v3295_v60, %v3294_v2  ;;  %v5599_v42 = vrot.slane %v5077_v63, 4  ;;  %v5627_v25 = vrot.slane %v5079_v31, 4  ;;  %v3289_v49 = vadd.f32 %v3288_v58, %v3287_v56  ;;  %2279 = vmatprep.mubr.f32.mxu1 %v11058_v53 }
 0x176   : > { %v3303_v7 = vadd.f32 %v3302_v5, %v3301_v41  ;;  %v7763_v6 = vsel %vm5582_vm4, %v5581_v32, %v7688_v36  ;;  %v7767_v54 = vsel %vm5582_vm4, %v5613_v40, %v7692_v50  ;;  %v3283_v8 = vrot.slane %v3282_v62, 2  ;;  %6416 = vmatmul.mubr.msk.f32.gmra.mrb[140].mxu0 %vm577_vm0, %v519_v0  ;;  %v520_v50 = vld [vmem:[%s7003_s15 + $0x238] sm:$0xff] }
 0x177   : > { %v3297_v2 = vrot.slane %v3296_v34, 2  ;;  %v7772_v3 = vsel %vm5582_vm4, %v5599_v42, %v7697_v14  ;;  %v7776_v41 = vsel %vm5582_vm4, %v5627_v25, %v7701_v33  ;;  %v3290_v56 = vrot.slane %v3289_v49, 2  ;;  %v7778_v23 = vpop.f32.mrb[34].mxu1  ;;  %v7780_v59 = vpop.f32.mrb[36].mxu0  ;;  %1452 = vmatprep.mubr.f32.mxu0 %v11058_v53 }
 0x178   : > { %v3304_v36 = vrot.slane %v3303_v7, 2  ;;  %v3284_v60 = vadd.f32 %v3283_v8, %v3282_v62  ;;  %v2676_v14 = vmul.f32 %v7630_v52, %v7297_v9  ;;  %v2678_v31 = vmul.f32 %v7657_v24, %v7304_v16  ;;  %v7788_v33 = vpop.f32.mrb[35].mxu1  ;;  %6544 = vmatmul.mubr.msk.f32.gmra.mrb[140].mxu1 %vm577_vm0, %v519_v0  ;;  %v7791_v58 = vpop.f32.mrb[37].mxu0 }
 0x179   : > { %v3298_v63 = vadd.f32 %v3297_v2, %v3296_v34  ;;  %v3291_v5 = vadd.f32 %v3290_v56, %v3289_v49  ;;  %v2677_v40 = vmul.f32 %v7641_v61, %v7299_v12  ;;  %v2679_v62 = vmul.f32 %v7663_v19, %v7324_v26  ;;  %2285 = vmatprep.mubr.f32.mxu1 %v11058_v53 }
 0x17a   : > { %v3305_v32 = vadd.f32 %v3304_v36, %v3303_v7  ;;  %v3285_v52 = vrot.slane %v3284_v60, 1  ;;  %v2680_v24 = vmul.f32 %v7659_v57, %v7306_v17  ;;  %v2682_v0 = vmul.f32 %v7674_v44, %v7312_v20  ;;  %6417 = vmatmul.mubr.msk.f32.gmra.mrb[142].mxu0 %vm577_vm0, %v520_v50  ;;  %v521_v57 = vld [vmem:[%s7003_s15 + $0x240] sm:$0xff] }
 0x17b   : > { %v3299_v34 = vrot.slane %v3298_v63, 1  ;;  %v3292_v42 = vrot.slane %v3291_v5, 1  ;;  %v2681_v61 = vmul.f32 %v7666_v37, %v7308_v18  ;;  %v2683_v19 = vmul.f32 %v7680_v15, %v7330_v28  ;;  %v7807_v49 = vpop.f32.mrb[36].mxu1  ;;  %v7809_v7 = vpop.f32.mrb[38].mxu0  ;;  %1458 = vmatprep.mubr.f32.mxu0 %v11058_v53 }
 0x17c   : > { %v3306_v25 = vrot.slane %v3305_v32, 1  ;;  %v3286_v8 = vadd.f32 %v3285_v52, %v3284_v60  ;;  %v3308_v44 = vadd.f32 %v2680_v24, %v2676_v14  ;;  %v3322_v56 = vadd.f32 %v2682_v0, %v2678_v31  ;;  %v7813_v36 = vpop.f32.mrb[37].mxu1  ;;  %6545 = vmatmul.mubr.msk.f32.gmra.mrb[142].mxu1 %vm577_vm0, %v520_v50  ;;  %v7816_v48 = vpop.f32.mrb[39].mxu0  ;;  %v11063_v31 = vld [vmem:[#allocation32_spill] sm:$0xff]  ;;  %v11064_v50 = vld [vmem:[#allocation33_spill] sm:$0xff] }
 0x17d   : > { %v3300_v2 = vadd.f32 %v3299_v34, %v3298_v63  ;;  %v3293_v37 = vadd.f32 %v3292_v42, %v3291_v5  ;;  %v3315_v15 = vadd.f32 %v2681_v61, %v2677_v40  ;;  %v3329_v46 = vadd.f32 %v2683_v19, %v2679_v62  ;;  %2291 = vmatprep.mubr.f32.mxu1 %v11058_v53  ;;  %v522_v62 = vld [vmem:[%s7003_s15 + $0x248] sm:$0xff] }
 0x17e   : > { %v3307_v35 = vadd.f32 %v3306_v25, %v3305_v32  ;;  %v5080_v30 = vmul.f32 %v11061_v1, %v3286_v8  ;;  %v3309_v63 = vrot.slane %v3308_v44, 4  ;;  %v3323_v14 = vrot.slane %v3322_v56, 4  ;;  %6418 = vmatmul.mubr.msk.f32.gmra.mrb[144].mxu0 %vm577_vm0, %v521_v57 }
 0x17f   : > { %v5082_v60 = vmul.f32 %v11062_v21, %v3300_v2  ;;  %v5081_v52 = vmul.f32 %v11063_v31, %v3293_v37  ;;  %v3316_v24 = vrot.slane %v3315_v15, 4  ;;  %v3330_v5 = vrot.slane %v3329_v46, 4  ;;  %v7824_v32 = vpop.f32.mrb[38].mxu1  ;;  %v7826_v40 = vpop.f32.mrb[40].mxu0  ;;  %1464 = vmatprep.mubr.f32.mxu0 %v11058_v53 }
 0x180   : > { %v5083_v34 = vmul.f32 %v11064_v50, %v3307_v35  ;;  %v5584_v0 = vrot.slane %v5080_v30, 3  ;;  %v3310_v25 = vadd.f32 %v3309_v63, %v3308_v44  ;;  %v3324_v61 = vadd.f32 %v3323_v14, %v3322_v56  ;;  %v7830_v19 = vpop.f32.mrb[39].mxu1  ;;  %6546 = vmatmul.mubr.msk.f32.gmra.mrb[144].mxu1 %vm577_vm0, %v521_v57  ;;  %v7833_v8 = vpop.f32.mrb[41].mxu0 }
 0x181   : > { %v5615_v42 = vrot.slane %v5082_v60, 3  ;;  %v5601_v35 = vrot.slane %v5081_v52, 3  ;;  %v3317_v37 = vadd.f32 %v3316_v24, %v3315_v15  ;;  %v3331_v50 = vadd.f32 %v3330_v5, %v3329_v46  ;;  %2297 = vmatprep.mubr.f32.mxu1 %v11058_v53 }
 0x182   : > { %v5629_v2 = vrot.slane %v5083_v34, 3  ;;  %v7838_v31 = vsel %vm5585_vm5, %v5584_v0, %v7763_v6  ;;  %v3311_v44 = vrot.slane %v3310_v25, 2  ;;  %v3325_v56 = vrot.slane %v3324_v61, 2  ;;  %6419 = vmatmul.mubr.msk.f32.gmra.mrb[146].mxu0 %vm577_vm0, %v522_v62 }
 0x183   : > { %v7842_v30 = vsel %vm5585_vm5, %v5615_v42, %v7767_v54  ;;  %v7847_v57 = vsel %vm5585_vm5, %v5601_v35, %v7772_v3  ;;  %v3318_v15 = vrot.slane %v3317_v37, 2  ;;  %v3332_v6 = vrot.slane %v3331_v50, 2  ;;  %v7853_v60 = vpop.f32.mrb[40].mxu1  ;;  %v7855_v63 = vpop.f32.mrb[42].mxu0  ;;  %1470 = vmatprep.mubr.f32.mxu0 %v11058_v53  ;;  %v523_v54 = vld [vmem:[%s7003_s15 + $0x250] sm:$0xff] }
 0x184   : > { %v7851_v46 = vsel %vm5585_vm5, %v5629_v2, %v7776_v41  ;;  %11065 = vst [vmem:[#allocation52_spill] sm:$0xff] %v7855_v63  ;;  %v3312_v14 = vadd.f32 %v3311_v44, %v3310_v25  ;;  %v3326_v52 = vadd.f32 %v3325_v56, %v3324_v61  ;;  %v2684_v3 = vmul.f32 %v7676_v55, %v7297_v9  ;;  %v7863_v41 = vpop.f32.mrb[41].mxu1  ;;  %v7866_v24 = vpop.f32.mrb[43].mxu0  ;;  %v11070_v63 = vld [vmem:[#allocation35_spill] sm:$0xff] }
 0x185   : > { %v2686_v34 = vmul.f32 %v7703_v22, %v7304_v16  ;;  %6547 = vmatmul.mubr.msk.f32.gmra.mrb[146].mxu1 %vm577_vm0, %v522_v62  ;;  %11066 = vst [vmem:[#allocation53_spill] sm:$0xff] %v7866_v24  ;;  %v3319_v5 = vadd.f32 %v3318_v15, %v3317_v37  ;;  %v3333_v0 = vadd.f32 %v3332_v6, %v3331_v50 }
 0x186   : > { %v2685_v42 = vmul.f32 %v7683_v27, %v7299_v12  ;;  %v2687_v25 = vmul.f32 %v7713_v47, %v7324_v26  ;;  %2303 = vmatprep.mubr.f32.mxu1 %v11058_v53  ;;  %v3313_v55 = vrot.slane %v3312_v14, 1  ;;  %v3327_v61 = vrot.slane %v3326_v52, 1  ;;  %6420 = vmatmul.mubr.msk.f32.gmra.mrb[148].mxu0 %vm577_vm0, %v523_v54 }
 0x187   : > { %v2688_v22 = vmul.f32 %v7705_v4, %v7306_v17  ;;  %v2690_v62 = vmul.f32 %v7732_v13, %v7312_v20  ;;  %v3320_v50 = vrot.slane %v3319_v5, 1  ;;  %v3334_v35 = vrot.slane %v3333_v0, 1  ;;  %v7882_v2 = vpop.f32.mrb[42].mxu1  ;;  %v7884_v37 = vpop.f32.mrb[44].mxu0  ;;  %1476 = vmatprep.mubr.f32.mxu0 %v11058_v53  ;;  %v524_v4 = vld [vmem:[%s7003_s15 + $0x258] sm:$0xff] }
 0x188   : > { %v2689_v27 = vmul.f32 %v7716_v51, %v7308_v18  ;;  %v2691_v47 = vmul.f32 %v7738_v29, %v7330_v28  ;;  %11067 = vst [vmem:[#allocation54_spill] sm:$0xff] %v7882_v2  ;;  %11068 = vst [vmem:[#allocation55_spill] sm:$0xff] %v7884_v37  ;;  %v3314_v44 = vadd.f32 %v3313_v55, %v3312_v14  ;;  %v7888_v6 = vpop.f32.mrb[43].mxu1  ;;  %v7891_v21 = vpop.f32.mrb[45].mxu0  ;;  %v11069_v37 = vld [vmem:[#allocation34_spill] sm:$0xff] }
 0x189   : > { %v3328_v56 = vadd.f32 %v3327_v61, %v3326_v52  ;;  %v3336_v13 = vadd.f32 %v2688_v22, %v2684_v3  ;;  %v3350_v15 = vadd.f32 %v2690_v62, %v2686_v34  ;;  %6548 = vmatmul.mubr.msk.f32.gmra.mrb[148].mxu1 %vm577_vm0, %v523_v54  ;;  %v3321_v51 = vadd.f32 %v3320_v50, %v3319_v5  ;;  %v11071_v34 = vld [vmem:[#allocation36_spill] sm:$0xff]  ;;  %v11072_v54 = vld [vmem:[#allocation37_spill] sm:$0xff] }
 0x18a   : > { %v3335_v1 = vadd.f32 %v3334_v35, %v3333_v0  ;;  %v3343_v29 = vadd.f32 %v2689_v27, %v2685_v42  ;;  %v3357_v24 = vadd.f32 %v2691_v47, %v2687_v25  ;;  %2309 = vmatprep.mubr.f32.mxu1 %v11058_v53  ;;  %v5084_v2 = vmul.f32 %v11069_v37, %v3314_v44  ;;  %v525_v25 = vld [vmem:[%s7003_s15 + $0x260] sm:$0xff] }
 0x18b   : > { %v5086_v14 = vmul.f32 %v11070_v63, %v3328_v56  ;;  %v3337_v52 = vrot.slane %v3336_v13, 4  ;;  %v3351_v3 = vrot.slane %v3350_v15, 4  ;;  %6421 = vmatmul.mubr.msk.f32.gmra.mrb[150].mxu0 %vm577_vm0, %v524_v4  ;;  %v5085_v55 = vmul.f32 %v11071_v34, %v3321_v51  ;;  %v7899_v0 = vpop.f32.mrb[44].mxu1  ;;  %v7901_v42 = vpop.f32.mrb[46].mxu0 }
 0x18c   : > { %v5087_v61 = vmul.f32 %v11072_v54, %v3335_v1  ;;  %v3344_v22 = vrot.slane %v3343_v29, 4  ;;  %v3358_v5 = vrot.slane %v3357_v24, 4  ;;  %1482 = vmatprep.mubr.f32.mxu0 %v11058_v53  ;;  %v5587_v62 = vrot.slane %v5084_v2, 2  ;;  %v7905_v47 = vpop.f32.mrb[45].mxu1  ;;  %v7908_v44 = vpop.f32.mrb[47].mxu0 }
 0x18d   : > { %v5617_v50 = vrot.slane %v5086_v14, 2  ;;  %v3338_v35 = vadd.f32 %v3337_v52, %v3336_v13  ;;  %v3352_v27 = vadd.f32 %v3351_v3, %v3350_v15  ;;  %6549 = vmatmul.mubr.msk.f32.gmra.mrb[150].mxu1 %vm577_vm0, %v524_v4  ;;  %v5603_v1 = vrot.slane %v5085_v55, 2 }
 0x18e   : > { %v5631_v56 = vrot.slane %v5087_v61, 2  ;;  %v3345_v51 = vadd.f32 %v3344_v22, %v3343_v29  ;;  %v3359_v54 = vadd.f32 %v3358_v5, %v3357_v24  ;;  %2315 = vmatprep.mubr.f32.mxu1 %v11058_v53  ;;  %v7913_v34 = vsel %vm5588_vm6, %v5587_v62, %v7838_v31 }
 0x18f   : > { %v7917_v2 = vsel %vm5588_vm6, %v5617_v50, %v7842_v30  ;;  %v3339_v13 = vrot.slane %v3338_v35, 2  ;;  %v3353_v15 = vrot.slane %v3352_v27, 2  ;;  %6422 = vmatmul.mubr.msk.f32.gmra.mrb[152].mxu0 %vm577_vm0, %v525_v25  ;;  %v7922_v4 = vsel %vm5588_vm6, %v5603_v1, %v7847_v57  ;;  %v7928_v14 = vpop.f32.mrb[46].mxu1  ;;  %v7930_v52 = vpop.f32.mrb[48].mxu0  ;;  %v526_v30 = vld [vmem:[%s7003_s15 + $0x268] sm:$0xff] }
 0x190   : > { %v7926_v24 = vsel %vm5588_vm6, %v5631_v56, %v7851_v46  ;;  %v3346_v29 = vrot.slane %v3345_v51, 2  ;;  %v3360_v31 = vrot.slane %v3359_v54, 2  ;;  %11073 = vst [vmem:[#allocation56_spill] sm:$0xff] %v7930_v52  ;;  %1488 = vmatprep.mubr.f32.mxu0 %v11058_v53  ;;  %v2692_v57 = vmul.f32 %v7734_v39, %v7297_v9  ;;  %v7938_v46 = vpop.f32.mrb[47].mxu1  ;;  %v7941_v22 = vpop.f32.mrb[49].mxu0  ;;  %v11078_v52 = vld [vmem:[#allocation39_spill] sm:$0xff] }
 0x191   : > { %v3340_v3 = vadd.f32 %v3339_v13, %v3338_v35  ;;  %v3354_v55 = vadd.f32 %v3353_v15, %v3352_v27  ;;  %v2694_v61 = vmul.f32 %v7749_v11, %v7304_v16  ;;  %6550 = vmatmul.mubr.msk.f32.gmra.mrb[152].mxu1 %vm577_vm0, %v525_v25  ;;  %11074 = vst [vmem:[#allocation57_spill] sm:$0xff] %v7941_v22 }
 0x192   : > { %v3347_v5 = vadd.f32 %v3346_v29, %v3345_v51  ;;  %v3361_v62 = vadd.f32 %v3360_v31, %v3359_v54  ;;  %v2693_v50 = vmul.f32 %v7741_v45, %v7299_v12  ;;  %v2695_v35 = vmul.f32 %v7755_v38, %v7324_v26  ;;  %2321 = vmatprep.mubr.f32.mxu1 %v11058_v53 }
 0x193   : > { %v3341_v39 = vrot.slane %v3340_v3, 1  ;;  %v3355_v27 = vrot.slane %v3354_v55, 1  ;;  %v2696_v11 = vmul.f32 %v7751_v43, %v7306_v17  ;;  %v2698_v25 = vmul.f32 %v7778_v23, %v7312_v20  ;;  %6423 = vmatmul.mubr.msk.f32.gmra.mrb[154].mxu0 %vm577_vm0, %v526_v30  ;;  %v7957_v56 = vpop.f32.mrb[48].mxu1  ;;  %v7959_v51 = vpop.f32.mrb[50].mxu0  ;;  %v527_v43 = vld [vmem:[%s7003_s15 + $0x270] sm:$0xff] }
 0x194   : > { %v3348_v54 = vrot.slane %v3347_v5, 1  ;;  %v3362_v1 = vrot.slane %v3361_v62, 1  ;;  %v2697_v45 = vmul.f32 %v7758_v10, %v7308_v18  ;;  %v2699_v38 = vmul.f32 %v7788_v33, %v7330_v28  ;;  %11075 = vst [vmem:[#allocation58_spill] sm:$0xff] %v7957_v56  ;;  %11076 = vst [vmem:[#allocation59_spill] sm:$0xff] %v7959_v51  ;;  %1494 = vmatprep.mubr.f32.mxu0 %v11058_v53  ;;  %v7963_v31 = vpop.f32.mrb[49].mxu1  ;;  %v7966_v63 = vpop.f32.mrb[51].mxu0 }
 0x195   : > { %v3342_v13 = vadd.f32 %v3341_v39, %v3340_v3  ;;  %v3356_v15 = vadd.f32 %v3355_v27, %v3354_v55  ;;  %v3364_v23 = vadd.f32 %v2696_v11, %v2692_v57  ;;  %v3378_v29 = vadd.f32 %v2698_v25, %v2694_v61  ;;  %6551 = vmatmul.mubr.msk.f32.gmra.mrb[154].mxu1 %vm577_vm0, %v526_v30  ;;  %v11077_v51 = vld [vmem:[#allocation38_spill] sm:$0xff]  ;;  %v11079_v61 = vld [vmem:[#allocation41_spill] sm:$0xff] }
 0x196   : > { %v3349_v10 = vadd.f32 %v3348_v54, %v3347_v5  ;;  %v3363_v37 = vadd.f32 %v3362_v1, %v3361_v62  ;;  %v3371_v33 = vadd.f32 %v2697_v45, %v2693_v50  ;;  %v3385_v22 = vadd.f32 %v2699_v38, %v2695_v35  ;;  %2327 = vmatprep.mubr.f32.mxu1 %v11058_v53  ;;  %v11080_v30 = vld [vmem:[#allocation42_spill] sm:$0xff]  ;;  %v528_v35 = vld [vmem:[%s7003_s15 + $0x278] sm:$0xff] }
 0x197   : > { %v5088_v56 = vmul.f32 %v11077_v51, %v3342_v13  ;;  %v5090_v3 = vmul.f32 %v11078_v52, %v3356_v15  ;;  %v3365_v55 = vrot.slane %v3364_v23, 4  ;;  %v3379_v57 = vrot.slane %v3378_v29, 4  ;;  %6424 = vmatmul.mubr.msk.f32.gmra.mrb[156].mxu0 %vm577_vm0, %v527_v43  ;;  %v7974_v62 = vpop.f32.mrb[50].mxu1  ;;  %v7976_v50 = vpop.f32.mrb[52].mxu0 }
 0x198   : > { %v5089_v39 = vmul.f32 %v11079_v61, %v3349_v10  ;;  %v5091_v27 = vmul.f32 %v11080_v30, %v3363_v37  ;;  %v3372_v11 = vrot.slane %v3371_v33, 4  ;;  %v3386_v5 = vrot.slane %v3385_v22, 4  ;;  %1500 = vmatprep.mubr.f32.mxu0 %v11058_v53  ;;  %v7980_v38 = vpop.f32.mrb[51].mxu1  ;;  %v7983_v13 = vpop.f32.mrb[53].mxu0 }
 0x199   : > { %v5590_v25 = vrot.slane %v5088_v56, 1  ;;  %v5619_v54 = vrot.slane %v5090_v3, 1  ;;  %v3366_v1 = vadd.f32 %v3365_v55, %v3364_v23  ;;  %v3380_v45 = vadd.f32 %v3379_v57, %v3378_v29  ;;  %6552 = vmatmul.mubr.msk.f32.gmra.mrb[156].mxu1 %vm577_vm0, %v527_v43 }
 0x19a   : > { %v5605_v37 = vrot.slane %v5089_v39, 1  ;;  %v5633_v15 = vrot.slane %v5091_v27, 1  ;;  %v3373_v10 = vadd.f32 %v3372_v11, %v3371_v33  ;;  %v3387_v30 = vadd.f32 %v3386_v5, %v3385_v22  ;;  %2333 = vmatprep.mubr.f32.mxu1 %v11058_v53 }
 0x19b   : > { %v7988_v61 = vsel %vm5591_vm7, %v5590_v25, %v7913_v34  ;;  %v7992_v56 = vsel %vm5591_vm7, %v5619_v54, %v7917_v2  ;;  %v3367_v23 = vrot.slane %v3366_v1, 2  ;;  %v3381_v29 = vrot.slane %v3380_v45, 2  ;;  %6425 = vmatmul.mubr.msk.f32.gmra.mrb[158].mxu0 %vm577_vm0, %v528_v35  ;;  %v8003_v34 = vpop.f32.mrb[52].mxu1  ;;  %v8005_v55 = vpop.f32.mrb[54].mxu0  ;;  %v529_v2 = vld [vmem:[%s7003_s15 + $0x280] sm:$0xff] }
 0x19c   : > { %11081 = vst [vmem:[#allocation60_spill] sm:$0xff] %v7988_v61  ;;  %11082 = vst [vmem:[#allocation61_spill] sm:$0xff] %v7992_v56  ;;  %v7997_v43 = vsel %vm5591_vm7, %v5605_v37, %v7922_v4  ;;  %v8001_v22 = vsel %vm5591_vm7, %v5633_v15, %v7926_v24  ;;  %v3374_v33 = vrot.slane %v3373_v10, 2  ;;  %v3388_v3 = vrot.slane %v3387_v30, 2  ;;  %1506 = vmatprep.mubr.f32.mxu0 %v11058_v53  ;;  %v8013_v11 = vpop.f32.mrb[53].mxu1  ;;  %v8016_v24 = vpop.f32.mrb[55].mxu0 }
 0x19d   : > { %11083 = vst [vmem:[#allocation62_spill] sm:$0xff] %v7997_v43  ;;  %11084 = vst [vmem:[#allocation63_spill] sm:$0xff] %v8001_v22  ;;  %v3368_v57 = vadd.f32 %v3367_v23, %v3366_v1  ;;  %v3382_v39 = vadd.f32 %v3381_v29, %v3380_v45  ;;  %v2700_v27 = vmul.f32 %v7780_v59, %v7297_v9  ;;  %6553 = vmatmul.mubr.msk.f32.gmra.mrb[158].mxu1 %vm577_vm0, %v528_v35  ;;  %v11090_v43 = vld [vmem:[#allocation40_spill] sm:$0xff] }
 0x19e   : > { %v2702_v4 = vmul.f32 %v7807_v49, %v7304_v16  ;;  %11085 = vst [vmem:[#allocation64_spill] sm:$0xff] %v8016_v24  ;;  %v3375_v5 = vadd.f32 %v3374_v33, %v3373_v10  ;;  %v3389_v25 = vadd.f32 %v3388_v3, %v3387_v30  ;;  %v2701_v54 = vmul.f32 %v7791_v58, %v7299_v12 }
 0x19f   : > { %v2703_v1 = vmul.f32 %v7813_v36, %v7324_v26  ;;  %2339 = vmatprep.mubr.f32.mxu1 %v11058_v53  ;;  %v3369_v59 = vrot.slane %v3368_v57, 1  ;;  %v3383_v45 = vrot.slane %v3382_v39, 1  ;;  %v2704_v49 = vmul.f32 %v7809_v7, %v7306_v17  ;;  %6426 = vmatmul.mubr.msk.f32.gmra.mrb[160].mxu0 %vm577_vm0, %v529_v2  ;;  %v8032_v15 = vpop.f32.mrb[54].mxu1  ;;  %v8034_v10 = vpop.f32.mrb[56].mxu0  ;;  %v530_v7 = vld [vmem:[%s7003_s15 + $0x288] sm:$0xff] }
 0x1a0   : > { %v2706_v35 = vmul.f32 %v7824_v32, %v7312_v20  ;;  %v3376_v30 = vrot.slane %v3375_v5, 1  ;;  %v3390_v37 = vrot.slane %v3389_v25, 1  ;;  %v2705_v58 = vmul.f32 %v7816_v48, %v7308_v18  ;;  %11086 = vst [vmem:[#allocation65_spill] sm:$0xff] %v8032_v15  ;;  %11087 = vst [vmem:[#allocation66_spill] sm:$0xff] %v8034_v10  ;;  %1512 = vmatprep.mubr.f32.mxu0 %v11058_v53  ;;  %v8038_v3 = vpop.f32.mrb[55].mxu1  ;;  %v8041_v52 = vpop.f32.mrb[57].mxu0 }
 0x1a1   : > { %v2707_v36 = vmul.f32 %v7830_v19, %v7330_v28  ;;  %v3370_v23 = vadd.f32 %v3369_v59, %v3368_v57  ;;  %v3384_v29 = vadd.f32 %v3383_v45, %v3382_v39  ;;  %v3392_v32 = vadd.f32 %v2704_v49, %v2700_v27  ;;  %11088 = vst [vmem:[#allocation67_spill] sm:$0xff] %v8038_v3  ;;  %v11091_v57 = vld [vmem:[#allocation43_spill] sm:$0xff] }
 0x1a2   : > { %v3406_v33 = vadd.f32 %v2706_v35, %v2702_v4  ;;  %6554 = vmatmul.mubr.msk.f32.gmra.mrb[160].mxu1 %vm577_vm0, %v529_v2  ;;  %11089 = vst [vmem:[#allocation68_spill] sm:$0xff] %v8041_v52  ;;  %v3377_v48 = vadd.f32 %v3376_v30, %v3375_v5  ;;  %v3391_v51 = vadd.f32 %v3390_v37, %v3389_v25  ;;  %v11092_v2 = vld [vmem:[#allocation11_spill] sm:$0xff]  ;;  %v11093_v5 = vld [vmem:[#allocation13_spill] sm:$0xff]  ;;  %v531_v35 = vld [vmem:[%s7003_s15 + $0x290] sm:$0xff] }
 0x1a3   : > { %v3399_v19 = vadd.f32 %v2705_v58, %v2701_v54  ;;  %v3413_v22 = vadd.f32 %v2707_v36, %v2703_v1  ;;  %2345 = vmatprep.mubr.f32.mxu1 %v11058_v53  ;;  %v8045_v56 = vmul.f32 %v3370_v23, %v11090_v43  ;;  %v8048_v39 = vmul.f32 %v3384_v29, %v11091_v57  ;;  %v8057_v45 = vpop.f32.mrb[56].mxu1  ;;  %v8059_v49 = vpop.f32.mrb[58].mxu0 }
 0x1a4   : > { %v3393_v27 = vrot.slane %v3392_v32, 4  ;;  %v3407_v4 = vrot.slane %v3406_v33, 4  ;;  %6427 = vmatmul.mubr.msk.f32.gmra.mrb[162].mxu0 %vm577_vm0, %v530_v7  ;;  %v8052_v59 = vmul.f32 %v3377_v48, %v11092_v2  ;;  %v8055_v25 = vmul.f32 %v3391_v51, %v11093_v5  ;;  %11094 = vst [vmem:[#allocation69_spill] sm:$0xff] %v8057_v45  ;;  %11095 = vst [vmem:[#allocation70_spill] sm:$0xff] %v8059_v49  ;;  %v8067_v23 = vpop.f32.mrb[57].mxu1  ;;  %v8070_v51 = vpop.f32.mrb[59].mxu0 }
 0x1a5   : > { %v3400_v54 = vrot.slane %v3399_v19, 4  ;;  %v3414_v1 = vrot.slane %v3413_v22, 4  ;;  %1518 = vmatprep.mubr.f32.mxu0 %v11058_v53  ;;  %v2708_v58 = vmul.f32 %v7826_v40, %v7297_v9  ;;  %v2710_v36 = vmul.f32 %v7853_v60, %v7304_v16  ;;  %11096 = vst [vmem:[#allocation71_spill] sm:$0xff] %v8067_v23  ;;  %11097 = vst [vmem:[#allocation72_spill] sm:$0xff] %v8070_v51  ;;  %v11098_v60 = vld [vmem:[#allocation52_spill] sm:$0xff] }
 0x1a6   : > { %v3394_v30 = vadd.f32 %v3393_v27, %v3392_v32  ;;  %v3408_v37 = vadd.f32 %v3407_v4, %v3406_v33  ;;  %6555 = vmatmul.mubr.msk.f32.gmra.mrb[162].mxu1 %vm577_vm0, %v530_v7  ;;  %v2709_v61 = vmul.f32 %v7833_v8, %v7299_v12  ;;  %v2711_v32 = vmul.f32 %v7863_v41, %v7324_v26  ;;  %v11099_v7 = vld [vmem:[#allocation54_spill] sm:$0xff] }
 0x1a7   : > { %v3401_v29 = vadd.f32 %v3400_v54, %v3399_v19  ;;  %v3415_v48 = vadd.f32 %v3414_v1, %v3413_v22  ;;  %2351 = vmatprep.mubr.f32.mxu1 %v11058_v53  ;;  %v2712_v27 = vmul.f32 %v11098_v60, %v7306_v17  ;;  %v2714_v4 = vmul.f32 %v11099_v7, %v7312_v20  ;;  %v11100_v54 = vld [vmem:[#allocation53_spill] sm:$0xff]  ;;  %v8086_v1 = vpop.f32.mrb[58].mxu1  ;;  %v8088_v51 = vpop.f32.mrb[60].mxu0  ;;  %v532_v60 = vld [vmem:[%s7003_s15 + $0x298] sm:$0xff] }
 0x1a8   : > { %v3395_v40 = vrot.slane %v3394_v30, 2  ;;  %v3409_v33 = vrot.slane %v3408_v37, 2  ;;  %6428 = vmatmul.mubr.msk.f32.gmra.mrb[164].mxu0 %vm577_vm0, %v531_v35  ;;  %v2713_v8 = vmul.f32 %v11100_v54, %v7308_v18  ;;  %v2715_v41 = vmul.f32 %v7888_v6, %v7330_v28  ;;  %11101 = vst [vmem:[#allocation52_spill] sm:$0xff] %v8086_v1  ;;  %11102 = vst [vmem:[#allocation54_spill] sm:$0xff] %v8088_v51  ;;  %v8092_v45 = vpop.f32.mrb[59].mxu1  ;;  %v8095_v54 = vpop.f32.mrb[61].mxu0 }
 0x1a9   : > { %v3402_v22 = vrot.slane %v3401_v29, 2  ;;  %v3416_v19 = vrot.slane %v3415_v48, 2  ;;  %1524 = vmatprep.mubr.f32.mxu0 %v11058_v53  ;;  %v3420_v7 = vadd.f32 %v2712_v27, %v2708_v58  ;;  %v3434_v52 = vadd.f32 %v2714_v4, %v2710_v36  ;;  %11103 = vst [vmem:[#allocation53_spill] sm:$0xff] %v8092_v45  ;;  %11104 = vst [vmem:[#allocation73_spill] sm:$0xff] %v8095_v54  ;;  %v11108_v45 = vld [vmem:[#allocation45_spill] sm:$0xff] }
 0x1aa   : > { %v3396_v49 = vadd.f32 %v3395_v40, %v3394_v30  ;;  %v3410_v23 = vadd.f32 %v3409_v33, %v3408_v37  ;;  %6556 = vmatmul.mubr.msk.f32.gmra.mrb[164].mxu1 %vm577_vm0, %v531_v35  ;;  %v3427_v3 = vadd.f32 %v2713_v8, %v2709_v61  ;;  %v3441_v1 = vadd.f32 %v2715_v41, %v2711_v32  ;;  %v533_v37 = vld [vmem:[%s7003_s15 + $0x2a0] sm:$0xff] }
 0x1ab   : > { %v3403_v10 = vadd.f32 %v3402_v22, %v3401_v29  ;;  %v3417_v6 = vadd.f32 %v3416_v19, %v3415_v48  ;;  %2357 = vmatprep.mubr.f32.mxu1 %v11058_v53  ;;  %v3421_v15 = vrot.slane %v3420_v7, 4  ;;  %v3435_v30 = vrot.slane %v3434_v52, 4  ;;  %v8100_v35 = vpop.f32.mrb[60].mxu1  ;;  %v8102_v27 = vpop.f32.mrb[62].mxu0 }
 0x1ac   : > { %v3397_v51 = vrot.slane %v3396_v49, 1  ;;  %v3411_v24 = vrot.slane %v3410_v23, 1  ;;  %6429 = vmatmul.mubr.msk.f32.gmra.mrb[166].mxu0 %vm577_vm0, %v532_v60  ;;  %v3428_v40 = vrot.slane %v3427_v3, 4  ;;  %v3442_v33 = vrot.slane %v3441_v1, 4  ;;  %11105 = vst [vmem:[#allocation74_spill] sm:$0xff] %v8100_v35  ;;  %11106 = vst [vmem:[#allocation75_spill] sm:$0xff] %v8102_v27 }
 0x1ad   : > { %v3404_v58 = vrot.slane %v3403_v10, 1  ;;  %v3418_v36 = vrot.slane %v3417_v6, 1  ;;  %1530 = vmatprep.mubr.f32.mxu0 %v11058_v53  ;;  %v3422_v48 = vadd.f32 %v3421_v15, %v3420_v7  ;;  %v3436_v32 = vadd.f32 %v3435_v30, %v3434_v52  ;;  %v8105_v4 = vpop.f32.mrb[61].mxu1  ;;  %v8108_v22 = vpop.f32.mrb[63].mxu0  ;;  %v11107_v27 = vld [vmem:[#allocation44_spill] sm:$0xff]  ;;  %v11109_v52 = vld [vmem:[#allocation46_spill] sm:$0xff] }
 0x1ae   : > { %v3398_v61 = vadd.f32 %v3397_v51, %v3396_v49  ;;  %v3412_v29 = vadd.f32 %v3411_v24, %v3410_v23  ;;  %6557 = vmatmul.mubr.msk.f32.gmra.mrb[166].mxu1 %vm577_vm0, %v532_v60  ;;  %v3429_v41 = vadd.f32 %v3428_v40, %v3427_v3  ;;  %v3443_v54 = vadd.f32 %v3442_v33, %v3441_v1  ;;  %v11110_v51 = vld [vmem:[#allocation47_spill] sm:$0xff]  ;;  %v534_v1 = vld [vmem:[%s7003_s15 + $0x2a8] sm:$0xff] }
 0x1af   : > { %v3405_v19 = vadd.f32 %v3404_v58, %v3403_v10  ;;  %v3419_v8 = vadd.f32 %v3418_v36, %v3417_v6  ;;  %2363 = vmatprep.mubr.f32.mxu1 %v11058_v53  ;;  %v3423_v24 = vrot.slane %v3422_v48, 2  ;;  %v3437_v15 = vrot.slane %v3436_v32, 2  ;;  %v8116_v6 = vpop.f32.mrb[62].mxu1  ;;  %v8118_v3 = vpop.f32.mrb[64].mxu0 }
 0x1b0   : > { %v5096_v35 = vmul.f32 %v11107_v27, %v3398_v61  ;;  %v5098_v49 = vmul.f32 %v11108_v45, %v3412_v29  ;;  %6430 = vmatmul.mubr.msk.f32.gmra.mrb[168].mxu0 %vm577_vm0, %v533_v37  ;;  %v3430_v7 = vrot.slane %v3429_v41, 2  ;;  %v3444_v10 = vrot.slane %v3443_v54, 2  ;;  %v8122_v33 = vpop.f32.mrb[63].mxu1  ;;  %v8125_v61 = vpop.f32.mrb[65].mxu0 }
 0x1b1   : > { %v5097_v23 = vmul.f32 %v11109_v52, %v3405_v19  ;;  %v5099_v60 = vmul.f32 %v11110_v51, %v3419_v8  ;;  %1536 = vmatprep.mubr.f32.mxu0 %v11058_v53  ;;  %v3424_v36 = vadd.f32 %v3423_v24, %v3422_v48  ;;  %v3438_v40 = vadd.f32 %v3437_v15, %v3436_v32 }
 0x1b2   : > { %v5635_v30 = vrot.slane %v5096_v35, 7  ;;  %v5663_v58 = vrot.slane %v5098_v49, 7  ;;  %6558 = vmatmul.mubr.msk.f32.gmra.mrb[168].mxu1 %vm577_vm0, %v533_v37  ;;  %v3431_v8 = vadd.f32 %v3430_v7, %v3429_v41  ;;  %v3445_v51 = vadd.f32 %v3444_v10, %v3443_v54 }
 0x1b3   : > { %v5649_v29 = vrot.slane %v5097_v23, 7  ;;  %v5677_v19 = vrot.slane %v5099_v60, 7  ;;  %2369 = vmatprep.mubr.f32.mxu1 %v11058_v53  ;;  %v3425_v48 = vrot.slane %v3424_v36, 1  ;;  %v3439_v32 = vrot.slane %v3438_v40, 1  ;;  %v8137_v24 = vpop.f32.mrb[64].mxu1  ;;  %v8139_v15 = vpop.f32.mrb[66].mxu0 }
 0x1b4   : > { %v5636_v52 = vsel %vm5573_vm1, %v5635_v30, %v8045_v56  ;;  %v5664_v35 = vsel %vm5573_vm1, %v5663_v58, %v8048_v39  ;;  %6431 = vmatmul.mubr.msk.f32.gmra.mrb[170].mxu0 %vm577_vm0, %v534_v1  ;;  %v3432_v41 = vrot.slane %v3431_v8, 1  ;;  %v3446_v54 = vrot.slane %v3445_v51, 1  ;;  %11111 = vst [vmem:[#allocation76_spill] sm:$0xff] %v8139_v15  ;;  %v535_v56 = vld [vmem:[%s7003_s15 + $0x2b0] sm:$0xff]  ;;  %v11112_v60 = vld [vmem:[#allocation55_spill] sm:$0xff]  ;;  %v8147_v10 = vpop.f32.mrb[65].mxu1 }
 0x1b5   : > { %v5650_v37 = vsel %vm5573_vm1, %v5649_v29, %v8052_v59  ;;  %v5678_v49 = vsel %vm5573_vm1, %v5677_v19, %v8055_v25  ;;  %1542 = vmatprep.mubr.f32.mxu0 %v11058_v53  ;;  %v3426_v39 = vadd.f32 %v3425_v48, %v3424_v36  ;;  %v3440_v23 = vadd.f32 %v3439_v32, %v3438_v40  ;;  %v8150_v25 = vpop.f32.mrb[67].mxu0  ;;  %v11114_v40 = vld [vmem:[#allocation48_spill] sm:$0xff] }
 0x1b6   : > { %v2716_v7 = vmul.f32 %v11112_v60, %v7297_v9  ;;  %v2718_v59 = vmul.f32 %v7899_v0, %v7304_v16  ;;  %6559 = vmatmul.mubr.msk.f32.gmra.mrb[170].mxu1 %vm577_vm0, %v534_v1  ;;  %11113 = vst [vmem:[#allocation55_spill] sm:$0xff] %v8150_v25  ;;  %v3433_v30 = vadd.f32 %v3432_v41, %v3431_v8  ;;  %v11115_v0 = vld [vmem:[#allocation49_spill] sm:$0xff]  ;;  %v8162_v32 = vrot.slane %v11090_v43, 3 }
 0x1b7   : > { %v3447_v58 = vadd.f32 %v3446_v54, %v3445_v51  ;;  %v2717_v29 = vmul.f32 %v7891_v21, %v7299_v12  ;;  %v2719_v36 = vmul.f32 %v7905_v47, %v7324_v26  ;;  %2375 = vmatprep.mubr.f32.mxu1 %v11058_v53  ;;  %v5100_v19 = vmul.f32 %v11114_v40, %v3426_v39  ;;  %v11117_v51 = vld [vmem:[#allocation50_spill] sm:$0xff]  ;;  %v11118_v21 = vld [vmem:[#allocation51_spill] sm:$0xff]  ;;  %v8172_v39 = vpop.f32.mrb[66].mxu1 }
 0x1b8   : > { %v5102_v48 = vmul.f32 %v11115_v0, %v3440_v23  ;;  %v2720_v1 = vmul.f32 %v7901_v42, %v7306_v17  ;;  %11116 = vst [vmem:[#allocation77_spill] sm:$0xff] %v8162_v32  ;;  %6432 = vmatmul.mubr.msk.f32.gmra.mrb[172].mxu0 %vm577_vm0, %v535_v56  ;;  %v5101_v8 = vmul.f32 %v11117_v51, %v3433_v30  ;;  %v8170_v54 = vrot.slane %v11091_v57, 3  ;;  %v8174_v23 = vpop.f32.mrb[68].mxu0  ;;  %v536_v42 = vld [vmem:[%s7003_s15 + $0x2b8] sm:$0xff] }
 0x1b9   : > { %v5103_v41 = vmul.f32 %v11118_v21, %v3447_v58  ;;  %v2722_v47 = vmul.f32 %v7928_v14, %v7312_v20  ;;  %11120 = vst [vmem:[#allocation79_spill] sm:$0xff] %v8172_v39  ;;  %11121 = vst [vmem:[#allocation80_spill] sm:$0xff] %v8174_v23  ;;  %1548 = vmatprep.mubr.f32.mxu0 %v11058_v53  ;;  %v5637_v60 = vrot.slane %v5100_v19, 6  ;;  %v8180_v58 = vpop.f32.mrb[67].mxu1  ;;  %v8183_v14 = vpop.f32.mrb[69].mxu0  ;;  %v8186_v27 = vrot.slane %v11092_v2, 3 }
 0x1ba   : > { %11119 = vst [vmem:[#allocation78_spill] sm:$0xff] %v8170_v54  ;;  %v5665_v0 = vrot.slane %v5102_v48, 6  ;;  %v3448_v40 = vadd.f32 %v2720_v1, %v2716_v7  ;;  %v2721_v30 = vmul.f32 %v7908_v44, %v7308_v18  ;;  %11122 = vst [vmem:[#allocation81_spill] sm:$0xff] %v8180_v58  ;;  %6560 = vmatmul.mubr.msk.f32.gmra.mrb[172].mxu1 %vm577_vm0, %v535_v56  ;;  %v5651_v21 = vrot.slane %v5101_v8, 6 }
 0x1bb   : > { %11123 = vst [vmem:[#allocation82_spill] sm:$0xff] %v8183_v14  ;;  %v5679_v51 = vrot.slane %v5103_v41, 6  ;;  %v3462_v45 = vadd.f32 %v2722_v47, %v2718_v59  ;;  %11124 = vst [vmem:[#allocation83_spill] sm:$0xff] %v8186_v27  ;;  %2381 = vmatprep.mubr.f32.mxu1 %v11058_v53  ;;  %v8190_v7 = vsel %vm5576_vm2, %v5637_v60, %v5636_v52  ;;  %v8204_v41 = vpop.f32.mrb[68].mxu1  ;;  %v8206_v52 = vpop.f32.mrb[70].mxu0  ;;  %v8211_v47 = vrot.slane %v11093_v5, 3 }
 0x1bc   : > { %v8193_v44 = vsel %vm5576_vm2, %v5665_v0, %v5664_v35  ;;  %v3449_v19 = vrot.slane %v3448_v40, 4  ;;  %v3455_v48 = vadd.f32 %v2721_v30, %v2717_v29  ;;  %6433 = vmatmul.mubr.msk.f32.gmra.mrb[174].mxu0 %vm577_vm0, %v536_v42  ;;  %v8197_v56 = vsel %vm5576_vm2, %v5651_v21, %v5650_v37  ;;  %11125 = vst [vmem:[#allocation84_spill] sm:$0xff] %v8204_v41  ;;  %v537_v35 = vld [vmem:[%s7003_s15 + $0x2c0] sm:$0xff]  ;;  %v11131_v30 = vld [vmem:[#allocation58_spill] sm:$0xff] }
 0x1bd   : > { %v8200_v59 = vsel %vm5576_vm2, %v5679_v51, %v5678_v49  ;;  %v3463_v1 = vrot.slane %v3462_v45, 4  ;;  %v2723_v8 = vmul.f32 %v7938_v46, %v7330_v28  ;;  %11126 = vst [vmem:[#allocation85_spill] sm:$0xff] %v8206_v52  ;;  %1554 = vmatprep.mubr.f32.mxu0 %v11058_v53  ;;  %11127 = vst [vmem:[#allocation86_spill] sm:$0xff] %v8211_v47  ;;  %v11128_v37 = vld [vmem:[#allocation56_spill] sm:$0xff]  ;;  %v8215_v51 = vpop.f32.mrb[69].mxu1  ;;  %v8218_v46 = vpop.f32.mrb[71].mxu0 }
 0x1be   : > { %v3450_v29 = vadd.f32 %v3449_v19, %v3448_v40  ;;  %v3456_v0 = vrot.slane %v3455_v48, 4  ;;  %v2724_v49 = vmul.f32 %v11128_v37, %v7297_v9  ;;  %11129 = vst [vmem:[#allocation56_spill] sm:$0xff] %v8215_v51  ;;  %6561 = vmatmul.mubr.msk.f32.gmra.mrb[174].mxu1 %vm577_vm0, %v536_v42  ;;  %11130 = vst [vmem:[#allocation87_spill] sm:$0xff] %v8218_v46  ;;  %v11132_v40 = vld [vmem:[#allocation57_spill] sm:$0xff]  ;;  %v11133_v42 = vld [vmem:[#allocation59_spill] sm:$0xff]  ;;  %v8242_v46 = vrot.slane %v11091_v57, 4 }
 0x1bf   : > { %v3464_v21 = vadd.f32 %v3463_v1, %v3462_v45  ;;  %v3469_v60 = vadd.f32 %v2723_v8, %v2719_v36  ;;  %v2726_v52 = vmul.f32 %v11131_v30, %v7304_v16  ;;  %v2725_v19 = vmul.f32 %v11132_v40, %v7299_v12  ;;  %2387 = vmatprep.mubr.f32.mxu1 %v11058_v53  ;;  %v8235_v30 = vpop.f32.mrb[70].mxu1  ;;  %v8237_v40 = vpop.f32.mrb[72].mxu0 }
 0x1c0   : > { %v3451_v14 = vrot.slane %v3450_v29, 2  ;;  %v3457_v41 = vadd.f32 %v3456_v0, %v3455_v48  ;;  %v2727_v37 = vmul.f32 %v7963_v31, %v7324_v26  ;;  %v2728_v51 = vmul.f32 %v11133_v42, %v7306_v17  ;;  %6434 = vmatmul.mubr.msk.f32.gmra.mrb[176].mxu0 %vm577_vm0, %v537_v35  ;;  %11135 = vst [vmem:[#allocation57_spill] sm:$0xff] %v8235_v30  ;;  %v538_v31 = vld [vmem:[%s7003_s15 + $0x2c8] sm:$0xff]  ;;  %v8244_v23 = vpop.f32.mrb[71].mxu1  ;;  %v8247_v58 = vpop.f32.mrb[73].mxu0 }
 0x1c1   : > { %v3465_v45 = vrot.slane %v3464_v21, 2  ;;  %v3470_v36 = vrot.slane %v3469_v60, 4  ;;  %v8231_v1 = vrot.slane %v11090_v43, 4  ;;  %v2730_v8 = vmul.f32 %v7974_v62, %v7312_v20  ;;  %11136 = vst [vmem:[#allocation59_spill] sm:$0xff] %v8237_v40  ;;  %1560 = vmatprep.mubr.f32.mxu0 %v11058_v53  ;;  %11137 = vst [vmem:[#allocation88_spill] sm:$0xff] %v8242_v46 }
 0x1c2   : > { %v3452_v48 = vadd.f32 %v3451_v14, %v3450_v29  ;;  %v3458_v0 = vrot.slane %v3457_v41, 2  ;;  %v3476_v42 = vadd.f32 %v2728_v51, %v2724_v49  ;;  %11138 = vst [vmem:[#allocation89_spill] sm:$0xff] %v8244_v23  ;;  %6562 = vmatmul.mubr.msk.f32.gmra.mrb[176].mxu1 %vm577_vm0, %v537_v35  ;;  %11139 = vst [vmem:[#allocation90_spill] sm:$0xff] %v8247_v58  ;;  %v8253_v51 = vrot.slane %v11092_v2, 4 }
 0x1c3   : > { %11134 = vst [vmem:[#allocation58_spill] sm:$0xff] %v8231_v1  ;;  %v3466_v62 = vadd.f32 %v3465_v45, %v3464_v21  ;;  %v3471_v25 = vadd.f32 %v3470_v36, %v3469_v60  ;;  %v3490_v30 = vadd.f32 %v2730_v8, %v2726_v52  ;;  %v2729_v40 = vmul.f32 %v7966_v63, %v7308_v18  ;;  %v8256_v60 = vpop.f32.mrb[72].mxu1  ;;  %v8258_v52 = vpop.f32.mrb[74].mxu0  ;;  %v539_v63 = vld [vmem:[%s7003_s15 + $0x2d0] sm:$0xff] }
 0x1c4   : > { %2393 = vmatprep.mubr.f32.mxu1 %v11058_v53  ;;  %v3453_v14 = vrot.slane %v3452_v48, 1  ;;  %v3459_v29 = vadd.f32 %v3458_v0, %v3457_v41  ;;  %v3477_v49 = vrot.slane %v3476_v42, 4  ;;  %11140 = vst [vmem:[#allocation91_spill] sm:$0xff] %v8253_v51  ;;  %6435 = vmatmul.mubr.msk.f32.gmra.mrb[178].mxu0 %vm577_vm0, %v538_v31  ;;  %11141 = vst [vmem:[#allocation92_spill] sm:$0xff] %v8256_v60  ;;  %v8264_v0 = vpop.f32.mrb[73].mxu1  ;;  %v8267_v39 = vpop.f32.mrb[75].mxu0 }
 0x1c5   : > { %v3467_v35 = vrot.slane %v3466_v62, 1  ;;  %v3472_v23 = vrot.slane %v3471_v25, 2  ;;  %v3491_v58 = vrot.slane %v3490_v30, 4  ;;  %v3483_v21 = vadd.f32 %v2729_v40, %v2725_v19  ;;  %11142 = vst [vmem:[#allocation93_spill] sm:$0xff] %v8258_v52  ;;  %1566 = vmatprep.mubr.f32.mxu0 %v11058_v53  ;;  %11143 = vst [vmem:[#allocation94_spill] sm:$0xff] %v8264_v0 }
 0x1c6   : > { %v3454_v45 = vadd.f32 %v3453_v14, %v3452_v48  ;;  %v3460_v36 = vrot.slane %v3459_v29, 1  ;;  %v3478_v41 = vadd.f32 %v3477_v49, %v3476_v42  ;;  %v2731_v8 = vmul.f32 %v7980_v38, %v7330_v28  ;;  %6563 = vmatmul.mubr.msk.f32.gmra.mrb[178].mxu1 %vm577_vm0, %v538_v31  ;;  %11144 = vst [vmem:[#allocation95_spill] sm:$0xff] %v8267_v39 }
 0x1c7   : > { %v3468_v19 = vadd.f32 %v3467_v35, %v3466_v62  ;;  %v3473_v40 = vadd.f32 %v3472_v23, %v3471_v25  ;;  %v3492_v60 = vadd.f32 %v3491_v58, %v3490_v30  ;;  %v3484_v52 = vrot.slane %v3483_v21, 4  ;;  %2399 = vmatprep.mubr.f32.mxu1 %v11058_v53  ;;  %v8273_v39 = vpop.f32.mrb[74].mxu1  ;;  %v8275_v25 = vpop.f32.mrb[76].mxu0  ;;  %v540_v23 = vld [vmem:[%s7003_s15 + $0x2d8] sm:$0xff] }
 0x1c8   : > { %v5104_v48 = vmul.f32 %v8162_v32, %v3454_v45  ;;  %v3461_v14 = vadd.f32 %v3460_v36, %v3459_v29  ;;  %v3479_v42 = vrot.slane %v3478_v41, 2  ;;  %v3497_v49 = vadd.f32 %v2731_v8, %v2727_v37  ;;  %6436 = vmatmul.mubr.msk.f32.gmra.mrb[180].mxu0 %vm577_vm0, %v539_v63  ;;  %v8280_v37 = vpop.f32.mrb[75].mxu1  ;;  %v8283_v35 = vpop.f32.mrb[77].mxu0  ;;  %v11166_v32 = vld [vmem:[#allocation68_spill] sm:$0xff] }
 0x1c9   : > { %v5106_v38 = vmul.f32 %v8170_v54, %v3468_v19  ;;  %v3474_v0 = vrot.slane %v3473_v40, 1  ;;  %v3493_v31 = vrot.slane %v3492_v60, 2  ;;  %v3485_v15 = vadd.f32 %v3484_v52, %v3483_v21  ;;  %1572 = vmatprep.mubr.f32.mxu0 %v11058_v53 }
 0x1ca   : > { %v5639_v58 = vrot.slane %v5104_v48, 5  ;;  %v5105_v30 = vmul.f32 %v8186_v27, %v3461_v14  ;;  %v3480_v62 = vadd.f32 %v3479_v42, %v3478_v41  ;;  %v3498_v29 = vrot.slane %v3497_v49, 4  ;;  %6564 = vmatmul.mubr.msk.f32.gmra.mrb[180].mxu1 %vm577_vm0, %v539_v63 }
 0x1cb   : > { %v5667_v45 = vrot.slane %v5106_v38, 5  ;;  %v3475_v21 = vadd.f32 %v3474_v0, %v3473_v40  ;;  %v3494_v52 = vadd.f32 %v3493_v31, %v3492_v60  ;;  %v3486_v36 = vrot.slane %v3485_v15, 2  ;;  %2405 = vmatprep.mubr.f32.mxu1 %v11058_v53  ;;  %v8292_v40 = vpop.f32.mrb[76].mxu1  ;;  %v8294_v60 = vpop.f32.mrb[78].mxu0  ;;  %v541_v38 = vld [vmem:[%s7003_s15 + $0x2e0] sm:$0xff] }
 0x1cc   : > { %v5640_v8 = vsel %vm5579_vm3, %v5639_v58, %v8190_v7  ;;  %v5653_v19 = vrot.slane %v5105_v30, 5  ;;  %v3481_v48 = vrot.slane %v3480_v62, 1  ;;  %v3499_v41 = vadd.f32 %v3498_v29, %v3497_v49  ;;  %6437 = vmatmul.mubr.msk.f32.gmra.mrb[182].mxu0 %vm577_vm0, %v540_v23  ;;  %11145 = vst [vmem:[#allocation96_spill] sm:$0xff] %v8294_v60 }
 0x1cd   : > { %v5668_v63 = vsel %vm5579_vm3, %v5667_v45, %v8193_v44  ;;  %v5107_v14 = vmul.f32 %v8211_v47, %v3475_v21  ;;  %v3495_v42 = vrot.slane %v3494_v52, 1  ;;  %v3487_v0 = vadd.f32 %v3486_v36, %v3485_v15  ;;  %1578 = vmatprep.mubr.f32.mxu0 %v11058_v53  ;;  %v8303_v44 = vpop.f32.mrb[77].mxu1  ;;  %v8306_v15 = vpop.f32.mrb[79].mxu0 }
 0x1ce   : > { %v5654_v7 = vsel %vm5579_vm3, %v5653_v19, %v8197_v56  ;;  %v3482_v49 = vadd.f32 %v3481_v48, %v3480_v62  ;;  %v3500_v31 = vrot.slane %v3499_v41, 2  ;;  %v8301_v58 = vrot.slane %v11093_v5, 4  ;;  %11147 = vst [vmem:[#allocation98_spill] sm:$0xff] %v8303_v44  ;;  %6565 = vmatmul.mubr.msk.f32.gmra.mrb[182].mxu1 %vm577_vm0, %v540_v23  ;;  %11148 = vst [vmem:[#allocation99_spill] sm:$0xff] %v8306_v15 }
 0x1cf   : > { %v5681_v30 = vrot.slane %v5107_v14, 5  ;;  %v3496_v29 = vadd.f32 %v3495_v42, %v3494_v52  ;;  %v3488_v45 = vrot.slane %v3487_v0, 1  ;;  %v2732_v21 = vmul.f32 %v7976_v50, %v7297_v9  ;;  %2411 = vmatprep.mubr.f32.mxu1 %v11058_v53  ;;  %v8322_v14 = vpop.f32.mrb[78].mxu1 }
 0x1d0   : > { %11146 = vst [vmem:[#allocation97_spill] sm:$0xff] %v8301_v58  ;;  %v5108_v56 = vmul.f32 %v8231_v1, %v3482_v49  ;;  %v3501_v62 = vadd.f32 %v3500_v31, %v3499_v41  ;;  %v2734_v36 = vmul.f32 %v8003_v34, %v7304_v16  ;;  %v2733_v23 = vmul.f32 %v7983_v13, %v7299_v12  ;;  %v8324_v41 = vpop.f32.mrb[80].mxu0  ;;  %v542_v34 = vld [vmem:[%s7003_s15 + $0x2e8] sm:$0xff]  ;;  %v8333_v31 = vpop.f32.mrb[79].mxu1 }
 0x1d1   : > { %6438 = vmatmul.mubr.msk.f32.gmra.mrb[184].mxu0 %vm577_vm0, %v541_v38  ;;  %v5682_v52 = vsel %vm5579_vm3, %v5681_v30, %v8200_v59  ;;  %v5110_v19 = vmul.f32 %v8242_v46, %v3496_v29  ;;  %v3489_v48 = vadd.f32 %v3488_v45, %v3487_v0  ;;  %v2735_v50 = vmul.f32 %v8013_v11, %v7324_v26  ;;  %v8336_v11 = vpop.f32.mrb[81].mxu0  ;;  %v11154_v29 = vld [vmem:[#allocation65_spill] sm:$0xff] }
 0x1d2   : > { %11149 = vst [vmem:[#allocation100_spill] sm:$0xff] %v8322_v14  ;;  %11150 = vst [vmem:[#allocation101_spill] sm:$0xff] %v8324_v41  ;;  %1584 = vmatprep.mubr.f32.mxu0 %v11058_v53  ;;  %v5641_v42 = vrot.slane %v5108_v56, 4  ;;  %v3502_v13 = vrot.slane %v3501_v62, 1  ;;  %v2736_v49 = vmul.f32 %v8005_v55, %v7306_v17  ;;  %v8331_v59 = vrot.slane %v11090_v43, 5  ;;  %6566 = vmatmul.mubr.msk.f32.gmra.mrb[184].mxu1 %vm577_vm0, %v541_v38  ;;  %v11156_v38 = vld [vmem:[#allocation64_spill] sm:$0xff] }
 0x1d3   : > { %11152 = vst [vmem:[#allocation103_spill] sm:$0xff] %v8333_v31  ;;  %11153 = vst [vmem:[#allocation104_spill] sm:$0xff] %v8336_v11  ;;  %v5669_v0 = vrot.slane %v5110_v19, 4  ;;  %v5109_v30 = vmul.f32 %v8253_v51, %v3489_v48  ;;  %v2738_v45 = vmul.f32 %v11154_v29, %v7312_v20  ;;  %v8342_v56 = vrot.slane %v11091_v57, 5  ;;  %2417 = vmatprep.mubr.f32.mxu1 %v11058_v53  ;;  %v8357_v27 = vpop.f32.mrb[80].mxu1  ;;  %v8359_v54 = vpop.f32.mrb[82].mxu0 }
 0x1d4   : > { %11151 = vst [vmem:[#allocation102_spill] sm:$0xff] %v8331_v59  ;;  %v8346_v55 = vsel %vm5582_vm4, %v5641_v42, %v5640_v8  ;;  %v3503_v46 = vadd.f32 %v3502_v13, %v3501_v62  ;;  %v3504_v1 = vadd.f32 %v2736_v49, %v2732_v21  ;;  %v2737_v47 = vmul.f32 %v11156_v38, %v7308_v18  ;;  %v543_v8 = vld [vmem:[%s7003_s15 + $0x2f0] sm:$0xff]  ;;  %v11160_v13 = vld [vmem:[#allocation67_spill] sm:$0xff]  ;;  %v8366_v49 = vpop.f32.mrb[81].mxu1 }
 0x1d5   : > { %11155 = vst [vmem:[#allocation65_spill] sm:$0xff] %v8342_v56  ;;  %6439 = vmatmul.mubr.msk.f32.gmra.mrb[186].mxu0 %vm577_vm0, %v542_v34  ;;  %v8352_v19 = vsel %vm5582_vm4, %v5669_v0, %v5668_v63  ;;  %v5655_v48 = vrot.slane %v5109_v30, 4  ;;  %v3518_v29 = vadd.f32 %v2738_v45, %v2734_v36  ;;  %v8355_v51 = vrot.slane %v11092_v2, 5  ;;  %11158 = vst [vmem:[#allocation105_spill] sm:$0xff] %v8357_v27  ;;  %v8369_v36 = vpop.f32.mrb[83].mxu0  ;;  %v11176_v27 = vld [vmem:[#allocation72_spill] sm:$0xff] }
 0x1d6   : > { %11159 = vst [vmem:[#allocation106_spill] sm:$0xff] %v8359_v54  ;;  %1590 = vmatprep.mubr.f32.mxu0 %v11058_v53  ;;  %v5111_v21 = vmul.f32 %v8301_v58, %v3503_v46  ;;  %v3505_v62 = vrot.slane %v3504_v1, 4  ;;  %v3511_v42 = vadd.f32 %v2737_v47, %v2733_v23  ;;  %v2739_v63 = vmul.f32 %v11160_v13, %v7330_v28  ;;  %v11164_v46 = vld [vmem:[#allocation66_spill] sm:$0xff]  ;;  %v11167_v54 = vld [vmem:[#allocation71_spill] sm:$0xff] }
 0x1d7   : > { %11157 = vst [vmem:[#allocation64_spill] sm:$0xff] %v8355_v51  ;;  %11161 = vst [vmem:[#allocation67_spill] sm:$0xff] %v8366_v49  ;;  %6567 = vmatmul.mubr.msk.f32.gmra.mrb[186].mxu1 %vm577_vm0, %v542_v34  ;;  %v8372_v0 = vsel %vm5582_vm4, %v5655_v48, %v5654_v7  ;;  %v3519_v30 = vrot.slane %v3518_v29, 4  ;;  %v8375_v45 = vrot.slane %v11093_v5, 5  ;;  %v2740_v47 = vmul.f32 %v11164_v46, %v7297_v9  ;;  %v11165_v7 = vld [vmem:[#allocation69_spill] sm:$0xff]  ;;  %v8387_v11 = vpop.f32.mrb[82].mxu1 }
 0x1d8   : > { %11162 = vst [vmem:[#allocation107_spill] sm:$0xff] %v8369_v36  ;;  %2423 = vmatprep.mubr.f32.mxu1 %v11058_v53  ;;  %v5683_v23 = vrot.slane %v5111_v21, 4  ;;  %v3506_v38 = vadd.f32 %v3505_v62, %v3504_v1  ;;  %v3512_v13 = vrot.slane %v3511_v42, 4  ;;  %v3525_v58 = vadd.f32 %v2739_v63, %v2735_v50  ;;  %11168 = vst [vmem:[#allocation66_spill] sm:$0xff] %v8387_v11  ;;  %v8389_v46 = vpop.f32.mrb[84].mxu0  ;;  %v544_v1 = vld [vmem:[%s7003_s15 + $0x2f8] sm:$0xff] }
 0x1d9   : > { %11163 = vst [vmem:[#allocation108_spill] sm:$0xff] %v8375_v45  ;;  %6440 = vmatmul.mubr.msk.f32.gmra.mrb[188].mxu0 %vm577_vm0, %v543_v8  ;;  %v3520_v34 = vadd.f32 %v3519_v30, %v3518_v29  ;;  %v2742_v48 = vmul.f32 %v11165_v7, %v7304_v16  ;;  %v2741_v36 = vmul.f32 %v11166_v32, %v7299_v12  ;;  %11169 = vst [vmem:[#allocation69_spill] sm:$0xff] %v8389_v46  ;;  %v8396_v63 = vpop.f32.mrb[83].mxu1  ;;  %v8399_v32 = vpop.f32.mrb[85].mxu0  ;;  %v11172_v30 = vld [vmem:[#allocation70_spill] sm:$0xff] }
 0x1da   : > { %v2743_v49 = vmul.f32 %v11167_v54, %v7324_v26  ;;  %1596 = vmatprep.mubr.f32.mxu0 %v11058_v53  ;;  %v8394_v50 = vsel %vm5582_vm4, %v5683_v23, %v5682_v52  ;;  %v3507_v29 = vrot.slane %v3506_v38, 2  ;;  %v3513_v21 = vadd.f32 %v3512_v13, %v3511_v42  ;;  %11170 = vst [vmem:[#allocation68_spill] sm:$0xff] %v8396_v63  ;;  %v11174_v52 = vld [vmem:[#allocation52_spill] sm:$0xff] }
 0x1db   : > { %v3526_v62 = vrot.slane %v3525_v58, 4  ;;  %6568 = vmatmul.mubr.msk.f32.gmra.mrb[188].mxu1 %vm577_vm0, %v543_v8  ;;  %11171 = vst [vmem:[#allocation71_spill] sm:$0xff] %v8399_v32  ;;  %v3521_v54 = vrot.slane %v3520_v34, 2  ;;  %v2744_v7 = vmul.f32 %v11172_v30, %v7306_v17  ;;  %v8404_v46 = vrot.slane %v11090_v43, 6  ;;  %v8415_v31 = vpop.f32.mrb[84].mxu1  ;;  %v8417_v15 = vpop.f32.mrb[86].mxu0 }
 0x1dc   : > { %v2746_v23 = vmul.f32 %v11174_v52, %v7312_v20  ;;  %2429 = vmatprep.mubr.f32.mxu1 %v11058_v53  ;;  %v3508_v42 = vadd.f32 %v3507_v29, %v3506_v38  ;;  %v3514_v13 = vrot.slane %v3513_v21, 2  ;;  %v8410_v8 = vrot.slane %v11091_v57, 6  ;;  %11177 = vst [vmem:[#allocation72_spill] sm:$0xff] %v8415_v31  ;;  %11178 = vst [vmem:[#allocation109_spill] sm:$0xff] %v8417_v15  ;;  %v545_v38 = vld [vmem:[%s7003_s15 + $0x300] sm:$0xff]  ;;  %v8424_v14 = vpop.f32.mrb[85].mxu1 }
 0x1dd   : > { %11173 = vst [vmem:[#allocation70_spill] sm:$0xff] %v8404_v46  ;;  %v3527_v63 = vadd.f32 %v3526_v62, %v3525_v58  ;;  %6441 = vmatmul.mubr.msk.f32.gmra.mrb[190].mxu0 %vm577_vm0, %v544_v1  ;;  %v3522_v32 = vadd.f32 %v3521_v54, %v3520_v34  ;;  %v3532_v11 = vadd.f32 %v2744_v7, %v2740_v47  ;;  %v8422_v52 = vrot.slane %v11092_v2, 6  ;;  %v8427_v47 = vpop.f32.mrb[87].mxu0 }
 0x1de   : > { %11175 = vst [vmem:[#allocation52_spill] sm:$0xff] %v8410_v8  ;;  %v3546_v30 = vadd.f32 %v2746_v23, %v2742_v48  ;;  %v2745_v41 = vmul.f32 %v11176_v27, %v7308_v18  ;;  %1602 = vmatprep.mubr.f32.mxu0 %v11058_v53  ;;  %v3509_v29 = vrot.slane %v3508_v42, 1  ;;  %v3515_v58 = vadd.f32 %v3514_v13, %v3513_v21  ;;  %v11182_v13 = vld [vmem:[#allocation53_spill] sm:$0xff] }
 0x1df   : > { %v3528_v62 = vrot.slane %v3527_v63, 2  ;;  %11179 = vst [vmem:[#allocation110_spill] sm:$0xff] %v8422_v52  ;;  %11180 = vst [vmem:[#allocation111_spill] sm:$0xff] %v8424_v14  ;;  %6569 = vmatmul.mubr.msk.f32.gmra.mrb[190].mxu1 %vm577_vm0, %v544_v1  ;;  %v3523_v27 = vrot.slane %v3522_v32, 1  ;;  %v3533_v34 = vrot.slane %v3532_v11, 4  ;;  %v2747_v15 = vmul.f32 %v11182_v13, %v7330_v28  ;;  %v8435_v44 = vpop.f32.mrb[88].mxu0 }
 0x1e0   : > { %11181 = vst [vmem:[#allocation112_spill] sm:$0xff] %v8427_v47  ;;  %v3547_v48 = vrot.slane %v3546_v30, 4  ;;  %v3539_v54 = vadd.f32 %v2745_v41, %v2741_v36  ;;  %2435 = vmatprep.mubr.f32.mxu1 %v11058_v53  ;;  %v3510_v7 = vadd.f32 %v3509_v29, %v3508_v42  ;;  %v3516_v23 = vrot.slane %v3515_v58, 1  ;;  %v8433_v47 = vpop.f32.mrb[86].mxu1  ;;  %v546_v41 = vld [vmem:[%s7003_s15 + $0x308] sm:$0xff] }
 0x1e1   : > { %v3529_v21 = vadd.f32 %v3528_v62, %v3527_v63  ;;  %6442 = vmatmul.mubr.msk.f32.gmra.mrb[192].mxu0 %vm577_vm0, %v545_v38  ;;  %v3524_v14 = vadd.f32 %v3523_v27, %v3522_v32  ;;  %v3534_v31 = vadd.f32 %v3533_v34, %v3532_v11  ;;  %v3553_v29 = vadd.f32 %v2747_v15, %v2743_v49  ;;  %v8440_v62 = vpop.f32.mrb[87].mxu1  ;;  %v8443_v32 = vpop.f32.mrb[89].mxu0 }
 0x1e2   : > { %v3548_v1 = vadd.f32 %v3547_v48, %v3546_v30  ;;  %v3540_v60 = vrot.slane %v3539_v54, 4  ;;  %1608 = vmatprep.mubr.f32.mxu0 %v11058_v53  ;;  %v5112_v36 = vmul.f32 %v8331_v59, %v3510_v7  ;;  %v3517_v42 = vadd.f32 %v3516_v23, %v3515_v58 }
 0x1e3   : > { %v3530_v63 = vrot.slane %v3529_v21, 1  ;;  %6570 = vmatmul.mubr.msk.f32.gmra.mrb[192].mxu1 %vm577_vm0, %v545_v38  ;;  %v5114_v11 = vmul.f32 %v8342_v56, %v3524_v14  ;;  %v3535_v30 = vrot.slane %v3534_v31, 2  ;;  %v3554_v23 = vrot.slane %v3553_v29, 4  ;;  %v8449_v59 = vpop.f32.mrb[88].mxu1  ;;  %v8451_v14 = vpop.f32.mrb[90].mxu0 }
 0x1e4   : > { %v3549_v27 = vrot.slane %v3548_v1, 2  ;;  %v3541_v34 = vadd.f32 %v3540_v60, %v3539_v54  ;;  %2441 = vmatprep.mubr.f32.mxu1 %v11058_v53  ;;  %v5643_v48 = vrot.slane %v5112_v36, 3  ;;  %v5113_v7 = vmul.f32 %v8355_v51, %v3517_v42  ;;  %v547_v60 = vld [vmem:[%s7003_s15 + $0x310] sm:$0xff] }
 0x1e5   : > { %v3531_v58 = vadd.f32 %v3530_v63, %v3529_v21  ;;  %6443 = vmatmul.mubr.msk.f32.gmra.mrb[194].mxu0 %vm577_vm0, %v546_v41  ;;  %v5671_v15 = vrot.slane %v5114_v11, 3  ;;  %v3536_v49 = vadd.f32 %v3535_v30, %v3534_v31  ;;  %v3555_v42 = vadd.f32 %v3554_v23, %v3553_v29  ;;  %v8458_v63 = vpop.f32.mrb[89].mxu1  ;;  %v8461_v31 = vpop.f32.mrb[91].mxu0 }
 0x1e6   : > { %v3550_v38 = vadd.f32 %v3549_v27, %v3548_v1  ;;  %v3542_v13 = vrot.slane %v3541_v34, 2  ;;  %1614 = vmatprep.mubr.f32.mxu0 %v11058_v53  ;;  %v5644_v54 = vsel %vm5585_vm5, %v5643_v48, %v8346_v55  ;;  %v5657_v36 = vrot.slane %v5113_v7, 3 }
 0x1e7   : > { %v5115_v21 = vmul.f32 %v8375_v45, %v3531_v58  ;;  %6571 = vmatmul.mubr.msk.f32.gmra.mrb[194].mxu1 %vm577_vm0, %v546_v41  ;;  %v5672_v1 = vsel %vm5585_vm5, %v5671_v15, %v8352_v19  ;;  %v3537_v11 = vrot.slane %v3536_v49, 1  ;;  %v3556_v29 = vrot.slane %v3555_v42, 2  ;;  %v11184_v19 = vld [vmem:[#allocation54_spill] sm:$0xff]  ;;  %v8474_v45 = vpop.f32.mrb[90].mxu1 }
 0x1e8   : > { %v3551_v30 = vrot.slane %v3550_v38, 1  ;;  %v3543_v27 = vadd.f32 %v3542_v13, %v3541_v34  ;;  %2447 = vmatprep.mubr.f32.mxu1 %v11058_v53  ;;  %v5658_v55 = vsel %vm5585_vm5, %v5657_v36, %v8372_v0  ;;  %v8469_v7 = vrot.slane %v11093_v5, 6  ;;  %v8476_v34 = vpop.f32.mrb[92].mxu0  ;;  %v548_v0 = vld [vmem:[%s7003_s15 + $0x318] sm:$0xff] }
 0x1e9   : > { %v5685_v48 = vrot.slane %v5115_v21, 3  ;;  %6444 = vmatmul.mubr.msk.f32.gmra.mrb[196].mxu0 %vm577_vm0, %v547_v60  ;;  %v3538_v41 = vadd.f32 %v3537_v11, %v3536_v49  ;;  %v2748_v15 = vmul.f32 %v11184_v19, %v7297_v9  ;;  %v3557_v36 = vadd.f32 %v3556_v29, %v3555_v42  ;;  %v11185_v21 = vld [vmem:[#allocation74_spill] sm:$0xff]  ;;  %v8491_v19 = vpop.f32.mrb[93].mxu0  ;;  %v11188_v29 = vld [vmem:[#allocation75_spill] sm:$0xff] }
 0x1ea   : > { %11183 = vst [vmem:[#allocation53_spill] sm:$0xff] %v8469_v7  ;;  %v3552_v58 = vadd.f32 %v3551_v30, %v3550_v38  ;;  %v3544_v23 = vrot.slane %v3543_v27, 1  ;;  %1620 = vmatprep.mubr.f32.mxu0 %v11058_v53  ;;  %v2750_v49 = vmul.f32 %v11185_v21, %v7304_v16  ;;  %v11186_v38 = vld [vmem:[#allocation73_spill] sm:$0xff]  ;;  %v8488_v30 = vpop.f32.mrb[91].mxu1  ;;  %11187 = vst [vmem:[#allocation54_spill] sm:$0xff] %v8491_v19 }
 0x1eb   : > { %v8482_v13 = vsel %vm5585_vm5, %v5685_v48, %v8394_v50  ;;  %v2749_v11 = vmul.f32 %v11186_v38, %v7299_v12  ;;  %6572 = vmatmul.mubr.msk.f32.gmra.mrb[196].mxu1 %vm577_vm0, %v547_v60  ;;  %v5116_v51 = vmul.f32 %v8404_v46, %v3538_v41  ;;  %v2751_v42 = vmul.f32 %v8105_v4, %v7324_v26 }
 0x1ec   : > { %v5118_v56 = vmul.f32 %v8410_v8, %v3552_v58  ;;  %v3545_v50 = vadd.f32 %v3544_v23, %v3543_v27  ;;  %2453 = vmatprep.mubr.f32.mxu1 %v11058_v53  ;;  %v3558_v48 = vrot.slane %v3557_v36, 1  ;;  %v2752_v21 = vmul.f32 %v11188_v29, %v7306_v17  ;;  %v8510_v23 = vpop.f32.mrb[92].mxu1  ;;  %v8512_v8 = vpop.f32.mrb[94].mxu0  ;;  %v549_v29 = vld [vmem:[%s7003_s15 + $0x320] sm:$0xff] }
 0x1ed   : > { %v8501_v38 = vrot.slane %v11090_v43, 7  ;;  %v2754_v60 = vmul.f32 %v8116_v6, %v7312_v20  ;;  %6445 = vmatmul.mubr.msk.f32.gmra.mrb[198].mxu0 %vm577_vm0, %v548_v0  ;;  %v5645_v41 = vrot.slane %v5116_v51, 2  ;;  %v8508_v4 = vrot.slane %v11091_v57, 7  ;;  %11191 = vst [vmem:[#allocation75_spill] sm:$0xff] %v8512_v8  ;;  %v8518_v51 = vpop.f32.mrb[93].mxu1 }
 0x1ee   : > { %v5673_v58 = vrot.slane %v5118_v56, 2  ;;  %v5117_v27 = vmul.f32 %v8422_v52, %v3545_v50  ;;  %1626 = vmatprep.mubr.f32.mxu0 %v11058_v53  ;;  %v3559_v46 = vadd.f32 %v3558_v48, %v3557_v36  ;;  %v3560_v43 = vadd.f32 %v2752_v21, %v2748_v15  ;;  %11192 = vst [vmem:[#allocation113_spill] sm:$0xff] %v8518_v51  ;;  %v8521_v56 = vpop.f32.mrb[95].mxu0 }
 0x1ef   : > { %11189 = vst [vmem:[#allocation74_spill] sm:$0xff] %v8501_v38  ;;  %11190 = vst [vmem:[#allocation73_spill] sm:$0xff] %v8508_v4  ;;  %v3574_v19 = vadd.f32 %v2754_v60, %v2750_v49  ;;  %v2753_v6 = vmul.f32 %v8108_v22, %v7308_v18  ;;  %6573 = vmatmul.mubr.msk.f32.gmra.mrb[198].mxu1 %vm577_vm0, %v548_v0  ;;  %v8524_v50 = vsel %vm5588_vm6, %v5645_v41, %v5644_v54  ;;  %v8545_v60 = vpop.f32.mrb[94].mxu1 }
 0x1f0   : > { %11193 = vst [vmem:[#allocation114_spill] sm:$0xff] %v8521_v56  ;;  %v8527_v52 = vsel %vm5588_vm6, %v5673_v58, %v5672_v1  ;;  %v5659_v57 = vrot.slane %v5117_v27, 2  ;;  %v8530_v15 = vrot.slane %v11092_v2, 7  ;;  %2459 = vmatprep.mubr.f32.mxu1 %v11058_v53  ;;  %v5119_v22 = vmul.f32 %v8469_v7, %v3559_v46  ;;  %11196 = vst [vmem:[#allocation117_spill] sm:$0xff] %v8545_v60  ;;  %v8547_v46 = vpop.f32.mrb[96].mxu0  ;;  %v8551_v27 = vpop.f32.mrb[95].mxu1 }
 0x1f1   : > { %v3561_v36 = vrot.slane %v3560_v43, 4  ;;  %v3575_v49 = vrot.slane %v3574_v19, 4  ;;  %v3567_v0 = vadd.f32 %v2753_v6, %v2749_v11  ;;  %6446 = vmatmul.mubr.msk.f32.gmra.mrb[200].mxu0 %vm577_vm0, %v549_v29  ;;  %v2755_v1 = vmul.f32 %v8122_v33, %v7330_v28  ;;  %11197 = vst [vmem:[#allocation118_spill] sm:$0xff] %v8547_v46  ;;  %v550_v11 = vld [vmem:[%s7003_s15 + $0x328] sm:$0xff]  ;;  %11198 = vst [vmem:[#allocation119_spill] sm:$0xff] %v8551_v27  ;;  %v8554_v33 = vpop.f32.mrb[97].mxu0 }
 0x1f2   : > { %11194 = vst [vmem:[#allocation115_spill] sm:$0xff] %v8530_v15  ;;  %v8536_v54 = vsel %vm5588_vm6, %v5659_v57, %v5658_v55  ;;  %v8541_v48 = vrot.slane %v11093_v5, 7  ;;  %v2756_v21 = vmul.f32 %v8118_v3, %v7297_v9  ;;  %1632 = vmatprep.mubr.f32.mxu0 %v11058_v53  ;;  %v5687_v41 = vrot.slane %v5119_v22, 2  ;;  %11199 = vst [vmem:[#allocation120_spill] sm:$0xff] %v8554_v33  ;;  %v11205_v46 = vld [vmem:[#allocation81_spill] sm:$0xff] }
 0x1f3   : > { %v3562_v58 = vadd.f32 %v3561_v36, %v3560_v43  ;;  %v3576_v57 = vadd.f32 %v3575_v49, %v3574_v19  ;;  %v3568_v55 = vrot.slane %v3567_v0, 4  ;;  %6574 = vmatmul.mubr.msk.f32.gmra.mrb[200].mxu1 %vm577_vm0, %v549_v29  ;;  %v3581_v6 = vadd.f32 %v2755_v1, %v2751_v42  ;;  %v8574_v2 = vpop.f32.mrb[96].mxu1  ;;  %v8576_v33 = vpop.f32.mrb[98].mxu0 }
 0x1f4   : > { %11195 = vst [vmem:[#allocation116_spill] sm:$0xff] %v8541_v48  ;;  %v2758_v3 = vmul.f32 %v8137_v24, %v7304_v16  ;;  %v2757_v7 = vmul.f32 %v8125_v61, %v7299_v12  ;;  %v2759_v22 = vmul.f32 %v8147_v10, %v7324_v26  ;;  %2465 = vmatprep.mubr.f32.mxu1 %v11058_v53  ;;  %v11200_v24 = vld [vmem:[#allocation76_spill] sm:$0xff]  ;;  %v11201_v61 = vld [vmem:[#allocation79_spill] sm:$0xff]  ;;  %v8582_v27 = vpop.f32.mrb[97].mxu1 }
 0x1f5   : > { %v8565_v43 = vsel %vm5588_vm6, %v5687_v41, %v8482_v13  ;;  %v3563_v19 = vrot.slane %v3562_v58, 2  ;;  %v3577_v29 = vrot.slane %v3576_v57, 2  ;;  %v3569_v36 = vadd.f32 %v3568_v55, %v3567_v0  ;;  %6447 = vmatmul.mubr.msk.f32.gmra.mrb[202].mxu0 %vm577_vm0, %v550_v11  ;;  %v11202_v10 = vld [vmem:[#allocation55_spill] sm:$0xff]  ;;  %11203 = vst [vmem:[#allocation76_spill] sm:$0xff] %v8574_v2  ;;  %11204 = vst [vmem:[#allocation79_spill] sm:$0xff] %v8576_v33  ;;  %v551_v13 = vld [vmem:[%s7003_s15 + $0x330] sm:$0xff] }
 0x1f6   : > { %v3582_v42 = vrot.slane %v3581_v6, 4  ;;  %v2760_v49 = vmul.f32 %v11200_v24, %v7306_v17  ;;  %v2762_v1 = vmul.f32 %v11201_v61, %v7312_v20  ;;  %v2761_v5 = vmul.f32 %v11202_v10, %v7308_v18  ;;  %1638 = vmatprep.mubr.f32.mxu0 %v11058_v53  ;;  %11206 = vst [vmem:[#allocation55_spill] sm:$0xff] %v8582_v27  ;;  %v8585_v61 = vpop.f32.mrb[99].mxu0 }
 0x1f7   : > { %v3564_v0 = vadd.f32 %v3563_v19, %v3562_v58  ;;  %v3578_v41 = vadd.f32 %v3577_v29, %v3576_v57  ;;  %v3570_v55 = vrot.slane %v3569_v36, 2  ;;  %v2763_v24 = vmul.f32 %v11205_v46, %v7330_v28  ;;  %6575 = vmatmul.mubr.msk.f32.gmra.mrb[202].mxu1 %vm577_vm0, %v550_v11  ;;  %11207 = vst [vmem:[#allocation81_spill] sm:$0xff] %v8585_v61  ;;  %v552_v29 = vld [vmem:[%s7003_s15 + $0x338] sm:$0xff]  ;;  %v8590_v11 = vpop.f32.mrb[98].mxu1  ;;  %v8592_v61 = vpop.f32.mrb[100].mxu0 }
 0x1f8   : > { %v3583_v10 = vadd.f32 %v3582_v42, %v3581_v6  ;;  %v3588_v2 = vadd.f32 %v2760_v49, %v2756_v21  ;;  %v3602_v56 = vadd.f32 %v2762_v1, %v2758_v3  ;;  %v3595_v33 = vadd.f32 %v2761_v5, %v2757_v7  ;;  %2471 = vmatprep.mubr.f32.mxu1 %v11058_v53  ;;  %v8595_v3 = vpop.f32.mrb[99].mxu1 }
 0x1f9   : > { %v3565_v60 = vrot.slane %v3564_v0, 1  ;;  %v3579_v58 = vrot.slane %v3578_v41, 1  ;;  %v3571_v57 = vadd.f32 %v3570_v55, %v3569_v36  ;;  %v3609_v19 = vadd.f32 %v2763_v24, %v2759_v22  ;;  %6448 = vmatmul.mubr.msk.f32.gmra.mrb[204].mxu0 %vm577_vm0, %v551_v13  ;;  %11208 = vst [vmem:[#allocation121_spill] sm:$0xff] %v8592_v61  ;;  %11209 = vst [vmem:[#allocation122_spill] sm:$0xff] %v8595_v3  ;;  %v8598_v22 = vpop.f32.mrb[101].mxu0  ;;  %v553_v24 = vld [vmem:[%s7003_s15 + $0x340] sm:$0xff] }
 0x1fa   : > { %v3584_v46 = vrot.slane %v3583_v10, 2  ;;  %v3589_v8 = vrot.slane %v3588_v2, 4  ;;  %v3603_v27 = vrot.slane %v3602_v56, 4  ;;  %v3596_v51 = vrot.slane %v3595_v33, 4  ;;  %1644 = vmatprep.mubr.f32.mxu0 %v11058_v53  ;;  %11210 = vst [vmem:[#allocation123_spill] sm:$0xff] %v8598_v22 }
 0x1fb   : > { %v3566_v5 = vadd.f32 %v3565_v60, %v3564_v0  ;;  %v3580_v7 = vadd.f32 %v3579_v58, %v3578_v41  ;;  %v3572_v21 = vrot.slane %v3571_v57, 1  ;;  %v3610_v6 = vrot.slane %v3609_v19, 4  ;;  %6576 = vmatmul.mubr.msk.f32.gmra.mrb[204].mxu1 %vm577_vm0, %v551_v13  ;;  %v8605_v22 = vpop.f32.mrb[100].mxu1 }
 0x1fc   : > { %v3585_v36 = vadd.f32 %v3584_v46, %v3583_v10  ;;  %v3590_v42 = vadd.f32 %v3589_v8, %v3588_v2  ;;  %v3604_v49 = vadd.f32 %v3603_v27, %v3602_v56  ;;  %v3597_v1 = vadd.f32 %v3596_v51, %v3595_v33  ;;  %2477 = vmatprep.mubr.f32.mxu1 %v11058_v53  ;;  %v8607_v2 = vpop.f32.mrb[102].mxu0  ;;  %v8611_v33 = vpop.f32.mrb[101].mxu1 }
 0x1fd   : > { %v5120_v55 = vmul.f32 %v8501_v38, %v3566_v5  ;;  %v5122_v60 = vmul.f32 %v8508_v4, %v3580_v7  ;;  %v3573_v0 = vadd.f32 %v3572_v21, %v3571_v57  ;;  %v3611_v41 = vadd.f32 %v3610_v6, %v3609_v19  ;;  %6449 = vmatmul.mubr.msk.f32.gmra.mrb[206].mxu0 %vm577_vm0, %v552_v29  ;;  %v8614_v10 = vpop.f32.mrb[103].mxu0 }
 0x1fe   : > { %v3586_v58 = vrot.slane %v3585_v36, 1  ;;  %v3591_v61 = vrot.slane %v3590_v42, 2  ;;  %v3605_v13 = vrot.slane %v3604_v49, 2  ;;  %v3598_v3 = vrot.slane %v3597_v1, 2  ;;  %1650 = vmatprep.mubr.f32.mxu0 %v11058_v53  ;;  %11211 = vst [vmem:[#allocation124_spill] sm:$0xff] %v8614_v10  ;;  %v564_v10 = vld [vmem:[%s7003_s15 + $0x398] sm:$0xff] }
 0x1ff   : > { %v5647_v8 = vrot.slane %v5120_v55, 1  ;;  %v5675_v51 = vrot.slane %v5122_v60, 1  ;;  %v5121_v56 = vmul.f32 %v8530_v15, %v3573_v0  ;;  %v3612_v27 = vrot.slane %v3611_v41, 2  ;;  %6577 = vmatmul.mubr.msk.f32.gmra.mrb[206].mxu1 %vm577_vm0, %v552_v29  ;;  %v11212_v29 = vld [vmem:[#allocation60_spill] sm:$0xff]  ;;  %v11213_v0 = vld [vmem:[#allocation61_spill] sm:$0xff] }
 0x200   : > { %v3587_v57 = vadd.f32 %v3586_v58, %v3585_v36  ;;  %v3592_v19 = vadd.f32 %v3591_v61, %v3590_v42  ;;  %v3606_v46 = vadd.f32 %v3605_v13, %v3604_v49  ;;  %v3599_v5 = vadd.f32 %v3598_v3, %v3597_v1  ;;  %2483 = vmatprep.mubr.f32.mxu1 %v11058_v53  ;;  %v8625_v3 = vpop.f32.mrb[102].mxu1  ;;  %v8627_v49 = vpop.f32.mrb[104].mxu0 }
 0x201   : > { %v5648_v7 = vsel %vm5591_vm7, %v5647_v8, %v8524_v50  ;;  %v5676_v21 = vsel %vm5591_vm7, %v5675_v51, %v8527_v52  ;;  %v5661_v6 = vrot.slane %v5121_v56, 1  ;;  %v3613_v55 = vadd.f32 %v3612_v27, %v3611_v41  ;;  %6450 = vmatmul.mubr.msk.f32.gmra.mrb[208].mxu0 %vm577_vm0, %v553_v24  ;;  %11214 = vst [vmem:[#allocation60_spill] sm:$0xff] %v8627_v49  ;;  %v554_v50 = vld [vmem:[%s7003_s15 + $0x348] sm:$0xff]  ;;  %v8633_v13 = vpop.f32.mrb[103].mxu1  ;;  %v8636_v8 = vpop.f32.mrb[105].mxu0  ;;  %v11217_v27 = vld [vmem:[#allocation62_spill] sm:$0xff] }
 0x202   : > { %v6059_v60 = vadd.f32 %v5648_v7, %v11212_v29  ;;  %v6073_v36 = vadd.f32 %v5676_v21, %v11213_v0  ;;  %v5123_v61 = vmul.f32 %v8541_v48, %v3587_v57  ;;  %v3593_v42 = vrot.slane %v3592_v19, 1  ;;  %1656 = vmatprep.mubr.f32.mxu0 %v11058_v53  ;;  %11215 = vst [vmem:[#allocation61_spill] sm:$0xff] %v8633_v13 }
 0x203   : > { %v5662_v52 = vsel %vm5591_vm7, %v5661_v6, %v8536_v54  ;;  %v3607_v1 = vrot.slane %v3606_v46, 1  ;;  %v3600_v41 = vrot.slane %v3599_v5, 1  ;;  %v3614_v58 = vrot.slane %v3613_v55, 1  ;;  %6578 = vmatmul.mubr.msk.f32.gmra.mrb[208].mxu1 %vm577_vm0, %v553_v24  ;;  %11216 = vst [vmem:[#allocation125_spill] sm:$0xff] %v8636_v8  ;;  %v8643_v4 = vpop.f32.mrb[104].mxu1  ;;  %v8645_v38 = vpop.f32.mrb[106].mxu0 }
 0x204   : > { %v6060_v51 = vrot.slane %v6059_v60, 4  ;;  %v6074_v56 = vrot.slane %v6073_v36, 4  ;;  %v6066_v57 = vadd.f32 %v5662_v52, %v11217_v27  ;;  %v5689_v7 = vrot.slane %v5123_v61, 1  ;;  %2489 = vmatprep.mubr.f32.mxu1 %v11058_v53  ;;  %11218 = vst [vmem:[#allocation62_spill] sm:$0xff] %v8643_v4  ;;  %11219 = vst [vmem:[#allocation126_spill] sm:$0xff] %v8645_v38  ;;  %v555_v61 = vld [vmem:[%s7003_s15 + $0x350] sm:$0xff] }
 0x205   : > { %v3594_v21 = vadd.f32 %v3593_v42, %v3592_v19  ;;  %v3608_v29 = vadd.f32 %v3607_v1, %v3606_v46  ;;  %v3601_v54 = vadd.f32 %v3600_v41, %v3599_v5  ;;  %v3615_v6 = vadd.f32 %v3614_v58, %v3613_v55  ;;  %6451 = vmatmul.mubr.msk.f32.gmra.mrb[210].mxu0 %vm577_vm0, %v554_v50  ;;  %v11220_v52 = vld [vmem:[#allocation63_spill] sm:$0xff]  ;;  %v11221_v46 = vld [vmem:[#allocation8_spill] sm:$0xff]  ;;  %v11222_v55 = vld [vmem:[#allocation9_spill] sm:$0xff]  ;;  %v8659_v1 = vpop.f32.mrb[105].mxu1 }
 0x206   : > { %v6061_v0 = vadd.f32 %v6060_v51, %v6059_v60  ;;  %v6075_v48 = vadd.f32 %v6074_v56, %v6073_v36  ;;  %v6067_v15 = vrot.slane %v6066_v57, 4  ;;  %v5690_v24 = vsel %vm5591_vm7, %v5689_v7, %v8565_v43  ;;  %1662 = vmatprep.mubr.f32.mxu0 %v11058_v53  ;;  %v11223_v60 = vld [vmem:[#allocation10_spill] sm:$0xff]  ;;  %11224 = vst [vmem:[#allocation63_spill] sm:$0xff] %v8659_v1  ;;  %v8662_v43 = vpop.f32.mrb[107].mxu0  ;;  %v11226_v56 = vld [vmem:[#allocation12_spill] sm:$0xff] }
 0x207   : > { %v6080_v19 = vadd.f32 %v5690_v24, %v11220_v52  ;;  %v8651_v5 = vmul.f32 %v3594_v21, %v11221_v46  ;;  %v8654_v42 = vmul.f32 %v3608_v29, %v11222_v55  ;;  %v8657_v36 = vmul.f32 %v3601_v54, %v11223_v60  ;;  %6579 = vmatmul.mubr.msk.f32.gmra.mrb[210].mxu1 %vm577_vm0, %v554_v50  ;;  %v11227_v21 = vld [vmem:[#allocation80_spill] sm:$0xff]  ;;  %v11229_v50 = vld [vmem:[#allocation82_spill] sm:$0xff]  ;;  %v8679_v46 = vpop.f32.mrb[108].mxu0 }
 0x208   : > { %11225 = vst [vmem:[#allocation127_spill] sm:$0xff] %v8662_v43  ;;  %v6062_v41 = vrot.slane %v6061_v0, 2  ;;  %v6076_v58 = vrot.slane %v6075_v48, 2  ;;  %v6068_v51 = vadd.f32 %v6067_v15, %v6066_v57  ;;  %v8665_v27 = vmul.f32 %v3615_v6, %v11226_v56  ;;  %2495 = vmatprep.mubr.f32.mxu1 %v11058_v53  ;;  %v11228_v54 = vld [vmem:[#allocation84_spill] sm:$0xff]  ;;  %v8677_v56 = vpop.f32.mrb[106].mxu1 }
 0x209   : > { %v6081_v7 = vrot.slane %v6080_v19, 4  ;;  %v2764_v29 = vmul.f32 %v11227_v21, %v7297_v9  ;;  %v2766_v24 = vmul.f32 %v11228_v54, %v7304_v16  ;;  %v2765_v52 = vmul.f32 %v11229_v50, %v7299_v12  ;;  %6452 = vmatmul.mubr.msk.f32.gmra.mrb[212].mxu0 %vm577_vm0, %v555_v61  ;;  %v11230_v57 = vld [vmem:[#allocation56_spill] sm:$0xff]  ;;  %11231 = vst [vmem:[#allocation80_spill] sm:$0xff] %v8677_v56  ;;  %v556_v21 = vld [vmem:[%s7003_s15 + $0x358] sm:$0xff]  ;;  %v11233_v54 = vld [vmem:[#allocation85_spill] sm:$0xff] }
 0x20a   : > { %v6063_v60 = vadd.f32 %v6062_v41, %v6061_v0  ;;  %v6077_v55 = vadd.f32 %v6076_v58, %v6075_v48  ;;  %v6069_v15 = vrot.slane %v6068_v51, 2  ;;  %v2767_v6 = vmul.f32 %v11230_v57, %v7324_v26  ;;  %11232 = vst [vmem:[#allocation84_spill] sm:$0xff] %v8679_v46  ;;  %1668 = vmatprep.mubr.f32.mxu0 %v11058_v53  ;;  %v11234_v50 = vld [vmem:[#allocation57_spill] sm:$0xff]  ;;  %v11235_v48 = vld [vmem:[#allocation87_spill] sm:$0xff]  ;;  %v8689_v41 = vpop.f32.mrb[107].mxu1  ;;  %v8692_v58 = vpop.f32.mrb[109].mxu0 }
 0x20b   : > { %v6082_v43 = vadd.f32 %v6081_v7, %v6080_v19  ;;  %v2768_v38 = vmul.f32 %v11233_v54, %v7306_v17  ;;  %v2770_v1 = vmul.f32 %v11234_v50, %v7312_v20  ;;  %v2769_v0 = vmul.f32 %v11235_v48, %v7308_v18  ;;  %11236 = vst [vmem:[#allocation82_spill] sm:$0xff] %v8689_v41  ;;  %v11238_v19 = vld [vmem:[#allocation89_spill] sm:$0xff]  ;;  %v8702_v49 = vpop.f32.mrb[108].mxu1 }
 0x20c   : > { %6580 = vmatmul.mubr.msk.f32.gmra.mrb[212].mxu1 %vm577_vm0, %v555_v61  ;;  %11237 = vst [vmem:[#allocation56_spill] sm:$0xff] %v8692_v58  ;;  %v6064_v57 = vrot.slane %v6063_v60, 1  ;;  %v6078_v46 = vrot.slane %v6077_v55, 1  ;;  %v6070_v56 = vadd.f32 %v6069_v15, %v6068_v51  ;;  %v2771_v7 = vmul.f32 %v11238_v19, %v7330_v28  ;;  %11241 = vst [vmem:[#allocation87_spill] sm:$0xff] %v8702_v49  ;;  %v8704_v51 = vpop.f32.mrb[110].mxu0  ;;  %v557_v15 = vld [vmem:[%s7003_s15 + $0x360] sm:$0xff] }
 0x20d   : > { %2501 = vmatprep.mubr.f32.mxu1 %v11058_v53  ;;  %v6083_v54 = vrot.slane %v6082_v43, 2  ;;  %v3616_v50 = vadd.f32 %v2768_v38, %v2764_v29  ;;  %v3630_v8 = vadd.f32 %v2770_v1, %v2766_v24  ;;  %v3623_v4 = vadd.f32 %v2769_v0, %v2765_v52  ;;  %6453 = vmatmul.mubr.msk.f32.gmra.mrb[214].mxu0 %vm577_vm0, %v556_v21  ;;  %v8708_v29 = vpop.f32.mrb[109].mxu1  ;;  %v11246_v24 = vld [vmem:[#allocation59_spill] sm:$0xff] }
 0x20e   : > { %v8698_v48 = vadd.f32 %v6064_v57, %v6063_v60  ;;  %v8700_v61 = vadd.f32 %v6078_v46, %v6077_v55  ;;  %v6071_v58 = vrot.slane %v6070_v56, 1  ;;  %v3637_v41 = vadd.f32 %v2771_v7, %v2767_v6  ;;  %11242 = vst [vmem:[#allocation89_spill] sm:$0xff] %v8704_v51  ;;  %1674 = vmatprep.mubr.f32.mxu0 %v11058_v53  ;;  %v8711_v60 = vpop.f32.mrb[111].mxu0  ;;  %v11247_v6 = vld [vmem:[#allocation92_spill] sm:$0xff] }
 0x20f   : > { %v6084_v19 = vadd.f32 %v6083_v54, %v6082_v43  ;;  %v3617_v13 = vrot.slane %v3616_v50, 4  ;;  %v3631_v38 = vrot.slane %v3630_v8, 4  ;;  %v3624_v1 = vrot.slane %v3623_v4, 4  ;;  %11243 = vst [vmem:[#allocation128_spill] sm:$0xff] %v8708_v29  ;;  %11244 = vst [vmem:[#allocation129_spill] sm:$0xff] %v8711_v60  ;;  %v8727_v60 = vpop.f32.mrb[110].mxu1 }
 0x210   : > { %11239 = vst [vmem:[#allocation85_spill] sm:$0xff] %v8698_v48  ;;  %11240 = vst [vmem:[#allocation57_spill] sm:$0xff] %v8700_v61  ;;  %6581 = vmatmul.mubr.msk.f32.gmra.mrb[214].mxu1 %vm577_vm0, %v556_v21  ;;  %v8713_v46 = vadd.f32 %v6071_v58, %v6070_v56  ;;  %v3638_v55 = vrot.slane %v3637_v41, 4  ;;  %v2772_v52 = vmul.f32 %v11246_v24, %v7297_v9  ;;  %v11248_v56 = vld [vmem:[#allocation90_spill] sm:$0xff]  ;;  %v11250_v24 = vld [vmem:[#allocation93_spill] sm:$0xff] }
 0x211   : > { %v2774_v0 = vmul.f32 %v11247_v6, %v7304_v16  ;;  %2507 = vmatprep.mubr.f32.mxu1 %v11058_v53  ;;  %v6085_v43 = vrot.slane %v6084_v19, 1  ;;  %v3618_v57 = vadd.f32 %v3617_v13, %v3616_v50  ;;  %v3632_v7 = vadd.f32 %v3631_v38, %v3630_v8  ;;  %6454 = vmatmul.mubr.msk.f32.gmra.mrb[216].mxu0 %vm577_vm0, %v557_v15  ;;  %v11249_v61 = vld [vmem:[#allocation94_spill] sm:$0xff]  ;;  %v8729_v6 = vpop.f32.mrb[112].mxu0  ;;  %v558_v13 = vld [vmem:[%s7003_s15 + $0x368] sm:$0xff]  ;;  %v8735_v38 = vpop.f32.mrb[111].mxu1  ;;  %v11264_v29 = vld [vmem:[#allocation15_spill] sm:$0xff] }
 0x212   : > { %11245 = vst [vmem:[#allocation130_spill] sm:$0xff] %v8713_v46  ;;  %v3625_v54 = vadd.f32 %v3624_v1, %v3623_v4  ;;  %v3639_v21 = vadd.f32 %v3638_v55, %v3637_v41  ;;  %v2773_v58 = vmul.f32 %v11248_v56, %v7299_v12  ;;  %v2775_v48 = vmul.f32 %v11249_v61, %v7324_v26  ;;  %v8738_v61 = vpop.f32.mrb[113].mxu0 }
 0x213   : > { %v2776_v46 = vmul.f32 %v11250_v24, %v7306_v17  ;;  %11251 = vst [vmem:[#allocation59_spill] sm:$0xff] %v8727_v60  ;;  %11252 = vst [vmem:[#allocation92_spill] sm:$0xff] %v8729_v6  ;;  %1680 = vmatprep.mubr.f32.mxu0 %v11058_v53  ;;  %v8733_v4 = vadd.f32 %v6085_v43, %v6084_v19  ;;  %v3619_v8 = vrot.slane %v3618_v57, 2  ;;  %v3633_v41 = vrot.slane %v3632_v7, 2  ;;  %v11256_v24 = vld [vmem:[#allocation95_spill] sm:$0xff]  ;;  %v8748_v60 = vpop.f32.mrb[112].mxu1 }
 0x214   : > { %v3626_v50 = vrot.slane %v3625_v54, 2  ;;  %11254 = vst [vmem:[#allocation94_spill] sm:$0xff] %v8735_v38  ;;  %6582 = vmatmul.mubr.msk.f32.gmra.mrb[216].mxu1 %vm577_vm0, %v557_v15  ;;  %11255 = vst [vmem:[#allocation93_spill] sm:$0xff] %v8738_v61  ;;  %v3640_v1 = vrot.slane %v3639_v21, 2  ;;  %v2778_v56 = vmul.f32 %v8273_v39, %v7312_v20  ;;  %v2777_v6 = vmul.f32 %v11256_v24, %v7308_v18  ;;  %v8750_v39 = vpop.f32.mrb[114].mxu0  ;;  %v559_v24 = vld [vmem:[%s7003_s15 + $0x370] sm:$0xff] }
 0x215   : > { %11253 = vst [vmem:[#allocation90_spill] sm:$0xff] %v8733_v4  ;;  %v3644_v55 = vadd.f32 %v2776_v46, %v2772_v52  ;;  %2513 = vmatprep.mubr.f32.mxu1 %v11058_v53  ;;  %v3620_v19 = vadd.f32 %v3619_v8, %v3618_v57  ;;  %v3634_v43 = vadd.f32 %v3633_v41, %v3632_v7  ;;  %11257 = vst [vmem:[#allocation95_spill] sm:$0xff] %v8748_v60  ;;  %v8754_v8 = vpop.f32.mrb[113].mxu1 }
 0x216   : > { %v3627_v4 = vadd.f32 %v3626_v50, %v3625_v54  ;;  %v2779_v38 = vmul.f32 %v8280_v37, %v7330_v28  ;;  %6455 = vmatmul.mubr.msk.f32.gmra.mrb[218].mxu0 %vm577_vm0, %v558_v13  ;;  %v3641_v15 = vadd.f32 %v3640_v1, %v3639_v21  ;;  %v3658_v46 = vadd.f32 %v2778_v56, %v2774_v0  ;;  %v8757_v37 = vpop.f32.mrb[115].mxu0 }
 0x217   : > { %v3645_v61 = vrot.slane %v3644_v55, 4  ;;  %v3651_v52 = vadd.f32 %v2777_v6, %v2773_v58  ;;  %11258 = vst [vmem:[#allocation131_spill] sm:$0xff] %v8750_v39  ;;  %1686 = vmatprep.mubr.f32.mxu0 %v11058_v53  ;;  %v3621_v51 = vrot.slane %v3620_v19, 1  ;;  %v3635_v57 = vrot.slane %v3634_v43, 1  ;;  %11259 = vst [vmem:[#allocation132_spill] sm:$0xff] %v8754_v8 }
 0x218   : > { %v3628_v7 = vrot.slane %v3627_v4, 1  ;;  %v3665_v54 = vadd.f32 %v2779_v38, %v2775_v48  ;;  %6583 = vmatmul.mubr.msk.f32.gmra.mrb[218].mxu1 %vm577_vm0, %v558_v13  ;;  %11260 = vst [vmem:[#allocation133_spill] sm:$0xff] %v8757_v37  ;;  %v3642_v21 = vrot.slane %v3641_v15, 1  ;;  %v3659_v58 = vrot.slane %v3658_v46, 4  ;;  %v8761_v13 = vpop.f32.mrb[114].mxu1  ;;  %v8763_v37 = vpop.f32.mrb[116].mxu0 }
 0x219   : > { %v3646_v0 = vadd.f32 %v3645_v61, %v3644_v55  ;;  %v3652_v6 = vrot.slane %v3651_v52, 4  ;;  %2519 = vmatprep.mubr.f32.mxu1 %v11058_v53  ;;  %v3622_v41 = vadd.f32 %v3621_v51, %v3620_v19  ;;  %v3636_v50 = vadd.f32 %v3635_v57, %v3634_v43  ;;  %11261 = vst [vmem:[#allocation134_spill] sm:$0xff] %v8761_v13  ;;  %v560_v61 = vld [vmem:[%s7003_s15 + $0x378] sm:$0xff]  ;;  %v11263_v55 = vld [vmem:[#allocation14_spill] sm:$0xff]  ;;  %v11265_v19 = vld [vmem:[#allocation16_spill] sm:$0xff]  ;;  %v8770_v57 = vpop.f32.mrb[115].mxu1 }
 0x21a   : > { %v3629_v1 = vadd.f32 %v3628_v7, %v3627_v4  ;;  %v3666_v56 = vrot.slane %v3665_v54, 4  ;;  %6456 = vmatmul.mubr.msk.f32.gmra.mrb[220].mxu0 %vm577_vm0, %v559_v24  ;;  %v3643_v48 = vadd.f32 %v3642_v21, %v3641_v15  ;;  %v3660_v39 = vadd.f32 %v3659_v58, %v3658_v46  ;;  %11262 = vst [vmem:[#allocation135_spill] sm:$0xff] %v8763_v37  ;;  %v8773_v15 = vpop.f32.mrb[117].mxu0  ;;  %v11268_v46 = vld [vmem:[#allocation17_spill] sm:$0xff] }
 0x21b   : > { %v3647_v38 = vrot.slane %v3646_v0, 2  ;;  %v3653_v8 = vadd.f32 %v3652_v6, %v3651_v52  ;;  %1692 = vmatprep.mubr.f32.mxu0 %v11058_v53  ;;  %v5128_v60 = vmul.f32 %v11263_v55, %v3622_v41  ;;  %v5130_v51 = vmul.f32 %v11264_v29, %v3636_v50  ;;  %11266 = vst [vmem:[#allocation136_spill] sm:$0xff] %v8770_v57 }
 0x21c   : > { %v5129_v4 = vmul.f32 %v11265_v19, %v3629_v1  ;;  %v3667_v43 = vadd.f32 %v3666_v56, %v3665_v54  ;;  %6584 = vmatmul.mubr.msk.f32.gmra.mrb[220].mxu1 %vm577_vm0, %v559_v24  ;;  %11267 = vst [vmem:[#allocation137_spill] sm:$0xff] %v8773_v15  ;;  %v5131_v52 = vmul.f32 %v11268_v46, %v3643_v48  ;;  %v3661_v21 = vrot.slane %v3660_v39, 2  ;;  %v8778_v19 = vpop.f32.mrb[116].mxu1  ;;  %v8780_v55 = vpop.f32.mrb[118].mxu0  ;;  %v11278_v46 = vld [vmem:[#allocation100_spill] sm:$0xff] }
 0x21d   : > { %v3648_v7 = vadd.f32 %v3647_v38, %v3646_v0  ;;  %v3654_v58 = vrot.slane %v3653_v8, 2  ;;  %2525 = vmatprep.mubr.f32.mxu1 %v11058_v53  ;;  %v5691_v6 = vrot.slane %v5128_v60, 7  ;;  %v5719_v41 = vrot.slane %v5130_v51, 7  ;;  %11269 = vst [vmem:[#allocation138_spill] sm:$0xff] %v8778_v19  ;;  %11270 = vst [vmem:[#allocation139_spill] sm:$0xff] %v8780_v55  ;;  %v561_v0 = vld [vmem:[%s7003_s15 + $0x380] sm:$0xff] }
 0x21e   : > { %v5705_v50 = vrot.slane %v5129_v4, 7  ;;  %v3668_v29 = vrot.slane %v3667_v43, 2  ;;  %6457 = vmatmul.mubr.msk.f32.gmra.mrb[222].mxu0 %vm577_vm0, %v560_v61  ;;  %v5733_v54 = vrot.slane %v5131_v52, 7  ;;  %v3662_v56 = vadd.f32 %v3661_v21, %v3660_v39  ;;  %v8790_v4 = vpop.f32.mrb[117].mxu1  ;;  %v8793_v39 = vpop.f32.mrb[119].mxu0 }
 0x21f   : > { %v3649_v1 = vrot.slane %v3648_v7, 1  ;;  %v3655_v24 = vadd.f32 %v3654_v58, %v3653_v8  ;;  %1698 = vmatprep.mubr.f32.mxu0 %v11058_v53  ;;  %v5692_v48 = vsel %vm5573_vm1, %v5691_v6, %v8651_v5  ;;  %v5720_v60 = vsel %vm5573_vm1, %v5719_v41, %v8654_v42  ;;  %11271 = vst [vmem:[#allocation140_spill] sm:$0xff] %v8790_v4  ;;  %v11274_v6 = vld [vmem:[#allocation98_spill] sm:$0xff] }
 0x220   : > { %v5706_v38 = vsel %vm5573_vm1, %v5705_v50, %v8657_v36  ;;  %v3669_v51 = vadd.f32 %v3668_v29, %v3667_v43  ;;  %6585 = vmatmul.mubr.msk.f32.gmra.mrb[222].mxu1 %vm577_vm0, %v560_v61  ;;  %11272 = vst [vmem:[#allocation141_spill] sm:$0xff] %v8793_v39  ;;  %v5734_v8 = vsel %vm5573_vm1, %v5733_v54, %v8665_v27  ;;  %v3663_v21 = vrot.slane %v3662_v56, 1  ;;  %v11273_v43 = vld [vmem:[#allocation18_spill] sm:$0xff]  ;;  %v8808_v50 = vpop.f32.mrb[118].mxu1  ;;  %v8810_v54 = vpop.f32.mrb[120].mxu0 }
 0x221   : > { %v3650_v52 = vadd.f32 %v3649_v1, %v3648_v7  ;;  %v3656_v5 = vrot.slane %v3655_v24, 1  ;;  %2531 = vmatprep.mubr.f32.mxu1 %v11058_v53  ;;  %v2780_v36 = vmul.f32 %v8275_v25, %v7297_v9  ;;  %v2782_v29 = vmul.f32 %v8292_v40, %v7304_v16  ;;  %11275 = vst [vmem:[#allocation98_spill] sm:$0xff] %v8808_v50  ;;  %v562_v25 = vld [vmem:[%s7003_s15 + $0x388] sm:$0xff]  ;;  %v11277_v1 = vld [vmem:[#allocation96_spill] sm:$0xff] }
 0x222   : > { %v3670_v42 = vrot.slane %v3669_v51, 1  ;;  %v2781_v61 = vmul.f32 %v8283_v35, %v7299_v12  ;;  %6458 = vmatmul.mubr.msk.f32.gmra.mrb[224].mxu0 %vm577_vm0, %v561_v0  ;;  %v3664_v7 = vadd.f32 %v3663_v21, %v3662_v56  ;;  %v2783_v41 = vmul.f32 %v11274_v6, %v7324_v26  ;;  %11276 = vst [vmem:[#allocation142_spill] sm:$0xff] %v8810_v54  ;;  %v11279_v56 = vld [vmem:[#allocation99_spill] sm:$0xff]  ;;  %v8823_v21 = vpop.f32.mrb[121].mxu0 }
 0x223   : > { %v5132_v27 = vmul.f32 %v11273_v43, %v3650_v52  ;;  %v3657_v58 = vadd.f32 %v3656_v5, %v3655_v24  ;;  %1704 = vmatprep.mubr.f32.mxu0 %v11058_v53  ;;  %v2784_v35 = vmul.f32 %v11277_v1, %v7306_v17  ;;  %v2786_v39 = vmul.f32 %v11278_v46, %v7312_v20  ;;  %v8820_v52 = vpop.f32.mrb[119].mxu1  ;;  %v11282_v6 = vld [vmem:[#allocation19_spill] sm:$0xff]  ;;  %v11285_v46 = vld [vmem:[#allocation21_spill] sm:$0xff] }
 0x224   : > { %v3671_v40 = vadd.f32 %v3670_v42, %v3669_v51  ;;  %v2785_v24 = vmul.f32 %v11279_v56, %v7308_v18  ;;  %11280 = vst [vmem:[#allocation96_spill] sm:$0xff] %v8820_v52  ;;  %6586 = vmatmul.mubr.msk.f32.gmra.mrb[224].mxu1 %vm577_vm0, %v561_v0  ;;  %11281 = vst [vmem:[#allocation100_spill] sm:$0xff] %v8823_v21  ;;  %v5134_v43 = vmul.f32 %v11282_v6, %v3664_v7  ;;  %v11283_v51 = vld [vmem:[#allocation20_spill] sm:$0xff]  ;;  %v11284_v1 = vld [vmem:[#allocation103_spill] sm:$0xff]  ;;  %v8835_v6 = vpop.f32.mrb[120].mxu1 }
 0x225   : > { %v5693_v5 = vrot.slane %v5132_v27, 6  ;;  %v5133_v42 = vmul.f32 %v11283_v51, %v3657_v58  ;;  %v2787_v54 = vmul.f32 %v11284_v1, %v7330_v28  ;;  %2537 = vmatprep.mubr.f32.mxu1 %v11058_v53  ;;  %v3672_v56 = vadd.f32 %v2784_v35, %v2780_v36  ;;  %11286 = vst [vmem:[#allocation99_spill] sm:$0xff] %v8835_v6  ;;  %v563_v58 = vld [vmem:[%s7003_s15 + $0x390] sm:$0xff]  ;;  %v8839_v36 = vpop.f32.mrb[121].mxu1 }
 0x226   : > { %v5135_v50 = vmul.f32 %v11285_v46, %v3671_v40  ;;  %v3686_v55 = vadd.f32 %v2786_v39, %v2782_v29  ;;  %v3679_v52 = vadd.f32 %v2785_v24, %v2781_v61  ;;  %6459 = vmatmul.mubr.msk.f32.gmra.mrb[226].mxu0 %vm577_vm0, %v562_v25  ;;  %v5721_v27 = vrot.slane %v5134_v43, 6  ;;  %11287 = vst [vmem:[#allocation103_spill] sm:$0xff] %v8839_v36  ;;  %v11288_v61 = vld [vmem:[#allocation101_spill] sm:$0xff] }
 0x227   : > { %v8833_v0 = vsel %vm5576_vm2, %v5693_v5, %v5692_v48  ;;  %v5707_v21 = vrot.slane %v5133_v42, 6  ;;  %v3693_v7 = vadd.f32 %v2787_v54, %v2783_v41  ;;  %1710 = vmatprep.mubr.f32.mxu0 %v11058_v53  ;;  %v3673_v51 = vrot.slane %v3672_v56, 4  ;;  %v8850_v41 = vpop.f32.mrb[122].mxu0  ;;  %v11292_v5 = vld [vmem:[#allocation104_spill] sm:$0xff]  ;;  %v8865_v46 = vpop.f32.mrb[122].mxu1 }
 0x228   : > { %v5735_v1 = vrot.slane %v5135_v50, 6  ;;  %v3687_v4 = vrot.slane %v3686_v55, 4  ;;  %v3680_v40 = vrot.slane %v3679_v52, 4  ;;  %6587 = vmatmul.mubr.msk.f32.gmra.mrb[226].mxu1 %vm577_vm0, %v562_v25  ;;  %v8843_v39 = vsel %vm5576_vm2, %v5721_v27, %v5720_v60  ;;  %11289 = vst [vmem:[#allocation101_spill] sm:$0xff] %v8850_v41  ;;  %v8856_v24 = vpop.f32.mrb[123].mxu0  ;;  %v11293_v27 = vld [vmem:[#allocation67_spill] sm:$0xff] }
 0x229   : > { %v8846_v48 = vsel %vm5576_vm2, %v5707_v21, %v5706_v38  ;;  %v3694_v29 = vrot.slane %v3693_v7, 4  ;;  %v2788_v43 = vmul.f32 %v11288_v61, %v7297_v9  ;;  %2543 = vmatprep.mubr.f32.mxu1 %v11058_v53  ;;  %v3674_v54 = vadd.f32 %v3673_v51, %v3672_v56  ;;  %11290 = vst [vmem:[#allocation143_spill] sm:$0xff] %v8856_v24  ;;  %v11291_v38 = vld [vmem:[#allocation105_spill] sm:$0xff]  ;;  %v8870_v56 = vpop.f32.mrb[123].mxu1  ;;  %v8879_v24 = vpop.f32.mrb[124].mxu0 }
 0x22a   : > { %v8854_v50 = vsel %vm5576_vm2, %v5735_v1, %v5734_v8  ;;  %v3688_v35 = vadd.f32 %v3687_v4, %v3686_v55  ;;  %v3681_v25 = vadd.f32 %v3680_v40, %v3679_v52  ;;  %6460 = vmatmul.mubr.msk.f32.gmra.mrb[228].mxu0 %vm577_vm0, %v563_v58  ;;  %v2790_v21 = vmul.f32 %v11291_v38, %v7304_v16  ;;  %v11295_v52 = vld [vmem:[#allocation106_spill] sm:$0xff] }
 0x22b   : > { %v3695_v60 = vadd.f32 %v3694_v29, %v3693_v7  ;;  %v2789_v42 = vmul.f32 %v11292_v5, %v7299_v12  ;;  %v2791_v61 = vmul.f32 %v11293_v27, %v7324_v26  ;;  %11294 = vst [vmem:[#allocation105_spill] sm:$0xff] %v8865_v46  ;;  %1716 = vmatprep.mubr.f32.mxu0 %v11058_v53  ;;  %v3675_v55 = vrot.slane %v3674_v54, 2  ;;  %v11297_v1 = vld [vmem:[#allocation66_spill] sm:$0xff]  ;;  %v11298_v29 = vld [vmem:[#allocation107_spill] sm:$0xff]  ;;  %v11299_v5 = vld [vmem:[#allocation68_spill] sm:$0xff] }
 0x22c   : > { %v3689_v4 = vrot.slane %v3688_v35, 2  ;;  %v3682_v8 = vrot.slane %v3681_v25, 2  ;;  %v2792_v51 = vmul.f32 %v11295_v52, %v7306_v17  ;;  %11296 = vst [vmem:[#allocation104_spill] sm:$0xff] %v8870_v56  ;;  %6588 = vmatmul.mubr.msk.f32.gmra.mrb[228].mxu1 %vm577_vm0, %v563_v58  ;;  %v2794_v40 = vmul.f32 %v11297_v1, %v7312_v20  ;;  %11300 = vst [vmem:[#allocation67_spill] sm:$0xff] %v8879_v24  ;;  %v8882_v24 = vpop.f32.mrb[124].mxu1 }
 0x22d   : > { %v3696_v7 = vrot.slane %v3695_v60, 2  ;;  %v2793_v38 = vmul.f32 %v11298_v29, %v7308_v18  ;;  %v2795_v27 = vmul.f32 %v11299_v5, %v7330_v28  ;;  %2549 = vmatprep.mubr.f32.mxu1 %v11058_v53  ;;  %v3676_v46 = vadd.f32 %v3675_v55, %v3674_v54 }
 0x22e   : > { %v3690_v52 = vadd.f32 %v3689_v4, %v3688_v35  ;;  %v3683_v56 = vadd.f32 %v3682_v8, %v3681_v25  ;;  %v3700_v41 = vadd.f32 %v2792_v51, %v2788_v43  ;;  %v3714_v36 = vadd.f32 %v2794_v40, %v2790_v21  ;;  %v8885_v43 = vpop.f32.mrb[125].mxu0  ;;  %6461 = vmatmul.mubr.msk.f32.gmra.mrb[230].mxu0 %vm577_vm0, %v564_v10  ;;  %v11301_v8 = vld [vmem:[#allocation22_spill] sm:$0xff] }
 0x22f   : > { %v3697_v58 = vadd.f32 %v3696_v7, %v3695_v60  ;;  %v3707_v6 = vadd.f32 %v2793_v38, %v2789_v42  ;;  %v3721_v15 = vadd.f32 %v2795_v27, %v2791_v61  ;;  %v3677_v1 = vrot.slane %v3676_v46, 1  ;;  %v8888_v60 = vpop.f32.mrb[125].mxu1  ;;  %v11302_v7 = vld [vmem:[#allocation23_spill] sm:$0xff]  ;;  %1722 = vmatprep.mubr.f32.mxu0 %v11058_v53 }
 0x230   : > { %v3691_v19 = vrot.slane %v3690_v52, 1  ;;  %v3684_v37 = vrot.slane %v3683_v56, 1  ;;  %v3701_v29 = vrot.slane %v3700_v41, 4  ;;  %v3715_v13 = vrot.slane %v3714_v36, 4  ;;  %6589 = vmatmul.mubr.msk.f32.gmra.mrb[230].mxu1 %vm577_vm0, %v564_v10  ;;  %v565_v10 = vld [vmem:[%s7003_s15 + $0x3a0] sm:$0xff] }
 0x231   : > { %v3698_v57 = vrot.slane %v3697_v58, 1  ;;  %v3708_v5 = vrot.slane %v3707_v6, 4  ;;  %v3722_v49 = vrot.slane %v3721_v15, 4  ;;  %v3678_v54 = vadd.f32 %v3677_v1, %v3676_v46  ;;  %2555 = vmatprep.mubr.f32.mxu1 %v11058_v53 }
 0x232   : > { %v3692_v35 = vadd.f32 %v3691_v19, %v3690_v52  ;;  %v3685_v55 = vadd.f32 %v3684_v37, %v3683_v56  ;;  %v3702_v25 = vadd.f32 %v3701_v29, %v3700_v41  ;;  %v3716_v42 = vadd.f32 %v3715_v13, %v3714_v36  ;;  %v11303_v19 = vld [vmem:[#allocation24_spill] sm:$0xff]  ;;  %v11304_v56 = vld [vmem:[#allocation25_spill] sm:$0xff]  ;;  %6462 = vmatmul.mubr.msk.f32.gmra.mrb[232].mxu0 %vm577_vm0, %v565_v10 }
 0x233   : > { %v3699_v21 = vadd.f32 %v3698_v57, %v3697_v58  ;;  %v3709_v61 = vadd.f32 %v3708_v5, %v3707_v6  ;;  %v3723_v4 = vadd.f32 %v3722_v49, %v3721_v15  ;;  %v5136_v51 = vmul.f32 %v11301_v8, %v3678_v54  ;;  %v8897_v6 = vpop.f32.mrb[126].mxu0  ;;  %v8899_v49 = vpop.f32.mrb[126].mxu1  ;;  %1728 = vmatprep.mubr.f32.mxu0 %v11058_v53 }
 0x234   : > { %v5138_v46 = vmul.f32 %v11302_v7, %v3692_v35  ;;  %v5137_v37 = vmul.f32 %v11303_v19, %v3685_v55  ;;  %v3703_v41 = vrot.slane %v3702_v25, 2  ;;  %v3717_v57 = vrot.slane %v3716_v42, 2  ;;  %v8902_v58 = vpop.f32.mrb[127].mxu0  ;;  %v8905_v1 = vpop.f32.mrb[127].mxu1  ;;  %6590 = vmatmul.mubr.msk.f32.gmra.mrb[232].mxu1 %vm577_vm0, %v565_v10  ;;  %v11313_v7 = vld [vmem:[#allocation112_spill] sm:$0xff] }
 0x235   : > { %v5139_v40 = vmul.f32 %v11304_v56, %v3699_v21  ;;  %v3710_v13 = vrot.slane %v3709_v61, 2  ;;  %v3724_v36 = vrot.slane %v3723_v4, 2  ;;  %v5695_v15 = vrot.slane %v5136_v51, 5  ;;  %2561 = vmatprep.mubr.f32.mxu1 %v11058_v53  ;;  %v11312_v56 = vld [vmem:[#allocation109_spill] sm:$0xff] }
 0x236   : > { %v5723_v38 = vrot.slane %v5138_v46, 5  ;;  %v5709_v27 = vrot.slane %v5137_v37, 5  ;;  %v3704_v52 = vadd.f32 %v3703_v41, %v3702_v25  ;;  %v3718_v5 = vadd.f32 %v3717_v57, %v3716_v42  ;;  %v8918_v37 = vpop.f32.mrb[128].mxu0  ;;  %v8920_v41 = vpop.f32.mrb[128].mxu1 }
 0x237   : > { %v5737_v29 = vrot.slane %v5139_v40, 5  ;;  %v3711_v54 = vadd.f32 %v3710_v13, %v3709_v61  ;;  %v3725_v35 = vadd.f32 %v3724_v36, %v3723_v4  ;;  %v5696_v55 = vsel %vm5579_vm3, %v5695_v15, %v8833_v0  ;;  %v566_v0 = vld [vmem:[%s7003_s15 + $0x3a8] sm:$0xff]  ;;  %v11307_v36 = vld [vmem:[#allocation71_spill] sm:$0xff]  ;;  %v8929_v15 = vpop.f32.mrb[129].mxu0 }
 0x238   : > { %v5724_v25 = vsel %vm5579_vm3, %v5723_v38, %v8843_v39  ;;  %v5710_v21 = vsel %vm5579_vm3, %v5709_v27, %v8846_v48  ;;  %v3705_v51 = vrot.slane %v3704_v52, 1  ;;  %v3719_v61 = vrot.slane %v3718_v5, 1  ;;  %v11305_v39 = vld [vmem:[#allocation69_spill] sm:$0xff]  ;;  %v11306_v48 = vld [vmem:[#allocation72_spill] sm:$0xff]  ;;  %11308 = vst [vmem:[#allocation106_spill] sm:$0xff] %v8929_v15  ;;  %6463 = vmatmul.mubr.msk.f32.gmra.mrb[234].mxu0 %vm577_vm0, %v566_v0  ;;  %6591 = vmatmul.mubr.msk.f32.gmra.mrb[234].mxu1 %vm577_vm0, %v566_v0 }
 0x239   : > { %v5738_v42 = vsel %vm5579_vm3, %v5737_v29, %v8854_v50  ;;  %v3712_v4 = vrot.slane %v3711_v54, 1  ;;  %v3726_v46 = vrot.slane %v3725_v35, 1  ;;  %v2796_v57 = vmul.f32 %v11305_v39, %v7297_v9  ;;  %v8932_v50 = vpop.f32.mrb[129].mxu1  ;;  %v11311_v39 = vld [vmem:[#allocation26_spill] sm:$0xff]  ;;  %1734 = vmatprep.mubr.f32.mxu0 %v11058_v53  ;;  %2567 = vmatprep.mubr.f32.mxu1 %v11058_v53 }
 0x23a   : > { %v3706_v40 = vadd.f32 %v3705_v51, %v3704_v52  ;;  %v2798_v13 = vmul.f32 %v11306_v48, %v7304_v16  ;;  %v2797_v10 = vmul.f32 %v11307_v36, %v7299_v12  ;;  %11309 = vst [vmem:[#allocation66_spill] sm:$0xff] %v8932_v50  ;;  %v3720_v38 = vadd.f32 %v3719_v61, %v3718_v5  ;;  %v11310_v52 = vld [vmem:[#allocation111_spill] sm:$0xff] }
 0x23b   : > { %v3713_v27 = vadd.f32 %v3712_v4, %v3711_v54  ;;  %v3727_v29 = vadd.f32 %v3726_v46, %v3725_v35  ;;  %v2799_v51 = vmul.f32 %v11310_v52, %v7324_v26  ;;  %v2800_v36 = vmul.f32 %v11312_v56, %v7306_v17  ;;  %v11314_v5 = vld [vmem:[#allocation27_spill] sm:$0xff]  ;;  %v11315_v35 = vld [vmem:[#allocation28_spill] sm:$0xff]  ;;  %v11316_v4 = vld [vmem:[#allocation29_spill] sm:$0xff]  ;;  %v8952_v56 = vpop.f32.mrb[130].mxu1 }
 0x23c   : > { %v5140_v48 = vmul.f32 %v11311_v39, %v3706_v40  ;;  %v2802_v19 = vmul.f32 %v8433_v47, %v7312_v20  ;;  %v2801_v8 = vmul.f32 %v11313_v7, %v7308_v18  ;;  %v5142_v54 = vmul.f32 %v11314_v5, %v3720_v38  ;;  %v8950_v40 = vpop.f32.mrb[130].mxu0  ;;  %11318 = vst [vmem:[#allocation68_spill] sm:$0xff] %v8952_v56  ;;  %v567_v47 = vld [vmem:[%s7003_s15 + $0x3b0] sm:$0xff]  ;;  %v8959_v38 = vpop.f32.mrb[131].mxu1 }
 0x23d   : > { %v5141_v61 = vmul.f32 %v11315_v35, %v3713_v27  ;;  %v5143_v46 = vmul.f32 %v11316_v4, %v3727_v29  ;;  %v2803_v0 = vmul.f32 %v8440_v62, %v7330_v28  ;;  %11317 = vst [vmem:[#allocation107_spill] sm:$0xff] %v8950_v40  ;;  %v3728_v7 = vadd.f32 %v2800_v36, %v2796_v57  ;;  %v8956_v15 = vpop.f32.mrb[131].mxu0 }
 0x23e   : > { %v5697_v52 = vrot.slane %v5140_v48, 4  ;;  %v3742_v39 = vadd.f32 %v2802_v19, %v2798_v13  ;;  %v3735_v50 = vadd.f32 %v2801_v8, %v2797_v10  ;;  %11319 = vst [vmem:[#allocation69_spill] sm:$0xff] %v8956_v15  ;;  %6464 = vmatmul.mubr.msk.f32.gmra.mrb[236].mxu0 %vm577_vm0, %v567_v47  ;;  %11320 = vst [vmem:[#allocation72_spill] sm:$0xff] %v8959_v38  ;;  %v5725_v27 = vrot.slane %v5142_v54, 4  ;;  %v8976_v36 = vpop.f32.mrb[132].mxu0 }
 0x23f   : > { %v5711_v29 = vrot.slane %v5141_v61, 4  ;;  %v5739_v62 = vrot.slane %v5143_v46, 4  ;;  %v3749_v4 = vadd.f32 %v2803_v0, %v2799_v51  ;;  %6592 = vmatmul.mubr.msk.f32.gmra.mrb[236].mxu1 %vm577_vm0, %v567_v47  ;;  %1740 = vmatprep.mubr.f32.mxu0 %v11058_v53  ;;  %v3729_v57 = vrot.slane %v3728_v7, 4  ;;  %11321 = vst [vmem:[#allocation71_spill] sm:$0xff] %v8976_v36 }
 0x240   : > { %v8964_v35 = vsel %vm5582_vm4, %v5697_v52, %v5696_v55  ;;  %v3743_v19 = vrot.slane %v3742_v39, 4  ;;  %v3736_v8 = vrot.slane %v3735_v50, 4  ;;  %2573 = vmatprep.mubr.f32.mxu1 %v11058_v53  ;;  %v8968_v13 = vsel %vm5582_vm4, %v5725_v27, %v5724_v25 }
 0x241   : > { %v8971_v10 = vsel %vm5582_vm4, %v5711_v29, %v5710_v21  ;;  %v8974_v51 = vsel %vm5582_vm4, %v5739_v62, %v5738_v42  ;;  %v3750_v48 = vrot.slane %v3749_v4, 4  ;;  %v3730_v54 = vadd.f32 %v3729_v57, %v3728_v7 }
 0x242   : > { %v3744_v55 = vadd.f32 %v3743_v19, %v3742_v39  ;;  %v3737_v61 = vadd.f32 %v3736_v8, %v3735_v50  ;;  %v2804_v46 = vmul.f32 %v8435_v44, %v7297_v9  ;;  %v2806_v25 = vmul.f32 %v8449_v59, %v7304_v16 }
 0x243   : > { %v3751_v0 = vadd.f32 %v3750_v48, %v3749_v4  ;;  %v2805_v21 = vmul.f32 %v8443_v32, %v7299_v12  ;;  %v2807_v42 = vmul.f32 %v8458_v63, %v7324_v26  ;;  %v3731_v47 = vrot.slane %v3730_v54, 2 }
 0x244   : > { %v3745_v52 = vrot.slane %v3744_v55, 2  ;;  %v3738_v27 = vrot.slane %v3737_v61, 2  ;;  %v2808_v39 = vmul.f32 %v8451_v14, %v7306_v17  ;;  %v2810_v44 = vmul.f32 %v8474_v45, %v7312_v20 }
 0x245   : > { %v3752_v50 = vrot.slane %v3751_v0, 2  ;;  %v2809_v4 = vmul.f32 %v8461_v31, %v7308_v18  ;;  %v2811_v59 = vmul.f32 %v8488_v30, %v7330_v28  ;;  %v3732_v32 = vadd.f32 %v3731_v47, %v3730_v54 }
 0x246   : > { %v3746_v7 = vadd.f32 %v3745_v52, %v3744_v55  ;;  %v3739_v29 = vadd.f32 %v3738_v27, %v3737_v61  ;;  %v3756_v63 = vadd.f32 %v2808_v39, %v2804_v46  ;;  %v3770_v57 = vadd.f32 %v2810_v44, %v2806_v25  ;;  %v8994_v55 = vpop.f32.mrb[132].mxu1  ;;  %v11323_v52 = vld [vmem:[#allocation31_spill] sm:$0xff]  ;;  %v11324_v39 = vld [vmem:[#allocation32_spill] sm:$0xff] }
 0x247   : > { %v3753_v62 = vadd.f32 %v3752_v50, %v3751_v0  ;;  %v3763_v19 = vadd.f32 %v2809_v4, %v2805_v21  ;;  %v3777_v8 = vadd.f32 %v2811_v59, %v2807_v42  ;;  %v3733_v48 = vrot.slane %v3732_v32, 1  ;;  %v568_v21 = vld [vmem:[%s7003_s15 + $0x3b8] sm:$0xff]  ;;  %v11322_v42 = vld [vmem:[#allocation30_spill] sm:$0xff]  ;;  %v9000_v4 = vpop.f32.mrb[133].mxu0 }
 0x248   : > { %v3747_v14 = vrot.slane %v3746_v7, 1  ;;  %v3740_v5 = vrot.slane %v3739_v29, 1  ;;  %v3757_v36 = vrot.slane %v3756_v63, 4  ;;  %v3771_v38 = vrot.slane %v3770_v57, 4  ;;  %6465 = vmatmul.mubr.msk.f32.gmra.mrb[238].mxu0 %vm577_vm0, %v568_v21  ;;  %6593 = vmatmul.mubr.msk.f32.gmra.mrb[238].mxu1 %vm577_vm0, %v568_v21 }
 0x249   : > { %v3754_v45 = vrot.slane %v3753_v62, 1  ;;  %v3764_v15 = vrot.slane %v3763_v19, 4  ;;  %v3778_v31 = vrot.slane %v3777_v8, 4  ;;  %v3734_v56 = vadd.f32 %v3733_v48, %v3732_v32  ;;  %1746 = vmatprep.mubr.f32.mxu0 %v11058_v53  ;;  %2579 = vmatprep.mubr.f32.mxu1 %v11058_v53 }
 0x24a   : > { %v3748_v40 = vadd.f32 %v3747_v14, %v3746_v7  ;;  %v3741_v30 = vadd.f32 %v3740_v5, %v3739_v29  ;;  %v3758_v54 = vadd.f32 %v3757_v36, %v3756_v63  ;;  %v3772_v46 = vadd.f32 %v3771_v38, %v3770_v57  ;;  %v9003_v5 = vpop.f32.mrb[133].mxu1  ;;  %v11325_v36 = vld [vmem:[#allocation33_spill] sm:$0xff]  ;;  %v569_v14 = vld [vmem:[%s7003_s15 + $0x3c0] sm:$0xff] }
 0x24b   : > { %v3755_v61 = vadd.f32 %v3754_v45, %v3753_v62  ;;  %v3765_v0 = vadd.f32 %v3764_v15, %v3763_v19  ;;  %v3779_v25 = vadd.f32 %v3778_v31, %v3777_v8  ;;  %v5144_v47 = vmul.f32 %v11322_v42, %v3734_v56  ;;  %v9009_v8 = vpop.f32.mrb[134].mxu0  ;;  %v9011_v48 = vpop.f32.mrb[134].mxu1 }
 0x24c   : > { %v5146_v27 = vmul.f32 %v11323_v52, %v3748_v40  ;;  %v5145_v50 = vmul.f32 %v11324_v39, %v3741_v30  ;;  %v3759_v44 = vrot.slane %v3758_v54, 2  ;;  %v3773_v15 = vrot.slane %v3772_v46, 2  ;;  %11326 = vst [vmem:[#allocation111_spill] sm:$0xff] %v9011_v48  ;;  %6466 = vmatmul.mubr.msk.f32.gmra.mrb[240].mxu0 %vm577_vm0, %v569_v14  ;;  %6594 = vmatmul.mubr.msk.f32.gmra.mrb[240].mxu1 %vm577_vm0, %v569_v14  ;;  %v570_v39 = vld [vmem:[%s7003_s15 + $0x3c8] sm:$0xff] }
 0x24d   : > { %v5147_v38 = vmul.f32 %v11325_v36, %v3755_v61  ;;  %v3766_v59 = vrot.slane %v3765_v0, 2  ;;  %v3780_v32 = vrot.slane %v3779_v25, 2  ;;  %v5699_v40 = vrot.slane %v5144_v47, 3  ;;  %1752 = vmatprep.mubr.f32.mxu0 %v11058_v53  ;;  %2585 = vmatprep.mubr.f32.mxu1 %v11058_v53 }
 0x24e   : > { %v5727_v56 = vrot.slane %v5146_v27, 3  ;;  %v5713_v7 = vrot.slane %v5145_v50, 3  ;;  %v3760_v29 = vadd.f32 %v3759_v44, %v3758_v54  ;;  %v3774_v62 = vadd.f32 %v3773_v15, %v3772_v46  ;;  %v9020_v54 = vpop.f32.mrb[135].mxu0  ;;  %v9023_v46 = vpop.f32.mrb[135].mxu1  ;;  %v11329_v27 = vld [vmem:[#allocation54_spill] sm:$0xff]  ;;  %v11330_v15 = vld [vmem:[#allocation113_spill] sm:$0xff] }
 0x24f   : > { %v5741_v63 = vrot.slane %v5147_v38, 3  ;;  %v3767_v57 = vadd.f32 %v3766_v59, %v3765_v0  ;;  %v3781_v19 = vadd.f32 %v3780_v32, %v3779_v25  ;;  %v5700_v45 = vsel %vm5585_vm5, %v5699_v40, %v8964_v35  ;;  %11327 = vst [vmem:[#allocation109_spill] sm:$0xff] %v9020_v54  ;;  %11328 = vst [vmem:[#allocation112_spill] sm:$0xff] %v9023_v46  ;;  %v9038_v32 = vpop.f32.mrb[136].mxu0  ;;  %v11332_v40 = vld [vmem:[#allocation34_spill] sm:$0xff] }
 0x250   : > { %v5728_v31 = vsel %vm5585_vm5, %v5727_v56, %v8968_v13  ;;  %v5714_v30 = vsel %vm5585_vm5, %v5713_v7, %v8971_v10  ;;  %v3761_v61 = vrot.slane %v3760_v29, 1  ;;  %v3775_v25 = vrot.slane %v3774_v62, 1  ;;  %11331 = vst [vmem:[#allocation54_spill] sm:$0xff] %v9038_v32  ;;  %v11333_v7 = vld [vmem:[#allocation75_spill] sm:$0xff]  ;;  %v9055_v32 = vpop.f32.mrb[137].mxu0  ;;  %6467 = vmatmul.mubr.msk.f32.gmra.mrb[242].mxu0 %vm577_vm0, %v570_v39  ;;  %6595 = vmatmul.mubr.msk.f32.gmra.mrb[242].mxu1 %vm577_vm0, %v570_v39 }
 0x251   : > { %v5742_v0 = vsel %vm5585_vm5, %v5741_v63, %v8974_v51  ;;  %v3768_v35 = vrot.slane %v3767_v57, 1  ;;  %v3782_v21 = vrot.slane %v3781_v19, 1  ;;  %v2812_v10 = vmul.f32 %v8476_v34, %v7297_v9  ;;  %v11335_v63 = vld [vmem:[#allocation114_spill] sm:$0xff]  ;;  %11341 = vst [vmem:[#allocation75_spill] sm:$0xff] %v9055_v32  ;;  %1758 = vmatprep.mubr.f32.mxu0 %v11058_v53  ;;  %2591 = vmatprep.mubr.f32.mxu1 %v11058_v53 }
 0x252   : > { %v3762_v13 = vadd.f32 %v3761_v61, %v3760_v29  ;;  %v2814_v47 = vmul.f32 %v8510_v23, %v7304_v16  ;;  %v2813_v50 = vmul.f32 %v11329_v27, %v7299_v12  ;;  %v3776_v44 = vadd.f32 %v3775_v25, %v3774_v62  ;;  %v11334_v29 = vld [vmem:[#allocation117_spill] sm:$0xff]  ;;  %v11336_v62 = vld [vmem:[#allocation35_spill] sm:$0xff] }
 0x253   : > { %v3769_v38 = vadd.f32 %v3768_v35, %v3767_v57  ;;  %v3783_v51 = vadd.f32 %v3782_v21, %v3781_v19  ;;  %v2815_v59 = vmul.f32 %v11330_v15, %v7324_v26  ;;  %v2816_v34 = vmul.f32 %v11333_v7, %v7306_v17  ;;  %v11337_v19 = vld [vmem:[#allocation36_spill] sm:$0xff]  ;;  %v11338_v25 = vld [vmem:[#allocation37_spill] sm:$0xff]  ;;  %v11339_v21 = vld [vmem:[#allocation119_spill] sm:$0xff]  ;;  %v9052_v7 = vpop.f32.mrb[136].mxu1 }
 0x254   : > { %v5148_v56 = vmul.f32 %v11332_v40, %v3762_v13  ;;  %v2818_v23 = vmul.f32 %v11334_v29, %v7312_v20  ;;  %v2817_v14 = vmul.f32 %v11335_v63, %v7308_v18  ;;  %v5150_v57 = vmul.f32 %v11336_v62, %v3776_v44  ;;  %11340 = vst [vmem:[#allocation113_spill] sm:$0xff] %v9052_v7  ;;  %v9058_v44 = vpop.f32.mrb[137].mxu1 }
 0x255   : > { %v5149_v61 = vmul.f32 %v11337_v19, %v3769_v38  ;;  %v5151_v35 = vmul.f32 %v11338_v25, %v3783_v51  ;;  %v2819_v27 = vmul.f32 %v11339_v21, %v7330_v28  ;;  %v3784_v13 = vadd.f32 %v2816_v34, %v2812_v10  ;;  %11342 = vst [vmem:[#allocation117_spill] sm:$0xff] %v9058_v44  ;;  %v571_v21 = vld [vmem:[%s7003_s15 + $0x3d0] sm:$0xff] }
 0x256   : > { %v5701_v15 = vrot.slane %v5148_v56, 2  ;;  %v3798_v40 = vadd.f32 %v2818_v23, %v2814_v47  ;;  %v3791_v36 = vadd.f32 %v2817_v14, %v2813_v50  ;;  %v5729_v29 = vrot.slane %v5150_v57, 2  ;;  %v11343_v14 = vld [vmem:[#allocation118_spill] sm:$0xff]  ;;  %6468 = vmatmul.mubr.msk.f32.gmra.mrb[244].mxu0 %vm577_vm0, %v571_v21  ;;  %6596 = vmatmul.mubr.msk.f32.gmra.mrb[244].mxu1 %vm577_vm0, %v571_v21 }
 0x257   : > { %v5715_v52 = vrot.slane %v5149_v61, 2  ;;  %v5743_v42 = vrot.slane %v5151_v35, 2  ;;  %v3805_v63 = vadd.f32 %v2819_v27, %v2815_v59  ;;  %v3785_v10 = vrot.slane %v3784_v13, 4  ;;  %v9077_v61 = vpop.f32.mrb[138].mxu0  ;;  %v9079_v35 = vpop.f32.mrb[138].mxu1  ;;  %v11346_v27 = vld [vmem:[#allocation76_spill] sm:$0xff]  ;;  %1764 = vmatprep.mubr.f32.mxu0 %v11058_v53  ;;  %2597 = vmatprep.mubr.f32.mxu1 %v11058_v53 }
 0x258   : > { %v9062_v38 = vsel %vm5588_vm6, %v5701_v15, %v5700_v45  ;;  %v3799_v47 = vrot.slane %v3798_v40, 4  ;;  %v3792_v50 = vrot.slane %v3791_v36, 4  ;;  %v9067_v51 = vsel %vm5588_vm6, %v5729_v29, %v5728_v31  ;;  %11344 = vst [vmem:[#allocation114_spill] sm:$0xff] %v9077_v61  ;;  %11345 = vst [vmem:[#allocation119_spill] sm:$0xff] %v9079_v35 }
 0x259   : > { %v9070_v59 = vsel %vm5588_vm6, %v5715_v52, %v5714_v30  ;;  %v9073_v56 = vsel %vm5588_vm6, %v5743_v42, %v5742_v0  ;;  %v3806_v39 = vrot.slane %v3805_v63, 4  ;;  %v3786_v45 = vadd.f32 %v3785_v10, %v3784_v13  ;;  %v11347_v30 = vld [vmem:[#allocation120_spill] sm:$0xff]  ;;  %v11348_v0 = vld [vmem:[#allocation55_spill] sm:$0xff] }
 0x25a   : > { %v3800_v34 = vadd.f32 %v3799_v47, %v3798_v40  ;;  %v3793_v23 = vadd.f32 %v3792_v50, %v3791_v36  ;;  %v2820_v57 = vmul.f32 %v11343_v14, %v7297_v9  ;;  %v2822_v52 = vmul.f32 %v11346_v27, %v7304_v16  ;;  %v9088_v40 = vpop.f32.mrb[139].mxu0  ;;  %v9091_v36 = vpop.f32.mrb[139].mxu1  ;;  %v11352_v14 = vld [vmem:[#allocation81_spill] sm:$0xff] }
 0x25b   : > { %v3807_v31 = vadd.f32 %v3806_v39, %v3805_v63  ;;  %v2821_v42 = vmul.f32 %v11347_v30, %v7299_v12  ;;  %v2823_v15 = vmul.f32 %v11348_v0, %v7324_v26  ;;  %11349 = vst [vmem:[#allocation118_spill] sm:$0xff] %v9088_v40  ;;  %11350 = vst [vmem:[#allocation76_spill] sm:$0xff] %v9091_v36  ;;  %v3787_v13 = vrot.slane %v3786_v45, 2  ;;  %v11351_v63 = vld [vmem:[#allocation79_spill] sm:$0xff]  ;;  %v11353_v30 = vld [vmem:[#allocation122_spill] sm:$0xff]  ;;  %v9104_v36 = vpop.f32.mrb[140].mxu0 }
 0x25c   : > { %v3801_v29 = vrot.slane %v3800_v34, 2  ;;  %v3794_v10 = vrot.slane %v3793_v23, 2  ;;  %v2824_v47 = vmul.f32 %v11351_v63, %v7306_v17  ;;  %v2826_v39 = vmul.f32 %v8590_v11, %v7312_v20  ;;  %11354 = vst [vmem:[#allocation120_spill] sm:$0xff] %v9104_v36  ;;  %v9112_v36 = vpop.f32.mrb[141].mxu0 }
 0x25d   : > { %v3808_v50 = vrot.slane %v3807_v31, 2  ;;  %v2825_v27 = vmul.f32 %v11352_v14, %v7308_v18  ;;  %v2827_v0 = vmul.f32 %v11353_v30, %v7330_v28  ;;  %v3788_v25 = vadd.f32 %v3787_v13, %v3786_v45  ;;  %11359 = vst [vmem:[#allocation79_spill] sm:$0xff] %v9112_v36 }
 0x25e   : > { %v3802_v19 = vadd.f32 %v3801_v29, %v3800_v34  ;;  %v3795_v62 = vadd.f32 %v3794_v10, %v3793_v23  ;;  %v3812_v63 = vadd.f32 %v2824_v47, %v2820_v57  ;;  %v3826_v40 = vadd.f32 %v2826_v39, %v2822_v52  ;;  %v9106_v57 = vpop.f32.mrb[140].mxu1  ;;  %v11356_v29 = vld [vmem:[#allocation38_spill] sm:$0xff]  ;;  %v11357_v47 = vld [vmem:[#allocation39_spill] sm:$0xff]  ;;  %v11358_v39 = vld [vmem:[#allocation41_spill] sm:$0xff] }
 0x25f   : > { %v3809_v21 = vadd.f32 %v3808_v50, %v3807_v31  ;;  %v3819_v35 = vadd.f32 %v2825_v27, %v2821_v42  ;;  %v3833_v61 = vadd.f32 %v2827_v0, %v2823_v15  ;;  %v3789_v44 = vrot.slane %v3788_v25, 1  ;;  %11355 = vst [vmem:[#allocation55_spill] sm:$0xff] %v9106_v57  ;;  %v572_v15 = vld [vmem:[%s7003_s15 + $0x3d8] sm:$0xff] }
 0x260   : > { %v3803_v11 = vrot.slane %v3802_v19, 1  ;;  %v3796_v32 = vrot.slane %v3795_v62, 1  ;;  %v3813_v14 = vrot.slane %v3812_v63, 4  ;;  %v3827_v46 = vrot.slane %v3826_v40, 4  ;;  %6469 = vmatmul.mubr.msk.f32.gmra.mrb[246].mxu0 %vm577_vm0, %v572_v15  ;;  %6597 = vmatmul.mubr.msk.f32.gmra.mrb[246].mxu1 %vm577_vm0, %v572_v15 }
 0x261   : > { %v3810_v7 = vrot.slane %v3809_v21, 1  ;;  %v3820_v30 = vrot.slane %v3819_v35, 4  ;;  %v3834_v54 = vrot.slane %v3833_v61, 4  ;;  %v3790_v48 = vadd.f32 %v3789_v44, %v3788_v25  ;;  %1770 = vmatprep.mubr.f32.mxu0 %v11058_v53  ;;  %2603 = vmatprep.mubr.f32.mxu1 %v11058_v53 }
 0x262   : > { %v3804_v45 = vadd.f32 %v3803_v11, %v3802_v19  ;;  %v3797_v34 = vadd.f32 %v3796_v32, %v3795_v62  ;;  %v3814_v23 = vadd.f32 %v3813_v14, %v3812_v63  ;;  %v3828_v31 = vadd.f32 %v3827_v46, %v3826_v40  ;;  %v9115_v32 = vpop.f32.mrb[141].mxu1  ;;  %v11361_v62 = vld [vmem:[#allocation42_spill] sm:$0xff]  ;;  %v9121_v11 = vpop.f32.mrb[142].mxu0 }
 0x263   : > { %v3811_v13 = vadd.f32 %v3810_v7, %v3809_v21  ;;  %v3821_v52 = vadd.f32 %v3820_v30, %v3819_v35  ;;  %v3835_v42 = vadd.f32 %v3834_v54, %v3833_v61  ;;  %v5152_v10 = vmul.f32 %v11356_v29, %v3790_v48  ;;  %11360 = vst [vmem:[#allocation81_spill] sm:$0xff] %v9115_v32  ;;  %v9123_v14 = vpop.f32.mrb[142].mxu1  ;;  %v573_v30 = vld [vmem:[%s7003_s15 + $0x3e0] sm:$0xff] }
 0x264   : > { %v5154_v50 = vmul.f32 %v11357_v47, %v3804_v45  ;;  %v5153_v27 = vmul.f32 %v11358_v39, %v3797_v34  ;;  %v3815_v0 = vrot.slane %v3814_v23, 2  ;;  %v3829_v54 = vrot.slane %v3828_v31, 2  ;;  %11362 = vst [vmem:[#allocation122_spill] sm:$0xff] %v9121_v11  ;;  %11363 = vst [vmem:[#allocation144_spill] sm:$0xff] %v9123_v14  ;;  %6470 = vmatmul.mubr.msk.f32.gmra.mrb[248].mxu0 %vm577_vm0, %v573_v30 }
 0x265   : > { %v5155_v46 = vmul.f32 %v11361_v62, %v3811_v13  ;;  %v3822_v19 = vrot.slane %v3821_v52, 2  ;;  %v3836_v25 = vrot.slane %v3835_v42, 2  ;;  %v5703_v48 = vrot.slane %v5152_v10, 1  ;;  %6598 = vmatmul.mubr.msk.f32.gmra.mrb[248].mxu1 %vm577_vm0, %v573_v30  ;;  %1776 = vmatprep.mubr.f32.mxu0 %v11058_v53  ;;  %v11366_v10 = vld [vmem:[#allocation121_spill] sm:$0xff]  ;;  %v11372_v30 = vld [vmem:[#allocation11_spill] sm:$0xff] }
 0x266   : > { %v5731_v7 = vrot.slane %v5154_v50, 1  ;;  %v5717_v44 = vrot.slane %v5153_v27, 1  ;;  %v3816_v61 = vadd.f32 %v3815_v0, %v3814_v23  ;;  %v3830_v40 = vadd.f32 %v3829_v54, %v3828_v31  ;;  %v9138_v31 = vpop.f32.mrb[143].mxu0  ;;  %2609 = vmatprep.mubr.f32.mxu1 %v11058_v53  ;;  %v11367_v0 = vld [vmem:[#allocation123_spill] sm:$0xff] }
 0x267   : > { %v5745_v35 = vrot.slane %v5155_v46, 1  ;;  %v3823_v63 = vadd.f32 %v3822_v19, %v3821_v52  ;;  %v3837_v21 = vadd.f32 %v3836_v25, %v3835_v42  ;;  %v9128_v45 = vsel %vm5591_vm7, %v5703_v48, %v9062_v38  ;;  %11364 = vst [vmem:[#allocation145_spill] sm:$0xff] %v9138_v31  ;;  %v9141_v52 = vpop.f32.mrb[143].mxu1  ;;  %v9158_v48 = vpop.f32.mrb[144].mxu0 }
 0x268   : > { %v9132_v34 = vsel %vm5591_vm7, %v5731_v7, %v9067_v51  ;;  %v9136_v23 = vsel %vm5591_vm7, %v5717_v44, %v9070_v59  ;;  %v3817_v13 = vrot.slane %v3816_v61, 1  ;;  %11365 = vst [vmem:[#allocation146_spill] sm:$0xff] %v9141_v52  ;;  %v3831_v42 = vrot.slane %v3830_v40, 1  ;;  %11368 = vst [vmem:[#allocation121_spill] sm:$0xff] %v9158_v48  ;;  %v11369_v7 = vld [vmem:[#allocation40_spill] sm:$0xff] }
 0x269   : > { %v9146_v38 = vsel %vm5591_vm7, %v5745_v35, %v9073_v56  ;;  %v3824_v51 = vrot.slane %v3823_v63, 1  ;;  %v3838_v15 = vrot.slane %v3837_v21, 1  ;;  %v2828_v50 = vmul.f32 %v11366_v10, %v7297_v9  ;;  %v11370_v35 = vld [vmem:[#allocation124_spill] sm:$0xff] }
 0x26a   : > { %v3818_v59 = vadd.f32 %v3817_v13, %v3816_v61  ;;  %v2830_v27 = vmul.f32 %v8605_v22, %v7304_v16  ;;  %v2829_v46 = vmul.f32 %v11367_v0, %v7299_v12  ;;  %v3832_v54 = vadd.f32 %v3831_v42, %v3830_v40 }
 0x26b   : > { %v3825_v56 = vadd.f32 %v3824_v51, %v3823_v63  ;;  %v3839_v19 = vadd.f32 %v3838_v15, %v3837_v21  ;;  %v2831_v25 = vmul.f32 %v8611_v33, %v7324_v26  ;;  %v2832_v61 = vmul.f32 %v8607_v2, %v7306_v17  ;;  %v11371_v63 = vld [vmem:[#allocation43_spill] sm:$0xff]  ;;  %v11373_v33 = vld [vmem:[#allocation13_spill] sm:$0xff] }
 0x26c   : > { %v9161_v44 = vmul.f32 %v3818_v59, %v11369_v7  ;;  %v2834_v22 = vmul.f32 %v8625_v3, %v7312_v20  ;;  %v2833_v40 = vmul.f32 %v11370_v35, %v7308_v18  ;;  %v9170_v21 = vmul.f32 %v3832_v54, %v11371_v63  ;;  %v11374_v51 = vld [vmem:[#allocation61_spill] sm:$0xff]  ;;  %v11375_v3 = vld [vmem:[#allocation60_spill] sm:$0xff]  ;;  %v9182_v7 = vpop.f32.mrb[144].mxu1  ;;  %v11377_v63 = vld [vmem:[#allocation62_spill] sm:$0xff] }
 0x26d   : > { %v9173_v13 = vmul.f32 %v3825_v56, %v11372_v30  ;;  %v9176_v42 = vmul.f32 %v3839_v19, %v11373_v33  ;;  %v2835_v15 = vmul.f32 %v11374_v51, %v7330_v28  ;;  %v3840_v59 = vadd.f32 %v2832_v61, %v2828_v50  ;;  %11376 = vst [vmem:[#allocation123_spill] sm:$0xff] %v9182_v7  ;;  %v574_v35 = vld [vmem:[%s7003_s15 + $0x3e8] sm:$0xff]  ;;  %v11379_v33 = vld [vmem:[#allocation63_spill] sm:$0xff]  ;;  %v9191_v51 = vpop.f32.mrb[145].mxu0  ;;  %v9194_v50 = vpop.f32.mrb[145].mxu1  ;;  %v575_v7 = vld [vmem:[%s7003_s15 + $0x3f0] sm:$0xff] }
 0x26e   : > { %v3854_v2 = vadd.f32 %v2834_v22, %v2830_v27  ;;  %v3847_v10 = vadd.f32 %v2833_v40, %v2829_v46  ;;  %v2836_v0 = vmul.f32 %v11375_v3, %v7297_v9  ;;  %v2838_v56 = vmul.f32 %v11377_v63, %v7304_v16  ;;  %v11378_v30 = vld [vmem:[#allocation125_spill] sm:$0xff]  ;;  %11380 = vst [vmem:[#allocation124_spill] sm:$0xff] %v9191_v51  ;;  %v11383_v63 = vld [vmem:[#allocation80_spill] sm:$0xff]  ;;  %v11385_v3 = vld [vmem:[#allocation82_spill] sm:$0xff]  ;;  %v9207_v51 = vpop.f32.mrb[146].mxu0 }
 0x26f   : > { %v3861_v54 = vadd.f32 %v2835_v15, %v2831_v25  ;;  %v2837_v19 = vmul.f32 %v11378_v30, %v7299_v12  ;;  %v2839_v62 = vmul.f32 %v11379_v33, %v7324_v26  ;;  %6471 = vmatmul.mubr.msk.f32.gmra.mrb[250].mxu0 %vm577_vm0, %v574_v35  ;;  %11381 = vst [vmem:[#allocation61_spill] sm:$0xff] %v9194_v50  ;;  %v3841_v27 = vrot.slane %v3840_v59, 4  ;;  %v11382_v25 = vld [vmem:[#allocation126_spill] sm:$0xff]  ;;  %v11384_v33 = vld [vmem:[#allocation127_spill] sm:$0xff]  ;;  %v9212_v14 = vpop.f32.mrb[147].mxu0 }
 0x270   : > { %v3855_v46 = vrot.slane %v3854_v2, 4  ;;  %v3848_v61 = vrot.slane %v3847_v10, 4  ;;  %v2840_v22 = vmul.f32 %v11382_v25, %v7306_v17  ;;  %6599 = vmatmul.mubr.msk.f32.gmra.mrb[250].mxu1 %vm577_vm0, %v574_v35  ;;  %1782 = vmatprep.mubr.f32.mxu0 %v11058_v53  ;;  %v2842_v30 = vmul.f32 %v11383_v63, %v7312_v20  ;;  %11386 = vst [vmem:[#allocation60_spill] sm:$0xff] %v9207_v51  ;;  %v9209_v35 = vpop.f32.mrb[146].mxu1 }
 0x271   : > { %v3862_v40 = vrot.slane %v3861_v54, 4  ;;  %v2841_v15 = vmul.f32 %v11384_v33, %v7308_v18  ;;  %v2843_v39 = vmul.f32 %v11385_v3, %v7330_v28  ;;  %2615 = vmatprep.mubr.f32.mxu1 %v11058_v53  ;;  %v3842_v47 = vadd.f32 %v3841_v27, %v3840_v59  ;;  %11387 = vst [vmem:[#allocation62_spill] sm:$0xff] %v9209_v35  ;;  %v9215_v33 = vpop.f32.mrb[147].mxu1 }
 0x272   : > { %v3856_v29 = vadd.f32 %v3855_v46, %v3854_v2  ;;  %v3849_v50 = vadd.f32 %v3848_v61, %v3847_v10  ;;  %v3868_v25 = vadd.f32 %v2840_v22, %v2836_v0  ;;  %v3882_v52 = vadd.f32 %v2842_v30, %v2838_v56  ;;  %11388 = vst [vmem:[#allocation125_spill] sm:$0xff] %v9212_v14  ;;  %v9220_v61 = vpop.f32.mrb[148].mxu0 }
 0x273   : > { %v3863_v48 = vadd.f32 %v3862_v40, %v3861_v54  ;;  %v3875_v63 = vadd.f32 %v2841_v15, %v2837_v19  ;;  %v3889_v31 = vadd.f32 %v2843_v39, %v2839_v62  ;;  %6472 = vmatmul.mubr.msk.f32.gmra.mrb[252].mxu0 %vm577_vm0, %v575_v7  ;;  %11389 = vst [vmem:[#allocation63_spill] sm:$0xff] %v9215_v33  ;;  %v3843_v3 = vrot.slane %v3842_v47, 2 }
 0x274   : > { %v3857_v59 = vrot.slane %v3856_v29, 2  ;;  %v3850_v2 = vrot.slane %v3849_v50, 2  ;;  %v3869_v10 = vrot.slane %v3868_v25, 4  ;;  %6600 = vmatmul.mubr.msk.f32.gmra.mrb[252].mxu1 %vm577_vm0, %v575_v7  ;;  %1788 = vmatprep.mubr.f32.mxu0 %v11058_v53  ;;  %v3883_v27 = vrot.slane %v3882_v52, 4  ;;  %11390 = vst [vmem:[#allocation126_spill] sm:$0xff] %v9220_v61  ;;  %v9228_v61 = vpop.f32.mrb[149].mxu0 }
 0x275   : > { %v3864_v0 = vrot.slane %v3863_v48, 2  ;;  %v3876_v54 = vrot.slane %v3875_v63, 4  ;;  %v3890_v56 = vrot.slane %v3889_v31, 4  ;;  %2621 = vmatprep.mubr.f32.mxu1 %v11058_v53  ;;  %v3844_v39 = vadd.f32 %v3843_v3, %v3842_v47  ;;  %11395 = vst [vmem:[#allocation127_spill] sm:$0xff] %v9228_v61 }
 0x276   : > { %v3858_v62 = vadd.f32 %v3857_v59, %v3856_v29  ;;  %v3851_v19 = vadd.f32 %v3850_v2, %v3849_v50  ;;  %v3870_v46 = vadd.f32 %v3869_v10, %v3868_v25  ;;  %v3884_v40 = vadd.f32 %v3883_v27, %v3882_v52  ;;  %v9222_v25 = vpop.f32.mrb[148].mxu1  ;;  %v11392_v59 = vld [vmem:[#allocation44_spill] sm:$0xff]  ;;  %v11393_v10 = vld [vmem:[#allocation45_spill] sm:$0xff]  ;;  %v11394_v27 = vld [vmem:[#allocation46_spill] sm:$0xff] }
 0x277   : > { %v3865_v22 = vadd.f32 %v3864_v0, %v3863_v48  ;;  %v3877_v30 = vadd.f32 %v3876_v54, %v3875_v63  ;;  %v3891_v15 = vadd.f32 %v3890_v56, %v3889_v31  ;;  %v3845_v33 = vrot.slane %v3844_v39, 1  ;;  %11391 = vst [vmem:[#allocation80_spill] sm:$0xff] %v9222_v25  ;;  %v576_v31 = vld [vmem:[%s7003_s15 + $0x3f8] sm:$0xff] }
 0x278   : > { %v3859_v7 = vrot.slane %v3858_v62, 1  ;;  %v3852_v14 = vrot.slane %v3851_v19, 1  ;;  %v3871_v35 = vrot.slane %v3870_v46, 2  ;;  %v3885_v11 = vrot.slane %v3884_v40, 2  ;;  %6473 = vmatmul.mubr.msk.f32.gmra.mrb[254].mxu0 %vm577_vm0, %v576_v31  ;;  %6601 = vmatmul.mubr.msk.f32.gmra.mrb[254].mxu1 %vm577_vm0, %v576_v31 }
 0x279   : > { %v3866_v51 = vrot.slane %v3865_v22, 1  ;;  %v3878_v32 = vrot.slane %v3877_v30, 2  ;;  %v3892_v36 = vrot.slane %v3891_v15, 2  ;;  %v3846_v53 = vadd.f32 %v3845_v33, %v3844_v39 }
 0x27a   : > { %v3860_v47 = vadd.f32 %v3859_v7, %v3858_v62  ;;  %v3853_v29 = vadd.f32 %v3852_v14, %v3851_v19  ;;  %v3872_v50 = vadd.f32 %v3871_v35, %v3870_v46  ;;  %v3886_v48 = vadd.f32 %v3885_v11, %v3884_v40  ;;  %v9231_v14 = vpop.f32.mrb[149].mxu1 }
 0x27b   : > { %v3867_v3 = vadd.f32 %v3866_v51, %v3865_v22  ;;  %v3879_v52 = vadd.f32 %v3878_v32, %v3877_v30  ;;  %v3893_v63 = vadd.f32 %v3892_v36, %v3891_v15  ;;  %v5160_v2 = vmul.f32 %v11392_v59, %v3846_v53  ;;  %11396 = vst [vmem:[#allocation82_spill] sm:$0xff] %v9231_v14  ;;  %v11397_v51 = vld [vmem:[#allocation47_spill] sm:$0xff]  ;;  %v9235_v15 = vpop.f32.mrb[150].mxu0  ;;  %v9237_v7 = vpop.f32.mrb[150].mxu1 }
 0x27c   : > { %v5162_v0 = vmul.f32 %v11393_v10, %v3860_v47  ;;  %v5161_v54 = vmul.f32 %v11394_v27, %v3853_v29  ;;  %v3873_v56 = vrot.slane %v3872_v50, 1  ;;  %v3887_v32 = vrot.slane %v3886_v48, 1  ;;  %11398 = vst [vmem:[#allocation147_spill] sm:$0xff] %v9235_v15  ;;  %11399 = vst [vmem:[#allocation148_spill] sm:$0xff] %v9237_v7 }
 0x27d   : > { %v5163_v11 = vmul.f32 %v11397_v51, %v3867_v3  ;;  %v3880_v36 = vrot.slane %v3879_v52, 1  ;;  %v3894_v35 = vrot.slane %v3893_v63, 1  ;;  %v5747_v33 = vrot.slane %v5160_v2, 7  ;;  %v11400_v3 = vld [vmem:[#allocation48_spill] sm:$0xff] }
 0x27e   : > { %v5775_v39 = vrot.slane %v5162_v0, 7  ;;  %v5761_v62 = vrot.slane %v5161_v54, 7  ;;  %v3874_v19 = vadd.f32 %v3873_v56, %v3872_v50  ;;  %v3888_v22 = vadd.f32 %v3887_v32, %v3886_v48  ;;  %v9246_v50 = vpop.f32.mrb[151].mxu0  ;;  %v9248_v48 = vpop.f32.mrb[151].mxu1  ;;  %v11404_v0 = vld [vmem:[#allocation50_spill] sm:$0xff] }
 0x27f   : > { %v5789_v46 = vrot.slane %v5163_v11, 7  ;;  %v3881_v40 = vadd.f32 %v3880_v36, %v3879_v52  ;;  %v3895_v30 = vadd.f32 %v3894_v35, %v3893_v63  ;;  %v5748_v53 = vsel %vm5573_vm1, %v5747_v33, %v9161_v44  ;;  %11401 = vst [vmem:[#allocation149_spill] sm:$0xff] %v9246_v50  ;;  %11402 = vst [vmem:[#allocation150_spill] sm:$0xff] %v9248_v48  ;;  %v11403_v63 = vld [vmem:[#allocation49_spill] sm:$0xff]  ;;  %v11405_v44 = vld [vmem:[#allocation51_spill] sm:$0xff] }
 0x280   : > { %v5776_v47 = vsel %vm5573_vm1, %v5775_v39, %v9170_v21  ;;  %v5762_v29 = vsel %vm5573_vm1, %v5761_v62, %v9173_v13  ;;  %v5164_v31 = vmul.f32 %v11400_v3, %v3874_v19  ;;  %v5166_v2 = vmul.f32 %v11403_v63, %v3888_v22  ;;  %v11406_v21 = vld [vmem:[#allocation84_spill] sm:$0xff]  ;;  %v11407_v13 = vld [vmem:[#allocation87_spill] sm:$0xff]  ;;  %v9263_v22 = vpop.f32.mrb[152].mxu0  ;;  %v9287_v3 = vpop.f32.mrb[152].mxu1 }
 0x281   : > { %v5790_v52 = vsel %vm5573_vm1, %v5789_v46, %v9176_v42  ;;  %v5165_v54 = vmul.f32 %v11404_v0, %v3881_v40  ;;  %v5167_v56 = vmul.f32 %v11405_v44, %v3895_v30  ;;  %v2844_v32 = vmul.f32 %v11406_v21, %v7297_v9  ;;  %v11408_v35 = vld [vmem:[#allocation56_spill] sm:$0xff]  ;;  %11410 = vst [vmem:[#allocation84_spill] sm:$0xff] %v9263_v22  ;;  %v11411_v30 = vld [vmem:[#allocation89_spill] sm:$0xff]  ;;  %v11412_v21 = vld [vmem:[#allocation59_spill] sm:$0xff]  ;;  %v9295_v51 = vpop.f32.mrb[153].mxu0 }
 0x282   : > { %v5749_v11 = vrot.slane %v5164_v31, 6  ;;  %v2846_v36 = vmul.f32 %v11407_v13, %v7304_v16  ;;  %v2845_v33 = vmul.f32 %v11408_v35, %v7299_v12  ;;  %v5777_v39 = vrot.slane %v5166_v2, 6  ;;  %v11409_v42 = vld [vmem:[#allocation128_spill] sm:$0xff]  ;;  %v11413_v44 = vld [vmem:[#allocation129_spill] sm:$0xff]  ;;  %11416 = vst [vmem:[#allocation87_spill] sm:$0xff] %v9287_v3  ;;  %11420 = vst [vmem:[#allocation56_spill] sm:$0xff] %v9295_v51 }
 0x283   : > { %v5763_v62 = vrot.slane %v5165_v54, 6  ;;  %v5791_v19 = vrot.slane %v5167_v56, 6  ;;  %v2847_v46 = vmul.f32 %v11409_v42, %v7324_v26  ;;  %v2848_v31 = vmul.f32 %v11411_v30, %v7306_v17  ;;  %v9307_v51 = vpop.f32.mrb[154].mxu0 }
 0x284   : > { %v9266_v40 = vsel %vm5576_vm2, %v5749_v11, %v5748_v53  ;;  %v2850_v13 = vmul.f32 %v11412_v21, %v7312_v20  ;;  %v2849_v35 = vmul.f32 %v11413_v44, %v7308_v18  ;;  %v9275_v2 = vsel %vm5576_vm2, %v5777_v39, %v5776_v47  ;;  %v11414_v53 = vld [vmem:[#allocation94_spill] sm:$0xff]  ;;  %v11415_v21 = vld [vmem:[#allocation92_spill] sm:$0xff]  ;;  %v11417_v47 = vld [vmem:[#allocation95_spill] sm:$0xff]  ;;  %11426 = vst [vmem:[#allocation89_spill] sm:$0xff] %v9307_v51  ;;  %v9311_v7 = vpop.f32.mrb[155].mxu0 }
 0x285   : > { %v9278_v54 = vsel %vm5576_vm2, %v5763_v62, %v5762_v29  ;;  %v9281_v56 = vsel %vm5576_vm2, %v5791_v19, %v5790_v52  ;;  %v2851_v11 = vmul.f32 %v11414_v53, %v7330_v28  ;;  %v3896_v42 = vadd.f32 %v2848_v31, %v2844_v32  ;;  %v11418_v29 = vld [vmem:[#allocation93_spill] sm:$0xff]  ;;  %v11419_v52 = vld [vmem:[#allocation132_spill] sm:$0xff]  ;;  %v9297_v32 = vpop.f32.mrb[153].mxu1  ;;  %v11423_v53 = vld [vmem:[#allocation134_spill] sm:$0xff]  ;;  %11428 = vst [vmem:[#allocation129_spill] sm:$0xff] %v9311_v7 }
 0x286   : > { %v3910_v30 = vadd.f32 %v2850_v13, %v2846_v36  ;;  %v3903_v0 = vadd.f32 %v2849_v35, %v2845_v33  ;;  %v2852_v63 = vmul.f32 %v11415_v21, %v7297_v9  ;;  %v2854_v39 = vmul.f32 %v11417_v47, %v7304_v16  ;;  %11421 = vst [vmem:[#allocation128_spill] sm:$0xff] %v9297_v32  ;;  %v11422_v13 = vld [vmem:[#allocation131_spill] sm:$0xff]  ;;  %v11424_v21 = vld [vmem:[#allocation133_spill] sm:$0xff]  ;;  %v9309_v3 = vpop.f32.mrb[154].mxu1 }
 0x287   : > { %v3917_v44 = vadd.f32 %v2851_v11, %v2847_v46  ;;  %v2853_v62 = vmul.f32 %v11418_v29, %v7299_v12  ;;  %v2855_v19 = vmul.f32 %v11419_v52, %v7324_v26  ;;  %v3897_v36 = vrot.slane %v3896_v42, 4  ;;  %v11425_v29 = vld [vmem:[#allocation136_spill] sm:$0xff]  ;;  %11427 = vst [vmem:[#allocation59_spill] sm:$0xff] %v9309_v3 }
 0x288   : > { %v3911_v33 = vrot.slane %v3910_v30, 4  ;;  %v3904_v31 = vrot.slane %v3903_v0, 4  ;;  %v2856_v35 = vmul.f32 %v11422_v13, %v7306_v17  ;;  %v2858_v11 = vmul.f32 %v11423_v53, %v7312_v20  ;;  %v9313_v53 = vpop.f32.mrb[155].mxu1 }
 0x289   : > { %v3918_v46 = vrot.slane %v3917_v44, 4  ;;  %v2857_v47 = vmul.f32 %v11424_v21, %v7308_v18  ;;  %v2859_v52 = vmul.f32 %v11425_v29, %v7330_v28  ;;  %v3898_v27 = vadd.f32 %v3897_v36, %v3896_v42  ;;  %11429 = vst [vmem:[#allocation94_spill] sm:$0xff] %v9313_v53 }
 0x28a   : > { %v3912_v10 = vadd.f32 %v3911_v33, %v3910_v30  ;;  %v3905_v59 = vadd.f32 %v3904_v31, %v3903_v0  ;;  %v3924_v32 = vadd.f32 %v2856_v35, %v2852_v63  ;;  %v3938_v13 = vadd.f32 %v2858_v11, %v2854_v39 }
 0x28b   : > { %v3919_v22 = vadd.f32 %v3918_v46, %v3917_v44  ;;  %v3931_v48 = vadd.f32 %v2857_v47, %v2853_v62  ;;  %v3945_v50 = vadd.f32 %v2859_v52, %v2855_v19  ;;  %v3899_v21 = vrot.slane %v3898_v27, 2  ;;  %v9315_v44 = vpop.f32.mrb[156].mxu0 }
 0x28c   : > { %v3913_v15 = vrot.slane %v3912_v10, 2  ;;  %v3906_v14 = vrot.slane %v3905_v59, 2  ;;  %v3925_v29 = vrot.slane %v3924_v32, 4  ;;  %v3939_v30 = vrot.slane %v3938_v13, 4  ;;  %11430 = vst [vmem:[#allocation92_spill] sm:$0xff] %v9315_v44 }
 0x28d   : > { %v3920_v42 = vrot.slane %v3919_v22, 2  ;;  %v3932_v0 = vrot.slane %v3931_v48, 4  ;;  %v3946_v63 = vrot.slane %v3945_v50, 4  ;;  %v3900_v36 = vadd.f32 %v3899_v21, %v3898_v27 }
 0x28e   : > { %v3914_v33 = vadd.f32 %v3913_v15, %v3912_v10  ;;  %v3907_v31 = vadd.f32 %v3906_v14, %v3905_v59  ;;  %v3926_v35 = vadd.f32 %v3925_v29, %v3924_v32  ;;  %v3940_v62 = vadd.f32 %v3939_v30, %v3938_v13  ;;  %v9317_v59 = vpop.f32.mrb[156].mxu1  ;;  %v11433_v13 = vld [vmem:[#allocation78_spill] sm:$0xff]  ;;  %v11434_v29 = vld [vmem:[#allocation83_spill] sm:$0xff] }
 0x28f   : > { %v3921_v39 = vadd.f32 %v3920_v42, %v3919_v22  ;;  %v3933_v19 = vadd.f32 %v3932_v0, %v3931_v48  ;;  %v3947_v46 = vadd.f32 %v3946_v63, %v3945_v50  ;;  %v3901_v11 = vrot.slane %v3900_v36, 1  ;;  %11431 = vst [vmem:[#allocation95_spill] sm:$0xff] %v9317_v59  ;;  %v11432_v48 = vld [vmem:[#allocation77_spill] sm:$0xff]  ;;  %v9322_v0 = vpop.f32.mrb[157].mxu0  ;;  %v9324_v63 = vpop.f32.mrb[157].mxu1 }
 0x290   : > { %v3915_v47 = vrot.slane %v3914_v33, 1  ;;  %v3908_v52 = vrot.slane %v3907_v31, 1  ;;  %v3927_v53 = vrot.slane %v3926_v35, 2  ;;  %v3941_v3 = vrot.slane %v3940_v62, 2  ;;  %11435 = vst [vmem:[#allocation93_spill] sm:$0xff] %v9322_v0  ;;  %11436 = vst [vmem:[#allocation132_spill] sm:$0xff] %v9324_v63 }
 0x291   : > { %v3922_v7 = vrot.slane %v3921_v39, 1  ;;  %v3934_v51 = vrot.slane %v3933_v19, 2  ;;  %v3948_v61 = vrot.slane %v3947_v46, 2  ;;  %v3902_v25 = vadd.f32 %v3901_v11, %v3900_v36  ;;  %v11437_v36 = vld [vmem:[#allocation86_spill] sm:$0xff] }
 0x292   : > { %v3916_v57 = vadd.f32 %v3915_v47, %v3914_v33  ;;  %v3909_v27 = vadd.f32 %v3908_v52, %v3907_v31  ;;  %v3928_v10 = vadd.f32 %v3927_v53, %v3926_v35  ;;  %v3942_v15 = vadd.f32 %v3941_v3, %v3940_v62 }
 0x293   : > { %v3923_v14 = vadd.f32 %v3922_v7, %v3921_v39  ;;  %v3935_v22 = vadd.f32 %v3934_v51, %v3933_v19  ;;  %v3949_v32 = vadd.f32 %v3948_v61, %v3947_v46  ;;  %v5168_v50 = vmul.f32 %v11432_v48, %v3902_v25  ;;  %v9327_v19 = vpop.f32.mrb[158].mxu0  ;;  %v9329_v46 = vpop.f32.mrb[158].mxu1 }
 0x294   : > { %v5170_v21 = vmul.f32 %v11433_v13, %v3916_v57  ;;  %v5169_v42 = vmul.f32 %v11434_v29, %v3909_v27  ;;  %v3929_v30 = vrot.slane %v3928_v10, 1  ;;  %v3943_v53 = vrot.slane %v3942_v15, 1  ;;  %11438 = vst [vmem:[#allocation131_spill] sm:$0xff] %v9327_v19  ;;  %11439 = vst [vmem:[#allocation134_spill] sm:$0xff] %v9329_v46  ;;  %v11440_v27 = vld [vmem:[#allocation58_spill] sm:$0xff] }
 0x295   : > { %v5171_v33 = vmul.f32 %v11437_v36, %v3923_v14  ;;  %v3936_v31 = vrot.slane %v3935_v22, 1  ;;  %v3950_v35 = vrot.slane %v3949_v32, 1  ;;  %v5751_v7 = vrot.slane %v5168_v50, 5 }
 0x296   : > { %v5779_v3 = vrot.slane %v5170_v21, 5  ;;  %v5765_v51 = vrot.slane %v5169_v42, 5  ;;  %v3930_v61 = vadd.f32 %v3929_v30, %v3928_v10  ;;  %v3944_v25 = vadd.f32 %v3943_v53, %v3942_v15  ;;  %v9338_v10 = vpop.f32.mrb[159].mxu0  ;;  %v9340_v15 = vpop.f32.mrb[159].mxu1  ;;  %v11444_v21 = vld [vmem:[#allocation91_spill] sm:$0xff] }
 0x297   : > { %v5793_v39 = vrot.slane %v5171_v33, 5  ;;  %v3937_v62 = vadd.f32 %v3936_v31, %v3935_v22  ;;  %v3951_v57 = vadd.f32 %v3950_v35, %v3949_v32  ;;  %v5752_v11 = vsel %vm5579_vm3, %v5751_v7, %v9266_v40  ;;  %11441 = vst [vmem:[#allocation133_spill] sm:$0xff] %v9338_v10  ;;  %11442 = vst [vmem:[#allocation136_spill] sm:$0xff] %v9340_v15  ;;  %v11443_v32 = vld [vmem:[#allocation88_spill] sm:$0xff]  ;;  %v11445_v40 = vld [vmem:[#allocation97_spill] sm:$0xff] }
 0x298   : > { %v5780_v47 = vsel %vm5579_vm3, %v5779_v3, %v9275_v2  ;;  %v5766_v52 = vsel %vm5579_vm3, %v5765_v51, %v9278_v54  ;;  %v5172_v14 = vmul.f32 %v11440_v27, %v3930_v61  ;;  %v5174_v50 = vmul.f32 %v11443_v32, %v3944_v25  ;;  %v11446_v2 = vld [vmem:[#allocation135_spill] sm:$0xff]  ;;  %v11447_v54 = vld [vmem:[#allocation138_spill] sm:$0xff]  ;;  %v11448_v35 = vld [vmem:[#allocation137_spill] sm:$0xff]  ;;  %v9355_v25 = vpop.f32.mrb[160].mxu0  ;;  %v9379_v27 = vpop.f32.mrb[160].mxu1 }
 0x299   : > { %v5794_v22 = vsel %vm5579_vm3, %v5793_v39, %v9281_v56  ;;  %v5173_v42 = vmul.f32 %v11444_v21, %v3937_v62  ;;  %v5175_v30 = vmul.f32 %v11445_v40, %v3951_v57  ;;  %v2860_v53 = vmul.f32 %v11446_v2, %v7297_v9  ;;  %v11449_v56 = vld [vmem:[#allocation140_spill] sm:$0xff]  ;;  %11450 = vst [vmem:[#allocation135_spill] sm:$0xff] %v9355_v25  ;;  %v11451_v57 = vld [vmem:[#allocation139_spill] sm:$0xff]  ;;  %v11452_v2 = vld [vmem:[#allocation98_spill] sm:$0xff]  ;;  %v9387_v36 = vpop.f32.mrb[161].mxu0 }
 0x29a   : > { %v5753_v33 = vrot.slane %v5172_v14, 4  ;;  %v2862_v31 = vmul.f32 %v11447_v54, %v7304_v16  ;;  %v2861_v7 = vmul.f32 %v11448_v35, %v7299_v12  ;;  %v5781_v3 = vrot.slane %v5174_v50, 4  ;;  %v11453_v40 = vld [vmem:[#allocation141_spill] sm:$0xff]  ;;  %11456 = vst [vmem:[#allocation138_spill] sm:$0xff] %v9379_v27  ;;  %11460 = vst [vmem:[#allocation137_spill] sm:$0xff] %v9387_v36  ;;  %v9399_v36 = vpop.f32.mrb[162].mxu0 }
 0x29b   : > { %v5767_v51 = vrot.slane %v5173_v42, 4  ;;  %v5795_v61 = vrot.slane %v5175_v30, 4  ;;  %v2863_v39 = vmul.f32 %v11449_v56, %v7324_v26  ;;  %v2864_v14 = vmul.f32 %v11451_v57, %v7306_v17  ;;  %11466 = vst [vmem:[#allocation139_spill] sm:$0xff] %v9399_v36  ;;  %v9403_v46 = vpop.f32.mrb[163].mxu0 }
 0x29c   : > { %v9358_v62 = vsel %vm5582_vm4, %v5753_v33, %v5752_v11  ;;  %v2866_v54 = vmul.f32 %v11452_v2, %v7312_v20  ;;  %v2865_v35 = vmul.f32 %v11453_v40, %v7308_v18  ;;  %v9367_v50 = vsel %vm5582_vm4, %v5781_v3, %v5780_v47  ;;  %v11454_v11 = vld [vmem:[#allocation96_spill] sm:$0xff]  ;;  %v11455_v2 = vld [vmem:[#allocation142_spill] sm:$0xff]  ;;  %v11457_v47 = vld [vmem:[#allocation99_spill] sm:$0xff]  ;;  %11468 = vst [vmem:[#allocation141_spill] sm:$0xff] %v9403_v46 }
 0x29d   : > { %v9370_v42 = vsel %vm5582_vm4, %v5767_v51, %v5766_v52  ;;  %v9373_v30 = vsel %vm5582_vm4, %v5795_v61, %v5794_v22  ;;  %v2867_v33 = vmul.f32 %v11454_v11, %v7330_v28  ;;  %v3952_v56 = vadd.f32 %v2864_v14, %v2860_v53  ;;  %v11458_v52 = vld [vmem:[#allocation100_spill] sm:$0xff]  ;;  %v11459_v22 = vld [vmem:[#allocation103_spill] sm:$0xff]  ;;  %v9389_v53 = vpop.f32.mrb[161].mxu1  ;;  %v11463_v11 = vld [vmem:[#allocation105_spill] sm:$0xff] }
 0x29e   : > { %v3966_v57 = vadd.f32 %v2866_v54, %v2862_v31  ;;  %v3959_v21 = vadd.f32 %v2865_v35, %v2861_v7  ;;  %v2868_v32 = vmul.f32 %v11455_v2, %v7297_v9  ;;  %v2870_v3 = vmul.f32 %v11457_v47, %v7304_v16  ;;  %11461 = vst [vmem:[#allocation140_spill] sm:$0xff] %v9389_v53  ;;  %v11462_v54 = vld [vmem:[#allocation101_spill] sm:$0xff]  ;;  %v11464_v2 = vld [vmem:[#allocation143_spill] sm:$0xff]  ;;  %v9401_v27 = vpop.f32.mrb[162].mxu1 }
 0x29f   : > { %v3973_v40 = vadd.f32 %v2867_v33, %v2863_v39  ;;  %v2869_v51 = vmul.f32 %v11458_v52, %v7299_v12  ;;  %v2871_v61 = vmul.f32 %v11459_v22, %v7324_v26  ;;  %v3953_v31 = vrot.slane %v3952_v56, 4  ;;  %v11465_v52 = vld [vmem:[#allocation104_spill] sm:$0xff]  ;;  %11467 = vst [vmem:[#allocation98_spill] sm:$0xff] %v9401_v27 }
 0x2a0   : > { %v3967_v7 = vrot.slane %v3966_v57, 4  ;;  %v3960_v14 = vrot.slane %v3959_v21, 4  ;;  %v2872_v35 = vmul.f32 %v11462_v54, %v7306_v17  ;;  %v2874_v33 = vmul.f32 %v11463_v11, %v7312_v20  ;;  %v9405_v11 = vpop.f32.mrb[163].mxu1 }
 0x2a1   : > { %v3974_v39 = vrot.slane %v3973_v40, 4  ;;  %v2873_v47 = vmul.f32 %v11464_v2, %v7308_v18  ;;  %v2875_v22 = vmul.f32 %v11465_v52, %v7330_v28  ;;  %v3954_v29 = vadd.f32 %v3953_v31, %v3952_v56  ;;  %11469 = vst [vmem:[#allocation96_spill] sm:$0xff] %v9405_v11 }
 0x2a2   : > { %v3968_v13 = vadd.f32 %v3967_v7, %v3966_v57  ;;  %v3961_v48 = vadd.f32 %v3960_v14, %v3959_v21  ;;  %v3980_v53 = vadd.f32 %v2872_v35, %v2868_v32  ;;  %v3994_v54 = vadd.f32 %v2874_v33, %v2870_v3 }
 0x2a3   : > { %v3975_v25 = vadd.f32 %v3974_v39, %v3973_v40  ;;  %v3987_v15 = vadd.f32 %v2873_v47, %v2869_v51  ;;  %v4001_v10 = vadd.f32 %v2875_v22, %v2871_v61  ;;  %v3955_v2 = vrot.slane %v3954_v29, 2  ;;  %v9407_v40 = vpop.f32.mrb[164].mxu0 }
 0x2a4   : > { %v3969_v19 = vrot.slane %v3968_v13, 2  ;;  %v3962_v63 = vrot.slane %v3961_v48, 2  ;;  %v3981_v52 = vrot.slane %v3980_v53, 4  ;;  %v3995_v57 = vrot.slane %v3994_v54, 4 }
 0x2a5   : > { %v3976_v56 = vrot.slane %v3975_v25, 2  ;;  %v3988_v21 = vrot.slane %v3987_v15, 4  ;;  %v4002_v32 = vrot.slane %v4001_v10, 4  ;;  %v3956_v31 = vadd.f32 %v3955_v2, %v3954_v29 }
 0x2a6   : > { %v3970_v7 = vadd.f32 %v3969_v19, %v3968_v13  ;;  %v3963_v14 = vadd.f32 %v3962_v63, %v3961_v48  ;;  %v3982_v35 = vadd.f32 %v3981_v52, %v3980_v53  ;;  %v3996_v51 = vadd.f32 %v3995_v57, %v3994_v54  ;;  %v9409_v48 = vpop.f32.mrb[164].mxu1  ;;  %v11471_v54 = vld [vmem:[#allocation65_spill] sm:$0xff]  ;;  %v11472_v52 = vld [vmem:[#allocation64_spill] sm:$0xff] }
 0x2a7   : > { %v3977_v3 = vadd.f32 %v3976_v56, %v3975_v25  ;;  %v3989_v61 = vadd.f32 %v3988_v21, %v3987_v15  ;;  %v4003_v39 = vadd.f32 %v4002_v32, %v4001_v10  ;;  %v3957_v33 = vrot.slane %v3956_v31, 1  ;;  %v11470_v15 = vld [vmem:[#allocation102_spill] sm:$0xff]  ;;  %v9414_v21 = vpop.f32.mrb[165].mxu0  ;;  %v9416_v32 = vpop.f32.mrb[165].mxu1 }
 0x2a8   : > { %v3971_v47 = vrot.slane %v3970_v7, 1  ;;  %v3964_v22 = vrot.slane %v3963_v14, 1  ;;  %v3983_v11 = vrot.slane %v3982_v35, 2  ;;  %v3997_v27 = vrot.slane %v3996_v51, 2 }
 0x2a9   : > { %v3978_v46 = vrot.slane %v3977_v3, 1  ;;  %v3990_v36 = vrot.slane %v3989_v61, 2  ;;  %v4004_v0 = vrot.slane %v4003_v39, 2  ;;  %v3958_v59 = vadd.f32 %v3957_v33, %v3956_v31  ;;  %v11473_v31 = vld [vmem:[#allocation108_spill] sm:$0xff] }
 0x2aa   : > { %v3972_v44 = vadd.f32 %v3971_v47, %v3970_v7  ;;  %v3965_v29 = vadd.f32 %v3964_v22, %v3963_v14  ;;  %v3984_v13 = vadd.f32 %v3983_v11, %v3982_v35  ;;  %v3998_v19 = vadd.f32 %v3997_v27, %v3996_v51 }
 0x2ab   : > { %v3979_v63 = vadd.f32 %v3978_v46, %v3977_v3  ;;  %v3991_v25 = vadd.f32 %v3990_v36, %v3989_v61  ;;  %v4005_v53 = vadd.f32 %v4004_v0, %v4003_v39  ;;  %v5176_v10 = vmul.f32 %v11470_v15, %v3958_v59  ;;  %v9419_v61 = vpop.f32.mrb[166].mxu0  ;;  %v9421_v39 = vpop.f32.mrb[166].mxu1 }
 0x2ac   : > { %v5178_v2 = vmul.f32 %v11471_v54, %v3972_v44  ;;  %v5177_v56 = vmul.f32 %v11472_v52, %v3965_v29  ;;  %v3985_v57 = vrot.slane %v3984_v13, 1  ;;  %v3999_v11 = vrot.slane %v3998_v19, 1  ;;  %v11474_v29 = vld [vmem:[#allocation70_spill] sm:$0xff] }
 0x2ad   : > { %v5179_v7 = vmul.f32 %v11473_v31, %v3979_v63  ;;  %v3992_v14 = vrot.slane %v3991_v25, 1  ;;  %v4006_v35 = vrot.slane %v4005_v53, 1  ;;  %v5755_v46 = vrot.slane %v5176_v10, 3 }
 0x2ae   : > { %v5783_v27 = vrot.slane %v5178_v2, 3  ;;  %v5769_v36 = vrot.slane %v5177_v56, 3  ;;  %v3986_v0 = vadd.f32 %v3985_v57, %v3984_v13  ;;  %v4000_v59 = vadd.f32 %v3999_v11, %v3998_v19  ;;  %v9430_v13 = vpop.f32.mrb[167].mxu0  ;;  %v9432_v19 = vpop.f32.mrb[167].mxu1  ;;  %v11476_v2 = vld [vmem:[#allocation110_spill] sm:$0xff] }
 0x2af   : > { %v5797_v3 = vrot.slane %v5179_v7, 3  ;;  %v3993_v51 = vadd.f32 %v3992_v14, %v3991_v25  ;;  %v4007_v44 = vadd.f32 %v4006_v35, %v4005_v53  ;;  %v5756_v33 = vsel %vm5585_vm5, %v5755_v46, %v9358_v62  ;;  %v11475_v53 = vld [vmem:[#allocation52_spill] sm:$0xff]  ;;  %v11477_v62 = vld [vmem:[#allocation53_spill] sm:$0xff] }
 0x2b0   : > { %v5784_v47 = vsel %vm5585_vm5, %v5783_v27, %v9367_v50  ;;  %v5770_v22 = vsel %vm5585_vm5, %v5769_v36, %v9370_v42  ;;  %v5180_v63 = vmul.f32 %v11474_v29, %v3986_v0  ;;  %v5182_v10 = vmul.f32 %v11475_v53, %v4000_v59  ;;  %v11478_v50 = vld [vmem:[#allocation67_spill] sm:$0xff]  ;;  %v9447_v36 = vpop.f32.mrb[168].mxu0  ;;  %v9449_v0 = vpop.f32.mrb[168].mxu1 }
 0x2b1   : > { %v5798_v25 = vsel %vm5585_vm5, %v5797_v3, %v9373_v30  ;;  %v5181_v56 = vmul.f32 %v11476_v2, %v3993_v51  ;;  %v5183_v57 = vmul.f32 %v11477_v62, %v4007_v44  ;;  %v2876_v11 = vmul.f32 %v11478_v50, %v7297_v9  ;;  %11479 = vst [vmem:[#allocation142_spill] sm:$0xff] %v9447_v36  ;;  %v9460_v51 = vpop.f32.mrb[169].mxu0  ;;  %v9462_v44 = vpop.f32.mrb[169].mxu1  ;;  %v11484_v50 = vld [vmem:[#allocation66_spill] sm:$0xff] }
 0x2b2   : > { %v5757_v7 = vrot.slane %v5180_v63, 2  ;;  %v2878_v42 = vmul.f32 %v8882_v24, %v7304_v16  ;;  %v2877_v14 = vmul.f32 %v8885_v43, %v7299_v12  ;;  %v5785_v35 = vrot.slane %v5182_v10, 2  ;;  %11480 = vst [vmem:[#allocation99_spill] sm:$0xff] %v9449_v0  ;;  %11481 = vst [vmem:[#allocation100_spill] sm:$0xff] %v9460_v51 }
 0x2b3   : > { %v5771_v46 = vrot.slane %v5181_v56, 2  ;;  %v5799_v27 = vrot.slane %v5183_v57, 2  ;;  %v2879_v30 = vmul.f32 %v8888_v60, %v7324_v26  ;;  %v2880_v59 = vmul.f32 %v8897_v6, %v7306_v17  ;;  %11482 = vst [vmem:[#allocation103_spill] sm:$0xff] %v9462_v44 }
 0x2b4   : > { %v9452_v3 = vsel %vm5588_vm6, %v5757_v7, %v5756_v33  ;;  %v2882_v24 = vmul.f32 %v8899_v49, %v7312_v20  ;;  %v2881_v43 = vmul.f32 %v8902_v58, %v7308_v18  ;;  %v9465_v60 = vsel %vm5588_vm6, %v5785_v35, %v5784_v47  ;;  %v11483_v7 = vld [vmem:[#allocation106_spill] sm:$0xff]  ;;  %v9483_v35 = vpop.f32.mrb[170].mxu0 }
 0x2b5   : > { %v9468_v63 = vsel %vm5588_vm6, %v5771_v46, %v5770_v22  ;;  %v9471_v33 = vsel %vm5588_vm6, %v5799_v27, %v5798_v25  ;;  %v2883_v6 = vmul.f32 %v8905_v1, %v7330_v28  ;;  %v4008_v49 = vadd.f32 %v2880_v59, %v2876_v11  ;;  %11485 = vst [vmem:[#allocation101_spill] sm:$0xff] %v9483_v35  ;;  %v9485_v46 = vpop.f32.mrb[170].mxu1  ;;  %v9489_v27 = vpop.f32.mrb[171].mxu0  ;;  %v11490_v59 = vld [vmem:[#allocation68_spill] sm:$0xff] }
 0x2b6   : > { %v4022_v10 = vadd.f32 %v2882_v24, %v2878_v42  ;;  %v4015_v56 = vadd.f32 %v2881_v43, %v2877_v14  ;;  %v2884_v58 = vmul.f32 %v8918_v37, %v7297_v9  ;;  %v2886_v47 = vmul.f32 %v8920_v41, %v7304_v16  ;;  %11486 = vst [vmem:[#allocation105_spill] sm:$0xff] %v9485_v46  ;;  %v11487_v14 = vld [vmem:[#allocation107_spill] sm:$0xff]  ;;  %v11491_v43 = vld [vmem:[#allocation69_spill] sm:$0xff]  ;;  %v9499_v15 = vpop.f32.mrb[172].mxu0 }
 0x2b7   : > { %v4029_v57 = vadd.f32 %v2883_v6, %v2879_v30  ;;  %v2885_v22 = vmul.f32 %v11483_v7, %v7299_v12  ;;  %v2887_v25 = vmul.f32 %v11484_v50, %v7324_v26  ;;  %v4009_v1 = vrot.slane %v4008_v49, 4  ;;  %11488 = vst [vmem:[#allocation143_spill] sm:$0xff] %v9489_v27  ;;  %v9491_v30 = vpop.f32.mrb[171].mxu1  ;;  %v11492_v7 = vld [vmem:[#allocation72_spill] sm:$0xff]  ;;  %11493 = vst [vmem:[#allocation67_spill] sm:$0xff] %v9499_v15 }
 0x2b8   : > { %v4023_v11 = vrot.slane %v4022_v10, 4  ;;  %v4016_v42 = vrot.slane %v4015_v56, 4  ;;  %v2888_v37 = vmul.f32 %v11487_v14, %v7306_v17  ;;  %11489 = vst [vmem:[#allocation104_spill] sm:$0xff] %v9491_v30  ;;  %v2890_v24 = vmul.f32 %v11490_v59, %v7312_v20 }
 0x2b9   : > { %v4030_v41 = vrot.slane %v4029_v57, 4  ;;  %v2889_v6 = vmul.f32 %v11491_v43, %v7308_v18  ;;  %v2891_v50 = vmul.f32 %v11492_v7, %v7330_v28  ;;  %v4010_v62 = vadd.f32 %v4009_v1, %v4008_v49 }
 0x2ba   : > { %v4024_v2 = vadd.f32 %v4023_v11, %v4022_v10  ;;  %v4017_v53 = vadd.f32 %v4016_v42, %v4015_v56  ;;  %v4036_v29 = vadd.f32 %v2888_v37, %v2884_v58  ;;  %v4050_v14 = vadd.f32 %v2890_v24, %v2886_v47 }
 0x2bb   : > { %v4031_v31 = vadd.f32 %v4030_v41, %v4029_v57  ;;  %v4043_v52 = vadd.f32 %v2889_v6, %v2885_v22  ;;  %v4057_v54 = vadd.f32 %v2891_v50, %v2887_v25  ;;  %v4011_v30 = vrot.slane %v4010_v62, 2 }
 0x2bc   : > { %v4025_v27 = vrot.slane %v4024_v2, 2  ;;  %v4018_v46 = vrot.slane %v4017_v53, 2  ;;  %v4037_v59 = vrot.slane %v4036_v29, 4  ;;  %v4051_v44 = vrot.slane %v4050_v14, 4 }
 0x2bd   : > { %v4032_v35 = vrot.slane %v4031_v31, 2  ;;  %v4044_v43 = vrot.slane %v4043_v52, 4  ;;  %v4058_v51 = vrot.slane %v4057_v54, 4  ;;  %v4012_v0 = vadd.f32 %v4011_v30, %v4010_v62  ;;  %v9501_v62 = vpop.f32.mrb[172].mxu1  ;;  %v9506_v30 = vpop.f32.mrb[173].mxu0 }
 0x2be   : > { %v4026_v7 = vadd.f32 %v4025_v27, %v4024_v2  ;;  %v4019_v49 = vadd.f32 %v4018_v46, %v4017_v53  ;;  %v4038_v10 = vadd.f32 %v4037_v59, %v4036_v29  ;;  %v4052_v58 = vadd.f32 %v4051_v44, %v4050_v14  ;;  %v9508_v14 = vpop.f32.mrb[173].mxu1 }
 0x2bf   : > { %v4033_v56 = vadd.f32 %v4032_v35, %v4031_v31  ;;  %v4045_v57 = vadd.f32 %v4044_v43, %v4043_v52  ;;  %v4059_v47 = vadd.f32 %v4058_v51, %v4057_v54  ;;  %v4013_v22 = vrot.slane %v4012_v0, 1  ;;  %v11494_v52 = vld [vmem:[#allocation74_spill] sm:$0xff]  ;;  %v11495_v51 = vld [vmem:[#allocation73_spill] sm:$0xff]  ;;  %v11496_v35 = vld [vmem:[#allocation115_spill] sm:$0xff] }
 0x2c0   : > { %v4027_v25 = vrot.slane %v4026_v7, 1  ;;  %v4020_v1 = vrot.slane %v4019_v49, 1  ;;  %v4039_v11 = vrot.slane %v4038_v10, 2  ;;  %v4053_v37 = vrot.slane %v4052_v58, 2 }
 0x2c1   : > { %v4034_v42 = vrot.slane %v4033_v56, 1  ;;  %v4046_v41 = vrot.slane %v4045_v57, 2  ;;  %v4060_v24 = vrot.slane %v4059_v47, 2  ;;  %v4014_v6 = vadd.f32 %v4013_v22, %v4012_v0  ;;  %v11497_v0 = vld [vmem:[#allocation116_spill] sm:$0xff] }
 0x2c2   : > { %v4028_v50 = vadd.f32 %v4027_v25, %v4026_v7  ;;  %v4021_v15 = vadd.f32 %v4020_v1, %v4019_v49  ;;  %v4040_v36 = vadd.f32 %v4039_v11, %v4038_v10  ;;  %v4054_v29 = vadd.f32 %v4053_v37, %v4052_v58  ;;  %v9511_v11 = vpop.f32.mrb[174].mxu0 }
 0x2c3   : > { %v4035_v53 = vadd.f32 %v4034_v42, %v4033_v56  ;;  %v4047_v31 = vadd.f32 %v4046_v41, %v4045_v57  ;;  %v4061_v2 = vadd.f32 %v4060_v24, %v4059_v47  ;;  %v5184_v54 = vmul.f32 %v11494_v52, %v4014_v6  ;;  %v11498_v24 = vld [vmem:[#allocation8_spill] sm:$0xff] }
 0x2c4   : > { %v5186_v44 = vmul.f32 %v11495_v51, %v4028_v50  ;;  %v5185_v46 = vmul.f32 %v11496_v35, %v4021_v15  ;;  %v4041_v27 = vrot.slane %v4040_v36, 1  ;;  %v4055_v43 = vrot.slane %v4054_v29, 1  ;;  %v9513_v15 = vpop.f32.mrb[174].mxu1 }
 0x2c5   : > { %v5187_v59 = vmul.f32 %v11497_v0, %v4035_v53  ;;  %v4048_v7 = vrot.slane %v4047_v31, 1  ;;  %v4062_v49 = vrot.slane %v4061_v2, 1  ;;  %v5759_v10 = vrot.slane %v5184_v54, 1  ;;  %v9526_v50 = vpop.f32.mrb[175].mxu1  ;;  %v11500_v54 = vld [vmem:[#allocation10_spill] sm:$0xff] }
 0x2c6   : > { %v5787_v56 = vrot.slane %v5186_v44, 1  ;;  %v5773_v58 = vrot.slane %v5185_v46, 1  ;;  %v4042_v57 = vadd.f32 %v4041_v27, %v4040_v36  ;;  %v4056_v22 = vadd.f32 %v4055_v43, %v4054_v29  ;;  %v9524_v36 = vpop.f32.mrb[175].mxu0  ;;  %v11501_v46 = vld [vmem:[#allocation12_spill] sm:$0xff] }
 0x2c7   : > { %v5801_v47 = vrot.slane %v5187_v59, 1  ;;  %v4049_v25 = vadd.f32 %v4048_v7, %v4047_v31  ;;  %v4063_v1 = vadd.f32 %v4062_v49, %v4061_v2  ;;  %v5760_v42 = vsel %vm5591_vm7, %v5759_v10, %v9452_v3  ;;  %v11499_v2 = vld [vmem:[#allocation9_spill] sm:$0xff]  ;;  %v9545_v7 = vpop.f32.mrb[176].mxu0 }
 0x2c8   : > { %v5788_v37 = vsel %vm5591_vm7, %v5787_v56, %v9465_v60  ;;  %v5774_v41 = vsel %vm5591_vm7, %v5773_v58, %v9468_v63  ;;  %v9522_v6 = vmul.f32 %v4042_v57, %v11498_v24  ;;  %v6087_v53 = vadd.f32 %v5760_v42, %v9128_v45  ;;  %v9555_v58 = vpop.f32.mrb[177].mxu0 }
 0x2c9   : > { %v6101_v29 = vadd.f32 %v5788_v37, %v9132_v34  ;;  %v6094_v31 = vadd.f32 %v5774_v41, %v9136_v23  ;;  %v5802_v3 = vsel %vm5591_vm7, %v5801_v47, %v9471_v33  ;;  %v9535_v63 = vmul.f32 %v4056_v22, %v11499_v2  ;;  %v11502_v34 = vld [vmem:[#allocation71_spill] sm:$0xff]  ;;  %v9547_v33 = vpop.f32.mrb[176].mxu1  ;;  %11504 = vst [vmem:[#allocation66_spill] sm:$0xff] %v9555_v58  ;;  %v11507_v41 = vld [vmem:[#allocation109_spill] sm:$0xff] }
 0x2ca   : > { %v6108_v60 = vadd.f32 %v5802_v3, %v9146_v38  ;;  %v9538_v44 = vmul.f32 %v4049_v25, %v11500_v54  ;;  %v9541_v27 = vmul.f32 %v4063_v1, %v11501_v46  ;;  %v6088_v59 = vrot.slane %v6087_v53, 4  ;;  %11503 = vst [vmem:[#allocation106_spill] sm:$0xff] %v9547_v33  ;;  %v9557_v57 = vpop.f32.mrb[177].mxu1  ;;  %v11506_v37 = vld [vmem:[#allocation111_spill] sm:$0xff]  ;;  %v11508_v3 = vld [vmem:[#allocation112_spill] sm:$0xff]  ;;  %v11609_v58 = vld [vmem:[#allocation33_spill] sm:$0xff] }
 0x2cb   : > { %v6102_v45 = vrot.slane %v6101_v29, 4  ;;  %v6095_v43 = vrot.slane %v6094_v31, 4  ;;  %v2892_v23 = vmul.f32 %v11502_v34, %v7297_v9  ;;  %v2894_v49 = vmul.f32 %v8994_v55, %v7304_v16  ;;  %11505 = vst [vmem:[#allocation107_spill] sm:$0xff] %v9557_v57 }
 0x2cc   : > { %v6109_v38 = vrot.slane %v6108_v60, 4  ;;  %v2893_v10 = vmul.f32 %v9000_v4, %v7299_v12  ;;  %v2895_v56 = vmul.f32 %v9003_v5, %v7324_v26  ;;  %v6089_v47 = vadd.f32 %v6088_v59, %v6087_v53  ;;  %v9567_v53 = vpop.f32.mrb[178].mxu0 }
 0x2cd   : > { %v6103_v22 = vadd.f32 %v6102_v45, %v6101_v29  ;;  %v6096_v25 = vadd.f32 %v6095_v43, %v6094_v31  ;;  %v2896_v1 = vmul.f32 %v9009_v8, %v7306_v17  ;;  %v2898_v55 = vmul.f32 %v11506_v37, %v7312_v20  ;;  %11509 = vst [vmem:[#allocation68_spill] sm:$0xff] %v9567_v53  ;;  %v9569_v29 = vpop.f32.mrb[178].mxu1  ;;  %v9571_v45 = vpop.f32.mrb[179].mxu0 }
 0x2ce   : > { %v6110_v42 = vadd.f32 %v6109_v38, %v6108_v60  ;;  %v2897_v4 = vmul.f32 %v11507_v41, %v7308_v18  ;;  %v2899_v5 = vmul.f32 %v11508_v3, %v7330_v28  ;;  %v6090_v34 = vrot.slane %v6089_v47, 2  ;;  %11510 = vst [vmem:[#allocation69_spill] sm:$0xff] %v9569_v29  ;;  %11511 = vst [vmem:[#allocation72_spill] sm:$0xff] %v9571_v45  ;;  %v9573_v43 = vpop.f32.mrb[179].mxu1  ;;  %v9575_v53 = vpop.f32.mrb[180].mxu0 }
 0x2cf   : > { %v6104_v46 = vrot.slane %v6103_v22, 2  ;;  %v6097_v54 = vrot.slane %v6096_v25, 2  ;;  %v4064_v2 = vadd.f32 %v2896_v1, %v2892_v23  ;;  %v4078_v8 = vadd.f32 %v2898_v55, %v2894_v49  ;;  %11512 = vst [vmem:[#allocation71_spill] sm:$0xff] %v9573_v43  ;;  %11513 = vst [vmem:[#allocation111_spill] sm:$0xff] %v9575_v53 }
 0x2d0   : > { %v6111_v31 = vrot.slane %v6110_v42, 2  ;;  %v4071_v60 = vadd.f32 %v2897_v4, %v2893_v10  ;;  %v4085_v59 = vadd.f32 %v2899_v5, %v2895_v56  ;;  %v6091_v38 = vadd.f32 %v6090_v34, %v6089_v47 }
 0x2d1   : > { %v6105_v37 = vadd.f32 %v6104_v46, %v6103_v22  ;;  %v6098_v41 = vadd.f32 %v6097_v54, %v6096_v25  ;;  %v4065_v3 = vrot.slane %v4064_v2, 4  ;;  %v4079_v0 = vrot.slane %v4078_v8, 4 }
 0x2d2   : > { %v6112_v24 = vadd.f32 %v6111_v31, %v6110_v42  ;;  %v4072_v35 = vrot.slane %v4071_v60, 4  ;;  %v4086_v23 = vrot.slane %v4085_v59, 4  ;;  %v6092_v1 = vrot.slane %v6091_v38, 1 }
 0x2d3   : > { %v6106_v51 = vrot.slane %v6105_v37, 1  ;;  %v6099_v52 = vrot.slane %v6098_v41, 1  ;;  %v4066_v29 = vadd.f32 %v4065_v3, %v4064_v2  ;;  %v4080_v10 = vadd.f32 %v4079_v0, %v4078_v8  ;;  %v11518_v2 = vld [vmem:[#allocation54_spill] sm:$0xff]  ;;  %v11519_v0 = vld [vmem:[#allocation113_spill] sm:$0xff]  ;;  %v11520_v8 = vld [vmem:[#allocation75_spill] sm:$0xff] }
 0x2d4   : > { %v6113_v49 = vrot.slane %v6112_v24, 1  ;;  %v4073_v56 = vadd.f32 %v4072_v35, %v4071_v60  ;;  %v4087_v55 = vadd.f32 %v4086_v23, %v4085_v59  ;;  %v9577_v4 = vadd.f32 %v6092_v1, %v6091_v38  ;;  %v11521_v38 = vld [vmem:[#allocation117_spill] sm:$0xff]  ;;  %v11524_v1 = vld [vmem:[#allocation118_spill] sm:$0xff] }
 0x2d5   : > { %v9579_v47 = vadd.f32 %v6106_v51, %v6105_v37  ;;  %v9581_v54 = vadd.f32 %v6099_v52, %v6098_v41  ;;  %v4067_v46 = vrot.slane %v4066_v29, 2  ;;  %v4081_v25 = vrot.slane %v4080_v10, 2  ;;  %v11522_v41 = vld [vmem:[#allocation114_spill] sm:$0xff] }
 0x2d6   : > { %11514 = vst [vmem:[#allocation109_spill] sm:$0xff] %v9577_v4  ;;  %v9583_v22 = vadd.f32 %v6113_v49, %v6112_v24  ;;  %v4074_v42 = vrot.slane %v4073_v56, 2  ;;  %v4088_v5 = vrot.slane %v4087_v55, 2  ;;  %v2900_v31 = vmul.f32 %v11518_v2, %v7297_v9 }
 0x2d7   : > { %11515 = vst [vmem:[#allocation112_spill] sm:$0xff] %v9579_v47  ;;  %11516 = vst [vmem:[#allocation151_spill] sm:$0xff] %v9581_v54  ;;  %v4068_v34 = vadd.f32 %v4067_v46, %v4066_v29  ;;  %v2902_v35 = vmul.f32 %v11519_v0, %v7304_v16  ;;  %v2901_v60 = vmul.f32 %v11520_v8, %v7299_v12  ;;  %v11523_v29 = vld [vmem:[#allocation119_spill] sm:$0xff] }
 0x2d8   : > { %11517 = vst [vmem:[#allocation152_spill] sm:$0xff] %v9583_v22  ;;  %v4082_v51 = vadd.f32 %v4081_v25, %v4080_v10  ;;  %v4075_v59 = vadd.f32 %v4074_v42, %v4073_v56  ;;  %v4089_v52 = vadd.f32 %v4088_v5, %v4087_v55  ;;  %v2903_v24 = vmul.f32 %v11521_v38, %v7324_v26  ;;  %v11525_v10 = vld [vmem:[#allocation76_spill] sm:$0xff]  ;;  %v9601_v55 = vpop.f32.mrb[180].mxu1 }
 0x2d9   : > { %v4069_v37 = vrot.slane %v4068_v34, 1  ;;  %v2904_v3 = vmul.f32 %v11522_v41, %v7306_v17  ;;  %v2906_v23 = vmul.f32 %v11523_v29, %v7312_v20  ;;  %v2905_v49 = vmul.f32 %v11524_v1, %v7308_v18  ;;  %11526 = vst [vmem:[#allocation54_spill] sm:$0xff] %v9601_v55  ;;  %v9603_v29 = vpop.f32.mrb[181].mxu0  ;;  %v9605_v4 = vpop.f32.mrb[181].mxu1  ;;  %v11529_v1 = vld [vmem:[#allocation14_spill] sm:$0xff]  ;;  %v11531_v55 = vld [vmem:[#allocation16_spill] sm:$0xff] }
 0x2da   : > { %v4083_v46 = vrot.slane %v4082_v51, 1  ;;  %v4076_v2 = vrot.slane %v4075_v59, 1  ;;  %v4090_v0 = vrot.slane %v4089_v52, 1  ;;  %v2907_v56 = vmul.f32 %v11525_v10, %v7330_v28  ;;  %11527 = vst [vmem:[#allocation113_spill] sm:$0xff] %v9603_v29  ;;  %11528 = vst [vmem:[#allocation75_spill] sm:$0xff] %v9605_v4  ;;  %v11530_v10 = vld [vmem:[#allocation15_spill] sm:$0xff] }
 0x2db   : > { %v4070_v25 = vadd.f32 %v4069_v37, %v4068_v34  ;;  %v4092_v42 = vadd.f32 %v2904_v3, %v2900_v31  ;;  %v4106_v5 = vadd.f32 %v2906_v23, %v2902_v35  ;;  %v4099_v8 = vadd.f32 %v2905_v49, %v2901_v60  ;;  %v11532_v31 = vld [vmem:[#allocation17_spill] sm:$0xff]  ;;  %v9611_v37 = vpop.f32.mrb[182].mxu0  ;;  %v9613_v3 = vpop.f32.mrb[182].mxu1 }
 0x2dc   : > { %v4084_v38 = vadd.f32 %v4083_v46, %v4082_v51  ;;  %v4077_v41 = vadd.f32 %v4076_v2, %v4075_v59  ;;  %v4091_v47 = vadd.f32 %v4090_v0, %v4089_v52  ;;  %v4113_v22 = vadd.f32 %v2907_v56, %v2903_v24  ;;  %11533 = vst [vmem:[#allocation117_spill] sm:$0xff] %v9611_v37  ;;  %v9615_v0 = vpop.f32.mrb[183].mxu0  ;;  %v9617_v56 = vpop.f32.mrb[183].mxu1  ;;  %v11554_v37 = vld [vmem:[#allocation19_spill] sm:$0xff] }
 0x2dd   : > { %v5192_v54 = vmul.f32 %v11529_v1, %v4070_v25  ;;  %v4093_v53 = vrot.slane %v4092_v42, 4  ;;  %v4107_v43 = vrot.slane %v4106_v5, 4  ;;  %v4100_v45 = vrot.slane %v4099_v8, 4  ;;  %11534 = vst [vmem:[#allocation114_spill] sm:$0xff] %v9613_v3  ;;  %11535 = vst [vmem:[#allocation119_spill] sm:$0xff] %v9615_v0 }
 0x2de   : > { %v5194_v57 = vmul.f32 %v11530_v10, %v4084_v38  ;;  %v5193_v34 = vmul.f32 %v11531_v55, %v4077_v41  ;;  %v5195_v35 = vmul.f32 %v11532_v31, %v4091_v47  ;;  %v4114_v60 = vrot.slane %v4113_v22, 4  ;;  %11536 = vst [vmem:[#allocation118_spill] sm:$0xff] %v9617_v56  ;;  %v11537_v38 = vld [vmem:[#allocation120_spill] sm:$0xff] }
 0x2df   : > { %v5803_v51 = vrot.slane %v5192_v54, 7  ;;  %v4094_v59 = vadd.f32 %v4093_v53, %v4092_v42  ;;  %v4108_v52 = vadd.f32 %v4107_v43, %v4106_v5  ;;  %v4101_v24 = vadd.f32 %v4100_v45, %v4099_v8 }
 0x2e0   : > { %v5831_v23 = vrot.slane %v5194_v57, 7  ;;  %v5817_v49 = vrot.slane %v5193_v34, 7  ;;  %v5845_v46 = vrot.slane %v5195_v35, 7  ;;  %v4115_v2 = vadd.f32 %v4114_v60, %v4113_v22  ;;  %v9631_v34 = vpop.f32.mrb[184].mxu1 }
 0x2e1   : > { %v5804_v47 = vsel %vm5573_vm1, %v5803_v51, %v9522_v6  ;;  %v4095_v25 = vrot.slane %v4094_v59, 2  ;;  %v4109_v54 = vrot.slane %v4108_v52, 2  ;;  %v4102_v53 = vrot.slane %v4101_v24, 2  ;;  %v9629_v6 = vpop.f32.mrb[184].mxu0  ;;  %11539 = vst [vmem:[#allocation120_spill] sm:$0xff] %v9631_v34 }
 0x2e2   : > { %v5832_v45 = vsel %vm5573_vm1, %v5831_v23, %v9535_v63  ;;  %v5818_v43 = vsel %vm5573_vm1, %v5817_v49, %v9538_v44  ;;  %v5846_v57 = vsel %vm5573_vm1, %v5845_v46, %v9541_v27  ;;  %v4116_v22 = vrot.slane %v4115_v2, 2  ;;  %11538 = vst [vmem:[#allocation76_spill] sm:$0xff] %v9629_v6  ;;  %v11540_v63 = vld [vmem:[#allocation55_spill] sm:$0xff]  ;;  %v11542_v27 = vld [vmem:[#allocation81_spill] sm:$0xff] }
 0x2e3   : > { %v4096_v42 = vadd.f32 %v4095_v25, %v4094_v59  ;;  %v4110_v5 = vadd.f32 %v4109_v54, %v4108_v52  ;;  %v4103_v8 = vadd.f32 %v4102_v53, %v4101_v24  ;;  %v2908_v41 = vmul.f32 %v11537_v38, %v7297_v9  ;;  %v11541_v44 = vld [vmem:[#allocation79_spill] sm:$0xff]  ;;  %v9639_v59 = vpop.f32.mrb[185].mxu0  ;;  %v9641_v52 = vpop.f32.mrb[185].mxu1  ;;  %v11545_v25 = vld [vmem:[#allocation122_spill] sm:$0xff]  ;;  %v11546_v53 = vld [vmem:[#allocation144_spill] sm:$0xff] }
 0x2e4   : > { %v4117_v35 = vadd.f32 %v4116_v22, %v4115_v2  ;;  %v2910_v60 = vmul.f32 %v11540_v63, %v7304_v16  ;;  %v2909_v51 = vmul.f32 %v11541_v44, %v7299_v12  ;;  %v2911_v23 = vmul.f32 %v11542_v27, %v7324_v26  ;;  %11543 = vst [vmem:[#allocation55_spill] sm:$0xff] %v9639_v59  ;;  %v11547_v38 = vld [vmem:[#allocation145_spill] sm:$0xff]  ;;  %v11548_v44 = vld [vmem:[#allocation146_spill] sm:$0xff]  ;;  %v9653_v59 = vpop.f32.mrb[186].mxu1 }
 0x2e5   : > { %11544 = vst [vmem:[#allocation79_spill] sm:$0xff] %v9641_v52  ;;  %v4097_v24 = vrot.slane %v4096_v42, 1  ;;  %v4111_v49 = vrot.slane %v4110_v5, 1  ;;  %v4104_v46 = vrot.slane %v4103_v8, 1  ;;  %v2912_v54 = vmul.f32 %v11545_v25, %v7306_v17  ;;  %v9651_v52 = vpop.f32.mrb[186].mxu0  ;;  %11550 = vst [vmem:[#allocation122_spill] sm:$0xff] %v9653_v59 }
 0x2e6   : > { %v4118_v2 = vrot.slane %v4117_v35, 1  ;;  %v2914_v22 = vmul.f32 %v11546_v53, %v7312_v20  ;;  %v2913_v63 = vmul.f32 %v11547_v38, %v7308_v18  ;;  %v2915_v27 = vmul.f32 %v11548_v44, %v7330_v28  ;;  %11549 = vst [vmem:[#allocation81_spill] sm:$0xff] %v9651_v52  ;;  %v9655_v0 = vpop.f32.mrb[187].mxu0  ;;  %v9657_v53 = vpop.f32.mrb[187].mxu1  ;;  %v11553_v38 = vld [vmem:[#allocation18_spill] sm:$0xff] }
 0x2e7   : > { %v4098_v31 = vadd.f32 %v4097_v24, %v4096_v42  ;;  %v4112_v55 = vadd.f32 %v4111_v49, %v4110_v5  ;;  %v4105_v10 = vadd.f32 %v4104_v46, %v4103_v8  ;;  %v4120_v1 = vadd.f32 %v2912_v54, %v2908_v41  ;;  %11551 = vst [vmem:[#allocation144_spill] sm:$0xff] %v9655_v0  ;;  %v11555_v42 = vld [vmem:[#allocation20_spill] sm:$0xff]  ;;  %v11556_v41 = vld [vmem:[#allocation21_spill] sm:$0xff] }
 0x2e8   : > { %v4119_v34 = vadd.f32 %v4118_v2, %v4117_v35  ;;  %v4134_v25 = vadd.f32 %v2914_v22, %v2910_v60  ;;  %v4127_v6 = vadd.f32 %v2913_v63, %v2909_v51  ;;  %v4141_v56 = vadd.f32 %v2915_v27, %v2911_v23  ;;  %11552 = vst [vmem:[#allocation145_spill] sm:$0xff] %v9657_v53  ;;  %v9663_v2 = vpop.f32.mrb[188].mxu0 }
 0x2e9   : > { %v5196_v3 = vmul.f32 %v11553_v38, %v4098_v31  ;;  %v5198_v44 = vmul.f32 %v11554_v37, %v4112_v55  ;;  %v5197_v5 = vmul.f32 %v11555_v42, %v4105_v10  ;;  %v4121_v8 = vrot.slane %v4120_v1, 4  ;;  %11557 = vst [vmem:[#allocation146_spill] sm:$0xff] %v9663_v2 }
 0x2ea   : > { %v5199_v24 = vmul.f32 %v11556_v41, %v4119_v34  ;;  %v4135_v49 = vrot.slane %v4134_v25, 4  ;;  %v4128_v46 = vrot.slane %v4127_v6, 4  ;;  %v4142_v54 = vrot.slane %v4141_v56, 4 }
 0x2eb   : > { %v5805_v35 = vrot.slane %v5196_v3, 6  ;;  %v5833_v60 = vrot.slane %v5198_v44, 6  ;;  %v5819_v51 = vrot.slane %v5197_v5, 6  ;;  %v4122_v23 = vadd.f32 %v4121_v8, %v4120_v1  ;;  %v11558_v1 = vld [vmem:[#allocation121_spill] sm:$0xff] }
 0x2ec   : > { %v5847_v22 = vrot.slane %v5199_v24, 6  ;;  %v4136_v63 = vadd.f32 %v4135_v49, %v4134_v25  ;;  %v4129_v27 = vadd.f32 %v4128_v46, %v4127_v6  ;;  %v4143_v31 = vadd.f32 %v4142_v54, %v4141_v56  ;;  %v11559_v25 = vld [vmem:[#allocation123_spill] sm:$0xff]  ;;  %v11560_v56 = vld [vmem:[#allocation124_spill] sm:$0xff] }
 0x2ed   : > { %v5806_v55 = vsel %vm5576_vm2, %v5805_v35, %v5804_v47  ;;  %v5834_v10 = vsel %vm5576_vm2, %v5833_v60, %v5832_v45  ;;  %v5820_v42 = vsel %vm5576_vm2, %v5819_v51, %v5818_v43  ;;  %v4123_v34 = vrot.slane %v4122_v23, 2  ;;  %v11561_v43 = vld [vmem:[#allocation61_spill] sm:$0xff]  ;;  %v11562_v54 = vld [vmem:[#allocation60_spill] sm:$0xff]  ;;  %v11563_v60 = vld [vmem:[#allocation62_spill] sm:$0xff] }
 0x2ee   : > { %v5848_v41 = vsel %vm5576_vm2, %v5847_v22, %v5846_v57  ;;  %v4137_v37 = vrot.slane %v4136_v63, 2  ;;  %v4130_v3 = vrot.slane %v4129_v27, 2  ;;  %v4144_v44 = vrot.slane %v4143_v31, 2 }
 0x2ef   : > { %v4124_v5 = vadd.f32 %v4123_v34, %v4122_v23  ;;  %v2916_v8 = vmul.f32 %v11558_v1, %v7297_v9  ;;  %v2918_v6 = vmul.f32 %v11559_v25, %v7304_v16  ;;  %v2917_v47 = vmul.f32 %v11560_v56, %v7299_v12  ;;  %v11564_v23 = vld [vmem:[#allocation125_spill] sm:$0xff] }
 0x2f0   : > { %v4138_v24 = vadd.f32 %v4137_v37, %v4136_v63  ;;  %v4131_v45 = vadd.f32 %v4130_v3, %v4129_v27  ;;  %v4145_v49 = vadd.f32 %v4144_v44, %v4143_v31  ;;  %v2919_v46 = vmul.f32 %v11561_v43, %v7324_v26  ;;  %v11565_v37 = vld [vmem:[#allocation63_spill] sm:$0xff]  ;;  %v9685_v27 = vpop.f32.mrb[188].mxu1 }
 0x2f1   : > { %v4125_v57 = vrot.slane %v4124_v5, 1  ;;  %v2920_v35 = vmul.f32 %v11562_v54, %v7306_v17  ;;  %v2922_v51 = vmul.f32 %v11563_v60, %v7312_v20  ;;  %v2921_v22 = vmul.f32 %v11564_v23, %v7308_v18  ;;  %11566 = vst [vmem:[#allocation121_spill] sm:$0xff] %v9685_v27  ;;  %v9687_v60 = vpop.f32.mrb[189].mxu0  ;;  %v9689_v53 = vpop.f32.mrb[189].mxu1  ;;  %v11569_v23 = vld [vmem:[#allocation22_spill] sm:$0xff]  ;;  %v11571_v27 = vld [vmem:[#allocation24_spill] sm:$0xff] }
 0x2f2   : > { %v4139_v34 = vrot.slane %v4138_v24, 1  ;;  %v4132_v1 = vrot.slane %v4131_v45, 1  ;;  %v4146_v25 = vrot.slane %v4145_v49, 1  ;;  %v2923_v63 = vmul.f32 %v11565_v37, %v7330_v28  ;;  %11567 = vst [vmem:[#allocation123_spill] sm:$0xff] %v9687_v60  ;;  %11568 = vst [vmem:[#allocation124_spill] sm:$0xff] %v9689_v53  ;;  %v11570_v37 = vld [vmem:[#allocation23_spill] sm:$0xff] }
 0x2f3   : > { %v4126_v31 = vadd.f32 %v4125_v57, %v4124_v5  ;;  %v4148_v3 = vadd.f32 %v2920_v35, %v2916_v8  ;;  %v4162_v44 = vadd.f32 %v2922_v51, %v2918_v6  ;;  %v4155_v56 = vadd.f32 %v2921_v22, %v2917_v47  ;;  %v11572_v8 = vld [vmem:[#allocation25_spill] sm:$0xff]  ;;  %v9695_v57 = vpop.f32.mrb[190].mxu0  ;;  %v9697_v35 = vpop.f32.mrb[190].mxu1  ;;  %v11608_v53 = vld [vmem:[#allocation32_spill] sm:$0xff] }
 0x2f4   : > { %v4140_v43 = vadd.f32 %v4139_v34, %v4138_v24  ;;  %v4133_v54 = vadd.f32 %v4132_v1, %v4131_v45  ;;  %v4147_v38 = vadd.f32 %v4146_v25, %v4145_v49  ;;  %v4169_v2 = vadd.f32 %v2923_v63, %v2919_v46  ;;  %11573 = vst [vmem:[#allocation61_spill] sm:$0xff] %v9695_v57  ;;  %v9699_v25 = vpop.f32.mrb[191].mxu0  ;;  %v9701_v63 = vpop.f32.mrb[191].mxu1  ;;  %v11594_v57 = vld [vmem:[#allocation27_spill] sm:$0xff] }
 0x2f5   : > { %v5200_v0 = vmul.f32 %v11569_v23, %v4126_v31  ;;  %v4149_v59 = vrot.slane %v4148_v3, 4  ;;  %v4163_v52 = vrot.slane %v4162_v44, 4  ;;  %v4156_v4 = vrot.slane %v4155_v56, 4  ;;  %11574 = vst [vmem:[#allocation60_spill] sm:$0xff] %v9697_v35  ;;  %11575 = vst [vmem:[#allocation62_spill] sm:$0xff] %v9699_v25 }
 0x2f6   : > { %v5202_v29 = vmul.f32 %v11570_v37, %v4140_v43  ;;  %v5201_v5 = vmul.f32 %v11571_v27, %v4133_v54  ;;  %v5203_v6 = vmul.f32 %v11572_v8, %v4147_v38  ;;  %v4170_v47 = vrot.slane %v4169_v2, 4  ;;  %11576 = vst [vmem:[#allocation125_spill] sm:$0xff] %v9701_v63 }
 0x2f7   : > { %v5807_v24 = vrot.slane %v5200_v0, 5  ;;  %v4150_v45 = vadd.f32 %v4149_v59, %v4148_v3  ;;  %v4164_v49 = vadd.f32 %v4163_v52, %v4162_v44  ;;  %v4157_v46 = vadd.f32 %v4156_v4, %v4155_v56 }
 0x2f8   : > { %v5835_v51 = vrot.slane %v5202_v29, 5  ;;  %v5821_v22 = vrot.slane %v5201_v5, 5  ;;  %v5849_v34 = vrot.slane %v5203_v6, 5  ;;  %v4171_v1 = vadd.f32 %v4170_v47, %v4169_v2  ;;  %v11577_v2 = vld [vmem:[#allocation126_spill] sm:$0xff]  ;;  %v9709_v5 = vpop.f32.mrb[192].mxu0  ;;  %v9711_v6 = vpop.f32.mrb[192].mxu1 }
 0x2f9   : > { %v5808_v31 = vsel %vm5579_vm3, %v5807_v24, %v5806_v55  ;;  %v4151_v38 = vrot.slane %v4150_v45, 2  ;;  %v4165_v43 = vrot.slane %v4164_v49, 2  ;;  %v4158_v0 = vrot.slane %v4157_v46, 2  ;;  %11578 = vst [vmem:[#allocation63_spill] sm:$0xff] %v9709_v5  ;;  %11579 = vst [vmem:[#allocation126_spill] sm:$0xff] %v9711_v6  ;;  %v11580_v47 = vld [vmem:[#allocation80_spill] sm:$0xff] }
 0x2fa   : > { %v5836_v59 = vsel %vm5579_vm3, %v5835_v51, %v5834_v10  ;;  %v5822_v4 = vsel %vm5579_vm3, %v5821_v22, %v5820_v42  ;;  %v5850_v52 = vsel %vm5579_vm3, %v5849_v34, %v5848_v41  ;;  %v4172_v3 = vrot.slane %v4171_v1, 2  ;;  %v11581_v10 = vld [vmem:[#allocation127_spill] sm:$0xff]  ;;  %v11582_v41 = vld [vmem:[#allocation82_spill] sm:$0xff] }
 0x2fb   : > { %v4152_v29 = vadd.f32 %v4151_v38, %v4150_v45  ;;  %v4166_v44 = vadd.f32 %v4165_v43, %v4164_v49  ;;  %v4159_v56 = vadd.f32 %v4158_v0, %v4157_v46  ;;  %v2924_v54 = vmul.f32 %v11577_v2, %v7297_v9  ;;  %v9719_v45 = vpop.f32.mrb[193].mxu0  ;;  %v9721_v49 = vpop.f32.mrb[193].mxu1  ;;  %v11585_v38 = vld [vmem:[#allocation147_spill] sm:$0xff]  ;;  %v11586_v0 = vld [vmem:[#allocation148_spill] sm:$0xff]  ;;  %v11587_v2 = vld [vmem:[#allocation149_spill] sm:$0xff] }
 0x2fc   : > { %v4173_v55 = vadd.f32 %v4172_v3, %v4171_v1  ;;  %v2926_v24 = vmul.f32 %v11580_v47, %v7304_v16  ;;  %v2925_v42 = vmul.f32 %v11581_v10, %v7299_v12  ;;  %v2927_v51 = vmul.f32 %v11582_v41, %v7324_v26  ;;  %11583 = vst [vmem:[#allocation80_spill] sm:$0xff] %v9719_v45  ;;  %v11588_v10 = vld [vmem:[#allocation150_spill] sm:$0xff]  ;;  %v9733_v45 = vpop.f32.mrb[194].mxu1 }
 0x2fd   : > { %11584 = vst [vmem:[#allocation127_spill] sm:$0xff] %v9721_v49  ;;  %v4153_v46 = vrot.slane %v4152_v29, 1  ;;  %v4167_v22 = vrot.slane %v4166_v44, 1  ;;  %v4160_v34 = vrot.slane %v4159_v56, 1  ;;  %v2928_v43 = vmul.f32 %v11585_v38, %v7306_v17  ;;  %v9731_v49 = vpop.f32.mrb[194].mxu0  ;;  %11590 = vst [vmem:[#allocation147_spill] sm:$0xff] %v9733_v45 }
 0x2fe   : > { %v4174_v1 = vrot.slane %v4173_v55, 1  ;;  %v2930_v3 = vmul.f32 %v11586_v0, %v7312_v20  ;;  %v2929_v47 = vmul.f32 %v11587_v2, %v7308_v18  ;;  %v2931_v41 = vmul.f32 %v11588_v10, %v7330_v28  ;;  %11589 = vst [vmem:[#allocation82_spill] sm:$0xff] %v9731_v49  ;;  %v9735_v25 = vpop.f32.mrb[195].mxu0  ;;  %v9737_v0 = vpop.f32.mrb[195].mxu1  ;;  %v11593_v2 = vld [vmem:[#allocation26_spill] sm:$0xff] }
 0x2ff   : > { %v4154_v8 = vadd.f32 %v4153_v46, %v4152_v29  ;;  %v4168_v27 = vadd.f32 %v4167_v22, %v4166_v44  ;;  %v4161_v37 = vadd.f32 %v4160_v34, %v4159_v56  ;;  %v4176_v23 = vadd.f32 %v2928_v43, %v2924_v54  ;;  %11591 = vst [vmem:[#allocation148_spill] sm:$0xff] %v9735_v25  ;;  %v11595_v29 = vld [vmem:[#allocation28_spill] sm:$0xff]  ;;  %v11596_v54 = vld [vmem:[#allocation29_spill] sm:$0xff] }
 0x300   : > { %v4175_v6 = vadd.f32 %v4174_v1, %v4173_v55  ;;  %v4190_v38 = vadd.f32 %v2930_v3, %v2926_v24  ;;  %v4183_v5 = vadd.f32 %v2929_v47, %v2925_v42  ;;  %v4197_v63 = vadd.f32 %v2931_v41, %v2927_v51  ;;  %11592 = vst [vmem:[#allocation149_spill] sm:$0xff] %v9737_v0  ;;  %v9743_v1 = vpop.f32.mrb[196].mxu0 }
 0x301   : > { %v5204_v35 = vmul.f32 %v11593_v2, %v4154_v8  ;;  %v5206_v10 = vmul.f32 %v11594_v57, %v4168_v27  ;;  %v5205_v44 = vmul.f32 %v11595_v29, %v4161_v37  ;;  %v4177_v56 = vrot.slane %v4176_v23, 4  ;;  %11597 = vst [vmem:[#allocation150_spill] sm:$0xff] %v9743_v1  ;;  %v11606_v1 = vld [vmem:[#allocation30_spill] sm:$0xff] }
 0x302   : > { %v5207_v46 = vmul.f32 %v11596_v54, %v4175_v6  ;;  %v4191_v22 = vrot.slane %v4190_v38, 4  ;;  %v4184_v34 = vrot.slane %v4183_v5, 4  ;;  %v4198_v43 = vrot.slane %v4197_v63, 4 }
 0x303   : > { %v5809_v55 = vrot.slane %v5204_v35, 4  ;;  %v5837_v24 = vrot.slane %v5206_v10, 4  ;;  %v5823_v42 = vrot.slane %v5205_v44, 4  ;;  %v4178_v51 = vadd.f32 %v4177_v56, %v4176_v23  ;;  %v11598_v23 = vld [vmem:[#allocation84_spill] sm:$0xff] }
 0x304   : > { %v5851_v3 = vrot.slane %v5207_v46, 4  ;;  %v4192_v47 = vadd.f32 %v4191_v22, %v4190_v38  ;;  %v4185_v41 = vadd.f32 %v4184_v34, %v4183_v5  ;;  %v4199_v8 = vadd.f32 %v4198_v43, %v4197_v63  ;;  %v11599_v38 = vld [vmem:[#allocation87_spill] sm:$0xff]  ;;  %v11600_v63 = vld [vmem:[#allocation56_spill] sm:$0xff]  ;;  %v11602_v43 = vld [vmem:[#allocation89_spill] sm:$0xff] }
 0x305   : > { %v5810_v27 = vsel %vm5582_vm4, %v5809_v55, %v5808_v31  ;;  %v5838_v37 = vsel %vm5582_vm4, %v5837_v24, %v5836_v59  ;;  %v5824_v29 = vsel %vm5582_vm4, %v5823_v42, %v5822_v4  ;;  %v4179_v6 = vrot.slane %v4178_v51, 2  ;;  %v11601_v4 = vld [vmem:[#allocation128_spill] sm:$0xff]  ;;  %v11603_v24 = vld [vmem:[#allocation59_spill] sm:$0xff] }
 0x306   : > { %v5852_v54 = vsel %vm5582_vm4, %v5851_v3, %v5850_v52  ;;  %v4193_v57 = vrot.slane %v4192_v47, 2  ;;  %v4186_v35 = vrot.slane %v4185_v41, 2  ;;  %v4200_v10 = vrot.slane %v4199_v8, 2 }
 0x307   : > { %v4180_v44 = vadd.f32 %v4179_v6, %v4178_v51  ;;  %v2932_v56 = vmul.f32 %v11598_v23, %v7297_v9  ;;  %v2934_v5 = vmul.f32 %v11599_v38, %v7304_v16  ;;  %v2933_v31 = vmul.f32 %v11600_v63, %v7299_v12  ;;  %v11604_v51 = vld [vmem:[#allocation129_spill] sm:$0xff] }
 0x308   : > { %v4194_v46 = vadd.f32 %v4193_v57, %v4192_v47  ;;  %v4187_v59 = vadd.f32 %v4186_v35, %v4185_v41  ;;  %v4201_v22 = vadd.f32 %v4200_v10, %v4199_v8  ;;  %v2935_v34 = vmul.f32 %v11601_v4, %v7324_v26  ;;  %v11605_v57 = vld [vmem:[#allocation94_spill] sm:$0xff] }
 0x309   : > { %v4181_v52 = vrot.slane %v4180_v44, 1  ;;  %v2936_v55 = vmul.f32 %v11602_v43, %v7306_v17  ;;  %v2938_v42 = vmul.f32 %v11603_v24, %v7312_v20  ;;  %v2937_v3 = vmul.f32 %v11604_v51, %v7308_v18  ;;  %v11607_v51 = vld [vmem:[#allocation31_spill] sm:$0xff] }
 0x30a   : > { %v4195_v6 = vrot.slane %v4194_v46, 1  ;;  %v4188_v23 = vrot.slane %v4187_v59, 1  ;;  %v4202_v38 = vrot.slane %v4201_v22, 1  ;;  %v2939_v47 = vmul.f32 %v11605_v57, %v7330_v28 }
 0x30b   : > { %v4182_v41 = vadd.f32 %v4181_v52, %v4180_v44  ;;  %v4204_v8 = vadd.f32 %v2936_v55, %v2932_v56  ;;  %v4218_v35 = vadd.f32 %v2938_v42, %v2934_v5  ;;  %v4211_v10 = vadd.f32 %v2937_v3, %v2933_v31  ;;  %v9769_v44 = vpop.f32.mrb[196].mxu1  ;;  %v9771_v55 = vpop.f32.mrb[197].mxu0 }
 0x30c   : > { %v4196_v63 = vadd.f32 %v4195_v6, %v4194_v46  ;;  %v4189_v4 = vadd.f32 %v4188_v23, %v4187_v59  ;;  %v4203_v2 = vadd.f32 %v4202_v38, %v4201_v22  ;;  %v4225_v43 = vadd.f32 %v2939_v47, %v2935_v34  ;;  %11610 = vst [vmem:[#allocation84_spill] sm:$0xff] %v9769_v44  ;;  %v9773_v42 = vpop.f32.mrb[197].mxu1  ;;  %v9776_v38 = vpop.f32.mrb[198].mxu0 }
 0x30d   : > { %v5208_v0 = vmul.f32 %v11606_v1, %v4182_v41  ;;  %v4205_v24 = vrot.slane %v4204_v8, 4  ;;  %v4219_v25 = vrot.slane %v4218_v35, 4  ;;  %v4212_v45 = vrot.slane %v4211_v10, 4  ;;  %11611 = vst [vmem:[#allocation87_spill] sm:$0xff] %v9771_v55  ;;  %11612 = vst [vmem:[#allocation56_spill] sm:$0xff] %v9773_v42  ;;  %v11614_v41 = vld [vmem:[#allocation92_spill] sm:$0xff] }
 0x30e   : > { %v5210_v49 = vmul.f32 %v11607_v51, %v4196_v63  ;;  %v5209_v60 = vmul.f32 %v11608_v53, %v4189_v4  ;;  %v5211_v33 = vmul.f32 %v11609_v58, %v4203_v2  ;;  %v4226_v57 = vrot.slane %v4225_v43, 4  ;;  %11613 = vst [vmem:[#allocation128_spill] sm:$0xff] %v9776_v38  ;;  %v11617_v4 = vld [vmem:[#allocation93_spill] sm:$0xff]  ;;  %v11649_v55 = vld [vmem:[#allocation42_spill] sm:$0xff] }
 0x30f   : > { %v5811_v56 = vrot.slane %v5208_v0, 3  ;;  %v4206_v5 = vadd.f32 %v4205_v24, %v4204_v8  ;;  %v4220_v31 = vadd.f32 %v4219_v25, %v4218_v35  ;;  %v4213_v46 = vadd.f32 %v4212_v45, %v4211_v10  ;;  %v9783_v35 = vpop.f32.mrb[198].mxu1  ;;  %v11616_v10 = vld [vmem:[#allocation95_spill] sm:$0xff]  ;;  %v11648_v38 = vld [vmem:[#allocation41_spill] sm:$0xff] }
 0x310   : > { %v5839_v59 = vrot.slane %v5210_v49, 3  ;;  %v5825_v22 = vrot.slane %v5209_v60, 3  ;;  %v5853_v34 = vrot.slane %v5211_v33, 3  ;;  %v4227_v52 = vadd.f32 %v4226_v57, %v4225_v43  ;;  %11615 = vst [vmem:[#allocation89_spill] sm:$0xff] %v9783_v35  ;;  %v9793_v24 = vpop.f32.mrb[199].mxu1  ;;  %v11630_v35 = vld [vmem:[#allocation35_spill] sm:$0xff] }
 0x311   : > { %v5812_v3 = vsel %vm5585_vm5, %v5811_v56, %v5810_v27  ;;  %v4207_v6 = vrot.slane %v4206_v5, 2  ;;  %v4221_v23 = vrot.slane %v4220_v31, 2  ;;  %v4214_v2 = vrot.slane %v4213_v46, 2  ;;  %11620 = vst [vmem:[#allocation129_spill] sm:$0xff] %v9793_v24  ;;  %v9805_v58 = vpop.f32.mrb[200].mxu1 }
 0x312   : > { %v5840_v0 = vsel %vm5585_vm5, %v5839_v59, %v5838_v37  ;;  %v5826_v25 = vsel %vm5585_vm5, %v5825_v22, %v5824_v29  ;;  %v5854_v45 = vsel %vm5585_vm5, %v5853_v34, %v5852_v54  ;;  %v4228_v60 = vrot.slane %v4227_v52, 2  ;;  %v11618_v29 = vld [vmem:[#allocation132_spill] sm:$0xff]  ;;  %v9791_v54 = vpop.f32.mrb[199].mxu0  ;;  %v11622_v22 = vld [vmem:[#allocation134_spill] sm:$0xff]  ;;  %11626 = vst [vmem:[#allocation92_spill] sm:$0xff] %v9805_v58 }
 0x313   : > { %v4208_v33 = vadd.f32 %v4207_v6, %v4206_v5  ;;  %v4222_v49 = vadd.f32 %v4221_v23, %v4220_v31  ;;  %v4215_v47 = vadd.f32 %v4214_v2, %v4213_v46  ;;  %v2940_v8 = vmul.f32 %v11614_v41, %v7297_v9  ;;  %11619 = vst [vmem:[#allocation59_spill] sm:$0xff] %v9791_v54  ;;  %v11621_v31 = vld [vmem:[#allocation131_spill] sm:$0xff]  ;;  %v11624_v23 = vld [vmem:[#allocation136_spill] sm:$0xff] }
 0x314   : > { %v4229_v27 = vadd.f32 %v4228_v60, %v4227_v52  ;;  %v2942_v63 = vmul.f32 %v11616_v10, %v7304_v16  ;;  %v2941_v37 = vmul.f32 %v11617_v4, %v7299_v12  ;;  %v2943_v43 = vmul.f32 %v11618_v29, %v7324_v26  ;;  %v11623_v52 = vld [vmem:[#allocation133_spill] sm:$0xff]  ;;  %v9803_v29 = vpop.f32.mrb[200].mxu0 }
 0x315   : > { %v4209_v57 = vrot.slane %v4208_v33, 1  ;;  %v4223_v56 = vrot.slane %v4222_v49, 1  ;;  %v4216_v5 = vrot.slane %v4215_v47, 1  ;;  %v2944_v46 = vmul.f32 %v11621_v31, %v7306_v17  ;;  %11625 = vst [vmem:[#allocation94_spill] sm:$0xff] %v9803_v29  ;;  %v9807_v24 = vpop.f32.mrb[201].mxu0 }
 0x316   : > { %v4230_v59 = vrot.slane %v4229_v27, 1  ;;  %v2946_v34 = vmul.f32 %v11622_v22, %v7312_v20  ;;  %v2945_v6 = vmul.f32 %v11623_v52, %v7308_v18  ;;  %v2947_v2 = vmul.f32 %v11624_v23, %v7330_v28  ;;  %11627 = vst [vmem:[#allocation95_spill] sm:$0xff] %v9807_v24  ;;  %v9809_v22 = vpop.f32.mrb[201].mxu1  ;;  %v11629_v52 = vld [vmem:[#allocation34_spill] sm:$0xff] }
 0x317   : > { %v4210_v60 = vadd.f32 %v4209_v57, %v4208_v33  ;;  %v4224_v41 = vadd.f32 %v4223_v56, %v4222_v49  ;;  %v4217_v10 = vadd.f32 %v4216_v5, %v4215_v47  ;;  %v4232_v4 = vadd.f32 %v2944_v46, %v2940_v8  ;;  %11628 = vst [vmem:[#allocation93_spill] sm:$0xff] %v9809_v22  ;;  %v11631_v33 = vld [vmem:[#allocation36_spill] sm:$0xff]  ;;  %v11632_v8 = vld [vmem:[#allocation37_spill] sm:$0xff] }
 0x318   : > { %v4231_v53 = vadd.f32 %v4230_v59, %v4229_v27  ;;  %v4246_v31 = vadd.f32 %v2946_v34, %v2942_v63  ;;  %v4239_v51 = vadd.f32 %v2945_v6, %v2941_v37  ;;  %v4253_v1 = vadd.f32 %v2947_v2, %v2943_v43  ;;  %v9815_v59 = vpop.f32.mrb[202].mxu0  ;;  %v9817_v34 = vpop.f32.mrb[202].mxu1 }
 0x319   : > { %v5212_v54 = vmul.f32 %v11629_v52, %v4210_v60  ;;  %v5214_v23 = vmul.f32 %v11630_v35, %v4224_v41  ;;  %v5213_v49 = vmul.f32 %v11631_v33, %v4217_v10  ;;  %v4233_v47 = vrot.slane %v4232_v4, 4  ;;  %11633 = vst [vmem:[#allocation132_spill] sm:$0xff] %v9815_v59  ;;  %11634 = vst [vmem:[#allocation131_spill] sm:$0xff] %v9817_v34  ;;  %v9819_v35 = vpop.f32.mrb[203].mxu0  ;;  %v9821_v10 = vpop.f32.mrb[203].mxu1  ;;  %v11646_v59 = vld [vmem:[#allocation38_spill] sm:$0xff] }
 0x31a   : > { %v5215_v57 = vmul.f32 %v11632_v8, %v4231_v53  ;;  %v4247_v56 = vrot.slane %v4246_v31, 4  ;;  %v4240_v5 = vrot.slane %v4239_v51, 4  ;;  %v4254_v46 = vrot.slane %v4253_v1, 4  ;;  %11635 = vst [vmem:[#allocation134_spill] sm:$0xff] %v9819_v35  ;;  %11636 = vst [vmem:[#allocation133_spill] sm:$0xff] %v9821_v10 }
 0x31b   : > { %v5813_v27 = vrot.slane %v5212_v54, 2  ;;  %v5841_v63 = vrot.slane %v5214_v23, 2  ;;  %v5827_v37 = vrot.slane %v5213_v49, 2  ;;  %v4234_v43 = vadd.f32 %v4233_v47, %v4232_v4 }
 0x31c   : > { %v5855_v6 = vrot.slane %v5215_v57, 2  ;;  %v4248_v2 = vadd.f32 %v4247_v56, %v4246_v31  ;;  %v4241_v60 = vadd.f32 %v4240_v5, %v4239_v51  ;;  %v4255_v41 = vadd.f32 %v4254_v46, %v4253_v1  ;;  %v11637_v51 = vld [vmem:[#allocation135_spill] sm:$0xff]  ;;  %v11638_v31 = vld [vmem:[#allocation138_spill] sm:$0xff]  ;;  %v11639_v5 = vld [vmem:[#allocation137_spill] sm:$0xff]  ;;  %v9833_v46 = vpop.f32.mrb[204].mxu0 }
 0x31d   : > { %v5814_v53 = vsel %vm5588_vm6, %v5813_v27, %v5812_v3  ;;  %v5842_v8 = vsel %vm5588_vm6, %v5841_v63, %v5840_v0  ;;  %v5828_v54 = vsel %vm5588_vm6, %v5827_v37, %v5826_v25  ;;  %v4235_v23 = vrot.slane %v4234_v43, 2  ;;  %11640 = vst [vmem:[#allocation136_spill] sm:$0xff] %v9833_v46 }
 0x31e   : > { %v5856_v4 = vsel %vm5588_vm6, %v5855_v6, %v5854_v45  ;;  %v4249_v49 = vrot.slane %v4248_v2, 2  ;;  %v4242_v47 = vrot.slane %v4241_v60, 2  ;;  %v4256_v33 = vrot.slane %v4255_v41, 2  ;;  %v11641_v45 = vld [vmem:[#allocation140_spill] sm:$0xff] }
 0x31f   : > { %v4236_v57 = vadd.f32 %v4235_v23, %v4234_v43  ;;  %v2948_v1 = vmul.f32 %v11637_v51, %v7297_v9  ;;  %v2950_v56 = vmul.f32 %v11638_v31, %v7304_v16  ;;  %v2949_v3 = vmul.f32 %v11639_v5, %v7299_v12  ;;  %v11642_v43 = vld [vmem:[#allocation139_spill] sm:$0xff]  ;;  %v11643_v23 = vld [vmem:[#allocation98_spill] sm:$0xff]  ;;  %v11644_v31 = vld [vmem:[#allocation141_spill] sm:$0xff] }
 0x320   : > { %v4250_v0 = vadd.f32 %v4249_v49, %v4248_v2  ;;  %v4243_v25 = vadd.f32 %v4242_v47, %v4241_v60  ;;  %v4257_v27 = vadd.f32 %v4256_v33, %v4255_v41  ;;  %v2951_v63 = vmul.f32 %v11641_v45, %v7324_v26  ;;  %v11645_v2 = vld [vmem:[#allocation96_spill] sm:$0xff] }
 0x321   : > { %v4237_v37 = vrot.slane %v4236_v57, 1  ;;  %v2952_v6 = vmul.f32 %v11642_v43, %v7306_v17  ;;  %v2954_v51 = vmul.f32 %v11643_v23, %v7312_v20  ;;  %v2953_v52 = vmul.f32 %v11644_v31, %v7308_v18  ;;  %v11647_v31 = vld [vmem:[#allocation39_spill] sm:$0xff] }
 0x322   : > { %v4251_v10 = vrot.slane %v4250_v0, 1  ;;  %v4244_v5 = vrot.slane %v4243_v25, 1  ;;  %v4258_v35 = vrot.slane %v4257_v27, 1  ;;  %v2955_v60 = vmul.f32 %v11645_v2, %v7330_v28 }
 0x323   : > { %v4238_v33 = vadd.f32 %v4237_v37, %v4236_v57  ;;  %v4260_v41 = vadd.f32 %v2952_v6, %v2948_v1  ;;  %v4274_v49 = vadd.f32 %v2954_v51, %v2950_v56  ;;  %v4267_v47 = vadd.f32 %v2953_v52, %v2949_v3 }
 0x324   : > { %v4252_v45 = vadd.f32 %v4251_v10, %v4250_v0  ;;  %v4245_v46 = vadd.f32 %v4244_v5, %v4243_v25  ;;  %v4259_v34 = vadd.f32 %v4258_v35, %v4257_v27  ;;  %v4281_v43 = vadd.f32 %v2955_v60, %v2951_v63  ;;  %v9849_v10 = vpop.f32.mrb[204].mxu1  ;;  %v9851_v27 = vpop.f32.mrb[205].mxu0 }
 0x325   : > { %v5216_v22 = vmul.f32 %v11646_v59, %v4238_v33  ;;  %v4261_v23 = vrot.slane %v4260_v41, 4  ;;  %v4275_v24 = vrot.slane %v4274_v49, 4  ;;  %v4268_v58 = vrot.slane %v4267_v47, 4  ;;  %v9853_v63 = vpop.f32.mrb[205].mxu1 }
 0x326   : > { %v5218_v29 = vmul.f32 %v11647_v31, %v4252_v45  ;;  %v5217_v42 = vmul.f32 %v11648_v38, %v4245_v46  ;;  %v5219_v44 = vmul.f32 %v11649_v55, %v4259_v34  ;;  %v4282_v2 = vrot.slane %v4281_v43, 4  ;;  %v9871_v60 = vpop.f32.mrb[206].mxu1 }
 0x327   : > { %v5815_v57 = vrot.slane %v5216_v22, 1  ;;  %v4262_v1 = vadd.f32 %v4261_v23, %v4260_v41  ;;  %v4276_v56 = vadd.f32 %v4275_v24, %v4274_v49  ;;  %v4269_v52 = vadd.f32 %v4268_v58, %v4267_v47  ;;  %v9858_v22 = vpop.f32.mrb[206].mxu0  ;;  %11650 = vst [vmem:[#allocation135_spill] sm:$0xff] %v9871_v60  ;;  %v9881_v49 = vpop.f32.mrb[207].mxu1 }
 0x328   : > { %v5843_v35 = vrot.slane %v5218_v29, 1  ;;  %v5829_v3 = vrot.slane %v5217_v42, 1  ;;  %v5857_v0 = vrot.slane %v5219_v44, 1  ;;  %v4283_v25 = vadd.f32 %v4282_v2, %v4281_v43  ;;  %v9879_v41 = vpop.f32.mrb[207].mxu0  ;;  %11652 = vst [vmem:[#allocation137_spill] sm:$0xff] %v9881_v49 }
 0x329   : > { %v9856_v37 = vsel %vm5591_vm7, %v5815_v57, %v5814_v53  ;;  %v4263_v46 = vrot.slane %v4262_v1, 2  ;;  %v4277_v34 = vrot.slane %v4276_v56, 2  ;;  %v4270_v6 = vrot.slane %v4269_v52, 2  ;;  %11651 = vst [vmem:[#allocation138_spill] sm:$0xff] %v9879_v41 }
 0x32a   : > { %v9861_v58 = vsel %vm5591_vm7, %v5843_v35, %v5842_v8  ;;  %v9864_v24 = vsel %vm5591_vm7, %v5829_v3, %v5828_v54  ;;  %v9867_v44 = vsel %vm5591_vm7, %v5857_v0, %v5856_v4  ;;  %v4284_v42 = vrot.slane %v4283_v25, 2  ;;  %v9893_v35 = vpop.f32.mrb[208].mxu1 }
 0x32b   : > { %v4264_v29 = vadd.f32 %v4263_v46, %v4262_v1  ;;  %v4278_v51 = vadd.f32 %v4277_v34, %v4276_v56  ;;  %v4271_v5 = vadd.f32 %v4270_v6, %v4269_v52  ;;  %v2956_v53 = vmul.f32 %v9407_v40, %v7297_v9  ;;  %v9891_v52 = vpop.f32.mrb[208].mxu0  ;;  %11654 = vst [vmem:[#allocation139_spill] sm:$0xff] %v9893_v35 }
 0x32c   : > { %v4285_v33 = vadd.f32 %v4284_v42, %v4283_v25  ;;  %v2958_v8 = vmul.f32 %v9409_v48, %v7304_v16  ;;  %v2957_v54 = vmul.f32 %v9414_v21, %v7299_v12  ;;  %v2959_v4 = vmul.f32 %v9416_v32, %v7324_v26  ;;  %11653 = vst [vmem:[#allocation140_spill] sm:$0xff] %v9891_v52  ;;  %v9895_v46 = vpop.f32.mrb[209].mxu0  ;;  %v11659_v42 = vld [vmem:[#allocation11_spill] sm:$0xff] }
 0x32d   : > { %v4265_v47 = vrot.slane %v4264_v29, 1  ;;  %v4279_v45 = vrot.slane %v4278_v51, 1  ;;  %v4272_v43 = vrot.slane %v4271_v5, 1  ;;  %v2960_v40 = vmul.f32 %v9419_v61, %v7306_v17  ;;  %11655 = vst [vmem:[#allocation98_spill] sm:$0xff] %v9895_v46 }
 0x32e   : > { %v4286_v23 = vrot.slane %v4285_v33, 1  ;;  %v2962_v48 = vmul.f32 %v9421_v39, %v7312_v20  ;;  %v2961_v21 = vmul.f32 %v9430_v13, %v7308_v18  ;;  %v2963_v32 = vmul.f32 %v9432_v19, %v7330_v28  ;;  %v9897_v39 = vpop.f32.mrb[209].mxu1  ;;  %v11657_v13 = vld [vmem:[#allocation40_spill] sm:$0xff]  ;;  %v11658_v19 = vld [vmem:[#allocation43_spill] sm:$0xff] }
 0x32f   : > { %v4266_v2 = vadd.f32 %v4265_v47, %v4264_v29  ;;  %v4280_v57 = vadd.f32 %v4279_v45, %v4278_v51  ;;  %v4273_v1 = vadd.f32 %v4272_v43, %v4271_v5  ;;  %v4288_v56 = vadd.f32 %v2960_v40, %v2956_v53  ;;  %11656 = vst [vmem:[#allocation141_spill] sm:$0xff] %v9897_v39  ;;  %v11660_v5 = vld [vmem:[#allocation13_spill] sm:$0xff]  ;;  %v11661_v47 = vld [vmem:[#allocation142_spill] sm:$0xff]  ;;  %v11662_v43 = vld [vmem:[#allocation99_spill] sm:$0xff] }
 0x330   : > { %v4287_v3 = vadd.f32 %v4286_v23, %v4285_v33  ;;  %v4302_v61 = vadd.f32 %v2962_v48, %v2958_v8  ;;  %v4295_v0 = vadd.f32 %v2961_v21, %v2957_v54  ;;  %v4309_v25 = vadd.f32 %v2963_v32, %v2959_v4  ;;  %v11663_v23 = vld [vmem:[#allocation100_spill] sm:$0xff]  ;;  %v9917_v21 = vpop.f32.mrb[210].mxu0  ;;  %v9919_v32 = vpop.f32.mrb[210].mxu1 }
 0x331   : > { %v9900_v34 = vmul.f32 %v4266_v2, %v11657_v13  ;;  %v9903_v6 = vmul.f32 %v4280_v57, %v11658_v19  ;;  %v9906_v29 = vmul.f32 %v4273_v1, %v11659_v42  ;;  %v4289_v51 = vrot.slane %v4288_v56, 4  ;;  %11664 = vst [vmem:[#allocation96_spill] sm:$0xff] %v9917_v21  ;;  %11665 = vst [vmem:[#allocation142_spill] sm:$0xff] %v9919_v32  ;;  %v11671_v13 = vld [vmem:[#allocation143_spill] sm:$0xff] }
 0x332   : > { %v9909_v53 = vmul.f32 %v4287_v3, %v11660_v5  ;;  %v4303_v33 = vrot.slane %v4302_v61, 4  ;;  %v4296_v8 = vrot.slane %v4295_v0, 4  ;;  %v4310_v54 = vrot.slane %v4309_v25, 4  ;;  %v11666_v3 = vld [vmem:[#allocation103_spill] sm:$0xff] }
 0x333   : > { %v4290_v4 = vadd.f32 %v4289_v51, %v4288_v56  ;;  %v2964_v45 = vmul.f32 %v11661_v47, %v7297_v9  ;;  %v2966_v40 = vmul.f32 %v11662_v43, %v7304_v16  ;;  %v2965_v48 = vmul.f32 %v11663_v23, %v7299_v12  ;;  %v9923_v56 = vpop.f32.mrb[211].mxu0  ;;  %v9925_v51 = vpop.f32.mrb[211].mxu1  ;;  %v11669_v43 = vld [vmem:[#allocation101_spill] sm:$0xff] }
 0x334   : > { %v4304_v2 = vadd.f32 %v4303_v33, %v4302_v61  ;;  %v4297_v57 = vadd.f32 %v4296_v8, %v4295_v0  ;;  %v4311_v1 = vadd.f32 %v4310_v54, %v4309_v25  ;;  %v2967_v5 = vmul.f32 %v11666_v3, %v7324_v26  ;;  %11667 = vst [vmem:[#allocation99_spill] sm:$0xff] %v9923_v56  ;;  %v11670_v23 = vld [vmem:[#allocation105_spill] sm:$0xff]  ;;  %v11672_v33 = vld [vmem:[#allocation104_spill] sm:$0xff]  ;;  %v9935_v59 = vpop.f32.mrb[212].mxu0 }
 0x335   : > { %11668 = vst [vmem:[#allocation100_spill] sm:$0xff] %v9925_v51  ;;  %v4291_v47 = vrot.slane %v4290_v4, 2  ;;  %v2968_v42 = vmul.f32 %v11669_v43, %v7306_v17  ;;  %v2970_v19 = vmul.f32 %v11670_v23, %v7312_v20  ;;  %v2969_v55 = vmul.f32 %v11671_v13, %v7308_v18  ;;  %11673 = vst [vmem:[#allocation103_spill] sm:$0xff] %v9935_v59 }
 0x336   : > { %v4305_v61 = vrot.slane %v4304_v2, 2  ;;  %v4298_v0 = vrot.slane %v4297_v57, 2  ;;  %v4312_v25 = vrot.slane %v4311_v1, 2  ;;  %v2971_v8 = vmul.f32 %v11672_v33, %v7330_v28 }
 0x337   : > { %v4292_v54 = vadd.f32 %v4291_v47, %v4290_v4  ;;  %v4316_v3 = vadd.f32 %v2968_v42, %v2964_v45  ;;  %v4330_v38 = vadd.f32 %v2970_v19, %v2966_v40  ;;  %v4323_v31 = vadd.f32 %v2969_v55, %v2965_v48  ;;  %v11674_v48 = vld [vmem:[#allocation44_spill] sm:$0xff]  ;;  %v11675_v47 = vld [vmem:[#allocation45_spill] sm:$0xff] }
 0x338   : > { %v4306_v51 = vadd.f32 %v4305_v61, %v4304_v2  ;;  %v4299_v43 = vadd.f32 %v4298_v0, %v4297_v57  ;;  %v4313_v56 = vadd.f32 %v4312_v25, %v4311_v1  ;;  %v4337_v32 = vadd.f32 %v2971_v8, %v2967_v5  ;;  %v11676_v0 = vld [vmem:[#allocation46_spill] sm:$0xff]  ;;  %v11677_v8 = vld [vmem:[#allocation47_spill] sm:$0xff] }
 0x339   : > { %v4293_v23 = vrot.slane %v4292_v54, 1  ;;  %v4317_v21 = vrot.slane %v4316_v3, 4  ;;  %v4331_v39 = vrot.slane %v4330_v38, 4  ;;  %v4324_v13 = vrot.slane %v4323_v31, 4 }
 0x33a   : > { %v4307_v46 = vrot.slane %v4306_v51, 1  ;;  %v4300_v35 = vrot.slane %v4299_v43, 1  ;;  %v4314_v52 = vrot.slane %v4313_v56, 1  ;;  %v4338_v49 = vrot.slane %v4337_v32, 4 }
 0x33b   : > { %v4294_v41 = vadd.f32 %v4293_v23, %v4292_v54  ;;  %v4318_v33 = vadd.f32 %v4317_v21, %v4316_v3  ;;  %v4332_v4 = vadd.f32 %v4331_v39, %v4330_v38  ;;  %v4325_v42 = vadd.f32 %v4324_v13, %v4323_v31  ;;  %v9943_v39 = vpop.f32.mrb[213].mxu0 }
 0x33c   : > { %v4308_v19 = vadd.f32 %v4307_v46, %v4306_v51  ;;  %v4301_v55 = vadd.f32 %v4300_v35, %v4299_v43  ;;  %v4315_v45 = vadd.f32 %v4314_v52, %v4313_v56  ;;  %v4339_v40 = vadd.f32 %v4338_v49, %v4337_v32  ;;  %v9941_v46 = vpop.f32.mrb[212].mxu1  ;;  %v9949_v23 = vpop.f32.mrb[214].mxu0 }
 0x33d   : > { %v5224_v2 = vmul.f32 %v11674_v48, %v4294_v41  ;;  %v4319_v57 = vrot.slane %v4318_v33, 2  ;;  %v4333_v5 = vrot.slane %v4332_v4, 2  ;;  %v4326_v1 = vrot.slane %v4325_v42, 2  ;;  %v9945_v32 = vpop.f32.mrb[213].mxu1 }
 0x33e   : > { %v5226_v61 = vmul.f32 %v11675_v47, %v4308_v19  ;;  %v5225_v25 = vmul.f32 %v11676_v0, %v4301_v55  ;;  %v5227_v59 = vmul.f32 %v11677_v8, %v4315_v45  ;;  %v4340_v60 = vrot.slane %v4339_v40, 2  ;;  %v9959_v45 = vpop.f32.mrb[214].mxu1 }
 0x33f   : > { %v5859_v54 = vrot.slane %v5224_v2, 7  ;;  %v4320_v21 = vadd.f32 %v4319_v57, %v4318_v33  ;;  %v4334_v38 = vadd.f32 %v4333_v5, %v4332_v4  ;;  %v4327_v31 = vadd.f32 %v4326_v1, %v4325_v42  ;;  %v9969_v57 = vpop.f32.mrb[215].mxu1  ;;  %v11679_v5 = vld [vmem:[#allocation48_spill] sm:$0xff] }
 0x340   : > { %v5887_v52 = vrot.slane %v5226_v61, 7  ;;  %v5873_v49 = vrot.slane %v5225_v25, 7  ;;  %v5901_v35 = vrot.slane %v5227_v59, 7  ;;  %v4341_v41 = vadd.f32 %v4340_v60, %v4339_v40  ;;  %v11680_v61 = vld [vmem:[#allocation49_spill] sm:$0xff] }
 0x341   : > { %v5860_v56 = vsel %vm5573_vm1, %v5859_v54, %v9900_v34  ;;  %v4321_v51 = vrot.slane %v4320_v21, 1  ;;  %v4335_v3 = vrot.slane %v4334_v38, 1  ;;  %v4328_v43 = vrot.slane %v4327_v31, 1  ;;  %v11678_v34 = vld [vmem:[#allocation67_spill] sm:$0xff]  ;;  %v11681_v54 = vld [vmem:[#allocation50_spill] sm:$0xff] }
 0x342   : > { %v5888_v13 = vsel %vm5573_vm1, %v5887_v52, %v9903_v6  ;;  %v5874_v33 = vsel %vm5573_vm1, %v5873_v49, %v9906_v29  ;;  %v5902_v59 = vsel %vm5573_vm1, %v5901_v35, %v9909_v53  ;;  %v4342_v60 = vrot.slane %v4341_v41, 1  ;;  %v9967_v53 = vpop.f32.mrb[215].mxu0 }
 0x343   : > { %v4322_v4 = vadd.f32 %v4321_v51, %v4320_v21  ;;  %v4336_v42 = vadd.f32 %v4335_v3, %v4334_v38  ;;  %v4329_v19 = vadd.f32 %v4328_v43, %v4327_v31  ;;  %v2972_v55 = vmul.f32 %v11678_v34, %v7297_v9  ;;  %v9983_v3 = vpop.f32.mrb[216].mxu0  ;;  %v9985_v43 = vpop.f32.mrb[216].mxu1 }
 0x344   : > { %v4343_v40 = vadd.f32 %v4342_v60, %v4341_v41  ;;  %v2974_v2 = vmul.f32 %v9501_v62, %v7304_v16  ;;  %v2973_v6 = vmul.f32 %v9506_v30, %v7299_v12  ;;  %v2975_v29 = vmul.f32 %v9508_v14, %v7324_v26  ;;  %v11682_v62 = vld [vmem:[#allocation51_spill] sm:$0xff]  ;;  %11683 = vst [vmem:[#allocation101_spill] sm:$0xff] %v9985_v43 }
 0x345   : > { %v5228_v1 = vmul.f32 %v11679_v5, %v4322_v4  ;;  %v5230_v25 = vmul.f32 %v11680_v61, %v4336_v42  ;;  %v5229_v21 = vmul.f32 %v11681_v54, %v4329_v19  ;;  %v2976_v38 = vmul.f32 %v9511_v11, %v7306_v17  ;;  %v9987_v19 = vpop.f32.mrb[217].mxu0 }
 0x346   : > { %v5231_v31 = vmul.f32 %v11682_v62, %v4343_v40  ;;  %v2978_v30 = vmul.f32 %v9513_v15, %v7312_v20  ;;  %v2977_v14 = vmul.f32 %v9524_v36, %v7308_v18  ;;  %v2979_v52 = vmul.f32 %v9526_v50, %v7330_v28  ;;  %11684 = vst [vmem:[#allocation105_spill] sm:$0xff] %v9987_v19  ;;  %v9989_v15 = vpop.f32.mrb[217].mxu1 }
 0x347   : > { %v5861_v49 = vrot.slane %v5228_v1, 6  ;;  %v5889_v35 = vrot.slane %v5230_v25, 6  ;;  %v5875_v41 = vrot.slane %v5229_v21, 6  ;;  %v4344_v51 = vadd.f32 %v2976_v38, %v2972_v55  ;;  %11685 = vst [vmem:[#allocation143_spill] sm:$0xff] %v9989_v15 }
 0x348   : > { %v5903_v11 = vrot.slane %v5231_v31, 6  ;;  %v4358_v60 = vadd.f32 %v2978_v30, %v2974_v2  ;;  %v4351_v4 = vadd.f32 %v2977_v14, %v2973_v6  ;;  %v4365_v42 = vadd.f32 %v2979_v52, %v2975_v29  ;;  %v10009_v31 = vpop.f32.mrb[218].mxu0  ;;  %v11690_v52 = vld [vmem:[#allocation107_spill] sm:$0xff] }
 0x349   : > { %v9992_v36 = vsel %vm5576_vm2, %v5861_v49, %v5860_v56  ;;  %v9995_v50 = vsel %vm5576_vm2, %v5889_v35, %v5888_v13  ;;  %v9998_v34 = vsel %vm5576_vm2, %v5875_v41, %v5874_v33  ;;  %v4345_v55 = vrot.slane %v4344_v51, 4  ;;  %v11686_v56 = vld [vmem:[#allocation106_spill] sm:$0xff]  ;;  %11688 = vst [vmem:[#allocation104_spill] sm:$0xff] %v10009_v31  ;;  %v10011_v33 = vpop.f32.mrb[218].mxu1  ;;  %v10015_v35 = vpop.f32.mrb[219].mxu0 }
 0x34a   : > { %v10001_v40 = vsel %vm5576_vm2, %v5903_v11, %v5902_v59  ;;  %v4359_v2 = vrot.slane %v4358_v60, 4  ;;  %v4352_v6 = vrot.slane %v4351_v4, 4  ;;  %v4366_v29 = vrot.slane %v4365_v42, 4  ;;  %v11687_v13 = vld [vmem:[#allocation66_spill] sm:$0xff]  ;;  %11689 = vst [vmem:[#allocation67_spill] sm:$0xff] %v10011_v33  ;;  %11691 = vst [vmem:[#allocation106_spill] sm:$0xff] %v10015_v35 }
 0x34b   : > { %v4346_v1 = vadd.f32 %v4345_v55, %v4344_v51  ;;  %v2980_v25 = vmul.f32 %v9545_v7, %v7297_v9  ;;  %v2982_v21 = vmul.f32 %v11686_v56, %v7304_v16  ;;  %v2981_v38 = vmul.f32 %v11687_v13, %v7299_v12  ;;  %v10017_v41 = vpop.f32.mrb[219].mxu1  ;;  %v11693_v51 = vld [vmem:[#allocation68_spill] sm:$0xff]  ;;  %v11694_v55 = vld [vmem:[#allocation69_spill] sm:$0xff]  ;;  %v10027_v5 = vpop.f32.mrb[220].mxu0 }
 0x34c   : > { %v4360_v30 = vadd.f32 %v4359_v2, %v4358_v60  ;;  %v4353_v59 = vadd.f32 %v4352_v6, %v4351_v4  ;;  %v4367_v14 = vadd.f32 %v4366_v29, %v4365_v42  ;;  %v2983_v49 = vmul.f32 %v11690_v52, %v7324_v26  ;;  %11692 = vst [vmem:[#allocation66_spill] sm:$0xff] %v10017_v41  ;;  %v11695_v13 = vld [vmem:[#allocation72_spill] sm:$0xff]  ;;  %v11696_v2 = vld [vmem:[#allocation71_spill] sm:$0xff] }
 0x34d   : > { %v4347_v7 = vrot.slane %v4346_v1, 2  ;;  %v2984_v11 = vmul.f32 %v11693_v51, %v7306_v17  ;;  %v2986_v56 = vmul.f32 %v11694_v55, %v7312_v20  ;;  %v2985_v62 = vmul.f32 %v11695_v13, %v7308_v18  ;;  %11697 = vst [vmem:[#allocation107_spill] sm:$0xff] %v10027_v5 }
 0x34e   : > { %v4361_v60 = vrot.slane %v4360_v30, 2  ;;  %v4354_v4 = vrot.slane %v4353_v59, 2  ;;  %v4368_v42 = vrot.slane %v4367_v14, 2  ;;  %v2987_v6 = vmul.f32 %v11696_v2, %v7330_v28 }
 0x34f   : > { %v4348_v29 = vadd.f32 %v4347_v7, %v4346_v1  ;;  %v4372_v52 = vadd.f32 %v2984_v11, %v2980_v25  ;;  %v4386_v54 = vadd.f32 %v2986_v56, %v2982_v21  ;;  %v4379_v61 = vadd.f32 %v2985_v62, %v2981_v38  ;;  %v11699_v56 = vld [vmem:[#allocation78_spill] sm:$0xff] }
 0x350   : > { %v4362_v8 = vadd.f32 %v4361_v60, %v4360_v30  ;;  %v4355_v51 = vadd.f32 %v4354_v4, %v4353_v59  ;;  %v4369_v0 = vadd.f32 %v4368_v42, %v4367_v14  ;;  %v4393_v47 = vadd.f32 %v2987_v6, %v2983_v49  ;;  %v11698_v30 = vld [vmem:[#allocation77_spill] sm:$0xff]  ;;  %v11700_v4 = vld [vmem:[#allocation83_spill] sm:$0xff]  ;;  %v11701_v6 = vld [vmem:[#allocation86_spill] sm:$0xff] }
 0x351   : > { %v4349_v55 = vrot.slane %v4348_v29, 1  ;;  %v4373_v48 = vrot.slane %v4372_v52, 4  ;;  %v4387_v41 = vrot.slane %v4386_v54, 4  ;;  %v4380_v13 = vrot.slane %v4379_v61, 4 }
 0x352   : > { %v4363_v35 = vrot.slane %v4362_v8, 1  ;;  %v4356_v33 = vrot.slane %v4355_v51, 1  ;;  %v4370_v31 = vrot.slane %v4369_v0, 1  ;;  %v4394_v15 = vrot.slane %v4393_v47, 4 }
 0x353   : > { %v4350_v19 = vadd.f32 %v4349_v55, %v4348_v29  ;;  %v4374_v2 = vadd.f32 %v4373_v48, %v4372_v52  ;;  %v4388_v1 = vadd.f32 %v4387_v41, %v4386_v54  ;;  %v4381_v25 = vadd.f32 %v4380_v13, %v4379_v61 }
 0x354   : > { %v4364_v21 = vadd.f32 %v4363_v35, %v4362_v8  ;;  %v4357_v62 = vadd.f32 %v4356_v33, %v4355_v51  ;;  %v4371_v38 = vadd.f32 %v4370_v31, %v4369_v0  ;;  %v4395_v7 = vadd.f32 %v4394_v15, %v4393_v47  ;;  %v10033_v8 = vpop.f32.mrb[220].mxu1  ;;  %v10035_v31 = vpop.f32.mrb[221].mxu0 }
 0x355   : > { %v5232_v59 = vmul.f32 %v11698_v30, %v4350_v19  ;;  %v4375_v14 = vrot.slane %v4374_v2, 2  ;;  %v4389_v49 = vrot.slane %v4388_v1, 2  ;;  %v4382_v11 = vrot.slane %v4381_v25, 2  ;;  %11702 = vst [vmem:[#allocation68_spill] sm:$0xff] %v10033_v8  ;;  %11703 = vst [vmem:[#allocation69_spill] sm:$0xff] %v10035_v31  ;;  %v10037_v33 = vpop.f32.mrb[221].mxu1 }
 0x356   : > { %v5234_v60 = vmul.f32 %v11699_v56, %v4364_v21  ;;  %v5233_v42 = vmul.f32 %v11700_v4, %v4357_v62  ;;  %v5235_v5 = vmul.f32 %v11701_v6, %v4371_v38  ;;  %v4396_v43 = vrot.slane %v4395_v7, 2  ;;  %11704 = vst [vmem:[#allocation72_spill] sm:$0xff] %v10037_v33  ;;  %v10041_v55 = vpop.f32.mrb[222].mxu0  ;;  %v10051_v38 = vpop.f32.mrb[222].mxu1  ;;  %v11735_v30 = vld [vmem:[#allocation144_spill] sm:$0xff] }
 0x357   : > { %v5863_v29 = vrot.slane %v5232_v59, 5  ;;  %v4376_v48 = vadd.f32 %v4375_v14, %v4374_v2  ;;  %v4390_v54 = vadd.f32 %v4389_v49, %v4388_v1  ;;  %v4383_v61 = vadd.f32 %v4382_v11, %v4381_v25  ;;  %11705 = vst [vmem:[#allocation71_spill] sm:$0xff] %v10041_v55  ;;  %v11708_v59 = vld [vmem:[#allocation54_spill] sm:$0xff] }
 0x358   : > { %v5891_v0 = vrot.slane %v5234_v60, 5  ;;  %v5877_v47 = vrot.slane %v5233_v42, 5  ;;  %v5905_v15 = vrot.slane %v5235_v5, 5  ;;  %v4397_v19 = vadd.f32 %v4396_v43, %v4395_v7  ;;  %v10061_v60 = vpop.f32.mrb[223].mxu1  ;;  %v11713_v42 = vld [vmem:[#allocation58_spill] sm:$0xff] }
 0x359   : > { %v5864_v35 = vsel %vm5579_vm3, %v5863_v29, %v9992_v36  ;;  %v4377_v41 = vrot.slane %v4376_v48, 1  ;;  %v4391_v52 = vrot.slane %v4390_v54, 1  ;;  %v4384_v51 = vrot.slane %v4383_v61, 1  ;;  %v11706_v36 = vld [vmem:[#allocation111_spill] sm:$0xff] }
 0x35a   : > { %v5892_v13 = vsel %vm5579_vm3, %v5891_v0, %v9995_v50  ;;  %v5878_v2 = vsel %vm5579_vm3, %v5877_v47, %v9998_v34  ;;  %v5906_v5 = vsel %vm5579_vm3, %v5905_v15, %v10001_v40  ;;  %v4398_v43 = vrot.slane %v4397_v19, 1  ;;  %11707 = vst [vmem:[#allocation111_spill] sm:$0xff] %v10051_v38  ;;  %v11709_v50 = vld [vmem:[#allocation113_spill] sm:$0xff]  ;;  %v11710_v34 = vld [vmem:[#allocation75_spill] sm:$0xff]  ;;  %v10059_v40 = vpop.f32.mrb[223].mxu0 }
 0x35b   : > { %v4378_v1 = vadd.f32 %v4377_v41, %v4376_v48  ;;  %v4392_v25 = vadd.f32 %v4391_v52, %v4390_v54  ;;  %v4385_v21 = vadd.f32 %v4384_v51, %v4383_v61  ;;  %v2988_v62 = vmul.f32 %v11706_v36, %v7297_v9  ;;  %11711 = vst [vmem:[#allocation54_spill] sm:$0xff] %v10059_v40  ;;  %v11714_v48 = vld [vmem:[#allocation88_spill] sm:$0xff]  ;;  %v11715_v61 = vld [vmem:[#allocation91_spill] sm:$0xff]  ;;  %v11716_v47 = vld [vmem:[#allocation117_spill] sm:$0xff] }
 0x35c   : > { %v4399_v7 = vadd.f32 %v4398_v43, %v4397_v19  ;;  %v2990_v14 = vmul.f32 %v11708_v59, %v7304_v16  ;;  %v2989_v49 = vmul.f32 %v11709_v50, %v7299_v12  ;;  %v2991_v11 = vmul.f32 %v11710_v34, %v7324_v26  ;;  %11712 = vst [vmem:[#allocation113_spill] sm:$0xff] %v10061_v60  ;;  %v11717_v19 = vld [vmem:[#allocation97_spill] sm:$0xff]  ;;  %v11718_v52 = vld [vmem:[#allocation114_spill] sm:$0xff]  ;;  %v11719_v43 = vld [vmem:[#allocation119_spill] sm:$0xff] }
 0x35d   : > { %v5236_v29 = vmul.f32 %v11713_v42, %v4378_v1  ;;  %v5238_v54 = vmul.f32 %v11714_v48, %v4392_v25  ;;  %v5237_v0 = vmul.f32 %v11715_v61, %v4385_v21  ;;  %v2992_v15 = vmul.f32 %v11716_v47, %v7306_v17  ;;  %v11720_v59 = vld [vmem:[#allocation118_spill] sm:$0xff]  ;;  %v10075_v48 = vpop.f32.mrb[224].mxu0  ;;  %v10077_v21 = vpop.f32.mrb[224].mxu1 }
 0x35e   : > { %v5239_v41 = vmul.f32 %v11717_v19, %v4399_v7  ;;  %v2994_v51 = vmul.f32 %v11718_v52, %v7312_v20  ;;  %v2993_v36 = vmul.f32 %v11719_v43, %v7308_v18  ;;  %v2995_v50 = vmul.f32 %v11720_v59, %v7330_v28  ;;  %11721 = vst [vmem:[#allocation75_spill] sm:$0xff] %v10075_v48  ;;  %v10079_v6 = vpop.f32.mrb[225].mxu0  ;;  %v10081_v52 = vpop.f32.mrb[225].mxu1 }
 0x35f   : > { %v5865_v34 = vrot.slane %v5236_v29, 4  ;;  %v5893_v1 = vrot.slane %v5238_v54, 4  ;;  %v5879_v42 = vrot.slane %v5237_v0, 4  ;;  %v4400_v25 = vadd.f32 %v2992_v15, %v2988_v62  ;;  %11722 = vst [vmem:[#allocation117_spill] sm:$0xff] %v10077_v21  ;;  %11723 = vst [vmem:[#allocation114_spill] sm:$0xff] %v10079_v6 }
 0x360   : > { %v5907_v47 = vrot.slane %v5239_v41, 4  ;;  %v4414_v61 = vadd.f32 %v2994_v51, %v2990_v14  ;;  %v4407_v7 = vadd.f32 %v2993_v36, %v2989_v49  ;;  %v4421_v19 = vadd.f32 %v2995_v50, %v2991_v11  ;;  %11724 = vst [vmem:[#allocation119_spill] sm:$0xff] %v10081_v52  ;;  %v11725_v41 = vld [vmem:[#allocation76_spill] sm:$0xff]  ;;  %v10101_v50 = vpop.f32.mrb[226].mxu0 }
 0x361   : > { %v10084_v43 = vsel %vm5582_vm4, %v5865_v34, %v5864_v35  ;;  %v10087_v29 = vsel %vm5582_vm4, %v5893_v1, %v5892_v13  ;;  %v10090_v62 = vsel %vm5582_vm4, %v5879_v42, %v5878_v2  ;;  %v4401_v54 = vrot.slane %v4400_v25, 4  ;;  %v11726_v35 = vld [vmem:[#allocation120_spill] sm:$0xff]  ;;  %v11727_v13 = vld [vmem:[#allocation55_spill] sm:$0xff]  ;;  %11728 = vst [vmem:[#allocation118_spill] sm:$0xff] %v10101_v50  ;;  %v10103_v2 = vpop.f32.mrb[226].mxu1 }
 0x362   : > { %v10093_v0 = vsel %vm5582_vm4, %v5907_v47, %v5906_v5  ;;  %v4415_v14 = vrot.slane %v4414_v61, 4  ;;  %v4408_v49 = vrot.slane %v4407_v7, 4  ;;  %v4422_v11 = vrot.slane %v4421_v19, 4  ;;  %11729 = vst [vmem:[#allocation76_spill] sm:$0xff] %v10103_v2  ;;  %v11730_v1 = vld [vmem:[#allocation79_spill] sm:$0xff] }
 0x363   : > { %v4402_v15 = vadd.f32 %v4401_v54, %v4400_v25  ;;  %v2996_v51 = vmul.f32 %v11725_v41, %v7297_v9  ;;  %v2998_v36 = vmul.f32 %v11726_v35, %v7304_v16  ;;  %v2997_v59 = vmul.f32 %v11727_v13, %v7299_v12  ;;  %v10107_v25 = vpop.f32.mrb[227].mxu0  ;;  %v10109_v54 = vpop.f32.mrb[227].mxu1  ;;  %v11733_v35 = vld [vmem:[#allocation81_spill] sm:$0xff]  ;;  %v11734_v13 = vld [vmem:[#allocation122_spill] sm:$0xff] }
 0x364   : > { %v4416_v42 = vadd.f32 %v4415_v14, %v4414_v61  ;;  %v4409_v5 = vadd.f32 %v4408_v49, %v4407_v7  ;;  %v4423_v34 = vadd.f32 %v4422_v11, %v4421_v19  ;;  %v2999_v47 = vmul.f32 %v11730_v1, %v7324_v26  ;;  %11731 = vst [vmem:[#allocation120_spill] sm:$0xff] %v10107_v25  ;;  %v11736_v14 = vld [vmem:[#allocation145_spill] sm:$0xff]  ;;  %v10119_v50 = vpop.f32.mrb[228].mxu0 }
 0x365   : > { %11732 = vst [vmem:[#allocation55_spill] sm:$0xff] %v10109_v54  ;;  %v4403_v41 = vrot.slane %v4402_v15, 2  ;;  %v3000_v4 = vmul.f32 %v11733_v35, %v7306_v17  ;;  %v3002_v56 = vmul.f32 %v11734_v13, %v7312_v20  ;;  %v3001_v2 = vmul.f32 %v11735_v30, %v7308_v18  ;;  %11737 = vst [vmem:[#allocation79_spill] sm:$0xff] %v10119_v50 }
 0x366   : > { %v4417_v61 = vrot.slane %v4416_v42, 2  ;;  %v4410_v7 = vrot.slane %v4409_v5, 2  ;;  %v4424_v19 = vrot.slane %v4423_v34, 2  ;;  %v3003_v49 = vmul.f32 %v11736_v14, %v7330_v28 }
 0x367   : > { %v4404_v11 = vadd.f32 %v4403_v41, %v4402_v15  ;;  %v4428_v1 = vadd.f32 %v3000_v4, %v2996_v51  ;;  %v4442_v25 = vadd.f32 %v3002_v56, %v2998_v36  ;;  %v4435_v54 = vadd.f32 %v3001_v2, %v2997_v59  ;;  %v11738_v2 = vld [vmem:[#allocation102_spill] sm:$0xff]  ;;  %v11739_v41 = vld [vmem:[#allocation65_spill] sm:$0xff] }
 0x368   : > { %v4418_v52 = vadd.f32 %v4417_v61, %v4416_v42  ;;  %v4411_v35 = vadd.f32 %v4410_v7, %v4409_v5  ;;  %v4425_v6 = vadd.f32 %v4424_v19, %v4423_v34  ;;  %v4449_v21 = vadd.f32 %v3003_v49, %v2999_v47  ;;  %v11740_v7 = vld [vmem:[#allocation64_spill] sm:$0xff] }
 0x369   : > { %v4405_v13 = vrot.slane %v4404_v11, 1  ;;  %v4429_v48 = vrot.slane %v4428_v1, 4  ;;  %v4443_v60 = vrot.slane %v4442_v25, 4  ;;  %v4436_v30 = vrot.slane %v4435_v54, 4  ;;  %v11741_v49 = vld [vmem:[#allocation108_spill] sm:$0xff] }
 0x36a   : > { %v4419_v40 = vrot.slane %v4418_v52, 1  ;;  %v4412_v38 = vrot.slane %v4411_v35, 1  ;;  %v4426_v55 = vrot.slane %v4425_v6, 1  ;;  %v4450_v33 = vrot.slane %v4449_v21, 4 }
 0x36b   : > { %v4406_v31 = vadd.f32 %v4405_v13, %v4404_v11  ;;  %v4430_v14 = vadd.f32 %v4429_v48, %v4428_v1  ;;  %v4444_v15 = vadd.f32 %v4443_v60, %v4442_v25  ;;  %v4437_v4 = vadd.f32 %v4436_v30, %v4435_v54  ;;  %v10125_v11 = vpop.f32.mrb[228].mxu1 }
 0x36c   : > { %v4420_v56 = vadd.f32 %v4419_v40, %v4418_v52  ;;  %v4413_v51 = vadd.f32 %v4412_v38, %v4411_v35  ;;  %v4427_v36 = vadd.f32 %v4426_v55, %v4425_v6  ;;  %v4451_v59 = vadd.f32 %v4450_v33, %v4449_v21  ;;  %11742 = vst [vmem:[#allocation81_spill] sm:$0xff] %v10125_v11  ;;  %v10127_v6 = vpop.f32.mrb[229].mxu0  ;;  %v10129_v33 = vpop.f32.mrb[229].mxu1 }
 0x36d   : > { %v5240_v42 = vmul.f32 %v11738_v2, %v4406_v31  ;;  %v4431_v5 = vrot.slane %v4430_v14, 2  ;;  %v4445_v34 = vrot.slane %v4444_v15, 2  ;;  %v4438_v47 = vrot.slane %v4437_v4, 2  ;;  %11743 = vst [vmem:[#allocation122_spill] sm:$0xff] %v10127_v6  ;;  %11744 = vst [vmem:[#allocation144_spill] sm:$0xff] %v10129_v33  ;;  %v10131_v25 = vpop.f32.mrb[230].mxu0 }
 0x36e   : > { %v5242_v61 = vmul.f32 %v11739_v41, %v4420_v56  ;;  %v5241_v19 = vmul.f32 %v11740_v7, %v4413_v51  ;;  %v5243_v50 = vmul.f32 %v11741_v49, %v4427_v36  ;;  %v4452_v8 = vrot.slane %v4451_v59, 2  ;;  %11745 = vst [vmem:[#allocation145_spill] sm:$0xff] %v10131_v25  ;;  %v11774_v2 = vld [vmem:[#allocation147_spill] sm:$0xff] }
 0x36f   : > { %v5867_v60 = vrot.slane %v5240_v42, 3  ;;  %v4432_v48 = vadd.f32 %v4431_v5, %v4430_v14  ;;  %v4446_v40 = vadd.f32 %v4445_v34, %v4444_v15  ;;  %v4439_v38 = vadd.f32 %v4438_v47, %v4437_v4  ;;  %v11750_v5 = vld [vmem:[#allocation121_spill] sm:$0xff]  ;;  %v11751_v34 = vld [vmem:[#allocation123_spill] sm:$0xff]  ;;  %v11752_v47 = vld [vmem:[#allocation124_spill] sm:$0xff] }
 0x370   : > { %v5895_v31 = vrot.slane %v5242_v61, 3  ;;  %v5881_v55 = vrot.slane %v5241_v19, 3  ;;  %v5909_v21 = vrot.slane %v5243_v50, 3  ;;  %v4453_v52 = vadd.f32 %v4452_v8, %v4451_v59  ;;  %v10141_v50 = vpop.f32.mrb[230].mxu1  ;;  %v10145_v59 = vpop.f32.mrb[231].mxu0  ;;  %v11753_v19 = vld [vmem:[#allocation70_spill] sm:$0xff] }
 0x371   : > { %v5868_v54 = vsel %vm5585_vm5, %v5867_v60, %v10084_v43  ;;  %v4433_v1 = vrot.slane %v4432_v48, 1  ;;  %v4447_v35 = vrot.slane %v4446_v40, 1  ;;  %v4440_v13 = vrot.slane %v4439_v38, 1  ;;  %11746 = vst [vmem:[#allocation153_spill] sm:$0xff] %v10141_v50  ;;  %v11747_v43 = vld [vmem:[#allocation146_spill] sm:$0xff]  ;;  %v10147_v42 = vpop.f32.mrb[231].mxu1 }
 0x372   : > { %v5896_v30 = vsel %vm5585_vm5, %v5895_v31, %v10087_v29  ;;  %v5882_v14 = vsel %vm5585_vm5, %v5881_v55, %v10090_v62  ;;  %v5910_v15 = vsel %vm5585_vm5, %v5909_v21, %v10093_v0  ;;  %v4454_v4 = vrot.slane %v4453_v52, 1  ;;  %11748 = vst [vmem:[#allocation146_spill] sm:$0xff] %v10145_v59  ;;  %11749 = vst [vmem:[#allocation154_spill] sm:$0xff] %v10147_v42  ;;  %v11756_v55 = vld [vmem:[#allocation61_spill] sm:$0xff] }
 0x373   : > { %v4434_v8 = vadd.f32 %v4433_v1, %v4432_v48  ;;  %v4448_v56 = vadd.f32 %v4447_v35, %v4446_v40  ;;  %v4441_v51 = vadd.f32 %v4440_v13, %v4439_v38  ;;  %v3004_v36 = vmul.f32 %v11747_v43, %v7297_v9  ;;  %v11754_v48 = vld [vmem:[#allocation52_spill] sm:$0xff]  ;;  %v11755_v38 = vld [vmem:[#allocation110_spill] sm:$0xff]  ;;  %v11757_v1 = vld [vmem:[#allocation53_spill] sm:$0xff] }
 0x374   : > { %v4455_v29 = vadd.f32 %v4454_v4, %v4453_v52  ;;  %v3006_v62 = vmul.f32 %v11750_v5, %v7304_v16  ;;  %v3005_v0 = vmul.f32 %v11751_v34, %v7299_v12  ;;  %v3007_v61 = vmul.f32 %v11752_v47, %v7324_v26  ;;  %v11758_v35 = vld [vmem:[#allocation60_spill] sm:$0xff]  ;;  %v11759_v4 = vld [vmem:[#allocation62_spill] sm:$0xff]  ;;  %v11760_v5 = vld [vmem:[#allocation125_spill] sm:$0xff]  ;;  %v10167_v47 = vpop.f32.mrb[232].mxu0 }
 0x375   : > { %v5244_v60 = vmul.f32 %v11753_v19, %v4434_v8  ;;  %v5246_v40 = vmul.f32 %v11754_v48, %v4448_v56  ;;  %v5245_v31 = vmul.f32 %v11755_v38, %v4441_v51  ;;  %v3008_v21 = vmul.f32 %v11756_v55, %v7306_v17  ;;  %11761 = vst [vmem:[#allocation121_spill] sm:$0xff] %v10167_v47  ;;  %v10169_v8 = vpop.f32.mrb[232].mxu1  ;;  %v10171_v55 = vpop.f32.mrb[233].mxu0 }
 0x376   : > { %v5247_v52 = vmul.f32 %v11757_v1, %v4455_v29  ;;  %v3010_v13 = vmul.f32 %v11758_v35, %v7312_v20  ;;  %v3009_v43 = vmul.f32 %v11759_v4, %v7308_v18  ;;  %v3011_v34 = vmul.f32 %v11760_v5, %v7330_v28  ;;  %11762 = vst [vmem:[#allocation123_spill] sm:$0xff] %v10169_v8  ;;  %v10173_v29 = vpop.f32.mrb[233].mxu1 }
 0x377   : > { %v5869_v56 = vrot.slane %v5244_v60, 2  ;;  %v5897_v51 = vrot.slane %v5246_v40, 2  ;;  %v5883_v38 = vrot.slane %v5245_v31, 2  ;;  %v4456_v48 = vadd.f32 %v3008_v21, %v3004_v36  ;;  %11763 = vst [vmem:[#allocation124_spill] sm:$0xff] %v10171_v55  ;;  %11764 = vst [vmem:[#allocation61_spill] sm:$0xff] %v10173_v29 }
 0x378   : > { %v5911_v1 = vrot.slane %v5247_v52, 2  ;;  %v4470_v35 = vadd.f32 %v3010_v13, %v3006_v62  ;;  %v4463_v19 = vadd.f32 %v3009_v43, %v3005_v0  ;;  %v4477_v49 = vadd.f32 %v3011_v34, %v3007_v61  ;;  %v10187_v52 = vpop.f32.mrb[234].mxu0  ;;  %v10189_v62 = vpop.f32.mrb[234].mxu1 }
 0x379   : > { %v10176_v4 = vsel %vm5588_vm6, %v5869_v56, %v5868_v54  ;;  %v10179_v5 = vsel %vm5588_vm6, %v5897_v51, %v5896_v30  ;;  %v10182_v7 = vsel %vm5588_vm6, %v5883_v38, %v5882_v14  ;;  %v4457_v60 = vrot.slane %v4456_v48, 4  ;;  %11765 = vst [vmem:[#allocation60_spill] sm:$0xff] %v10187_v52  ;;  %11766 = vst [vmem:[#allocation62_spill] sm:$0xff] %v10189_v62  ;;  %v11767_v54 = vld [vmem:[#allocation63_spill] sm:$0xff]  ;;  %v11768_v30 = vld [vmem:[#allocation126_spill] sm:$0xff]  ;;  %v10197_v43 = vpop.f32.mrb[235].mxu0 }
 0x37a   : > { %v10185_v36 = vsel %vm5588_vm6, %v5911_v1, %v5910_v15  ;;  %v4471_v40 = vrot.slane %v4470_v35, 4  ;;  %v4464_v31 = vrot.slane %v4463_v19, 4  ;;  %v4478_v21 = vrot.slane %v4477_v49, 4  ;;  %v11769_v14 = vld [vmem:[#allocation80_spill] sm:$0xff]  ;;  %11770 = vst [vmem:[#allocation125_spill] sm:$0xff] %v10197_v43  ;;  %v10199_v15 = vpop.f32.mrb[235].mxu1 }
 0x37b   : > { %v4458_v0 = vadd.f32 %v4457_v60, %v4456_v48  ;;  %v3012_v61 = vmul.f32 %v11767_v54, %v7297_v9  ;;  %v3014_v13 = vmul.f32 %v11768_v30, %v7304_v16  ;;  %v3013_v38 = vmul.f32 %v11769_v14, %v7299_v12  ;;  %11771 = vst [vmem:[#allocation63_spill] sm:$0xff] %v10199_v15  ;;  %v11772_v51 = vld [vmem:[#allocation127_spill] sm:$0xff]  ;;  %v11773_v60 = vld [vmem:[#allocation82_spill] sm:$0xff]  ;;  %v11775_v62 = vld [vmem:[#allocation148_spill] sm:$0xff] }
 0x37c   : > { %v4472_v1 = vadd.f32 %v4471_v40, %v4470_v35  ;;  %v4465_v34 = vadd.f32 %v4464_v31, %v4463_v19  ;;  %v4479_v56 = vadd.f32 %v4478_v21, %v4477_v49  ;;  %v3015_v41 = vmul.f32 %v11772_v51, %v7324_v26  ;;  %v11776_v35 = vld [vmem:[#allocation149_spill] sm:$0xff]  ;;  %v10211_v49 = vpop.f32.mrb[236].mxu0 }
 0x37d   : > { %v4459_v48 = vrot.slane %v4458_v0, 2  ;;  %v3016_v54 = vmul.f32 %v11773_v60, %v7306_v17  ;;  %v3018_v30 = vmul.f32 %v11774_v2, %v7312_v20  ;;  %v3017_v14 = vmul.f32 %v11775_v62, %v7308_v18  ;;  %11777 = vst [vmem:[#allocation126_spill] sm:$0xff] %v10211_v49 }
 0x37e   : > { %v4473_v52 = vrot.slane %v4472_v1, 2  ;;  %v4466_v43 = vrot.slane %v4465_v34, 2  ;;  %v4480_v29 = vrot.slane %v4479_v56, 2  ;;  %v3019_v19 = vmul.f32 %v11776_v35, %v7330_v28 }
 0x37f   : > { %v4460_v40 = vadd.f32 %v4459_v48, %v4458_v0  ;;  %v4484_v31 = vadd.f32 %v3016_v54, %v3012_v61  ;;  %v4498_v21 = vadd.f32 %v3018_v30, %v3014_v13  ;;  %v4491_v51 = vadd.f32 %v3017_v14, %v3013_v38  ;;  %v11780_v54 = vld [vmem:[#allocation115_spill] sm:$0xff]  ;;  %v11781_v14 = vld [vmem:[#allocation116_spill] sm:$0xff] }
 0x380   : > { %v4474_v15 = vadd.f32 %v4473_v52, %v4472_v1  ;;  %v4467_v60 = vadd.f32 %v4466_v43, %v4465_v34  ;;  %v4481_v55 = vadd.f32 %v4480_v29, %v4479_v56  ;;  %v4505_v8 = vadd.f32 %v3019_v19, %v3015_v41  ;;  %v11778_v52 = vld [vmem:[#allocation74_spill] sm:$0xff]  ;;  %v10214_v34 = vpop.f32.mrb[236].mxu1  ;;  %v11779_v56 = vld [vmem:[#allocation73_spill] sm:$0xff] }
 0x381   : > { %v4461_v2 = vrot.slane %v4460_v40, 1  ;;  %v4485_v47 = vrot.slane %v4484_v31, 4  ;;  %v4499_v42 = vrot.slane %v4498_v21, 4  ;;  %v4492_v62 = vrot.slane %v4491_v51, 4 }
 0x382   : > { %v4475_v59 = vrot.slane %v4474_v15, 1  ;;  %v4468_v50 = vrot.slane %v4467_v60, 1  ;;  %v4482_v25 = vrot.slane %v4481_v55, 1  ;;  %v4506_v33 = vrot.slane %v4505_v8, 4 }
 0x383   : > { %v4462_v6 = vadd.f32 %v4461_v2, %v4460_v40  ;;  %v4486_v35 = vadd.f32 %v4485_v47, %v4484_v31  ;;  %v4500_v11 = vadd.f32 %v4499_v42, %v4498_v21  ;;  %v4493_v49 = vadd.f32 %v4492_v62, %v4491_v51  ;;  %v10219_v42 = vpop.f32.mrb[237].mxu0 }
 0x384   : > { %v4476_v0 = vadd.f32 %v4475_v59, %v4474_v15  ;;  %v4469_v61 = vadd.f32 %v4468_v50, %v4467_v60  ;;  %v4483_v13 = vadd.f32 %v4482_v25, %v4481_v55  ;;  %v4507_v38 = vadd.f32 %v4506_v33, %v4505_v8  ;;  %v10221_v59 = vpop.f32.mrb[237].mxu1  ;;  %v10223_v8 = vpop.f32.mrb[238].mxu0 }
 0x385   : > { %v5248_v43 = vmul.f32 %v11778_v52, %v4462_v6  ;;  %v4487_v29 = vrot.slane %v4486_v35, 2  ;;  %v4501_v41 = vrot.slane %v4500_v11, 2  ;;  %v4494_v1 = vrot.slane %v4493_v49, 2  ;;  %v10227_v62 = vpop.f32.mrb[238].mxu1  ;;  %v11813_v52 = vld [vmem:[#allocation132_spill] sm:$0xff] }
 0x386   : > { %v5250_v48 = vmul.f32 %v11779_v56, %v4476_v0  ;;  %v5249_v30 = vmul.f32 %v11780_v54, %v4469_v61  ;;  %v5251_v19 = vmul.f32 %v11781_v14, %v4483_v13  ;;  %v4508_v47 = vrot.slane %v4507_v38, 2  ;;  %11782 = vst [vmem:[#allocation80_spill] sm:$0xff] %v10227_v62  ;;  %v10236_v61 = vpop.f32.mrb[239].mxu0  ;;  %v10238_v13 = vpop.f32.mrb[239].mxu1 }
 0x387   : > { %v5871_v25 = vrot.slane %v5248_v43, 1  ;;  %v4488_v33 = vadd.f32 %v4487_v29, %v4486_v35  ;;  %v4502_v50 = vadd.f32 %v4501_v41, %v4500_v11  ;;  %v4495_v6 = vadd.f32 %v4494_v1, %v4493_v49  ;;  %11783 = vst [vmem:[#allocation127_spill] sm:$0xff] %v10236_v61  ;;  %11784 = vst [vmem:[#allocation82_spill] sm:$0xff] %v10238_v13 }
 0x388   : > { %v5899_v55 = vrot.slane %v5250_v48, 1  ;;  %v5885_v15 = vrot.slane %v5249_v30, 1  ;;  %v5913_v40 = vrot.slane %v5251_v19, 1  ;;  %v4509_v31 = vadd.f32 %v4508_v47, %v4507_v38  ;;  %v11785_v19 = vld [vmem:[#allocation8_spill] sm:$0xff]  ;;  %v10246_v47 = vpop.f32.mrb[240].mxu0 }
 0x389   : > { %v5872_v21 = vsel %vm5591_vm7, %v5871_v25, %v10176_v4  ;;  %v4489_v51 = vrot.slane %v4488_v33, 1  ;;  %v4503_v60 = vrot.slane %v4502_v50, 1  ;;  %v4496_v2 = vrot.slane %v4495_v6, 1  ;;  %11786 = vst [vmem:[#allocation147_spill] sm:$0xff] %v10246_v47  ;;  %v10248_v25 = vpop.f32.mrb[240].mxu1 }
 0x38a   : > { %v6115_v0 = vadd.f32 %v5872_v21, %v9856_v37  ;;  %v5900_v11 = vsel %vm5591_vm7, %v5899_v55, %v10179_v5  ;;  %v5886_v49 = vsel %vm5591_vm7, %v5885_v15, %v10182_v7  ;;  %v5914_v35 = vsel %vm5591_vm7, %v5913_v40, %v10185_v36  ;;  %11787 = vst [vmem:[#allocation148_spill] sm:$0xff] %v10248_v25  ;;  %v10260_v15 = vpop.f32.mrb[241].mxu1 }
 0x38b   : > { %v6129_v4 = vadd.f32 %v5900_v11, %v9861_v58  ;;  %v6122_v38 = vadd.f32 %v5886_v49, %v9864_v24  ;;  %v6136_v43 = vadd.f32 %v5914_v35, %v9867_v44  ;;  %v4490_v37 = vadd.f32 %v4489_v51, %v4488_v33  ;;  %v11789_v24 = vld [vmem:[#allocation9_spill] sm:$0xff]  ;;  %v11790_v44 = vld [vmem:[#allocation10_spill] sm:$0xff]  ;;  %v11797_v11 = vld [vmem:[#allocation12_spill] sm:$0xff] }
 0x38c   : > { %v6116_v29 = vrot.slane %v6115_v0, 4  ;;  %v4504_v41 = vadd.f32 %v4503_v60, %v4502_v50  ;;  %v4497_v5 = vadd.f32 %v4496_v2, %v4495_v6  ;;  %v4510_v1 = vrot.slane %v4509_v31, 1  ;;  %v10258_v6 = vpop.f32.mrb[241].mxu0  ;;  %11792 = vst [vmem:[#allocation9_spill] sm:$0xff] %v10260_v15  ;;  %v11796_v60 = vld [vmem:[#allocation150_spill] sm:$0xff] }
 0x38d   : > { %v6130_v48 = vrot.slane %v6129_v4, 4  ;;  %v6123_v7 = vrot.slane %v6122_v38, 4  ;;  %v6137_v30 = vrot.slane %v6136_v43, 4  ;;  %v10244_v36 = vmul.f32 %v4490_v37, %v11785_v19  ;;  %11791 = vst [vmem:[#allocation8_spill] sm:$0xff] %v10258_v6  ;;  %v11799_v37 = vld [vmem:[#allocation87_spill] sm:$0xff]  ;;  %v11804_v19 = vld [vmem:[#allocation89_spill] sm:$0xff] }
 0x38e   : > { %v10250_v58 = vadd.f32 %v6116_v29, %v6115_v0  ;;  %v10253_v55 = vmul.f32 %v4504_v41, %v11789_v24  ;;  %v10256_v33 = vmul.f32 %v4497_v5, %v11790_v44  ;;  %v4511_v50 = vadd.f32 %v4510_v1, %v4509_v31  ;;  %v11798_v31 = vld [vmem:[#allocation84_spill] sm:$0xff]  ;;  %v10283_v1 = vpop.f32.mrb[242].mxu0  ;;  %v11805_v44 = vld [vmem:[#allocation59_spill] sm:$0xff] }
 0x38f   : > { %v10262_v40 = vadd.f32 %v6130_v48, %v6129_v4  ;;  %v10264_v21 = vadd.f32 %v6123_v7, %v6122_v38  ;;  %v10266_v51 = vadd.f32 %v6137_v30, %v6136_v43  ;;  %v3020_v2 = vmul.f32 %v11796_v60, %v7297_v9  ;;  %v11800_v41 = vld [vmem:[#allocation56_spill] sm:$0xff]  ;;  %11801 = vst [vmem:[#allocation150_spill] sm:$0xff] %v10283_v1  ;;  %v10285_v48 = vpop.f32.mrb[242].mxu1  ;;  %v11806_v60 = vld [vmem:[#allocation129_spill] sm:$0xff] }
 0x390   : > { %11788 = vst [vmem:[#allocation149_spill] sm:$0xff] %v10250_v58  ;;  %v10272_v49 = vmul.f32 %v4511_v50, %v11797_v11  ;;  %v3022_v35 = vmul.f32 %v11798_v31, %v7304_v16  ;;  %v3021_v29 = vmul.f32 %v11799_v37, %v7299_v12  ;;  %v3023_v5 = vmul.f32 %v11800_v41, %v7324_v26  ;;  %v11803_v7 = vld [vmem:[#allocation128_spill] sm:$0xff]  ;;  %v10295_v31 = vpop.f32.mrb[243].mxu0  ;;  %v10297_v37 = vpop.f32.mrb[243].mxu1  ;;  %v11809_v41 = vld [vmem:[#allocation94_spill] sm:$0xff] }
 0x391   : > { %11793 = vst [vmem:[#allocation10_spill] sm:$0xff] %v10262_v40  ;;  %11794 = vst [vmem:[#allocation155_spill] sm:$0xff] %v10264_v21  ;;  %v3024_v30 = vmul.f32 %v11803_v7, %v7306_v17  ;;  %v3026_v24 = vmul.f32 %v11804_v19, %v7312_v20  ;;  %v3025_v50 = vmul.f32 %v11805_v44, %v7308_v18  ;;  %v11810_v4 = vld [vmem:[#allocation92_spill] sm:$0xff]  ;;  %v11811_v7 = vld [vmem:[#allocation95_spill] sm:$0xff] }
 0x392   : > { %11795 = vst [vmem:[#allocation156_spill] sm:$0xff] %v10266_v51  ;;  %11802 = vst [vmem:[#allocation12_spill] sm:$0xff] %v10285_v48  ;;  %v3027_v11 = vmul.f32 %v11806_v60, %v7330_v28  ;;  %v3028_v43 = vmul.f32 %v11809_v41, %v7297_v9  ;;  %v3030_v38 = vmul.f32 %v11810_v4, %v7304_v16  ;;  %v11812_v19 = vld [vmem:[#allocation93_spill] sm:$0xff]  ;;  %v11814_v40 = vld [vmem:[#allocation131_spill] sm:$0xff] }
 0x393   : > { %11807 = vst [vmem:[#allocation84_spill] sm:$0xff] %v10295_v31  ;;  %11808 = vst [vmem:[#allocation87_spill] sm:$0xff] %v10297_v37  ;;  %v3029_v0 = vmul.f32 %v11811_v7, %v7299_v12  ;;  %v3031_v14 = vmul.f32 %v11812_v19, %v7324_v26  ;;  %v4512_v44 = vadd.f32 %v3024_v30, %v3020_v2  ;;  %v11815_v41 = vld [vmem:[#allocation134_spill] sm:$0xff]  ;;  %v11816_v4 = vld [vmem:[#allocation133_spill] sm:$0xff]  ;;  %v10315_v7 = vpop.f32.mrb[244].mxu0 }
 0x394   : > { %v4526_v54 = vadd.f32 %v3026_v24, %v3022_v35  ;;  %v4519_v56 = vadd.f32 %v3025_v50, %v3021_v29  ;;  %v4533_v60 = vadd.f32 %v3027_v11, %v3023_v5  ;;  %v3032_v51 = vmul.f32 %v11813_v52, %v7306_v17  ;;  %11817 = vst [vmem:[#allocation56_spill] sm:$0xff] %v10315_v7 }
 0x395   : > { %v3034_v21 = vmul.f32 %v11814_v40, %v7312_v20  ;;  %v3033_v58 = vmul.f32 %v11815_v41, %v7308_v18  ;;  %v3035_v37 = vmul.f32 %v11816_v4, %v7330_v28  ;;  %v4513_v31 = vrot.slane %v4512_v44, 4 }
 0x396   : > { %v4527_v19 = vrot.slane %v4526_v54, 4  ;;  %v4520_v2 = vrot.slane %v4519_v56, 4  ;;  %v4534_v35 = vrot.slane %v4533_v60, 4  ;;  %v4540_v29 = vadd.f32 %v3032_v51, %v3028_v43  ;;  %v10317_v43 = vpop.f32.mrb[244].mxu1 }
 0x397   : > { %v4554_v5 = vadd.f32 %v3034_v21, %v3030_v38  ;;  %v4547_v30 = vadd.f32 %v3033_v58, %v3029_v0  ;;  %v4561_v24 = vadd.f32 %v3035_v37, %v3031_v14  ;;  %v4514_v52 = vadd.f32 %v4513_v31, %v4512_v44 }
 0x398   : > { %v4528_v50 = vadd.f32 %v4527_v19, %v4526_v54  ;;  %v4521_v11 = vadd.f32 %v4520_v2, %v4519_v56  ;;  %v4535_v40 = vadd.f32 %v4534_v35, %v4533_v60  ;;  %v4541_v48 = vrot.slane %v4540_v29, 4  ;;  %v10319_v19 = vpop.f32.mrb[245].mxu0 }
 0x399   : > { %v4555_v1 = vrot.slane %v4554_v5, 4  ;;  %v4548_v41 = vrot.slane %v4547_v30, 4  ;;  %v4562_v15 = vrot.slane %v4561_v24, 4  ;;  %v4515_v6 = vrot.slane %v4514_v52, 2 }
 0x39a   : > { %v4529_v4 = vrot.slane %v4528_v50, 2  ;;  %v4522_v25 = vrot.slane %v4521_v11, 2  ;;  %v4536_v7 = vrot.slane %v4535_v40, 2  ;;  %v4542_v47 = vadd.f32 %v4541_v48, %v4540_v29  ;;  %v10321_v48 = vpop.f32.mrb[245].mxu1 }
 0x39b   : > { %v4556_v13 = vadd.f32 %v4555_v1, %v4554_v5  ;;  %v4549_v61 = vadd.f32 %v4548_v41, %v4547_v30  ;;  %v4563_v62 = vadd.f32 %v4562_v15, %v4561_v24  ;;  %v4516_v51 = vadd.f32 %v4515_v6, %v4514_v52  ;;  %11818 = vst [vmem:[#allocation128_spill] sm:$0xff] %v10321_v48 }
 0x39c   : > { %v4530_v21 = vadd.f32 %v4529_v4, %v4528_v50  ;;  %v4523_v58 = vadd.f32 %v4522_v25, %v4521_v11  ;;  %v4537_v14 = vadd.f32 %v4536_v7, %v4535_v40  ;;  %v4543_v0 = vrot.slane %v4542_v47, 2  ;;  %v10323_v25 = vpop.f32.mrb[246].mxu0  ;;  %v10325_v11 = vpop.f32.mrb[246].mxu1  ;;  %v11819_v40 = vld [vmem:[#allocation14_spill] sm:$0xff]  ;;  %v11820_v4 = vld [vmem:[#allocation15_spill] sm:$0xff] }
 0x39d   : > { %v4557_v54 = vrot.slane %v4556_v13, 2  ;;  %v4550_v56 = vrot.slane %v4549_v61, 2  ;;  %v4564_v38 = vrot.slane %v4563_v62, 2  ;;  %v4517_v31 = vrot.slane %v4516_v51, 1 }
 0x39e   : > { %v4531_v37 = vrot.slane %v4530_v21, 1  ;;  %v4524_v44 = vrot.slane %v4523_v58, 1  ;;  %v4538_v60 = vrot.slane %v4537_v14, 1  ;;  %v4544_v1 = vadd.f32 %v4543_v0, %v4542_v47  ;;  %v11821_v47 = vld [vmem:[#allocation16_spill] sm:$0xff]  ;;  %v10331_v0 = vpop.f32.mrb[247].mxu0 }
 0x39f   : > { %v4558_v15 = vadd.f32 %v4557_v54, %v4556_v13  ;;  %v4551_v6 = vadd.f32 %v4550_v56, %v4549_v61  ;;  %v4565_v2 = vadd.f32 %v4564_v38, %v4563_v62  ;;  %v4518_v7 = vadd.f32 %v4517_v31, %v4516_v51  ;;  %v11822_v61 = vld [vmem:[#allocation17_spill] sm:$0xff]  ;;  %11823 = vst [vmem:[#allocation89_spill] sm:$0xff] %v10331_v0  ;;  %v10333_v51 = vpop.f32.mrb[247].mxu1 }
 0x3a0   : > { %v4532_v35 = vadd.f32 %v4531_v37, %v4530_v21  ;;  %v4525_v29 = vadd.f32 %v4524_v44, %v4523_v58  ;;  %v4539_v5 = vadd.f32 %v4538_v60, %v4537_v14  ;;  %v4545_v30 = vrot.slane %v4544_v1, 1  ;;  %11824 = vst [vmem:[#allocation59_spill] sm:$0xff] %v10333_v51  ;;  %v11825_v44 = vld [vmem:[#allocation18_spill] sm:$0xff] }
 0x3a1   : > { %v4559_v24 = vrot.slane %v4558_v15, 1  ;;  %v4552_v52 = vrot.slane %v4551_v6, 1  ;;  %v4566_v50 = vrot.slane %v4565_v2, 1  ;;  %v5256_v41 = vmul.f32 %v11819_v40, %v4518_v7  ;;  %v11826_v7 = vld [vmem:[#allocation19_spill] sm:$0xff]  ;;  %v11827_v40 = vld [vmem:[#allocation20_spill] sm:$0xff] }
 0x3a2   : > { %v5258_v48 = vmul.f32 %v11820_v4, %v4532_v35  ;;  %v5257_v13 = vmul.f32 %v11821_v47, %v4525_v29  ;;  %v5259_v62 = vmul.f32 %v11822_v61, %v4539_v5  ;;  %v4546_v21 = vadd.f32 %v4545_v30, %v4544_v1  ;;  %v11828_v4 = vld [vmem:[#allocation21_spill] sm:$0xff]  ;;  %v10339_v47 = vpop.f32.mrb[248].mxu0  ;;  %v10341_v61 = vpop.f32.mrb[248].mxu1 }
 0x3a3   : > { %v4560_v58 = vadd.f32 %v4559_v24, %v4558_v15  ;;  %v4553_v14 = vadd.f32 %v4552_v52, %v4551_v6  ;;  %v4567_v54 = vadd.f32 %v4566_v50, %v4565_v2  ;;  %v5915_v56 = vrot.slane %v5256_v41, 7  ;;  %11829 = vst [vmem:[#allocation129_spill] sm:$0xff] %v10339_v47  ;;  %11830 = vst [vmem:[#allocation94_spill] sm:$0xff] %v10341_v61  ;;  %v10351_v2 = vpop.f32.mrb[249].mxu0  ;;  %v10353_v30 = vpop.f32.mrb[249].mxu1 }
 0x3a4   : > { %v5943_v38 = vrot.slane %v5258_v48, 7  ;;  %v5929_v31 = vrot.slane %v5257_v13, 7  ;;  %v5957_v37 = vrot.slane %v5259_v62, 7  ;;  %v5260_v60 = vmul.f32 %v11825_v44, %v4546_v21  ;;  %11831 = vst [vmem:[#allocation92_spill] sm:$0xff] %v10351_v2  ;;  %11832 = vst [vmem:[#allocation95_spill] sm:$0xff] %v10353_v30  ;;  %v11833_v13 = vld [vmem:[#allocation136_spill] sm:$0xff] }
 0x3a5   : > { %v5262_v35 = vmul.f32 %v11826_v7, %v4560_v58  ;;  %v5261_v29 = vmul.f32 %v11827_v40, %v4553_v14  ;;  %v5263_v5 = vmul.f32 %v11828_v4, %v4567_v54  ;;  %v5916_v1 = vsel %vm5573_vm1, %v5915_v56, %v10244_v36  ;;  %v10375_v54 = vpop.f32.mrb[250].mxu0 }
 0x3a6   : > { %v5944_v48 = vsel %vm5573_vm1, %v5943_v38, %v10253_v55  ;;  %v5930_v15 = vsel %vm5573_vm1, %v5929_v31, %v10256_v33  ;;  %v5958_v6 = vsel %vm5573_vm1, %v5957_v37, %v10272_v49  ;;  %v5917_v24 = vrot.slane %v5260_v60, 6  ;;  %11834 = vst [vmem:[#allocation93_spill] sm:$0xff] %v10375_v54  ;;  %v11837_v38 = vld [vmem:[#allocation138_spill] sm:$0xff]  ;;  %v11838_v37 = vld [vmem:[#allocation137_spill] sm:$0xff]  ;;  %v10387_v60 = vpop.f32.mrb[251].mxu0 }
 0x3a7   : > { %v5945_v52 = vrot.slane %v5262_v35, 6  ;;  %v5931_v50 = vrot.slane %v5261_v29, 6  ;;  %v5959_v41 = vrot.slane %v5263_v5, 6  ;;  %v3036_v36 = vmul.f32 %v11833_v13, %v7297_v9  ;;  %11839 = vst [vmem:[#allocation131_spill] sm:$0xff] %v10387_v60  ;;  %v11841_v35 = vld [vmem:[#allocation140_spill] sm:$0xff]  ;;  %v11842_v29 = vld [vmem:[#allocation139_spill] sm:$0xff] }
 0x3a8   : > { %v3038_v55 = vmul.f32 %v9849_v10, %v7304_v16  ;;  %v3037_v33 = vmul.f32 %v9851_v27, %v7299_v12  ;;  %v3039_v49 = vmul.f32 %v9853_v63, %v7324_v26  ;;  %v10364_v62 = vsel %vm5576_vm2, %v5917_v24, %v5916_v1  ;;  %v10377_v10 = vpop.f32.mrb[250].mxu1  ;;  %v11836_v63 = vld [vmem:[#allocation135_spill] sm:$0xff]  ;;  %v11844_v1 = vld [vmem:[#allocation141_spill] sm:$0xff]  ;;  %v11846_v13 = vld [vmem:[#allocation142_spill] sm:$0xff] }
 0x3a9   : > { %v10367_v21 = vsel %vm5576_vm2, %v5945_v52, %v5944_v48  ;;  %v10370_v58 = vsel %vm5576_vm2, %v5931_v50, %v5930_v15  ;;  %v10373_v14 = vsel %vm5576_vm2, %v5959_v41, %v5958_v6  ;;  %11835 = vst [vmem:[#allocation132_spill] sm:$0xff] %v10377_v10  ;;  %v3040_v27 = vmul.f32 %v9858_v22, %v7306_v17  ;;  %v10389_v7 = vpop.f32.mrb[251].mxu1  ;;  %v11843_v22 = vld [vmem:[#allocation98_spill] sm:$0xff]  ;;  %v11845_v50 = vld [vmem:[#allocation96_spill] sm:$0xff] }
 0x3aa   : > { %v3042_v56 = vmul.f32 %v11836_v63, %v7312_v20  ;;  %v3041_v31 = vmul.f32 %v11837_v38, %v7308_v18  ;;  %v3043_v44 = vmul.f32 %v11838_v37, %v7330_v28  ;;  %11840 = vst [vmem:[#allocation134_spill] sm:$0xff] %v10389_v7  ;;  %v3044_v40 = vmul.f32 %v11841_v35, %v7297_v9  ;;  %v11847_v38 = vld [vmem:[#allocation99_spill] sm:$0xff]  ;;  %v11848_v35 = vld [vmem:[#allocation100_spill] sm:$0xff] }
 0x3ab   : > { %v3046_v4 = vmul.f32 %v11842_v29, %v7304_v16  ;;  %v3045_v5 = vmul.f32 %v11843_v22, %v7299_v12  ;;  %v3047_v48 = vmul.f32 %v11844_v1, %v7324_v26  ;;  %v4568_v15 = vadd.f32 %v3040_v27, %v3036_v36  ;;  %v10407_v22 = vpop.f32.mrb[252].mxu0 }
 0x3ac   : > { %v4582_v6 = vadd.f32 %v3042_v56, %v3038_v55  ;;  %v4575_v24 = vadd.f32 %v3041_v31, %v3037_v33  ;;  %v4589_v52 = vadd.f32 %v3043_v44, %v3039_v49  ;;  %v3048_v41 = vmul.f32 %v11845_v50, %v7306_v17  ;;  %11849 = vst [vmem:[#allocation133_spill] sm:$0xff] %v10407_v22 }
 0x3ad   : > { %v3050_v63 = vmul.f32 %v11846_v13, %v7312_v20  ;;  %v3049_v37 = vmul.f32 %v11847_v38, %v7308_v18  ;;  %v3051_v29 = vmul.f32 %v11848_v35, %v7330_v28  ;;  %v4569_v7 = vrot.slane %v4568_v15, 4 }
 0x3ae   : > { %v4583_v1 = vrot.slane %v4582_v6, 4  ;;  %v4576_v36 = vrot.slane %v4575_v24, 4  ;;  %v4590_v55 = vrot.slane %v4589_v52, 4  ;;  %v4596_v33 = vadd.f32 %v3048_v41, %v3044_v40 }
 0x3af   : > { %v4610_v49 = vadd.f32 %v3050_v63, %v3046_v4  ;;  %v4603_v27 = vadd.f32 %v3049_v37, %v3045_v5  ;;  %v4617_v56 = vadd.f32 %v3051_v29, %v3047_v48  ;;  %v4570_v31 = vadd.f32 %v4569_v7, %v4568_v15 }
 0x3b0   : > { %v4584_v44 = vadd.f32 %v4583_v1, %v4582_v6  ;;  %v4577_v50 = vadd.f32 %v4576_v36, %v4575_v24  ;;  %v4591_v13 = vadd.f32 %v4590_v55, %v4589_v52  ;;  %v4597_v60 = vrot.slane %v4596_v33, 4  ;;  %v10409_v52 = vpop.f32.mrb[252].mxu1  ;;  %v10411_v1 = vpop.f32.mrb[253].mxu0 }
 0x3b1   : > { %v4611_v10 = vrot.slane %v4610_v49, 4  ;;  %v4604_v38 = vrot.slane %v4603_v27, 4  ;;  %v4618_v54 = vrot.slane %v4617_v56, 4  ;;  %v4571_v30 = vrot.slane %v4570_v31, 2 }
 0x3b2   : > { %v4585_v35 = vrot.slane %v4584_v44, 2  ;;  %v4578_v2 = vrot.slane %v4577_v50, 2  ;;  %v4592_v22 = vrot.slane %v4591_v13, 2  ;;  %v4598_v61 = vadd.f32 %v4597_v60, %v4596_v33  ;;  %v10413_v60 = vpop.f32.mrb[253].mxu1 }
 0x3b3   : > { %v4612_v47 = vadd.f32 %v4611_v10, %v4610_v49  ;;  %v4605_v51 = vadd.f32 %v4604_v38, %v4603_v27  ;;  %v4619_v0 = vadd.f32 %v4618_v54, %v4617_v56  ;;  %v4572_v40 = vadd.f32 %v4571_v30, %v4570_v31  ;;  %11850 = vst [vmem:[#allocation14_spill] sm:$0xff] %v10413_v60 }
 0x3b4   : > { %v4586_v4 = vadd.f32 %v4585_v35, %v4584_v44  ;;  %v4579_v5 = vadd.f32 %v4578_v2, %v4577_v50  ;;  %v4593_v48 = vadd.f32 %v4592_v22, %v4591_v13  ;;  %v4599_v7 = vrot.slane %v4598_v61, 2  ;;  %v10415_v2 = vpop.f32.mrb[254].mxu0  ;;  %v10417_v50 = vpop.f32.mrb[254].mxu1  ;;  %v11851_v13 = vld [vmem:[#allocation22_spill] sm:$0xff]  ;;  %v11852_v35 = vld [vmem:[#allocation23_spill] sm:$0xff] }
 0x3b5   : > { %v4613_v15 = vrot.slane %v4612_v47, 2  ;;  %v4606_v6 = vrot.slane %v4605_v51, 2  ;;  %v4620_v24 = vrot.slane %v4619_v0, 2  ;;  %v4573_v41 = vrot.slane %v4572_v40, 1 }
 0x3b6   : > { %v4587_v63 = vrot.slane %v4586_v4, 1  ;;  %v4580_v37 = vrot.slane %v4579_v5, 1  ;;  %v4594_v29 = vrot.slane %v4593_v48, 1  ;;  %v4600_v10 = vadd.f32 %v4599_v7, %v4598_v61  ;;  %v11853_v61 = vld [vmem:[#allocation24_spill] sm:$0xff]  ;;  %v10423_v7 = vpop.f32.mrb[255].mxu0 }
 0x3b7   : > { %v4614_v54 = vadd.f32 %v4613_v15, %v4612_v47  ;;  %v4607_v30 = vadd.f32 %v4606_v6, %v4605_v51  ;;  %v4621_v36 = vadd.f32 %v4620_v24, %v4619_v0  ;;  %v4574_v22 = vadd.f32 %v4573_v41, %v4572_v40  ;;  %v11854_v51 = vld [vmem:[#allocation25_spill] sm:$0xff]  ;;  %v10425_v40 = vpop.f32.mrb[255].mxu1 }
 0x3b8   : > { %v4588_v55 = vadd.f32 %v4587_v63, %v4586_v4  ;;  %v4581_v33 = vadd.f32 %v4580_v37, %v4579_v5  ;;  %v4595_v49 = vadd.f32 %v4594_v29, %v4593_v48  ;;  %v4601_v27 = vrot.slane %v4600_v10, 1  ;;  %v11855_v37 = vld [vmem:[#allocation26_spill] sm:$0xff] }
 0x3b9   : > { %v4615_v56 = vrot.slane %v4614_v54, 1  ;;  %v4608_v31 = vrot.slane %v4607_v30, 1  ;;  %v4622_v44 = vrot.slane %v4621_v36, 1  ;;  %v5264_v38 = vmul.f32 %v11851_v13, %v4574_v22  ;;  %v11856_v22 = vld [vmem:[#allocation27_spill] sm:$0xff]  ;;  %v11857_v13 = vld [vmem:[#allocation28_spill] sm:$0xff] }
 0x3ba   : > { %v5266_v60 = vmul.f32 %v11852_v35, %v4588_v55  ;;  %v5265_v47 = vmul.f32 %v11853_v61, %v4581_v33  ;;  %v5267_v0 = vmul.f32 %v11854_v51, %v4595_v49  ;;  %v4602_v4 = vadd.f32 %v4601_v27, %v4600_v10  ;;  %v11858_v35 = vld [vmem:[#allocation29_spill] sm:$0xff] }
 0x3bb   : > { %v4616_v5 = vadd.f32 %v4615_v56, %v4614_v54  ;;  %v4609_v48 = vadd.f32 %v4608_v31, %v4607_v30  ;;  %v4623_v15 = vadd.f32 %v4622_v44, %v4621_v36  ;;  %v5919_v6 = vrot.slane %v5264_v38, 5  ;;  %v11859_v31 = vld [vmem:[#allocation103_spill] sm:$0xff] }
 0x3bc   : > { %v5947_v24 = vrot.slane %v5266_v60, 5  ;;  %v5933_v41 = vrot.slane %v5265_v47, 5  ;;  %v5961_v63 = vrot.slane %v5267_v0, 5  ;;  %v5268_v29 = vmul.f32 %v11855_v37, %v4602_v4 }
 0x3bd   : > { %v5270_v55 = vmul.f32 %v11856_v22, %v4616_v5  ;;  %v5269_v33 = vmul.f32 %v11857_v13, %v4609_v48  ;;  %v5271_v49 = vmul.f32 %v11858_v35, %v4623_v15  ;;  %v5920_v61 = vsel %vm5579_vm3, %v5919_v6, %v10364_v62  ;;  %v11860_v5 = vld [vmem:[#allocation101_spill] sm:$0xff]  ;;  %v11866_v13 = vld [vmem:[#allocation66_spill] sm:$0xff] }
 0x3be   : > { %v5948_v10 = vsel %vm5579_vm3, %v5947_v24, %v10367_v21  ;;  %v5934_v54 = vsel %vm5579_vm3, %v5933_v41, %v10370_v58  ;;  %v5962_v60 = vsel %vm5579_vm3, %v5961_v63, %v10373_v14  ;;  %v5921_v30 = vrot.slane %v5268_v29, 4  ;;  %v11861_v15 = vld [vmem:[#allocation105_spill] sm:$0xff] }
 0x3bf   : > { %v5949_v36 = vrot.slane %v5270_v55, 4  ;;  %v5935_v27 = vrot.slane %v5269_v33, 4  ;;  %v5963_v56 = vrot.slane %v5271_v49, 4  ;;  %v3052_v44 = vmul.f32 %v11859_v31, %v7297_v9 }
 0x3c0   : > { %v3054_v38 = vmul.f32 %v9941_v46, %v7304_v16  ;;  %v3053_v62 = vmul.f32 %v9943_v39, %v7299_v12  ;;  %v3055_v21 = vmul.f32 %v9945_v32, %v7324_v26  ;;  %v10448_v58 = vsel %vm5582_vm4, %v5921_v30, %v5920_v61 }
 0x3c1   : > { %v10451_v14 = vsel %vm5582_vm4, %v5949_v36, %v5948_v10  ;;  %v10454_v47 = vsel %vm5582_vm4, %v5935_v27, %v5934_v54  ;;  %v10457_v51 = vsel %vm5582_vm4, %v5963_v56, %v5962_v60  ;;  %v3056_v46 = vmul.f32 %v9949_v23, %v7306_v17  ;;  %v11862_v23 = vld [vmem:[#allocation143_spill] sm:$0xff] }
 0x3c2   : > { %v3058_v39 = vmul.f32 %v9959_v45, %v7312_v20  ;;  %v3057_v32 = vmul.f32 %v9967_v53, %v7308_v18  ;;  %v3059_v0 = vmul.f32 %v9969_v57, %v7330_v28  ;;  %v3060_v4 = vmul.f32 %v9983_v3, %v7297_v9  ;;  %v11863_v53 = vld [vmem:[#allocation104_spill] sm:$0xff]  ;;  %v11864_v57 = vld [vmem:[#allocation67_spill] sm:$0xff]  ;;  %v11865_v3 = vld [vmem:[#allocation106_spill] sm:$0xff] }
 0x3c3   : > { %v3062_v48 = vmul.f32 %v11860_v5, %v7304_v16  ;;  %v3061_v6 = vmul.f32 %v11861_v15, %v7299_v12  ;;  %v3063_v24 = vmul.f32 %v11862_v23, %v7324_v26  ;;  %v4624_v41 = vadd.f32 %v3056_v46, %v3052_v44 }
 0x3c4   : > { %v4638_v45 = vadd.f32 %v3058_v39, %v3054_v38  ;;  %v4631_v63 = vadd.f32 %v3057_v32, %v3053_v62  ;;  %v4645_v37 = vadd.f32 %v3059_v0, %v3055_v21  ;;  %v3064_v29 = vmul.f32 %v11863_v53, %v7306_v17 }
 0x3c5   : > { %v3066_v22 = vmul.f32 %v11864_v57, %v7312_v20  ;;  %v3065_v55 = vmul.f32 %v11865_v3, %v7308_v18  ;;  %v3067_v33 = vmul.f32 %v11866_v13, %v7330_v28  ;;  %v4625_v35 = vrot.slane %v4624_v41, 4 }
 0x3c6   : > { %v4639_v49 = vrot.slane %v4638_v45, 4  ;;  %v4632_v61 = vrot.slane %v4631_v63, 4  ;;  %v4646_v10 = vrot.slane %v4645_v37, 4  ;;  %v4652_v54 = vadd.f32 %v3064_v29, %v3060_v4 }
 0x3c7   : > { %v4666_v60 = vadd.f32 %v3066_v22, %v3062_v48  ;;  %v4659_v30 = vadd.f32 %v3065_v55, %v3061_v6  ;;  %v4673_v36 = vadd.f32 %v3067_v33, %v3063_v24  ;;  %v4626_v27 = vadd.f32 %v4625_v35, %v4624_v41 }
 0x3c8   : > { %v4640_v56 = vadd.f32 %v4639_v49, %v4638_v45  ;;  %v4633_v31 = vadd.f32 %v4632_v61, %v4631_v63  ;;  %v4647_v44 = vadd.f32 %v4646_v10, %v4645_v37  ;;  %v4653_v38 = vrot.slane %v4652_v54, 4 }
 0x3c9   : > { %v4667_v62 = vrot.slane %v4666_v60, 4  ;;  %v4660_v21 = vrot.slane %v4659_v30, 4  ;;  %v4674_v46 = vrot.slane %v4673_v36, 4  ;;  %v4627_v39 = vrot.slane %v4626_v27, 2 }
 0x3ca   : > { %v4641_v32 = vrot.slane %v4640_v56, 2  ;;  %v4634_v0 = vrot.slane %v4633_v31, 2  ;;  %v4648_v5 = vrot.slane %v4647_v44, 2  ;;  %v4654_v15 = vadd.f32 %v4653_v38, %v4652_v54  ;;  %v11868_v38 = vld [vmem:[#allocation31_spill] sm:$0xff] }
 0x3cb   : > { %v4668_v23 = vadd.f32 %v4667_v62, %v4666_v60  ;;  %v4661_v53 = vadd.f32 %v4660_v21, %v4659_v30  ;;  %v4675_v57 = vadd.f32 %v4674_v46, %v4673_v36  ;;  %v4628_v4 = vadd.f32 %v4627_v39, %v4626_v27  ;;  %v11869_v21 = vld [vmem:[#allocation32_spill] sm:$0xff]  ;;  %v11870_v39 = vld [vmem:[#allocation33_spill] sm:$0xff] }
 0x3cc   : > { %v4642_v48 = vadd.f32 %v4641_v32, %v4640_v56  ;;  %v4635_v6 = vadd.f32 %v4634_v0, %v4633_v31  ;;  %v4649_v24 = vadd.f32 %v4648_v5, %v4647_v44  ;;  %v4655_v41 = vrot.slane %v4654_v15, 2  ;;  %v11867_v31 = vld [vmem:[#allocation30_spill] sm:$0xff] }
 0x3cd   : > { %v4669_v45 = vrot.slane %v4668_v23, 2  ;;  %v4662_v63 = vrot.slane %v4661_v53, 2  ;;  %v4676_v37 = vrot.slane %v4675_v57, 2  ;;  %v4629_v29 = vrot.slane %v4628_v4, 1 }
 0x3ce   : > { %v4643_v22 = vrot.slane %v4642_v48, 1  ;;  %v4636_v3 = vrot.slane %v4635_v6, 1  ;;  %v4650_v55 = vrot.slane %v4649_v24, 1  ;;  %v4656_v13 = vadd.f32 %v4655_v41, %v4654_v15  ;;  %v11872_v41 = vld [vmem:[#allocation35_spill] sm:$0xff] }
 0x3cf   : > { %v4670_v33 = vadd.f32 %v4669_v45, %v4668_v23  ;;  %v4663_v35 = vadd.f32 %v4662_v63, %v4661_v53  ;;  %v4677_v49 = vadd.f32 %v4676_v37, %v4675_v57  ;;  %v4630_v61 = vadd.f32 %v4629_v29, %v4628_v4  ;;  %v11873_v63 = vld [vmem:[#allocation36_spill] sm:$0xff]  ;;  %v11874_v29 = vld [vmem:[#allocation37_spill] sm:$0xff] }
 0x3d0   : > { %v4644_v10 = vadd.f32 %v4643_v22, %v4642_v48  ;;  %v4637_v54 = vadd.f32 %v4636_v3, %v4635_v6  ;;  %v4651_v60 = vadd.f32 %v4650_v55, %v4649_v24  ;;  %v4657_v30 = vrot.slane %v4656_v13, 1  ;;  %v11871_v6 = vld [vmem:[#allocation34_spill] sm:$0xff] }
 0x3d1   : > { %v4671_v36 = vrot.slane %v4670_v33, 1  ;;  %v4664_v27 = vrot.slane %v4663_v35, 1  ;;  %v4678_v56 = vrot.slane %v4677_v49, 1  ;;  %v5272_v44 = vmul.f32 %v11867_v31, %v4630_v61 }
 0x3d2   : > { %v5274_v62 = vmul.f32 %v11868_v38, %v4644_v10  ;;  %v5273_v46 = vmul.f32 %v11869_v21, %v4637_v54  ;;  %v5275_v32 = vmul.f32 %v11870_v39, %v4651_v60  ;;  %v4658_v0 = vadd.f32 %v4657_v30, %v4656_v13  ;;  %v11875_v54 = vld [vmem:[#allocation107_spill] sm:$0xff]  ;;  %v11876_v30 = vld [vmem:[#allocation68_spill] sm:$0xff]  ;;  %v11881_v39 = vld [vmem:[#allocation54_spill] sm:$0xff] }
 0x3d3   : > { %v4672_v5 = vadd.f32 %v4671_v36, %v4670_v33  ;;  %v4665_v15 = vadd.f32 %v4664_v27, %v4663_v35  ;;  %v4679_v23 = vadd.f32 %v4678_v56, %v4677_v49  ;;  %v5923_v53 = vrot.slane %v5272_v44, 3  ;;  %v11879_v38 = vld [vmem:[#allocation71_spill] sm:$0xff] }
 0x3d4   : > { %v5951_v57 = vrot.slane %v5274_v62, 3  ;;  %v5937_v4 = vrot.slane %v5273_v46, 3  ;;  %v5965_v48 = vrot.slane %v5275_v32, 3  ;;  %v5276_v24 = vmul.f32 %v11871_v6, %v4658_v0  ;;  %v11880_v21 = vld [vmem:[#allocation111_spill] sm:$0xff]  ;;  %v11882_v0 = vld [vmem:[#allocation113_spill] sm:$0xff] }
 0x3d5   : > { %v5278_v45 = vmul.f32 %v11872_v41, %v4672_v5  ;;  %v5277_v37 = vmul.f32 %v11873_v63, %v4665_v15  ;;  %v5279_v22 = vmul.f32 %v11874_v29, %v4679_v23  ;;  %v5924_v3 = vsel %vm5585_vm5, %v5923_v53, %v10448_v58  ;;  %v11877_v58 = vld [vmem:[#allocation69_spill] sm:$0xff]  ;;  %v11883_v15 = vld [vmem:[#allocation75_spill] sm:$0xff]  ;;  %v11887_v29 = vld [vmem:[#allocation118_spill] sm:$0xff] }
 0x3d6   : > { %v5952_v55 = vsel %vm5585_vm5, %v5951_v57, %v10451_v14  ;;  %v5938_v13 = vsel %vm5585_vm5, %v5937_v4, %v10454_v47  ;;  %v5966_v33 = vsel %vm5585_vm5, %v5965_v48, %v10457_v51  ;;  %v5925_v35 = vrot.slane %v5276_v24, 2  ;;  %v11878_v14 = vld [vmem:[#allocation72_spill] sm:$0xff]  ;;  %v11884_v53 = vld [vmem:[#allocation117_spill] sm:$0xff]  ;;  %v11885_v4 = vld [vmem:[#allocation114_spill] sm:$0xff] }
 0x3d7   : > { %v5953_v49 = vrot.slane %v5278_v45, 2  ;;  %v5939_v61 = vrot.slane %v5277_v37, 2  ;;  %v5967_v10 = vrot.slane %v5279_v22, 2  ;;  %v3068_v60 = vmul.f32 %v11875_v54, %v7297_v9  ;;  %v11886_v6 = vld [vmem:[#allocation119_spill] sm:$0xff] }
 0x3d8   : > { %v3070_v36 = vmul.f32 %v11876_v30, %v7304_v16  ;;  %v3069_v27 = vmul.f32 %v11877_v58, %v7299_v12  ;;  %v3071_v56 = vmul.f32 %v11878_v14, %v7324_v26  ;;  %v10508_v47 = vsel %vm5588_vm6, %v5925_v35, %v5924_v3  ;;  %v11888_v3 = vld [vmem:[#allocation76_spill] sm:$0xff]  ;;  %v11890_v35 = vld [vmem:[#allocation55_spill] sm:$0xff] }
 0x3d9   : > { %v10511_v51 = vsel %vm5588_vm6, %v5953_v49, %v5952_v55  ;;  %v10514_v31 = vsel %vm5588_vm6, %v5939_v61, %v5938_v13  ;;  %v10517_v44 = vsel %vm5588_vm6, %v5967_v10, %v5966_v33  ;;  %v3072_v62 = vmul.f32 %v11879_v38, %v7306_v17  ;;  %v11889_v13 = vld [vmem:[#allocation120_spill] sm:$0xff] }
 0x3da   : > { %v3074_v46 = vmul.f32 %v11880_v21, %v7312_v20  ;;  %v3073_v32 = vmul.f32 %v11881_v39, %v7308_v18  ;;  %v3075_v5 = vmul.f32 %v11882_v0, %v7330_v28  ;;  %v3076_v23 = vmul.f32 %v11883_v15, %v7297_v9 }
 0x3db   : > { %v3078_v57 = vmul.f32 %v11884_v53, %v7304_v16  ;;  %v3077_v48 = vmul.f32 %v11885_v4, %v7299_v12  ;;  %v3079_v24 = vmul.f32 %v11886_v6, %v7324_v26  ;;  %v4680_v41 = vadd.f32 %v3072_v62, %v3068_v60 }
 0x3dc   : > { %v4694_v45 = vadd.f32 %v3074_v46, %v3070_v36  ;;  %v4687_v63 = vadd.f32 %v3073_v32, %v3069_v27  ;;  %v4701_v37 = vadd.f32 %v3075_v5, %v3071_v56  ;;  %v3080_v22 = vmul.f32 %v11887_v29, %v7306_v17 }
 0x3dd   : > { %v3082_v55 = vmul.f32 %v11888_v3, %v7312_v20  ;;  %v3081_v33 = vmul.f32 %v11889_v13, %v7308_v18  ;;  %v3083_v49 = vmul.f32 %v11890_v35, %v7330_v28  ;;  %v4681_v61 = vrot.slane %v4680_v41, 4 }
 0x3de   : > { %v4695_v10 = vrot.slane %v4694_v45, 4  ;;  %v4688_v54 = vrot.slane %v4687_v63, 4  ;;  %v4702_v30 = vrot.slane %v4701_v37, 4  ;;  %v4708_v60 = vadd.f32 %v3080_v22, %v3076_v23 }
 0x3df   : > { %v4722_v36 = vadd.f32 %v3082_v55, %v3078_v57  ;;  %v4715_v58 = vadd.f32 %v3081_v33, %v3077_v48  ;;  %v4729_v27 = vadd.f32 %v3083_v49, %v3079_v24  ;;  %v4682_v14 = vadd.f32 %v4681_v61, %v4680_v41 }
 0x3e0   : > { %v4696_v56 = vadd.f32 %v4695_v10, %v4694_v45  ;;  %v4689_v38 = vadd.f32 %v4688_v54, %v4687_v63  ;;  %v4703_v62 = vadd.f32 %v4702_v30, %v4701_v37  ;;  %v4709_v21 = vrot.slane %v4708_v60, 4 }
 0x3e1   : > { %v4723_v46 = vrot.slane %v4722_v36, 4  ;;  %v4716_v39 = vrot.slane %v4715_v58, 4  ;;  %v4730_v32 = vrot.slane %v4729_v27, 4  ;;  %v4683_v0 = vrot.slane %v4682_v14, 2 }
 0x3e2   : > { %v4697_v5 = vrot.slane %v4696_v56, 2  ;;  %v4690_v15 = vrot.slane %v4689_v38, 2  ;;  %v4704_v53 = vrot.slane %v4703_v62, 2  ;;  %v4710_v4 = vadd.f32 %v4709_v21, %v4708_v60  ;;  %v11892_v21 = vld [vmem:[#allocation39_spill] sm:$0xff] }
 0x3e3   : > { %v4724_v6 = vadd.f32 %v4723_v46, %v4722_v36  ;;  %v4717_v29 = vadd.f32 %v4716_v39, %v4715_v58  ;;  %v4731_v3 = vadd.f32 %v4730_v32, %v4729_v27  ;;  %v4684_v23 = vadd.f32 %v4683_v0, %v4682_v14  ;;  %v11893_v39 = vld [vmem:[#allocation41_spill] sm:$0xff]  ;;  %v11894_v0 = vld [vmem:[#allocation42_spill] sm:$0xff] }
 0x3e4   : > { %v4698_v57 = vadd.f32 %v4697_v5, %v4696_v56  ;;  %v4691_v48 = vadd.f32 %v4690_v15, %v4689_v38  ;;  %v4705_v24 = vadd.f32 %v4704_v53, %v4703_v62  ;;  %v4711_v41 = vrot.slane %v4710_v4, 2  ;;  %v11891_v38 = vld [vmem:[#allocation38_spill] sm:$0xff] }
 0x3e5   : > { %v4725_v45 = vrot.slane %v4724_v6, 2  ;;  %v4718_v63 = vrot.slane %v4717_v29, 2  ;;  %v4732_v37 = vrot.slane %v4731_v3, 2  ;;  %v4685_v22 = vrot.slane %v4684_v23, 1 }
 0x3e6   : > { %v4699_v55 = vrot.slane %v4698_v57, 1  ;;  %v4692_v13 = vrot.slane %v4691_v48, 1  ;;  %v4706_v33 = vrot.slane %v4705_v24, 1  ;;  %v4712_v35 = vadd.f32 %v4711_v41, %v4710_v4  ;;  %v11896_v41 = vld [vmem:[#allocation43_spill] sm:$0xff] }
 0x3e7   : > { %v4726_v49 = vadd.f32 %v4725_v45, %v4724_v6  ;;  %v4719_v61 = vadd.f32 %v4718_v63, %v4717_v29  ;;  %v4733_v10 = vadd.f32 %v4732_v37, %v4731_v3  ;;  %v4686_v54 = vadd.f32 %v4685_v22, %v4684_v23  ;;  %v11897_v63 = vld [vmem:[#allocation11_spill] sm:$0xff]  ;;  %v11898_v22 = vld [vmem:[#allocation13_spill] sm:$0xff] }
 0x3e8   : > { %v4700_v30 = vadd.f32 %v4699_v55, %v4698_v57  ;;  %v4693_v60 = vadd.f32 %v4692_v13, %v4691_v48  ;;  %v4707_v36 = vadd.f32 %v4706_v33, %v4705_v24  ;;  %v4713_v58 = vrot.slane %v4712_v35, 1  ;;  %v11895_v48 = vld [vmem:[#allocation40_spill] sm:$0xff] }
 0x3e9   : > { %v4727_v27 = vrot.slane %v4726_v49, 1  ;;  %v4720_v14 = vrot.slane %v4719_v61, 1  ;;  %v4734_v56 = vrot.slane %v4733_v10, 1  ;;  %v5280_v62 = vmul.f32 %v11891_v38, %v4686_v54  ;;  %v11902_v54 = vld [vmem:[#allocation81_spill] sm:$0xff]  ;;  %v11908_v38 = vld [vmem:[#allocation154_spill] sm:$0xff] }
 0x3ea   : > { %v5282_v46 = vmul.f32 %v11892_v21, %v4700_v30  ;;  %v5281_v32 = vmul.f32 %v11893_v39, %v4693_v60  ;;  %v5283_v5 = vmul.f32 %v11894_v0, %v4707_v36  ;;  %v4714_v15 = vadd.f32 %v4713_v58, %v4712_v35  ;;  %v11905_v58 = vld [vmem:[#allocation145_spill] sm:$0xff]  ;;  %v11910_v39 = vld [vmem:[#allocation123_spill] sm:$0xff]  ;;  %v11911_v0 = vld [vmem:[#allocation124_spill] sm:$0xff] }
 0x3eb   : > { %v4728_v53 = vadd.f32 %v4727_v27, %v4726_v49  ;;  %v4721_v4 = vadd.f32 %v4720_v14, %v4719_v61  ;;  %v4735_v6 = vadd.f32 %v4734_v56, %v4733_v10  ;;  %v5927_v29 = vrot.slane %v5280_v62, 1  ;;  %v11901_v61 = vld [vmem:[#allocation79_spill] sm:$0xff]  ;;  %v11906_v27 = vld [vmem:[#allocation153_spill] sm:$0xff] }
 0x3ec   : > { %v5955_v3 = vrot.slane %v5282_v46, 1  ;;  %v5941_v23 = vrot.slane %v5281_v32, 1  ;;  %v5969_v57 = vrot.slane %v5283_v5, 1  ;;  %v10548_v24 = vmul.f32 %v4714_v15, %v11895_v48  ;;  %v11909_v21 = vld [vmem:[#allocation121_spill] sm:$0xff]  ;;  %v11914_v48 = vld [vmem:[#allocation62_spill] sm:$0xff] }
 0x3ed   : > { %v10551_v45 = vmul.f32 %v4728_v53, %v11896_v41  ;;  %v10554_v37 = vmul.f32 %v4721_v4, %v11897_v63  ;;  %v10557_v55 = vmul.f32 %v4735_v6, %v11898_v22  ;;  %v10561_v13 = vsel %vm5591_vm7, %v5927_v29, %v10508_v47  ;;  %v11903_v47 = vld [vmem:[#allocation122_spill] sm:$0xff]  ;;  %v11912_v15 = vld [vmem:[#allocation61_spill] sm:$0xff] }
 0x3ee   : > { %v10565_v33 = vsel %vm5591_vm7, %v5955_v3, %v10511_v51  ;;  %v10569_v35 = vsel %vm5591_vm7, %v5941_v23, %v10514_v31  ;;  %v10573_v49 = vsel %vm5591_vm7, %v5969_v57, %v10517_v44  ;;  %v3084_v10 = vmul.f32 %v11901_v61, %v7297_v9  ;;  %v11904_v51 = vld [vmem:[#allocation144_spill] sm:$0xff]  ;;  %v11907_v44 = vld [vmem:[#allocation146_spill] sm:$0xff]  ;;  %v11915_v63 = vld [vmem:[#allocation125_spill] sm:$0xff] }
 0x3ef   : > { %11899 = vst [vmem:[#allocation15_spill] sm:$0xff] %v10569_v35  ;;  %11900 = vst [vmem:[#allocation16_spill] sm:$0xff] %v10573_v49  ;;  %v3086_v30 = vmul.f32 %v11902_v54, %v7304_v16  ;;  %v3085_v60 = vmul.f32 %v11903_v47, %v7299_v12  ;;  %v3087_v36 = vmul.f32 %v11904_v51, %v7324_v26  ;;  %v11913_v23 = vld [vmem:[#allocation60_spill] sm:$0xff]  ;;  %v11916_v61 = vld [vmem:[#allocation63_spill] sm:$0xff] }
 0x3f0   : > { %v3088_v31 = vmul.f32 %v11905_v58, %v7306_v17  ;;  %v3090_v14 = vmul.f32 %v11906_v27, %v7312_v20  ;;  %v3089_v56 = vmul.f32 %v11907_v44, %v7308_v18  ;;  %v3091_v62 = vmul.f32 %v11908_v38, %v7330_v28 }
 0x3f1   : > { %v3092_v46 = vmul.f32 %v11909_v21, %v7297_v9  ;;  %v3094_v32 = vmul.f32 %v11910_v39, %v7304_v16  ;;  %v3093_v5 = vmul.f32 %v11911_v0, %v7299_v12  ;;  %v3095_v53 = vmul.f32 %v11912_v15, %v7324_v26 }
 0x3f2   : > { %v4736_v4 = vadd.f32 %v3088_v31, %v3084_v10  ;;  %v4750_v6 = vadd.f32 %v3090_v14, %v3086_v30  ;;  %v4743_v29 = vadd.f32 %v3089_v56, %v3085_v60  ;;  %v4757_v3 = vadd.f32 %v3091_v62, %v3087_v36 }
 0x3f3   : > { %v3096_v57 = vmul.f32 %v11913_v23, %v7306_v17  ;;  %v3098_v41 = vmul.f32 %v11914_v48, %v7312_v20  ;;  %v3097_v22 = vmul.f32 %v11915_v63, %v7308_v18  ;;  %v3099_v54 = vmul.f32 %v11916_v61, %v7330_v28 }
 0x3f4   : > { %v4737_v47 = vrot.slane %v4736_v4, 4  ;;  %v4751_v51 = vrot.slane %v4750_v6, 4  ;;  %v4744_v58 = vrot.slane %v4743_v29, 4  ;;  %v4758_v27 = vrot.slane %v4757_v3, 4 }
 0x3f5   : > { %v4764_v10 = vadd.f32 %v3096_v57, %v3092_v46  ;;  %v4778_v30 = vadd.f32 %v3098_v41, %v3094_v32  ;;  %v4771_v60 = vadd.f32 %v3097_v22, %v3093_v5  ;;  %v4785_v36 = vadd.f32 %v3099_v54, %v3095_v53 }
 0x3f6   : > { %v4738_v31 = vadd.f32 %v4737_v47, %v4736_v4  ;;  %v4752_v14 = vadd.f32 %v4751_v51, %v4750_v6  ;;  %v4745_v44 = vadd.f32 %v4744_v58, %v4743_v29  ;;  %v4759_v56 = vadd.f32 %v4758_v27, %v4757_v3 }
 0x3f7   : > { %v4765_v38 = vrot.slane %v4764_v10, 4  ;;  %v4779_v62 = vrot.slane %v4778_v30, 4  ;;  %v4772_v21 = vrot.slane %v4771_v60, 4  ;;  %v4786_v39 = vrot.slane %v4785_v36, 4 }
 0x3f8   : > { %v4739_v0 = vrot.slane %v4738_v31, 2  ;;  %v4753_v15 = vrot.slane %v4752_v14, 2  ;;  %v4746_v23 = vrot.slane %v4745_v44, 2  ;;  %v4760_v48 = vrot.slane %v4759_v56, 2 }
 0x3f9   : > { %v4766_v63 = vadd.f32 %v4765_v38, %v4764_v10  ;;  %v4780_v61 = vadd.f32 %v4779_v62, %v4778_v30  ;;  %v4773_v49 = vadd.f32 %v4772_v21, %v4771_v60  ;;  %v4787_v35 = vadd.f32 %v4786_v39, %v4785_v36  ;;  %v11917_v38 = vld [vmem:[#allocation44_spill] sm:$0xff]  ;;  %v11918_v21 = vld [vmem:[#allocation45_spill] sm:$0xff] }
 0x3fa   : > { %v4740_v46 = vadd.f32 %v4739_v0, %v4738_v31  ;;  %v4754_v32 = vadd.f32 %v4753_v15, %v4752_v14  ;;  %v4747_v5 = vadd.f32 %v4746_v23, %v4745_v44  ;;  %v4761_v53 = vadd.f32 %v4760_v48, %v4759_v56  ;;  %v11919_v0 = vld [vmem:[#allocation46_spill] sm:$0xff]  ;;  %v11920_v23 = vld [vmem:[#allocation47_spill] sm:$0xff] }
 0x3fb   : > { %v4767_v4 = vrot.slane %v4766_v63, 2  ;;  %v4781_v6 = vrot.slane %v4780_v61, 2  ;;  %v4774_v29 = vrot.slane %v4773_v49, 2  ;;  %v4788_v3 = vrot.slane %v4787_v35, 2 }
 0x3fc   : > { %v4741_v57 = vrot.slane %v4740_v46, 1  ;;  %v4755_v41 = vrot.slane %v4754_v32, 1  ;;  %v4748_v22 = vrot.slane %v4747_v5, 1  ;;  %v4762_v54 = vrot.slane %v4761_v53, 1 }
 0x3fd   : > { %v4768_v47 = vadd.f32 %v4767_v4, %v4766_v63  ;;  %v4782_v51 = vadd.f32 %v4781_v6, %v4780_v61  ;;  %v4775_v58 = vadd.f32 %v4774_v29, %v4773_v49  ;;  %v4789_v27 = vadd.f32 %v4788_v3, %v4787_v35  ;;  %v11921_v4 = vld [vmem:[#allocation48_spill] sm:$0xff]  ;;  %v11922_v29 = vld [vmem:[#allocation49_spill] sm:$0xff] }
 0x3fe   : > { %v4742_v10 = vadd.f32 %v4741_v57, %v4740_v46  ;;  %v4756_v30 = vadd.f32 %v4755_v41, %v4754_v32  ;;  %v4749_v60 = vadd.f32 %v4748_v22, %v4747_v5  ;;  %v4763_v36 = vadd.f32 %v4762_v54, %v4761_v53  ;;  %v11923_v57 = vld [vmem:[#allocation50_spill] sm:$0xff]  ;;  %v11924_v22 = vld [vmem:[#allocation51_spill] sm:$0xff] }
 0x3ff   : > { %v4769_v31 = vrot.slane %v4768_v47, 1  ;;  %v4783_v14 = vrot.slane %v4782_v51, 1  ;;  %v4776_v44 = vrot.slane %v4775_v58, 1  ;;  %v4790_v56 = vrot.slane %v4789_v27, 1 }
 0x400   : > { %v5288_v62 = vmul.f32 %v11917_v38, %v4742_v10  ;;  %v5290_v39 = vmul.f32 %v11918_v21, %v4756_v30  ;;  %v5289_v15 = vmul.f32 %v11919_v0, %v4749_v60  ;;  %v5291_v48 = vmul.f32 %v11920_v23, %v4763_v36 }
 0x401   : > { %v4770_v63 = vadd.f32 %v4769_v31, %v4768_v47  ;;  %v4784_v61 = vadd.f32 %v4783_v14, %v4782_v51  ;;  %v4777_v49 = vadd.f32 %v4776_v44, %v4775_v58  ;;  %v4791_v35 = vadd.f32 %v4790_v56, %v4789_v27  ;;  %v11925_v31 = vld [vmem:[#allocation126_spill] sm:$0xff] }
 0x402   : > { %v5971_v46 = vrot.slane %v5288_v62, 7  ;;  %v5999_v32 = vrot.slane %v5290_v39, 7  ;;  %v5985_v5 = vrot.slane %v5289_v15, 7  ;;  %v6013_v53 = vrot.slane %v5291_v48, 7  ;;  %v11928_v39 = vld [vmem:[#allocation82_spill] sm:$0xff]  ;;  %v11929_v15 = vld [vmem:[#allocation147_spill] sm:$0xff] }
 0x403   : > { %v5292_v6 = vmul.f32 %v11921_v4, %v4770_v63  ;;  %v5294_v3 = vmul.f32 %v11922_v29, %v4784_v61  ;;  %v5293_v41 = vmul.f32 %v11923_v57, %v4777_v49  ;;  %v5295_v54 = vmul.f32 %v11924_v22, %v4791_v35  ;;  %v11930_v48 = vld [vmem:[#allocation148_spill] sm:$0xff]  ;;  %v11933_v4 = vld [vmem:[#allocation150_spill] sm:$0xff]  ;;  %v11936_v22 = vld [vmem:[#allocation87_spill] sm:$0xff] }
 0x404   : > { %v5972_v10 = vsel %vm5573_vm1, %v5971_v46, %v10548_v24  ;;  %v6000_v47 = vsel %vm5573_vm1, %v5999_v32, %v10551_v45  ;;  %v5986_v51 = vsel %vm5573_vm1, %v5985_v5, %v10554_v37  ;;  %v6014_v58 = vsel %vm5573_vm1, %v6013_v53, %v10557_v55  ;;  %v11931_v61 = vld [vmem:[#allocation8_spill] sm:$0xff] }
 0x405   : > { %v5973_v27 = vrot.slane %v5292_v6, 6  ;;  %v6001_v30 = vrot.slane %v5294_v3, 6  ;;  %v5987_v60 = vrot.slane %v5293_v41, 6  ;;  %v6015_v36 = vrot.slane %v5295_v54, 6  ;;  %v11934_v29 = vld [vmem:[#allocation12_spill] sm:$0xff] }
 0x406   : > { %v3100_v14 = vmul.f32 %v11925_v31, %v7297_v9  ;;  %v3102_v44 = vmul.f32 %v10214_v34, %v7304_v16  ;;  %v3101_v24 = vmul.f32 %v10219_v42, %v7299_v12  ;;  %v3103_v45 = vmul.f32 %v10221_v59, %v7324_v26  ;;  %v11926_v42 = vld [vmem:[#allocation80_spill] sm:$0xff]  ;;  %v11927_v59 = vld [vmem:[#allocation127_spill] sm:$0xff] }
 0x407   : > { %v10632_v37 = vsel %vm5576_vm2, %v5973_v27, %v5972_v10  ;;  %v10635_v55 = vsel %vm5576_vm2, %v6001_v30, %v6000_v47  ;;  %v10638_v56 = vsel %vm5576_vm2, %v5987_v60, %v5986_v51  ;;  %v10641_v38 = vsel %vm5576_vm2, %v6015_v36, %v6014_v58  ;;  %v11935_v57 = vld [vmem:[#allocation84_spill] sm:$0xff] }
 0x408   : > { %v3104_v34 = vmul.f32 %v10223_v8, %v7306_v17  ;;  %v3106_v62 = vmul.f32 %v11926_v42, %v7312_v20  ;;  %v3105_v21 = vmul.f32 %v11927_v59, %v7308_v18  ;;  %v3107_v0 = vmul.f32 %v11928_v39, %v7330_v28  ;;  %v11932_v8 = vld [vmem:[#allocation9_spill] sm:$0xff] }
 0x409   : > { %v3108_v23 = vmul.f32 %v11929_v15, %v7297_v9  ;;  %v3110_v63 = vmul.f32 %v11930_v48, %v7304_v16  ;;  %v3109_v49 = vmul.f32 %v11931_v61, %v7299_v12  ;;  %v3111_v35 = vmul.f32 %v11932_v8, %v7324_v26 }
 0x40a   : > { %v4792_v46 = vadd.f32 %v3104_v34, %v3100_v14  ;;  %v4806_v32 = vadd.f32 %v3106_v62, %v3102_v44  ;;  %v4799_v5 = vadd.f32 %v3105_v21, %v3101_v24  ;;  %v4813_v53 = vadd.f32 %v3107_v0, %v3103_v45 }
 0x40b   : > { %v3112_v6 = vmul.f32 %v11933_v4, %v7306_v17  ;;  %v3114_v3 = vmul.f32 %v11934_v29, %v7312_v20  ;;  %v3113_v41 = vmul.f32 %v11935_v57, %v7308_v18  ;;  %v3115_v54 = vmul.f32 %v11936_v22, %v7330_v28 }
 0x40c   : > { %v4793_v10 = vrot.slane %v4792_v46, 4  ;;  %v4807_v47 = vrot.slane %v4806_v32, 4  ;;  %v4800_v51 = vrot.slane %v4799_v5, 4  ;;  %v4814_v58 = vrot.slane %v4813_v53, 4 }
 0x40d   : > { %v4820_v27 = vadd.f32 %v3112_v6, %v3108_v23  ;;  %v4834_v30 = vadd.f32 %v3114_v3, %v3110_v63  ;;  %v4827_v60 = vadd.f32 %v3113_v41, %v3109_v49  ;;  %v4841_v36 = vadd.f32 %v3115_v54, %v3111_v35 }
 0x40e   : > { %v4794_v31 = vadd.f32 %v4793_v10, %v4792_v46  ;;  %v4808_v14 = vadd.f32 %v4807_v47, %v4806_v32  ;;  %v4801_v44 = vadd.f32 %v4800_v51, %v4799_v5  ;;  %v4815_v24 = vadd.f32 %v4814_v58, %v4813_v53 }
 0x40f   : > { %v4821_v45 = vrot.slane %v4820_v27, 4  ;;  %v4835_v34 = vrot.slane %v4834_v30, 4  ;;  %v4828_v42 = vrot.slane %v4827_v60, 4  ;;  %v4842_v62 = vrot.slane %v4841_v36, 4 }
 0x410   : > { %v4795_v59 = vrot.slane %v4794_v31, 2  ;;  %v4809_v21 = vrot.slane %v4808_v14, 2  ;;  %v4802_v39 = vrot.slane %v4801_v44, 2  ;;  %v4816_v0 = vrot.slane %v4815_v24, 2 }
 0x411   : > { %v4822_v15 = vadd.f32 %v4821_v45, %v4820_v27  ;;  %v4836_v48 = vadd.f32 %v4835_v34, %v4834_v30  ;;  %v4829_v61 = vadd.f32 %v4828_v42, %v4827_v60  ;;  %v4843_v8 = vadd.f32 %v4842_v62, %v4841_v36  ;;  %v11939_v45 = vld [vmem:[#allocation83_spill] sm:$0xff]  ;;  %v11940_v42 = vld [vmem:[#allocation86_spill] sm:$0xff] }
 0x412   : > { %v4796_v23 = vadd.f32 %v4795_v59, %v4794_v31  ;;  %v4810_v63 = vadd.f32 %v4809_v21, %v4808_v14  ;;  %v4803_v49 = vadd.f32 %v4802_v39, %v4801_v44  ;;  %v4817_v35 = vadd.f32 %v4816_v0, %v4815_v24  ;;  %v11937_v31 = vld [vmem:[#allocation77_spill] sm:$0xff]  ;;  %v11938_v44 = vld [vmem:[#allocation78_spill] sm:$0xff] }
 0x413   : > { %v4823_v46 = vrot.slane %v4822_v15, 2  ;;  %v4837_v32 = vrot.slane %v4836_v48, 2  ;;  %v4830_v5 = vrot.slane %v4829_v61, 2  ;;  %v4844_v53 = vrot.slane %v4843_v8, 2 }
 0x414   : > { %v4797_v4 = vrot.slane %v4796_v23, 1  ;;  %v4811_v6 = vrot.slane %v4810_v63, 1  ;;  %v4804_v29 = vrot.slane %v4803_v49, 1  ;;  %v4818_v3 = vrot.slane %v4817_v35, 1 }
 0x415   : > { %v4824_v57 = vadd.f32 %v4823_v46, %v4822_v15  ;;  %v4838_v41 = vadd.f32 %v4837_v32, %v4836_v48  ;;  %v4831_v22 = vadd.f32 %v4830_v5, %v4829_v61  ;;  %v4845_v54 = vadd.f32 %v4844_v53, %v4843_v8  ;;  %v11943_v46 = vld [vmem:[#allocation91_spill] sm:$0xff]  ;;  %v11944_v5 = vld [vmem:[#allocation97_spill] sm:$0xff] }
 0x416   : > { %v4798_v10 = vadd.f32 %v4797_v4, %v4796_v23  ;;  %v4812_v47 = vadd.f32 %v4811_v6, %v4810_v63  ;;  %v4805_v51 = vadd.f32 %v4804_v29, %v4803_v49  ;;  %v4819_v58 = vadd.f32 %v4818_v3, %v4817_v35  ;;  %v11941_v23 = vld [vmem:[#allocation58_spill] sm:$0xff]  ;;  %v11942_v49 = vld [vmem:[#allocation88_spill] sm:$0xff] }
 0x417   : > { %v4825_v27 = vrot.slane %v4824_v57, 1  ;;  %v4839_v30 = vrot.slane %v4838_v41, 1  ;;  %v4832_v60 = vrot.slane %v4831_v22, 1  ;;  %v4846_v36 = vrot.slane %v4845_v54, 1 }
 0x418   : > { %v5296_v14 = vmul.f32 %v11937_v31, %v4798_v10  ;;  %v5298_v24 = vmul.f32 %v11938_v44, %v4812_v47  ;;  %v5297_v34 = vmul.f32 %v11939_v45, %v4805_v51  ;;  %v5299_v62 = vmul.f32 %v11940_v42, %v4819_v58  ;;  %v11945_v10 = vld [vmem:[#allocation56_spill] sm:$0xff]  ;;  %v11948_v31 = vld [vmem:[#allocation59_spill] sm:$0xff]  ;;  %v11949_v44 = vld [vmem:[#allocation129_spill] sm:$0xff] }
 0x419   : > { %v4826_v59 = vadd.f32 %v4825_v27, %v4824_v57  ;;  %v4840_v21 = vadd.f32 %v4839_v30, %v4838_v41  ;;  %v4833_v39 = vadd.f32 %v4832_v60, %v4831_v22  ;;  %v4847_v0 = vadd.f32 %v4846_v36, %v4845_v54  ;;  %v11947_v60 = vld [vmem:[#allocation89_spill] sm:$0xff]  ;;  %v11950_v45 = vld [vmem:[#allocation94_spill] sm:$0xff]  ;;  %v11951_v42 = vld [vmem:[#allocation92_spill] sm:$0xff] }
 0x41a   : > { %v5975_v15 = vrot.slane %v5296_v14, 5  ;;  %v6003_v48 = vrot.slane %v5298_v24, 5  ;;  %v5989_v61 = vrot.slane %v5297_v34, 5  ;;  %v6017_v8 = vrot.slane %v5299_v62, 5 }
 0x41b   : > { %v5300_v63 = vmul.f32 %v11941_v23, %v4826_v59  ;;  %v5302_v35 = vmul.f32 %v11942_v49, %v4840_v21  ;;  %v5301_v32 = vmul.f32 %v11943_v46, %v4833_v39  ;;  %v5303_v53 = vmul.f32 %v11944_v5, %v4847_v0  ;;  %v11955_v23 = vld [vmem:[#allocation131_spill] sm:$0xff]  ;;  %v11956_v49 = vld [vmem:[#allocation134_spill] sm:$0xff] }
 0x41c   : > { %v5976_v4 = vsel %vm5579_vm3, %v5975_v15, %v10632_v37  ;;  %v6004_v6 = vsel %vm5579_vm3, %v6003_v48, %v10635_v55  ;;  %v5990_v29 = vsel %vm5579_vm3, %v5989_v61, %v10638_v56  ;;  %v6018_v3 = vsel %vm5579_vm3, %v6017_v8, %v10641_v38  ;;  %v11946_v55 = vld [vmem:[#allocation128_spill] sm:$0xff]  ;;  %v11953_v15 = vld [vmem:[#allocation93_spill] sm:$0xff] }
 0x41d   : > { %v5977_v57 = vrot.slane %v5300_v63, 4  ;;  %v6005_v41 = vrot.slane %v5302_v35, 4  ;;  %v5991_v22 = vrot.slane %v5301_v32, 4  ;;  %v6019_v54 = vrot.slane %v5303_v53, 4  ;;  %v11954_v61 = vld [vmem:[#allocation132_spill] sm:$0xff] }
 0x41e   : > { %v3116_v47 = vmul.f32 %v11945_v10, %v7297_v9  ;;  %v3118_v51 = vmul.f32 %v10317_v43, %v7304_v16  ;;  %v3117_v37 = vmul.f32 %v10319_v19, %v7299_v12  ;;  %v3119_v58 = vmul.f32 %v11946_v55, %v7324_v26 }
 0x41f   : > { %v10692_v56 = vsel %vm5582_vm4, %v5977_v57, %v5976_v4  ;;  %v10695_v38 = vsel %vm5582_vm4, %v6005_v41, %v6004_v6  ;;  %v10698_v27 = vsel %vm5582_vm4, %v5991_v22, %v5990_v29  ;;  %v10701_v30 = vsel %vm5582_vm4, %v6019_v54, %v6018_v3 }
 0x420   : > { %v3120_v43 = vmul.f32 %v10323_v25, %v7306_v17  ;;  %v3122_v19 = vmul.f32 %v10325_v11, %v7312_v20  ;;  %v3121_v36 = vmul.f32 %v11947_v60, %v7308_v18  ;;  %v3123_v14 = vmul.f32 %v11948_v31, %v7330_v28  ;;  %v11952_v25 = vld [vmem:[#allocation95_spill] sm:$0xff] }
 0x421   : > { %v3124_v24 = vmul.f32 %v11949_v44, %v7297_v9  ;;  %v3126_v34 = vmul.f32 %v11950_v45, %v7304_v16  ;;  %v3125_v62 = vmul.f32 %v11951_v42, %v7299_v12  ;;  %v3127_v59 = vmul.f32 %v11952_v25, %v7324_v26 }
 0x422   : > { %v4848_v21 = vadd.f32 %v3120_v43, %v3116_v47  ;;  %v4862_v11 = vadd.f32 %v3122_v19, %v3118_v51  ;;  %v4855_v39 = vadd.f32 %v3121_v36, %v3117_v37  ;;  %v4869_v0 = vadd.f32 %v3123_v14, %v3119_v58 }
 0x423   : > { %v3128_v48 = vmul.f32 %v11953_v15, %v7306_v17  ;;  %v3130_v8 = vmul.f32 %v11954_v61, %v7312_v20  ;;  %v3129_v63 = vmul.f32 %v11955_v23, %v7308_v18  ;;  %v3131_v35 = vmul.f32 %v11956_v49, %v7330_v28 }
 0x424   : > { %v4849_v46 = vrot.slane %v4848_v21, 4  ;;  %v4863_v32 = vrot.slane %v4862_v11, 4  ;;  %v4856_v5 = vrot.slane %v4855_v39, 4  ;;  %v4870_v53 = vrot.slane %v4869_v0, 4 }
 0x425   : > { %v4876_v4 = vadd.f32 %v3128_v48, %v3124_v24  ;;  %v4890_v6 = vadd.f32 %v3130_v8, %v3126_v34  ;;  %v4883_v29 = vadd.f32 %v3129_v63, %v3125_v62  ;;  %v4897_v3 = vadd.f32 %v3131_v35, %v3127_v59 }
 0x426   : > { %v4850_v57 = vadd.f32 %v4849_v46, %v4848_v21  ;;  %v4864_v41 = vadd.f32 %v4863_v32, %v4862_v11  ;;  %v4857_v22 = vadd.f32 %v4856_v5, %v4855_v39  ;;  %v4871_v54 = vadd.f32 %v4870_v53, %v4869_v0 }
 0x427   : > { %v4877_v10 = vrot.slane %v4876_v4, 4  ;;  %v4891_v47 = vrot.slane %v4890_v6, 4  ;;  %v4884_v51 = vrot.slane %v4883_v29, 4  ;;  %v4898_v37 = vrot.slane %v4897_v3, 4 }
 0x428   : > { %v4851_v55 = vrot.slane %v4850_v57, 2  ;;  %v4865_v58 = vrot.slane %v4864_v41, 2  ;;  %v4858_v43 = vrot.slane %v4857_v22, 2  ;;  %v4872_v19 = vrot.slane %v4871_v54, 2 }
 0x429   : > { %v4878_v60 = vadd.f32 %v4877_v10, %v4876_v4  ;;  %v4892_v36 = vadd.f32 %v4891_v47, %v4890_v6  ;;  %v4885_v31 = vadd.f32 %v4884_v51, %v4883_v29  ;;  %v4899_v14 = vadd.f32 %v4898_v37, %v4897_v3  ;;  %v11957_v4 = vld [vmem:[#allocation102_spill] sm:$0xff]  ;;  %v11958_v29 = vld [vmem:[#allocation65_spill] sm:$0xff] }
 0x42a   : > { %v4852_v44 = vadd.f32 %v4851_v55, %v4850_v57  ;;  %v4866_v24 = vadd.f32 %v4865_v58, %v4864_v41  ;;  %v4859_v45 = vadd.f32 %v4858_v43, %v4857_v22  ;;  %v4873_v34 = vadd.f32 %v4872_v19, %v4871_v54  ;;  %v11959_v57 = vld [vmem:[#allocation64_spill] sm:$0xff] }
 0x42b   : > { %v4879_v42 = vrot.slane %v4878_v60, 2  ;;  %v4893_v62 = vrot.slane %v4892_v36, 2  ;;  %v4886_v25 = vrot.slane %v4885_v31, 2  ;;  %v4900_v59 = vrot.slane %v4899_v14, 2  ;;  %v11960_v22 = vld [vmem:[#allocation108_spill] sm:$0xff] }
 0x42c   : > { %v4853_v21 = vrot.slane %v4852_v44, 1  ;;  %v4867_v11 = vrot.slane %v4866_v24, 1  ;;  %v4860_v39 = vrot.slane %v4859_v45, 1  ;;  %v4874_v0 = vrot.slane %v4873_v34, 1 }
 0x42d   : > { %v4880_v15 = vadd.f32 %v4879_v42, %v4878_v60  ;;  %v4894_v48 = vadd.f32 %v4893_v62, %v4892_v36  ;;  %v4887_v61 = vadd.f32 %v4886_v25, %v4885_v31  ;;  %v4901_v8 = vadd.f32 %v4900_v59, %v4899_v14  ;;  %v11961_v60 = vld [vmem:[#allocation70_spill] sm:$0xff]  ;;  %v11962_v31 = vld [vmem:[#allocation52_spill] sm:$0xff] }
 0x42e   : > { %v4854_v23 = vadd.f32 %v4853_v21, %v4852_v44  ;;  %v4868_v63 = vadd.f32 %v4867_v11, %v4866_v24  ;;  %v4861_v49 = vadd.f32 %v4860_v39, %v4859_v45  ;;  %v4875_v35 = vadd.f32 %v4874_v0, %v4873_v34  ;;  %v11963_v44 = vld [vmem:[#allocation110_spill] sm:$0xff]  ;;  %v11964_v45 = vld [vmem:[#allocation53_spill] sm:$0xff] }
 0x42f   : > { %v4881_v46 = vrot.slane %v4880_v15, 1  ;;  %v4895_v32 = vrot.slane %v4894_v48, 1  ;;  %v4888_v5 = vrot.slane %v4887_v61, 1  ;;  %v4902_v53 = vrot.slane %v4901_v8, 1 }
 0x430   : > { %v5304_v6 = vmul.f32 %v11957_v4, %v4854_v23  ;;  %v5306_v3 = vmul.f32 %v11958_v29, %v4868_v63  ;;  %v5305_v41 = vmul.f32 %v11959_v57, %v4861_v49  ;;  %v5307_v54 = vmul.f32 %v11960_v22, %v4875_v35  ;;  %v11969_v35 = vld [vmem:[#allocation155_spill] sm:$0xff] }
 0x431   : > { %v4882_v10 = vadd.f32 %v4881_v46, %v4880_v15  ;;  %v4896_v47 = vadd.f32 %v4895_v32, %v4894_v48  ;;  %v4889_v51 = vadd.f32 %v4888_v5, %v4887_v61  ;;  %v4903_v37 = vadd.f32 %v4902_v53, %v4901_v8  ;;  %v11965_v15 = vld [vmem:[#allocation133_spill] sm:$0xff]  ;;  %v11971_v5 = vld [vmem:[#allocation10_spill] sm:$0xff]  ;;  %v11973_v53 = vld [vmem:[#allocation156_spill] sm:$0xff] }
 0x432   : > { %v5979_v55 = vrot.slane %v5304_v6, 3  ;;  %v6007_v58 = vrot.slane %v5306_v3, 3  ;;  %v5993_v43 = vrot.slane %v5305_v41, 3  ;;  %v6021_v19 = vrot.slane %v5307_v54, 3 }
 0x433   : > { %v5308_v36 = vmul.f32 %v11961_v60, %v4882_v10  ;;  %v5310_v14 = vmul.f32 %v11962_v31, %v4896_v47  ;;  %v5309_v24 = vmul.f32 %v11963_v44, %v4889_v51  ;;  %v5311_v34 = vmul.f32 %v11964_v45, %v4903_v37  ;;  %v11975_v60 = vld [vmem:[#allocation130_spill] sm:$0xff]  ;;  %v11978_v44 = vld [vmem:[#allocation57_spill] sm:$0xff]  ;;  %v11979_v45 = vld [vmem:[#allocation151_spill] sm:$0xff] }
 0x434   : > { %v5980_v42 = vsel %vm5585_vm5, %v5979_v55, %v10692_v56  ;;  %v6008_v62 = vsel %vm5585_vm5, %v6007_v58, %v10695_v38  ;;  %v5994_v25 = vsel %vm5585_vm5, %v5993_v43, %v10698_v27  ;;  %v6022_v59 = vsel %vm5585_vm5, %v6021_v19, %v10701_v30  ;;  %v11966_v38 = vld [vmem:[#allocation14_spill] sm:$0xff] }
 0x435   : > { %v5981_v21 = vrot.slane %v5308_v36, 2  ;;  %v6009_v11 = vrot.slane %v5310_v14, 2  ;;  %v5995_v39 = vrot.slane %v5309_v24, 2  ;;  %v6023_v0 = vrot.slane %v5311_v34, 2  ;;  %v11976_v36 = vld [vmem:[#allocation85_spill] sm:$0xff]  ;;  %v11977_v14 = vld [vmem:[#allocation90_spill] sm:$0xff] }
 0x436   : > { %v3132_v48 = vmul.f32 %v11965_v15, %v7297_v9  ;;  %v3134_v61 = vmul.f32 %v10409_v52, %v7304_v16  ;;  %v3133_v56 = vmul.f32 %v10411_v1, %v7299_v12  ;;  %v3135_v8 = vmul.f32 %v11966_v38, %v7324_v26  ;;  %v11967_v1 = vld [vmem:[#allocation149_spill] sm:$0xff] }
 0x437   : > { %v10752_v27 = vsel %vm5588_vm6, %v5981_v21, %v5980_v42  ;;  %v10755_v30 = vsel %vm5588_vm6, %v6009_v11, %v6008_v62  ;;  %v10758_v23 = vsel %vm5588_vm6, %v5995_v39, %v5994_v25  ;;  %v10761_v9 = vsel %vm5588_vm6, %v6023_v0, %v6022_v59  ;;  %v11980_v34 = vld [vmem:[#allocation109_spill] sm:$0xff]  ;;  %v11981_v62 = vld [vmem:[#allocation152_spill] sm:$0xff] }
 0x438   : > { %v3136_v16 = vmul.f32 %v10415_v2, %v7306_v17  ;;  %v3138_v12 = vmul.f32 %v10417_v50, %v7312_v20  ;;  %v3137_v26 = vmul.f32 %v10423_v7, %v7308_v18  ;;  %v3139_v52 = vmul.f32 %v10425_v40, %v7330_v28  ;;  %v11982_v25 = vld [vmem:[#allocation112_spill] sm:$0xff] }
 0x439   : > { %v11968_v63 = vrot.slane %v11967_v1, 2  ;;  %v11970_v46 = vrot.slane %v11969_v35, 2  ;;  %v11972_v17 = vrot.slane %v11971_v5, 2  ;;  %v11974_v20 = vrot.slane %v11973_v53, 2 }
 0x43a   : > { %v4904_v18 = vadd.f32 %v3136_v16, %v3132_v48  ;;  %v4918_v7 = vadd.f32 %v3138_v12, %v3134_v61  ;;  %v4911_v4 = vadd.f32 %v3137_v26, %v3133_v56  ;;  %v4925_v28 = vadd.f32 %v3139_v52, %v3135_v8 }
 0x43b   : > { %v6119_v49 = vadd.f32 %v11968_v63, %v11967_v1  ;;  %v6126_v32 = vadd.f32 %v11970_v46, %v11969_v35  ;;  %v6133_v2 = vadd.f32 %v11972_v17, %v11971_v5  ;;  %v6140_v50 = vadd.f32 %v11974_v20, %v11973_v53 }
 0x43c   : > { %v4905_v57 = vrot.slane %v4904_v18, 4  ;;  %v4919_v41 = vrot.slane %v4918_v7, 4  ;;  %v4912_v22 = vrot.slane %v4911_v4, 4  ;;  %v4926_v54 = vrot.slane %v4925_v28, 4 }
 0x43d   : > { %v6120_v40 = vrot.slane %v6119_v49, 1  ;;  %v6127_v6 = vrot.slane %v6126_v32, 1  ;;  %v6134_v29 = vrot.slane %v6133_v2, 1  ;;  %v6141_v3 = vrot.slane %v6140_v50, 1 }
 0x43e   : > { %v4906_v55 = vadd.f32 %v4905_v57, %v4904_v18  ;;  %v4920_v58 = vadd.f32 %v4919_v41, %v4918_v7  ;;  %v4913_v43 = vadd.f32 %v4912_v22, %v4911_v4  ;;  %v4927_v19 = vadd.f32 %v4926_v54, %v4925_v28  ;;  %v11983_v4 = vld [vmem:[#allocation74_spill] sm:$0xff]  ;;  %v11986_v57 = vld [vmem:[#allocation116_spill] sm:$0xff] }
 0x43f   : > { %v6121_v10 = vadd.f32 %v6120_v40, %v6119_v49  ;;  %v6128_v47 = vadd.f32 %v6127_v6, %v6126_v32  ;;  %v6135_v51 = vadd.f32 %v6134_v29, %v6133_v2  ;;  %v6142_v37 = vadd.f32 %v6141_v3, %v6140_v50  ;;  %v11984_v40 = vld [vmem:[#allocation73_spill] sm:$0xff]  ;;  %v11985_v29 = vld [vmem:[#allocation115_spill] sm:$0xff] }
 0x440   : > { %v6187_v31 = vcombine.low %v11976_v36, %v11975_v60  ;;  %v6188_v24 = vcombine.low %v11978_v44, %v11977_v14  ;;  %v6189_v42 = vcombine.low %v11980_v34, %v11979_v45  ;;  %v6190_v59 = vcombine.low %v11982_v25, %v11981_v62  ;;  %v11988_v44 = vld [vmem:[#allocation16_spill] sm:$0xff] }
 0x441   : > { %v4907_v21 = vrot.slane %v4906_v55, 2  ;;  %v4921_v11 = vrot.slane %v4920_v58, 2  ;;  %v4914_v39 = vrot.slane %v4913_v43, 2  ;;  %v4928_v0 = vrot.slane %v4927_v19, 2 }
 0x442   : > { %v6191_v15 = vcombine.low %v6121_v10, %v6128_v47  ;;  %v6192_v48 = vcombine.low %v6135_v51, %v6142_v37  ;;  %v6195_v61 = vrot.slane %v6189_v42, 7  ;;  %v6204_v56 = vrot.slane %v6190_v59, 7 }
 0x443   : > { %v4908_v38 = vadd.f32 %v4907_v21, %v4906_v55  ;;  %v4922_v8 = vadd.f32 %v4921_v11, %v4920_v58  ;;  %v4915_v16 = vadd.f32 %v4914_v39, %v4913_v43  ;;  %v4929_v12 = vadd.f32 %v4928_v0, %v4927_v19 }
 0x444   : > { %v6196_v26 = vsel %vm5573_vm1, %v6195_v61, %v6187_v31  ;;  %v6198_v52 = vrot.slane %v6191_v15, 6  ;;  %v6205_v1 = vsel %vm5573_vm1, %v6204_v56, %v6188_v24  ;;  %v6207_v63 = vrot.slane %v6192_v48, 6  ;;  %v11987_v31 = vld [vmem:[#allocation15_spill] sm:$0xff] }
 0x445   : > { %v4909_v49 = vrot.slane %v4908_v38, 1  ;;  %v4923_v35 = vrot.slane %v4922_v8, 1  ;;  %v4916_v46 = vrot.slane %v4915_v16, 1  ;;  %v4930_v32 = vrot.slane %v4929_v12, 1 }
 0x446   : > { %v6197_v5 = vsel %vm5585_vm5, %v6195_v61, %v6196_v26  ;;  %v6206_v17 = vsel %vm5585_vm5, %v6204_v56, %v6205_v1 }
 0x447   : > { %v4910_v2 = vadd.f32 %v4909_v49, %v4908_v38  ;;  %v4924_v53 = vadd.f32 %v4923_v35, %v4922_v8  ;;  %v4917_v20 = vadd.f32 %v4916_v46, %v4915_v16  ;;  %v4931_v50 = vadd.f32 %v4930_v32, %v4929_v12 }
 0x448   : > { %v6199_v18 = vsel %vm5576_vm2, %v6198_v52, %v6197_v5  ;;  %v6208_v7 = vsel %vm5576_vm2, %v6207_v63, %v6206_v17 }
 0x449   : > { %v5312_v28 = vmul.f32 %v11983_v4, %v4910_v2  ;;  %v5314_v6 = vmul.f32 %v11984_v40, %v4924_v53  ;;  %v5313_v3 = vmul.f32 %v11985_v29, %v4917_v20  ;;  %v5315_v41 = vmul.f32 %v11986_v57, %v4931_v50 }
 0x44a   : > { %v6200_v22 = vsel %vm5588_vm6, %v6198_v52, %v6199_v18  ;;  %v6209_v54 = vsel %vm5588_vm6, %v6207_v63, %v6208_v7 }
 0x44b   : > { %v5983_v10 = vrot.slane %v5312_v28, 1  ;;  %v6011_v47 = vrot.slane %v5314_v6, 1  ;;  %v5997_v51 = vrot.slane %v5313_v3, 1  ;;  %v6025_v37 = vrot.slane %v5315_v41, 1 }
 0x44d   : > { %v5984_v55 = vsel %vm5591_vm7, %v5983_v10, %v10752_v27  ;;  %v6012_v58 = vsel %vm5591_vm7, %v6011_v47, %v10755_v30  ;;  %v5998_v43 = vsel %vm5591_vm7, %v5997_v51, %v10758_v23  ;;  %v6026_v19 = vsel %vm5591_vm7, %v6025_v37, %v10761_v9 }
 0x44e   : > { %v6143_v60 = vadd.f32 %v5984_v55, %v10561_v13  ;;  %v6157_v36 = vadd.f32 %v6012_v58, %v10565_v33  ;;  %v6150_v14 = vadd.f32 %v5998_v43, %v11987_v31  ;;  %v6164_v24 = vadd.f32 %v6026_v19, %v11988_v44 }
 0x450   : > { %v6144_v45 = vrot.slane %v6143_v60, 4  ;;  %v6158_v27 = vrot.slane %v6157_v36, 4  ;;  %v6151_v34 = vrot.slane %v6150_v14, 4  ;;  %v6165_v30 = vrot.slane %v6164_v24, 4 }
 0x452   : > { %v6145_v42 = vadd.f32 %v6144_v45, %v6143_v60  ;;  %v6152_v62 = vadd.f32 %v6151_v34, %v6150_v14  ;;  %v6159_v23 = vadd.f32 %v6158_v27, %v6157_v36  ;;  %v6166_v25 = vadd.f32 %v6165_v30, %v6164_v24 }
 0x454   : > { %v6146_v9 = vrot.slane %v6145_v42, 2  ;;  %v6153_v59 = vrot.slane %v6152_v62, 2  ;;  %v6160_v13 = vrot.slane %v6159_v23, 2  ;;  %v6167_v33 = vrot.slane %v6166_v25, 2 }
 0x456   : > { %v6147_v21 = vadd.f32 %v6146_v9, %v6145_v42  ;;  %v6154_v11 = vadd.f32 %v6153_v59, %v6152_v62  ;;  %v6161_v39 = vadd.f32 %v6160_v13, %v6159_v23  ;;  %v6168_v0 = vadd.f32 %v6167_v33, %v6166_v25 }
 0x458   : > { %v6148_v15 = vrot.slane %v6147_v21, 1  ;;  %v6155_v48 = vrot.slane %v6154_v11, 1  ;;  %v6162_v61 = vrot.slane %v6161_v39, 1  ;;  %v6169_v56 = vrot.slane %v6168_v0, 1 }
 0x45a   : > { %v6149_v38 = vadd.f32 %v6148_v15, %v6147_v21  ;;  %v6156_v8 = vadd.f32 %v6155_v48, %v6154_v11  ;;  %v6163_v16 = vadd.f32 %v6162_v61, %v6161_v39  ;;  %v6170_v12 = vadd.f32 %v6169_v56, %v6168_v0 }
 0x45c   : > { %v6193_v26 = vcombine.low %v6149_v38, %v6156_v8  ;;  %v6194_v52 = vcombine.low %v6163_v16, %v6170_v12 }
 0x45e   : > { %v6201_v1 = vrot.slane %v6193_v26, 5  ;;  %v6210_v63 = vrot.slane %v6194_v52, 5 }
 0x460   : > { %v6202_v49 = vsel %vm5579_vm3, %v6201_v1, %v6200_v22  ;;  %v6211_v35 = vsel %vm5579_vm3, %v6210_v63, %v6209_v54 }
 0x461   : > { %v6203_v46 = vsel %vm5591_vm7, %v6201_v1, %v6202_v49  ;;  %v6212_v32 = vsel %vm5591_vm7, %v6210_v63, %v6211_v35 }
 0x462   : > { %6215 = vst [vmem:[%s207_s6] sm:$0xff] %v6203_v46  ;;  %6216 = vst [vmem:[%s207_s6 + $0x8] sm:$0xff] %v6212_v32 }
 0x463   : > { %6728 = shalt.err (!%p6725_p4)
}
 0x464   : > { %s6729_s9 = scalar_lea.hbm %s10825_s10, 256  ;;  %s6733_s25 = scalar_lea.hbm %s10885_s3, 8192 }
 0x465   : > { %p6730_p5 = scmp.ne.s32.totalorder %s10825_s10, %s6729_s9  ;;  %p6734_p9 = scmp.lt.u32.totalorder %s10825_s10, %s10885_s3 }
 0x466   : > { %p6735_p8 = scmp.lt.u32.totalorder %s6733_s25, %s6729_s9  ;;  %p6737_p11 = scmp.lt.u32.totalorder %s6729_s9, %s10825_s10 }
 0x467   : > { %p6731_p6 = pnand %p6730_p5, %p6890_p3 }
 0x468   : > { %p6736_p10 = por %p6735_p8, %p6734_p9 }
 0x469   : > { %p6732_p7 = pneg %p6731_p6 }
 0x46a   : > { %p6738_p12 = por %p6737_p11, %p6736_p10 }
 0x46c   : > { %p6739_p13 = pnand %p6738_p12, %p6732_p7 }
 0x46e   : > { %6742 = shalt.err (!%p6739_p13)
}
 0x46f   : > { %6621 = dma.vmem_to_hbm [thread:$0]  (%p6890_p3), %s10827_s7, 256, %s10825_s10, %s6218_s11  }
 0x470 PF: > { %p6633_p0 = scmp.ge.s32.totalorder %s6813_s19, 2  ;;  %s6246_s21 = sand.u32 1, %s6785_s12  }
 0x471   : > { %p11989_p1 = scmp.ne.s32.totalorder %s11011_s27, 0  ;;  %s6247_s5 = scalar_lea.sflag [#allocation3], %s6246_s21 }
 0x473   : > { %p6628_p2 = pnand %p6633_p0, %p11989_p1 }
 0x475   : > { %6780 = dma.done.wait (!%p6628_p2), %s6247_s5, 256  }
 0x476   : > { %6782 = vsyncadd (!%p6628_p2), %s6247_s5, 4294967040  ;;  %s17_s19 = sadd.s32 1, %s6813_s19   ;;  %s11990_s12 = smov %s6789_s13 }
 0x477   : > { %p14_p4 = scmp.ge.s32.totalorder %s17_s19, 34   ;;  %s11991_s13 = smov %s6793_s14 }
 0x478   : > { %s11992_s14 = smov %s6920_s8  ;;  %s11993_s15 = smov %s6805_s17 }
 0x479   : > { %s11994_s16 = smov %s6809_s18  ;;  %s11995_s17 = smov %s11998_s22 }
 0x47a   : > { %s11996_s18 = smov %s12002_s23  ;;  %16 = sbr.rel (!%p14_p4) target bundleno = 9 (0x9), region = 77 }
 0x481   :  { %6252 = vsyncpa [#allocation3], 1 }
 0x482   :  { %6254 = vsyncpa [#allocation3 + $0x1], 1 }
 0x483   :  { %6255 = vsyncpa [#allocation4], 1 }
 0x484   :  { %6257 = vsyncpa [#allocation4 + $0x1], 1 }

</bundles_post_ra>
